<compile_context>
chip_gen: v5e
topology: v5e:2x2
jax: 0.10.0
libtpu: 0.0.40
codegen_flags: <defaults>
</compile_context>

<pallas_src>
import numpy as np
import jax
import jax.numpy as jnp
from jax.experimental import pallas as pl
from jax.experimental.pallas import tpu as pltpu

EPS = 1e-5          # nn.BatchNorm2d default eps
KSZ = 5             # all convs are 5x5, padding=1
NUM_CLASSES = 10


def _round_up(v, m):
    return ((v + m - 1) // m) * m


# --------------------------- static shape tables ---------------------------

def _build_cfg(n, h, w):
    """Static geometry for conv1, conv2, (pool), conv4, conv5."""
    layers = []

    def add(cin, cout, hin, win):
        hp, wp = hin + 2, win + 2          # padding=1 on each side
        ho, wo = hin - 2, win - 2          # k=5, p=1  ->  H-2
        r = n * hp * wp                    # flat size of padded input grid
        layers.append(dict(
            cin=cin, cout=cout, hp=hp, wp=wp, ho=ho, wo=wo, r=r,
            bufw=_round_up(r + (KSZ - 1) * wp + (KSZ - 1), 128),
            cnt=float(n * ho * wo)))
        return ho, wo

    ho, wo = add(3, 12, h, w)              # conv1
    ho, wo = add(12, 12, ho, wo)           # conv2
    hpo, wpo = ho // 2, wo // 2            # 2x2 max pool (floor)
    ho, wo = add(12, 24, hpo, wpo)         # conv4
    ho, wo = add(24, 24, ho, wo)           # conv5
    poolw = layers[1]["r"] - layers[1]["wp"] - 1
    return dict(n=n, layers=layers, hpo=hpo, wpo=wpo, poolw=poolw,
                ho5=ho, wo5=wo, nq=ho * wo, c5=layers[3]["cout"])


def _flat(lay, n_i, y, x):
    return n_i * lay["hp"] * lay["wp"] + y * lay["wp"] + x


def _build_tables(cfg):
    """Constant masks / 0-1 selection matrices (baked in at trace time)."""
    n, L = cfg["n"], cfg["layers"]
    t = {}
    # Valid-output masks over each conv layer's flat (padded-input-grid) space.
    for i, lay in enumerate(L):
        r = np.arange(lay["r"])
        y = (r % (lay["hp"] * lay["wp"])) // lay["wp"]
        x = r % lay["wp"]
        t[f"mask{i}"] = jnp.asarray(
            ((y < lay["ho"]) & (x < lay["wo"])).astype(np.float32).reshape(1, -1))

    def conv_to_conv(src, dst):
        # Scatter `src`'s valid conv outputs into `dst`'s zero-padded grid.
        s = np.zeros((src["r"], dst["bufw"]), np.float32)
        for n_i in range(n):
            for y in range(src["ho"]):
                for x in range(src["wo"]):
                    s[_flat(src, n_i, y, x), _flat(dst, n_i, y + 1, x + 1)] = 1.0
        return jnp.asarray(s, jnp.bfloat16)

    t["sel1"] = conv_to_conv(L[0], L[1])

    # 2x2 max-pool compaction + scatter into conv4's padded input grid.
    s = np.zeros((cfg["poolw"], L[2]["bufw"]), np.float32)
    for n_i in range(n):
        for yo in range(cfg["hpo"]):
            for xo in range(cfg["wpo"]):
                s[_flat(L[1], n_i, 2 * yo, 2 * xo),
                  _flat(L[2], n_i, yo + 1, xo + 1)] = 1.0
    t["selpool"] = jnp.asarray(s, jnp.bfloat16)

    t["sel4"] = conv_to_conv(L[2], L[3])

    # FC gather: conv5 valid outputs -> columns ordered (q = y*W5 + x, n),
    # matching PyTorch's NCHW .view(-1, C*H*W) once combined with wfr below.
    s = np.zeros((L[3]["r"], cfg["nq"] * n), np.float32)
    for n_i in range(n):
        for y in range(cfg["ho5"]):
            for x in range(cfg["wo5"]):
                s[_flat(L[3], n_i, y, x), (y * cfg["wo5"] + x) * n + n_i] = 1.0
    t["selfc"] = jnp.asarray(s, jnp.bfloat16)
    return t


# ------------------------------ fused kernel -------------------------------

def _make_kernel(cfg):
    n, L = cfg["n"], cfg["layers"]
    poolw, nq, wp2 = cfg["poolw"], cfg["nq"], L[1]["wp"]
    bf16 = jnp.bfloat16

    def conv_bn_relu(get_slab, w_ref, b_ref, g_ref, be_ref, m_ref, lay):
        """5x5 conv as 25 shifted-slab MXU taps + bias + BN(batch stats,
        one-pass sum/sumsq) + ReLU.  Output layout: (Cout, R), R in lanes."""
        r = lay["r"]
        acc = jnp.zeros((lay["cout"], r), jnp.float32)
        for dy in range(KSZ):
            for dx in range(KSZ):
                acc = acc + jnp.dot(w_ref[dy * KSZ + dx],
                                    get_slab(dy * lay["wp"] + dx, r),
                                    preferred_element_type=jnp.float32)
        acc = acc + b_ref[...]
        mv = acc * m_ref[...]                     # zero the invalid columns
        inv_cnt = 1.0 / lay["cnt"]
        mean = jnp.sum(mv, axis=1, keepdims=True) * inv_cnt
        var = jnp.sum(mv * mv, axis=1, keepdims=True) * inv_cnt - mean * mean
        y = (acc - mean) * jax.lax.rsqrt(var + EPS) * g_ref[...] + be_ref[...]
        return jnp.maximum(y, 0.0)

    def kernel(a1_ref,
               w1, b1, g1, be1, m1, sel1,
               w2, b2, g2, be2, m2, selp,
               w4, b4, g4, be4, m4, sel4,
               w5, b5, g5, be5, m5, selfc, wfr, bfc,
               o_ref):
        # conv1: slabs sliced straight from the padded, pre-flattened input.
        y1 = conv_bn_relu(lambda s, r: a1_ref[:, s:s + r],
                          w1, b1, g1, be1, m1, L[0])
        # Scatter valid conv1 outputs into conv2's zero-padded input grid.
        a2 = jnp.dot(y1.astype(bf16), sel1[...],
                     preferred_element_type=jnp.float32).astype(bf16)
        y2 = conv_bn_relu(lambda s, r: a2[:, s:s + r],
                          w2, b2, g2, be2, m2, L[1])
        # Fused 2x2 max pool: max of 4 shifted slabs, then compact + scatter.
        y2b = y2.astype(bf16)
        mp = jnp.maximum(
            jnp.maximum(y2b[:, 0:poolw], y2b[:, 1:1 + poolw]),
            jnp.maximum(y2b[:, wp2:wp2 + poolw], y2b[:, wp2 + 1:wp2 + 1 + poolw]))
        a4 = jnp.dot(mp, selp[...],
                     preferred_element_type=jnp.float32).astype(bf16)
        y4 = conv_bn_relu(lambda s, r: a4[:, s:s + r],
                          w4, b4, g4, be4, m4, L[2])
        a5 = jnp.dot(y4.astype(bf16), sel4[...],
                     preferred_element_type=jnp.float32).astype(bf16)
        y5 = conv_bn_relu(lambda s, r: a5[:, s:s + r],
                          w5, b5, g5, be5, m5, L[3])
        # FC: gather conv5 outputs (NCHW flatten order baked into selfc/wfr),
        # then nq tiny dots.  Output is (10, N); wrapper transposes.
        yall = jnp.dot(y5.astype(bf16), selfc[...],
                       preferred_element_type=jnp.float32).astype(bf16)
        out = jnp.zeros((NUM_CLASSES, n), jnp.float32)
        for q in range(nq):
            out = out + jnp.dot(wfr[q], yall[:, q * n:(q + 1) * n],
                                preferred_element_type=jnp.float32)
        o_ref[...] = out + bfc[...]

    return kernel


# ------------------------------ forward pass -------------------------------

@jax.jit
def network_forward(params, x_nchw):
    n, cin, h, w = x_nchw.shape
    cfg = _build_cfg(n, h, w)
    L = cfg["layers"]
    tables = _build_tables(cfg)
    bf16 = jnp.bfloat16

    def conv_w(key, cin_pad=0):
        whwio = params[key]                       # (5, 5, Cin, Cout)
        k, _, ci, co = whwio.shape
        wt = jnp.transpose(whwio, (0, 1, 3, 2)).reshape(k * k, co, ci)
        if cin_pad:
            wt = jnp.pad(wt, ((0, 0), (0, 0), (0, cin_pad)))
        return wt.astype(bf16)                    # (25, Cout, Cin[+pad])

    def col(key):
        v = params[key]
        return v.reshape(v.shape[0], 1).astype(jnp.float32)

    # conv1 input: zero-pad spatially, channels-first flatten, pad lanes and
    # (for safety) pad the tiny Cin=3 up to 8 sublanes.
    lay1 = L[0]
    cin_pad = _round_up(cin, 8) - cin
    xp = jnp.pad(x_nchw.astype(jnp.float32), ((0, 0), (0, 0), (1, 1), (1, 1)))
    a1 = jnp.transpose(xp, (1, 0, 2, 3)).reshape(cin, lay1["r"])
    a1 = jnp.pad(a1, ((0, cin_pad), (0, lay1["bufw"] - lay1["r"]))).astype(bf16)

    # FC weight reordered so the in-kernel gather reproduces the NCHW flatten.
    c5, nq = cfg["c5"], cfg["nq"]
    wfr = params["wf"].reshape(c5, nq, NUM_CLASSES).transpose(1, 2, 0).astype(bf16)
    bfc = params["bf"].reshape(NUM_CLASSES, 1).astype(jnp.float32)

    args = (
        a1,
        conv_w("w1", cin_pad), col("b1"), col("g1"), col("be1"),
        tables["mask0"], tables["sel1"],
        conv_w("w2"), col("b2"), col("g2"), col("be2"),
        tables["mask1"], tables["selpool"],
        conv_w("w4"), col("b4"), col("g4"), col("be4"),
        tables["mask2"], tables["sel4"],
        conv_w("w5"), col("b5"), col("g5"), col("be5"),
        tables["mask3"], tables["selfc"],
        wfr, bfc,
    )
    vmem = pl.BlockSpec(memory_space=pltpu.MemorySpace.VMEM)
    out_t = pl.pallas_call(
        _make_kernel(cfg),
        out_shape=jax.ShapeDtypeStruct((NUM_CLASSES, n), jnp.float32),
        in_specs=[vmem] * len(args),
        out_specs=vmem,
    )(*args)
    return out_t.T                                # (N, 10)


# ------------------------------ parameters ---------------------------------

def _feature_shape(input_shape):
    """Mirror of Network.get_linear_shape: (C, H, W) after the conv stack."""
    _, h, w = input_shape
    h, w = h - 2, w - 2          # conv1 (k=5, p=1)
    h, w = h - 2, w - 2          # conv2
    h, w = h // 2, w // 2        # maxpool 2x2
    h, w = h - 2, w - 2          # conv4
    h, w = h - 2, w - 2          # conv5
    return (24, h, w)


def init_params(key, input_shape):
    def conv_p(k, cin, cout, ksz=KSZ):
        kw, kb = jax.random.split(k)
        bound = 1.0 / (cin * ksz * ksz) ** 0.5
        wgt = jax.random.uniform(kw, (ksz, ksz, cin, cout), jnp.float32, -bound, bound)
        b = jax.random.uniform(kb, (cout,), jnp.float32, -bound, bound)
        return wgt, b

    def bn_p(c):
        return jnp.ones((c,), jnp.float32), jnp.zeros((c,), jnp.float32)

    k1, k2, k4, k5, kf = jax.random.split(key, 5)
    p = {}
    p["w1"], p["b1"] = conv_p(k1, 3, 12)
    p["g1"], p["be1"] = bn_p(12)
    p["w2"], p["b2"] = conv_p(k2, 12, 12)
    p["g2"], p["be2"] = bn_p(12)
    p["w4"], p["b4"] = conv_p(k4, 12, 24)
    p["g4"], p["be4"] = bn_p(24)
    p["w5"], p["b5"] = conv_p(k5, 24, 24)
    p["g5"], p["be5"] = bn_p(24)

    c, h, w = _feature_shape(input_shape)
    fin = c * h * w
    kw, kb = jax.random.split(kf)
    bound = 1.0 / fin ** 0.5
    p["wf"] = jax.random.uniform(kw, (fin, NUM_CLASSES), jnp.float32, -bound, bound)
    p["bf"] = jax.random.uniform(kb, (NUM_CLASSES,), jnp.float32, -bound, bound)
    return p


if __name__ == "__main__":
    key = jax.random.PRNGKey(0)
    pkey, xkey = jax.random.split(key)

    input_shape = (3, 16, 16)                       # (C, H, W)
    params = init_params(pkey, input_shape)
    x = jax.random.normal(xkey, (2,) + input_shape, jnp.float32)  # (N, C, H, W)

    out = jax.block_until_ready(network_forward(params, x))
    assert out.shape == (2, 10), out.shape
    assert out.dtype == jnp.float32
    assert bool(jnp.all(jnp.isfinite(out)))
    print("KERNEL_OK")
</pallas_src>

<mosaic_0001>
module attributes {stable_mosaic.version = 11 : i64} {
  func.func @kernel(%arg0: memref<8x768xbf16, #tpu.memory_space<vmem>>, %arg1: memref<25x12x8xbf16, #tpu.memory_space<vmem>>, %arg2: memref<12x1xf32, #tpu.memory_space<vmem>>, %arg3: memref<12x1xf32, #tpu.memory_space<vmem>>, %arg4: memref<12x1xf32, #tpu.memory_space<vmem>>, %arg5: memref<1x648xf32, #tpu.memory_space<vmem>>, %arg6: memref<648x640xbf16, #tpu.memory_space<vmem>>, %arg7: memref<25x12x12xbf16, #tpu.memory_space<vmem>>, %arg8: memref<12x1xf32, #tpu.memory_space<vmem>>, %arg9: memref<12x1xf32, #tpu.memory_space<vmem>>, %arg10: memref<12x1xf32, #tpu.memory_space<vmem>>, %arg11: memref<1x512xf32, #tpu.memory_space<vmem>>, %arg12: memref<495x256xbf16, #tpu.memory_space<vmem>>, %arg13: memref<25x24x12xbf16, #tpu.memory_space<vmem>>, %arg14: memref<24x1xf32, #tpu.memory_space<vmem>>, %arg15: memref<24x1xf32, #tpu.memory_space<vmem>>, %arg16: memref<24x1xf32, #tpu.memory_space<vmem>>, %arg17: memref<1x128xf32, #tpu.memory_space<vmem>>, %arg18: memref<128x128xbf16, #tpu.memory_space<vmem>>, %arg19: memref<25x24x24xbf16, #tpu.memory_space<vmem>>, %arg20: memref<24x1xf32, #tpu.memory_space<vmem>>, %arg21: memref<24x1xf32, #tpu.memory_space<vmem>>, %arg22: memref<24x1xf32, #tpu.memory_space<vmem>>, %arg23: memref<1x72xf32, #tpu.memory_space<vmem>>, %arg24: memref<72x8xbf16, #tpu.memory_space<vmem>>, %arg25: memref<4x10x24xbf16, #tpu.memory_space<vmem>>, %arg26: memref<10x1xf32, #tpu.memory_space<vmem>>, %arg27: memref<10x2xf32, #tpu.memory_space<vmem>>) attributes {dimension_semantics = [], scalar_prefetch = 0 : i64, scratch_operands = 0 : i64, tpu.core_type = #tpu.core_type<tc>} {
    %cst = arith.constant 0.000000e+00 : f32
    %0 = vector.broadcast %cst : f32 to vector<12x648xf32>
    %c0 = arith.constant 0 : index
    %c0_0 = arith.constant 0 : index
    %c0_1 = arith.constant 0 : index
    %1 = vector.load %arg1[%c0, %c0_0, %c0_1] : memref<25x12x8xbf16, #tpu.memory_space<vmem>>, vector<1x12x8xbf16>
    %2 = vector.shape_cast %1 : vector<1x12x8xbf16> to vector<12x8xbf16>
    %c0_2 = arith.constant 0 : index
    %c0_3 = arith.constant 0 : index
    %3 = vector.load %arg0[%c0_2, %c0_3] : memref<8x768xbf16, #tpu.memory_space<vmem>>, vector<8x648xbf16>
    %cst_4 = arith.constant dense<0.000000e+00> : vector<12x648xf32>
    %4 = tpu.matmul %2, %3, %cst_4 {dimension_numbers = #tpu.dot_dimension_numbers<[1], [0], [0], [1], [0, 0, 1, 1], [], []>} : vector<12x8xbf16>, vector<8x648xbf16>, vector<12x648xf32> -> vector<12x648xf32>
    %5 = arith.addf %0, %4 : vector<12x648xf32>
    %c1 = arith.constant 1 : index
    %c0_5 = arith.constant 0 : index
    %c0_6 = arith.constant 0 : index
    %6 = vector.load %arg1[%c1, %c0_5, %c0_6] : memref<25x12x8xbf16, #tpu.memory_space<vmem>>, vector<1x12x8xbf16>
    %7 = vector.shape_cast %6 : vector<1x12x8xbf16> to vector<12x8xbf16>
    %c0_7 = arith.constant 0 : index
    %c1_8 = arith.constant 1 : index
    %8 = vector.load %arg0[%c0_7, %c1_8] : memref<8x768xbf16, #tpu.memory_space<vmem>>, vector<8x648xbf16>
    %cst_9 = arith.constant dense<0.000000e+00> : vector<12x648xf32>
    %9 = tpu.matmul %7, %8, %cst_9 {dimension_numbers = #tpu.dot_dimension_numbers<[1], [0], [0], [1], [0, 0, 1, 1], [], []>} : vector<12x8xbf16>, vector<8x648xbf16>, vector<12x648xf32> -> vector<12x648xf32>
    %10 = arith.addf %5, %9 : vector<12x648xf32>
    %c2 = arith.constant 2 : index
    %c0_10 = arith.constant 0 : index
    %c0_11 = arith.constant 0 : index
    %11 = vector.load %arg1[%c2, %c0_10, %c0_11] : memref<25x12x8xbf16, #tpu.memory_space<vmem>>, vector<1x12x8xbf16>
    %12 = vector.shape_cast %11 : vector<1x12x8xbf16> to vector<12x8xbf16>
    %c0_12 = arith.constant 0 : index
    %c2_13 = arith.constant 2 : index
    %13 = vector.load %arg0[%c0_12, %c2_13] : memref<8x768xbf16, #tpu.memory_space<vmem>>, vector<8x648xbf16>
    %cst_14 = arith.constant dense<0.000000e+00> : vector<12x648xf32>
    %14 = tpu.matmul %12, %13, %cst_14 {dimension_numbers = #tpu.dot_dimension_numbers<[1], [0], [0], [1], [0, 0, 1, 1], [], []>} : vector<12x8xbf16>, vector<8x648xbf16>, vector<12x648xf32> -> vector<12x648xf32>
    %15 = arith.addf %10, %14 : vector<12x648xf32>
    %c3 = arith.constant 3 : index
    %c0_15 = arith.constant 0 : index
    %c0_16 = arith.constant 0 : index
    %16 = vector.load %arg1[%c3, %c0_15, %c0_16] : memref<25x12x8xbf16, #tpu.memory_space<vmem>>, vector<1x12x8xbf16>
    %17 = vector.shape_cast %16 : vector<1x12x8xbf16> to vector<12x8xbf16>
    %c0_17 = arith.constant 0 : index
    %c3_18 = arith.constant 3 : index
    %18 = vector.load %arg0[%c0_17, %c3_18] : memref<8x768xbf16, #tpu.memory_space<vmem>>, vector<8x648xbf16>
    %cst_19 = arith.constant dense<0.000000e+00> : vector<12x648xf32>
    %19 = tpu.matmul %17, %18, %cst_19 {dimension_numbers = #tpu.dot_dimension_numbers<[1], [0], [0], [1], [0, 0, 1, 1], [], []>} : vector<12x8xbf16>, vector<8x648xbf16>, vector<12x648xf32> -> vector<12x648xf32>
    %20 = arith.addf %15, %19 : vector<12x648xf32>
    %c4 = arith.constant 4 : index
    %c0_20 = arith.constant 0 : index
    %c0_21 = arith.constant 0 : index
    %21 = vector.load %arg1[%c4, %c0_20, %c0_21] : memref<25x12x8xbf16, #tpu.memory_space<vmem>>, vector<1x12x8xbf16>
    %22 = vector.shape_cast %21 : vector<1x12x8xbf16> to vector<12x8xbf16>
    %c0_22 = arith.constant 0 : index
    %c4_23 = arith.constant 4 : index
    %23 = vector.load %arg0[%c0_22, %c4_23] : memref<8x768xbf16, #tpu.memory_space<vmem>>, vector<8x648xbf16>
    %cst_24 = arith.constant dense<0.000000e+00> : vector<12x648xf32>
    %24 = tpu.matmul %22, %23, %cst_24 {dimension_numbers = #tpu.dot_dimension_numbers<[1], [0], [0], [1], [0, 0, 1, 1], [], []>} : vector<12x8xbf16>, vector<8x648xbf16>, vector<12x648xf32> -> vector<12x648xf32>
    %25 = arith.addf %20, %24 : vector<12x648xf32>
    %c5 = arith.constant 5 : index
    %c0_25 = arith.constant 0 : index
    %c0_26 = arith.constant 0 : index
    %26 = vector.load %arg1[%c5, %c0_25, %c0_26] : memref<25x12x8xbf16, #tpu.memory_space<vmem>>, vector<1x12x8xbf16>
    %27 = vector.shape_cast %26 : vector<1x12x8xbf16> to vector<12x8xbf16>
    %c0_27 = arith.constant 0 : index
    %c18 = arith.constant 18 : index
    %28 = vector.load %arg0[%c0_27, %c18] : memref<8x768xbf16, #tpu.memory_space<vmem>>, vector<8x648xbf16>
    %cst_28 = arith.constant dense<0.000000e+00> : vector<12x648xf32>
    %29 = tpu.matmul %27, %28, %cst_28 {dimension_numbers = #tpu.dot_dimension_numbers<[1], [0], [0], [1], [0, 0, 1, 1], [], []>} : vector<12x8xbf16>, vector<8x648xbf16>, vector<12x648xf32> -> vector<12x648xf32>
    %30 = arith.addf %25, %29 : vector<12x648xf32>
    %c6 = arith.constant 6 : index
    %c0_29 = arith.constant 0 : index
    %c0_30 = arith.constant 0 : index
    %31 = vector.load %arg1[%c6, %c0_29, %c0_30] : memref<25x12x8xbf16, #tpu.memory_space<vmem>>, vector<1x12x8xbf16>
    %32 = vector.shape_cast %31 : vector<1x12x8xbf16> to vector<12x8xbf16>
    %c0_31 = arith.constant 0 : index
    %c19 = arith.constant 19 : index
    %33 = vector.load %arg0[%c0_31, %c19] : memref<8x768xbf16, #tpu.memory_space<vmem>>, vector<8x648xbf16>
    %cst_32 = arith.constant dense<0.000000e+00> : vector<12x648xf32>
    %34 = tpu.matmul %32, %33, %cst_32 {dimension_numbers = #tpu.dot_dimension_numbers<[1], [0], [0], [1], [0, 0, 1, 1], [], []>} : vector<12x8xbf16>, vector<8x648xbf16>, vector<12x648xf32> -> vector<12x648xf32>
    %35 = arith.addf %30, %34 : vector<12x648xf32>
    %c7 = arith.constant 7 : index
    %c0_33 = arith.constant 0 : index
    %c0_34 = arith.constant 0 : index
    %36 = vector.load %arg1[%c7, %c0_33, %c0_34] : memref<25x12x8xbf16, #tpu.memory_space<vmem>>, vector<1x12x8xbf16>
    %37 = vector.shape_cast %36 : vector<1x12x8xbf16> to vector<12x8xbf16>
    %c0_35 = arith.constant 0 : index
    %c20 = arith.constant 20 : index
    %38 = vector.load %arg0[%c0_35, %c20] : memref<8x768xbf16, #tpu.memory_space<vmem>>, vector<8x648xbf16>
    %cst_36 = arith.constant dense<0.000000e+00> : vector<12x648xf32>
    %39 = tpu.matmul %37, %38, %cst_36 {dimension_numbers = #tpu.dot_dimension_numbers<[1], [0], [0], [1], [0, 0, 1, 1], [], []>} : vector<12x8xbf16>, vector<8x648xbf16>, vector<12x648xf32> -> vector<12x648xf32>
    %40 = arith.addf %35, %39 : vector<12x648xf32>
    %c8 = arith.constant 8 : index
    %c0_37 = arith.constant 0 : index
    %c0_38 = arith.constant 0 : index
    %41 = vector.load %arg1[%c8, %c0_37, %c0_38] : memref<25x12x8xbf16, #tpu.memory_space<vmem>>, vector<1x12x8xbf16>
    %42 = vector.shape_cast %41 : vector<1x12x8xbf16> to vector<12x8xbf16>
    %c0_39 = arith.constant 0 : index
    %c21 = arith.constant 21 : index
    %43 = vector.load %arg0[%c0_39, %c21] : memref<8x768xbf16, #tpu.memory_space<vmem>>, vector<8x648xbf16>
    %cst_40 = arith.constant dense<0.000000e+00> : vector<12x648xf32>
    %44 = tpu.matmul %42, %43, %cst_40 {dimension_numbers = #tpu.dot_dimension_numbers<[1], [0], [0], [1], [0, 0, 1, 1], [], []>} : vector<12x8xbf16>, vector<8x648xbf16>, vector<12x648xf32> -> vector<12x648xf32>
    %45 = arith.addf %40, %44 : vector<12x648xf32>
    %c9 = arith.constant 9 : index
    %c0_41 = arith.constant 0 : index
    %c0_42 = arith.constant 0 : index
    %46 = vector.load %arg1[%c9, %c0_41, %c0_42] : memref<25x12x8xbf16, #tpu.memory_space<vmem>>, vector<1x12x8xbf16>
    %47 = vector.shape_cast %46 : vector<1x12x8xbf16> to vector<12x8xbf16>
    %c0_43 = arith.constant 0 : index
    %c22 = arith.constant 22 : index
    %48 = vector.load %arg0[%c0_43, %c22] : memref<8x768xbf16, #tpu.memory_space<vmem>>, vector<8x648xbf16>
    %cst_44 = arith.constant dense<0.000000e+00> : vector<12x648xf32>
    %49 = tpu.matmul %47, %48, %cst_44 {dimension_numbers = #tpu.dot_dimension_numbers<[1], [0], [0], [1], [0, 0, 1, 1], [], []>} : vector<12x8xbf16>, vector<8x648xbf16>, vector<12x648xf32> -> vector<12x648xf32>
    %50 = arith.addf %45, %49 : vector<12x648xf32>
    %c10 = arith.constant 10 : index
    %c0_45 = arith.constant 0 : index
    %c0_46 = arith.constant 0 : index
    %51 = vector.load %arg1[%c10, %c0_45, %c0_46] : memref<25x12x8xbf16, #tpu.memory_space<vmem>>, vector<1x12x8xbf16>
    %52 = vector.shape_cast %51 : vector<1x12x8xbf16> to vector<12x8xbf16>
    %c0_47 = arith.constant 0 : index
    %c36 = arith.constant 36 : index
    %53 = vector.load %arg0[%c0_47, %c36] : memref<8x768xbf16, #tpu.memory_space<vmem>>, vector<8x648xbf16>
    %cst_48 = arith.constant dense<0.000000e+00> : vector<12x648xf32>
    %54 = tpu.matmul %52, %53, %cst_48 {dimension_numbers = #tpu.dot_dimension_numbers<[1], [0], [0], [1], [0, 0, 1, 1], [], []>} : vector<12x8xbf16>, vector<8x648xbf16>, vector<12x648xf32> -> vector<12x648xf32>
    %55 = arith.addf %50, %54 : vector<12x648xf32>
    %c11 = arith.constant 11 : index
    %c0_49 = arith.constant 0 : index
    %c0_50 = arith.constant 0 : index
    %56 = vector.load %arg1[%c11, %c0_49, %c0_50] : memref<25x12x8xbf16, #tpu.memory_space<vmem>>, vector<1x12x8xbf16>
    %57 = vector.shape_cast %56 : vector<1x12x8xbf16> to vector<12x8xbf16>
    %c0_51 = arith.constant 0 : index
    %c37 = arith.constant 37 : index
    %58 = vector.load %arg0[%c0_51, %c37] : memref<8x768xbf16, #tpu.memory_space<vmem>>, vector<8x648xbf16>
    %cst_52 = arith.constant dense<0.000000e+00> : vector<12x648xf32>
    %59 = tpu.matmul %57, %58, %cst_52 {dimension_numbers = #tpu.dot_dimension_numbers<[1], [0], [0], [1], [0, 0, 1, 1], [], []>} : vector<12x8xbf16>, vector<8x648xbf16>, vector<12x648xf32> -> vector<12x648xf32>
    %60 = arith.addf %55, %59 : vector<12x648xf32>
    %c12 = arith.constant 12 : index
    %c0_53 = arith.constant 0 : index
    %c0_54 = arith.constant 0 : index
    %61 = vector.load %arg1[%c12, %c0_53, %c0_54] : memref<25x12x8xbf16, #tpu.memory_space<vmem>>, vector<1x12x8xbf16>
    %62 = vector.shape_cast %61 : vector<1x12x8xbf16> to vector<12x8xbf16>
    %c0_55 = arith.constant 0 : index
    %c38 = arith.constant 38 : index
    %63 = vector.load %arg0[%c0_55, %c38] : memref<8x768xbf16, #tpu.memory_space<vmem>>, vector<8x648xbf16>
    %cst_56 = arith.constant dense<0.000000e+00> : vector<12x648xf32>
    %64 = tpu.matmul %62, %63, %cst_56 {dimension_numbers = #tpu.dot_dimension_numbers<[1], [0], [0], [1], [0, 0, 1, 1], [], []>} : vector<12x8xbf16>, vector<8x648xbf16>, vector<12x648xf32> -> vector<12x648xf32>
    %65 = arith.addf %60, %64 : vector<12x648xf32>
    %c13 = arith.constant 13 : index
    %c0_57 = arith.constant 0 : index
    %c0_58 = arith.constant 0 : index
    %66 = vector.load %arg1[%c13, %c0_57, %c0_58] : memref<25x12x8xbf16, #tpu.memory_space<vmem>>, vector<1x12x8xbf16>
    %67 = vector.shape_cast %66 : vector<1x12x8xbf16> to vector<12x8xbf16>
    %c0_59 = arith.constant 0 : index
    %c39 = arith.constant 39 : index
    %68 = vector.load %arg0[%c0_59, %c39] : memref<8x768xbf16, #tpu.memory_space<vmem>>, vector<8x648xbf16>
    %cst_60 = arith.constant dense<0.000000e+00> : vector<12x648xf32>
    %69 = tpu.matmul %67, %68, %cst_60 {dimension_numbers = #tpu.dot_dimension_numbers<[1], [0], [0], [1], [0, 0, 1, 1], [], []>} : vector<12x8xbf16>, vector<8x648xbf16>, vector<12x648xf32> -> vector<12x648xf32>
    %70 = arith.addf %65, %69 : vector<12x648xf32>
    %c14 = arith.constant 14 : index
    %c0_61 = arith.constant 0 : index
    %c0_62 = arith.constant 0 : index
    %71 = vector.load %arg1[%c14, %c0_61, %c0_62] : memref<25x12x8xbf16, #tpu.memory_space<vmem>>, vector<1x12x8xbf16>
    %72 = vector.shape_cast %71 : vector<1x12x8xbf16> to vector<12x8xbf16>
    %c0_63 = arith.constant 0 : index
    %c40 = arith.constant 40 : index
    %73 = vector.load %arg0[%c0_63, %c40] : memref<8x768xbf16, #tpu.memory_space<vmem>>, vector<8x648xbf16>
    %cst_64 = arith.constant dense<0.000000e+00> : vector<12x648xf32>
    %74 = tpu.matmul %72, %73, %cst_64 {dimension_numbers = #tpu.dot_dimension_numbers<[1], [0], [0], [1], [0, 0, 1, 1], [], []>} : vector<12x8xbf16>, vector<8x648xbf16>, vector<12x648xf32> -> vector<12x648xf32>
    %75 = arith.addf %70, %74 : vector<12x648xf32>
    %c15 = arith.constant 15 : index
    %c0_65 = arith.constant 0 : index
    %c0_66 = arith.constant 0 : index
    %76 = vector.load %arg1[%c15, %c0_65, %c0_66] : memref<25x12x8xbf16, #tpu.memory_space<vmem>>, vector<1x12x8xbf16>
    %77 = vector.shape_cast %76 : vector<1x12x8xbf16> to vector<12x8xbf16>
    %c0_67 = arith.constant 0 : index
    %c54 = arith.constant 54 : index
    %78 = vector.load %arg0[%c0_67, %c54] : memref<8x768xbf16, #tpu.memory_space<vmem>>, vector<8x648xbf16>
    %cst_68 = arith.constant dense<0.000000e+00> : vector<12x648xf32>
    %79 = tpu.matmul %77, %78, %cst_68 {dimension_numbers = #tpu.dot_dimension_numbers<[1], [0], [0], [1], [0, 0, 1, 1], [], []>} : vector<12x8xbf16>, vector<8x648xbf16>, vector<12x648xf32> -> vector<12x648xf32>
    %80 = arith.addf %75, %79 : vector<12x648xf32>
    %c16 = arith.constant 16 : index
    %c0_69 = arith.constant 0 : index
    %c0_70 = arith.constant 0 : index
    %81 = vector.load %arg1[%c16, %c0_69, %c0_70] : memref<25x12x8xbf16, #tpu.memory_space<vmem>>, vector<1x12x8xbf16>
    %82 = vector.shape_cast %81 : vector<1x12x8xbf16> to vector<12x8xbf16>
    %c0_71 = arith.constant 0 : index
    %c55 = arith.constant 55 : index
    %83 = vector.load %arg0[%c0_71, %c55] : memref<8x768xbf16, #tpu.memory_space<vmem>>, vector<8x648xbf16>
    %cst_72 = arith.constant dense<0.000000e+00> : vector<12x648xf32>
    %84 = tpu.matmul %82, %83, %cst_72 {dimension_numbers = #tpu.dot_dimension_numbers<[1], [0], [0], [1], [0, 0, 1, 1], [], []>} : vector<12x8xbf16>, vector<8x648xbf16>, vector<12x648xf32> -> vector<12x648xf32>
    %85 = arith.addf %80, %84 : vector<12x648xf32>
    %c17 = arith.constant 17 : index
    %c0_73 = arith.constant 0 : index
    %c0_74 = arith.constant 0 : index
    %86 = vector.load %arg1[%c17, %c0_73, %c0_74] : memref<25x12x8xbf16, #tpu.memory_space<vmem>>, vector<1x12x8xbf16>
    %87 = vector.shape_cast %86 : vector<1x12x8xbf16> to vector<12x8xbf16>
    %c0_75 = arith.constant 0 : index
    %c56 = arith.constant 56 : index
    %88 = vector.load %arg0[%c0_75, %c56] : memref<8x768xbf16, #tpu.memory_space<vmem>>, vector<8x648xbf16>
    %cst_76 = arith.constant dense<0.000000e+00> : vector<12x648xf32>
    %89 = tpu.matmul %87, %88, %cst_76 {dimension_numbers = #tpu.dot_dimension_numbers<[1], [0], [0], [1], [0, 0, 1, 1], [], []>} : vector<12x8xbf16>, vector<8x648xbf16>, vector<12x648xf32> -> vector<12x648xf32>
    %90 = arith.addf %85, %89 : vector<12x648xf32>
    %c18_77 = arith.constant 18 : index
    %c0_78 = arith.constant 0 : index
    %c0_79 = arith.constant 0 : index
    %91 = vector.load %arg1[%c18_77, %c0_78, %c0_79] : memref<25x12x8xbf16, #tpu.memory_space<vmem>>, vector<1x12x8xbf16>
    %92 = vector.shape_cast %91 : vector<1x12x8xbf16> to vector<12x8xbf16>
    %c0_80 = arith.constant 0 : index
    %c57 = arith.constant 57 : index
    %93 = vector.load %arg0[%c0_80, %c57] : memref<8x768xbf16, #tpu.memory_space<vmem>>, vector<8x648xbf16>
    %cst_81 = arith.constant dense<0.000000e+00> : vector<12x648xf32>
    %94 = tpu.matmul %92, %93, %cst_81 {dimension_numbers = #tpu.dot_dimension_numbers<[1], [0], [0], [1], [0, 0, 1, 1], [], []>} : vector<12x8xbf16>, vector<8x648xbf16>, vector<12x648xf32> -> vector<12x648xf32>
    %95 = arith.addf %90, %94 : vector<12x648xf32>
    %c19_82 = arith.constant 19 : index
    %c0_83 = arith.constant 0 : index
    %c0_84 = arith.constant 0 : index
    %96 = vector.load %arg1[%c19_82, %c0_83, %c0_84] : memref<25x12x8xbf16, #tpu.memory_space<vmem>>, vector<1x12x8xbf16>
    %97 = vector.shape_cast %96 : vector<1x12x8xbf16> to vector<12x8xbf16>
    %c0_85 = arith.constant 0 : index
    %c58 = arith.constant 58 : index
    %98 = vector.load %arg0[%c0_85, %c58] : memref<8x768xbf16, #tpu.memory_space<vmem>>, vector<8x648xbf16>
    %cst_86 = arith.constant dense<0.000000e+00> : vector<12x648xf32>
    %99 = tpu.matmul %97, %98, %cst_86 {dimension_numbers = #tpu.dot_dimension_numbers<[1], [0], [0], [1], [0, 0, 1, 1], [], []>} : vector<12x8xbf16>, vector<8x648xbf16>, vector<12x648xf32> -> vector<12x648xf32>
    %100 = arith.addf %95, %99 : vector<12x648xf32>
    %c20_87 = arith.constant 20 : index
    %c0_88 = arith.constant 0 : index
    %c0_89 = arith.constant 0 : index
    %101 = vector.load %arg1[%c20_87, %c0_88, %c0_89] : memref<25x12x8xbf16, #tpu.memory_space<vmem>>, vector<1x12x8xbf16>
    %102 = vector.shape_cast %101 : vector<1x12x8xbf16> to vector<12x8xbf16>
    %c0_90 = arith.constant 0 : index
    %c72 = arith.constant 72 : index
    %103 = vector.load %arg0[%c0_90, %c72] : memref<8x768xbf16, #tpu.memory_space<vmem>>, vector<8x648xbf16>
    %cst_91 = arith.constant dense<0.000000e+00> : vector<12x648xf32>
    %104 = tpu.matmul %102, %103, %cst_91 {dimension_numbers = #tpu.dot_dimension_numbers<[1], [0], [0], [1], [0, 0, 1, 1], [], []>} : vector<12x8xbf16>, vector<8x648xbf16>, vector<12x648xf32> -> vector<12x648xf32>
    %105 = arith.addf %100, %104 : vector<12x648xf32>
    %c21_92 = arith.constant 21 : index
    %c0_93 = arith.constant 0 : index
    %c0_94 = arith.constant 0 : index
    %106 = vector.load %arg1[%c21_92, %c0_93, %c0_94] : memref<25x12x8xbf16, #tpu.memory_space<vmem>>, vector<1x12x8xbf16>
    %107 = vector.shape_cast %106 : vector<1x12x8xbf16> to vector<12x8xbf16>
    %c0_95 = arith.constant 0 : index
    %c73 = arith.constant 73 : index
    %108 = vector.load %arg0[%c0_95, %c73] : memref<8x768xbf16, #tpu.memory_space<vmem>>, vector<8x648xbf16>
    %cst_96 = arith.constant dense<0.000000e+00> : vector<12x648xf32>
    %109 = tpu.matmul %107, %108, %cst_96 {dimension_numbers = #tpu.dot_dimension_numbers<[1], [0], [0], [1], [0, 0, 1, 1], [], []>} : vector<12x8xbf16>, vector<8x648xbf16>, vector<12x648xf32> -> vector<12x648xf32>
    %110 = arith.addf %105, %109 : vector<12x648xf32>
    %c22_97 = arith.constant 22 : index
    %c0_98 = arith.constant 0 : index
    %c0_99 = arith.constant 0 : index
    %111 = vector.load %arg1[%c22_97, %c0_98, %c0_99] : memref<25x12x8xbf16, #tpu.memory_space<vmem>>, vector<1x12x8xbf16>
    %112 = vector.shape_cast %111 : vector<1x12x8xbf16> to vector<12x8xbf16>
    %c0_100 = arith.constant 0 : index
    %c74 = arith.constant 74 : index
    %113 = vector.load %arg0[%c0_100, %c74] : memref<8x768xbf16, #tpu.memory_space<vmem>>, vector<8x648xbf16>
    %cst_101 = arith.constant dense<0.000000e+00> : vector<12x648xf32>
    %114 = tpu.matmul %112, %113, %cst_101 {dimension_numbers = #tpu.dot_dimension_numbers<[1], [0], [0], [1], [0, 0, 1, 1], [], []>} : vector<12x8xbf16>, vector<8x648xbf16>, vector<12x648xf32> -> vector<12x648xf32>
    %115 = arith.addf %110, %114 : vector<12x648xf32>
    %c23 = arith.constant 23 : index
    %c0_102 = arith.constant 0 : index
    %c0_103 = arith.constant 0 : index
    %116 = vector.load %arg1[%c23, %c0_102, %c0_103] : memref<25x12x8xbf16, #tpu.memory_space<vmem>>, vector<1x12x8xbf16>
    %117 = vector.shape_cast %116 : vector<1x12x8xbf16> to vector<12x8xbf16>
    %c0_104 = arith.constant 0 : index
    %c75 = arith.constant 75 : index
    %118 = vector.load %arg0[%c0_104, %c75] : memref<8x768xbf16, #tpu.memory_space<vmem>>, vector<8x648xbf16>
    %cst_105 = arith.constant dense<0.000000e+00> : vector<12x648xf32>
    %119 = tpu.matmul %117, %118, %cst_105 {dimension_numbers = #tpu.dot_dimension_numbers<[1], [0], [0], [1], [0, 0, 1, 1], [], []>} : vector<12x8xbf16>, vector<8x648xbf16>, vector<12x648xf32> -> vector<12x648xf32>
    %120 = arith.addf %115, %119 : vector<12x648xf32>
    %c24 = arith.constant 24 : index
    %c0_106 = arith.constant 0 : index
    %c0_107 = arith.constant 0 : index
    %121 = vector.load %arg1[%c24, %c0_106, %c0_107] : memref<25x12x8xbf16, #tpu.memory_space<vmem>>, vector<1x12x8xbf16>
    %122 = vector.shape_cast %121 : vector<1x12x8xbf16> to vector<12x8xbf16>
    %c0_108 = arith.constant 0 : index
    %c76 = arith.constant 76 : index
    %123 = vector.load %arg0[%c0_108, %c76] : memref<8x768xbf16, #tpu.memory_space<vmem>>, vector<8x648xbf16>
    %cst_109 = arith.constant dense<0.000000e+00> : vector<12x648xf32>
    %124 = tpu.matmul %122, %123, %cst_109 {dimension_numbers = #tpu.dot_dimension_numbers<[1], [0], [0], [1], [0, 0, 1, 1], [], []>} : vector<12x8xbf16>, vector<8x648xbf16>, vector<12x648xf32> -> vector<12x648xf32>
    %125 = arith.addf %120, %124 : vector<12x648xf32>
    %c0_110 = arith.constant 0 : index
    %c0_111 = arith.constant 0 : index
    %126 = vector.load %arg2[%c0_110, %c0_111] : memref<12x1xf32, #tpu.memory_space<vmem>>, vector<12x1xf32>
    %127 = vector.broadcast %126 : vector<12x1xf32> to vector<12x648xf32>
    %128 = arith.addf %125, %127 : vector<12x648xf32>
    %c0_112 = arith.constant 0 : index
    %c0_113 = arith.constant 0 : index
    %129 = vector.load %arg5[%c0_112, %c0_113] : memref<1x648xf32, #tpu.memory_space<vmem>>, vector<1x648xf32>
    %130 = vector.broadcast %129 : vector<1x648xf32> to vector<12x648xf32>
    %131 = arith.mulf %128, %130 : vector<12x648xf32>
    %cst_114 = arith.constant dense<0.000000e+00> : vector<12xf32>
    %132 = vector.multi_reduction <add>, %131, %cst_114 [1] : vector<12x648xf32> to vector<12xf32>
    %133 = vector.shape_cast %132 : vector<12xf32> to vector<12x1xf32>
    %cst_115 = arith.constant 0.00255102036 : f32
    %134 = vector.broadcast %cst_115 : f32 to vector<12x1xf32>
    %135 = arith.mulf %133, %134 : vector<12x1xf32>
    %136 = arith.mulf %131, %131 : vector<12x648xf32>
    %cst_116 = arith.constant dense<0.000000e+00> : vector<12xf32>
    %137 = vector.multi_reduction <add>, %136, %cst_116 [1] : vector<12x648xf32> to vector<12xf32>
    %138 = vector.shape_cast %137 : vector<12xf32> to vector<12x1xf32>
    %cst_117 = arith.constant 0.00255102036 : f32
    %139 = vector.broadcast %cst_117 : f32 to vector<12x1xf32>
    %140 = arith.mulf %138, %139 : vector<12x1xf32>
    %141 = arith.mulf %135, %135 : vector<12x1xf32>
    %142 = arith.subf %140, %141 : vector<12x1xf32>
    %143 = vector.broadcast %135 : vector<12x1xf32> to vector<12x648xf32>
    %144 = arith.subf %128, %143 : vector<12x648xf32>
    %cst_118 = arith.constant 9.99999974E-6 : f32
    %145 = vector.broadcast %cst_118 : f32 to vector<12x1xf32>
    %146 = arith.addf %142, %145 : vector<12x1xf32>
    %147 = math.rsqrt %146 : vector<12x1xf32>
    %148 = vector.broadcast %147 : vector<12x1xf32> to vector<12x648xf32>
    %149 = arith.mulf %144, %148 : vector<12x648xf32>
    %c0_119 = arith.constant 0 : index
    %c0_120 = arith.constant 0 : index
    %150 = vector.load %arg3[%c0_119, %c0_120] : memref<12x1xf32, #tpu.memory_space<vmem>>, vector<12x1xf32>
    %151 = vector.broadcast %150 : vector<12x1xf32> to vector<12x648xf32>
    %152 = arith.mulf %149, %151 : vector<12x648xf32>
    %c0_121 = arith.constant 0 : index
    %c0_122 = arith.constant 0 : index
    %153 = vector.load %arg4[%c0_121, %c0_122] : memref<12x1xf32, #tpu.memory_space<vmem>>, vector<12x1xf32>
    %154 = vector.broadcast %153 : vector<12x1xf32> to vector<12x648xf32>
    %155 = arith.addf %152, %154 : vector<12x648xf32>
    %cst_123 = arith.constant 0.000000e+00 : f32
    %156 = vector.broadcast %cst_123 : f32 to vector<12x648xf32>
    %157 = arith.maximumf %155, %156 : vector<12x648xf32>
    %158 = arith.truncf %157 : vector<12x648xf32> to vector<12x648xbf16>
    %c0_124 = arith.constant 0 : index
    %c0_125 = arith.constant 0 : index
    %159 = vector.load %arg6[%c0_124, %c0_125] : memref<648x640xbf16, #tpu.memory_space<vmem>>, vector<648x640xbf16>
    %cst_126 = arith.constant dense<0.000000e+00> : vector<12x640xf32>
    %160 = tpu.matmul %158, %159, %cst_126 {dimension_numbers = #tpu.dot_dimension_numbers<[1], [0], [0], [1], [0, 0, 1, 1], [], []>} : vector<12x648xbf16>, vector<648x640xbf16>, vector<12x640xf32> -> vector<12x640xf32>
    %161 = arith.truncf %160 : vector<12x640xf32> to vector<12x640xbf16>
    %cst_127 = arith.constant 0.000000e+00 : f32
    %162 = vector.broadcast %cst_127 : f32 to vector<12x512xf32>
    %c0_128 = arith.constant 0 : index
    %c0_129 = arith.constant 0 : index
    %c0_130 = arith.constant 0 : index
    %163 = vector.load %arg7[%c0_128, %c0_129, %c0_130] : memref<25x12x12xbf16, #tpu.memory_space<vmem>>, vector<1x12x12xbf16>
    %164 = vector.shape_cast %163 : vector<1x12x12xbf16> to vector<12x12xbf16>
    %165 = vector.extract_strided_slice %161 {offsets = [0, 0], sizes = [12, 512], strides = [1, 1]} : vector<12x640xbf16> to vector<12x512xbf16>
    %cst_131 = arith.constant dense<0.000000e+00> : vector<12x512xf32>
    %166 = tpu.matmul %164, %165, %cst_131 {dimension_numbers = #tpu.dot_dimension_numbers<[1], [0], [0], [1], [0, 0, 1, 1], [], []>} : vector<12x12xbf16>, vector<12x512xbf16>, vector<12x512xf32> -> vector<12x512xf32>
    %167 = arith.addf %162, %166 : vector<12x512xf32>
    %c1_132 = arith.constant 1 : index
    %c0_133 = arith.constant 0 : index
    %c0_134 = arith.constant 0 : index
    %168 = vector.load %arg7[%c1_132, %c0_133, %c0_134] : memref<25x12x12xbf16, #tpu.memory_space<vmem>>, vector<1x12x12xbf16>
    %169 = vector.shape_cast %168 : vector<1x12x12xbf16> to vector<12x12xbf16>
    %170 = vector.extract_strided_slice %161 {offsets = [0, 1], sizes = [12, 512], strides = [1, 1]} : vector<12x640xbf16> to vector<12x512xbf16>
    %cst_135 = arith.constant dense<0.000000e+00> : vector<12x512xf32>
    %171 = tpu.matmul %169, %170, %cst_135 {dimension_numbers = #tpu.dot_dimension_numbers<[1], [0], [0], [1], [0, 0, 1, 1], [], []>} : vector<12x12xbf16>, vector<12x512xbf16>, vector<12x512xf32> -> vector<12x512xf32>
    %172 = arith.addf %167, %171 : vector<12x512xf32>
    %c2_136 = arith.constant 2 : index
    %c0_137 = arith.constant 0 : index
    %c0_138 = arith.constant 0 : index
    %173 = vector.load %arg7[%c2_136, %c0_137, %c0_138] : memref<25x12x12xbf16, #tpu.memory_space<vmem>>, vector<1x12x12xbf16>
    %174 = vector.shape_cast %173 : vector<1x12x12xbf16> to vector<12x12xbf16>
    %175 = vector.extract_strided_slice %161 {offsets = [0, 2], sizes = [12, 512], strides = [1, 1]} : vector<12x640xbf16> to vector<12x512xbf16>
    %cst_139 = arith.constant dense<0.000000e+00> : vector<12x512xf32>
    %176 = tpu.matmul %174, %175, %cst_139 {dimension_numbers = #tpu.dot_dimension_numbers<[1], [0], [0], [1], [0, 0, 1, 1], [], []>} : vector<12x12xbf16>, vector<12x512xbf16>, vector<12x512xf32> -> vector<12x512xf32>
    %177 = arith.addf %172, %176 : vector<12x512xf32>
    %c3_140 = arith.constant 3 : index
    %c0_141 = arith.constant 0 : index
    %c0_142 = arith.constant 0 : index
    %178 = vector.load %arg7[%c3_140, %c0_141, %c0_142] : memref<25x12x12xbf16, #tpu.memory_space<vmem>>, vector<1x12x12xbf16>
    %179 = vector.shape_cast %178 : vector<1x12x12xbf16> to vector<12x12xbf16>
    %180 = vector.extract_strided_slice %161 {offsets = [0, 3], sizes = [12, 512], strides = [1, 1]} : vector<12x640xbf16> to vector<12x512xbf16>
    %cst_143 = arith.constant dense<0.000000e+00> : vector<12x512xf32>
    %181 = tpu.matmul %179, %180, %cst_143 {dimension_numbers = #tpu.dot_dimension_numbers<[1], [0], [0], [1], [0, 0, 1, 1], [], []>} : vector<12x12xbf16>, vector<12x512xbf16>, vector<12x512xf32> -> vector<12x512xf32>
    %182 = arith.addf %177, %181 : vector<12x512xf32>
    %c4_144 = arith.constant 4 : index
    %c0_145 = arith.constant 0 : index
    %c0_146 = arith.constant 0 : index
    %183 = vector.load %arg7[%c4_144, %c0_145, %c0_146] : memref<25x12x12xbf16, #tpu.memory_space<vmem>>, vector<1x12x12xbf16>
    %184 = vector.shape_cast %183 : vector<1x12x12xbf16> to vector<12x12xbf16>
    %185 = vector.extract_strided_slice %161 {offsets = [0, 4], sizes = [12, 512], strides = [1, 1]} : vector<12x640xbf16> to vector<12x512xbf16>
    %cst_147 = arith.constant dense<0.000000e+00> : vector<12x512xf32>
    %186 = tpu.matmul %184, %185, %cst_147 {dimension_numbers = #tpu.dot_dimension_numbers<[1], [0], [0], [1], [0, 0, 1, 1], [], []>} : vector<12x12xbf16>, vector<12x512xbf16>, vector<12x512xf32> -> vector<12x512xf32>
    %187 = arith.addf %182, %186 : vector<12x512xf32>
    %c5_148 = arith.constant 5 : index
    %c0_149 = arith.constant 0 : index
    %c0_150 = arith.constant 0 : index
    %188 = vector.load %arg7[%c5_148, %c0_149, %c0_150] : memref<25x12x12xbf16, #tpu.memory_space<vmem>>, vector<1x12x12xbf16>
    %189 = vector.shape_cast %188 : vector<1x12x12xbf16> to vector<12x12xbf16>
    %190 = vector.extract_strided_slice %161 {offsets = [0, 16], sizes = [12, 512], strides = [1, 1]} : vector<12x640xbf16> to vector<12x512xbf16>
    %cst_151 = arith.constant dense<0.000000e+00> : vector<12x512xf32>
    %191 = tpu.matmul %189, %190, %cst_151 {dimension_numbers = #tpu.dot_dimension_numbers<[1], [0], [0], [1], [0, 0, 1, 1], [], []>} : vector<12x12xbf16>, vector<12x512xbf16>, vector<12x512xf32> -> vector<12x512xf32>
    %192 = arith.addf %187, %191 : vector<12x512xf32>
    %c6_152 = arith.constant 6 : index
    %c0_153 = arith.constant 0 : index
    %c0_154 = arith.constant 0 : index
    %193 = vector.load %arg7[%c6_152, %c0_153, %c0_154] : memref<25x12x12xbf16, #tpu.memory_space<vmem>>, vector<1x12x12xbf16>
    %194 = vector.shape_cast %193 : vector<1x12x12xbf16> to vector<12x12xbf16>
    %195 = vector.extract_strided_slice %161 {offsets = [0, 17], sizes = [12, 512], strides = [1, 1]} : vector<12x640xbf16> to vector<12x512xbf16>
    %cst_155 = arith.constant dense<0.000000e+00> : vector<12x512xf32>
    %196 = tpu.matmul %194, %195, %cst_155 {dimension_numbers = #tpu.dot_dimension_numbers<[1], [0], [0], [1], [0, 0, 1, 1], [], []>} : vector<12x12xbf16>, vector<12x512xbf16>, vector<12x512xf32> -> vector<12x512xf32>
    %197 = arith.addf %192, %196 : vector<12x512xf32>
    %c7_156 = arith.constant 7 : index
    %c0_157 = arith.constant 0 : index
    %c0_158 = arith.constant 0 : index
    %198 = vector.load %arg7[%c7_156, %c0_157, %c0_158] : memref<25x12x12xbf16, #tpu.memory_space<vmem>>, vector<1x12x12xbf16>
    %199 = vector.shape_cast %198 : vector<1x12x12xbf16> to vector<12x12xbf16>
    %200 = vector.extract_strided_slice %161 {offsets = [0, 18], sizes = [12, 512], strides = [1, 1]} : vector<12x640xbf16> to vector<12x512xbf16>
    %cst_159 = arith.constant dense<0.000000e+00> : vector<12x512xf32>
    %201 = tpu.matmul %199, %200, %cst_159 {dimension_numbers = #tpu.dot_dimension_numbers<[1], [0], [0], [1], [0, 0, 1, 1], [], []>} : vector<12x12xbf16>, vector<12x512xbf16>, vector<12x512xf32> -> vector<12x512xf32>
    %202 = arith.addf %197, %201 : vector<12x512xf32>
    %c8_160 = arith.constant 8 : index
    %c0_161 = arith.constant 0 : index
    %c0_162 = arith.constant 0 : index
    %203 = vector.load %arg7[%c8_160, %c0_161, %c0_162] : memref<25x12x12xbf16, #tpu.memory_space<vmem>>, vector<1x12x12xbf16>
    %204 = vector.shape_cast %203 : vector<1x12x12xbf16> to vector<12x12xbf16>
    %205 = vector.extract_strided_slice %161 {offsets = [0, 19], sizes = [12, 512], strides = [1, 1]} : vector<12x640xbf16> to vector<12x512xbf16>
    %cst_163 = arith.constant dense<0.000000e+00> : vector<12x512xf32>
    %206 = tpu.matmul %204, %205, %cst_163 {dimension_numbers = #tpu.dot_dimension_numbers<[1], [0], [0], [1], [0, 0, 1, 1], [], []>} : vector<12x12xbf16>, vector<12x512xbf16>, vector<12x512xf32> -> vector<12x512xf32>
    %207 = arith.addf %202, %206 : vector<12x512xf32>
    %c9_164 = arith.constant 9 : index
    %c0_165 = arith.constant 0 : index
    %c0_166 = arith.constant 0 : index
    %208 = vector.load %arg7[%c9_164, %c0_165, %c0_166] : memref<25x12x12xbf16, #tpu.memory_space<vmem>>, vector<1x12x12xbf16>
    %209 = vector.shape_cast %208 : vector<1x12x12xbf16> to vector<12x12xbf16>
    %210 = vector.extract_strided_slice %161 {offsets = [0, 20], sizes = [12, 512], strides = [1, 1]} : vector<12x640xbf16> to vector<12x512xbf16>
    %cst_167 = arith.constant dense<0.000000e+00> : vector<12x512xf32>
    %211 = tpu.matmul %209, %210, %cst_167 {dimension_numbers = #tpu.dot_dimension_numbers<[1], [0], [0], [1], [0, 0, 1, 1], [], []>} : vector<12x12xbf16>, vector<12x512xbf16>, vector<12x512xf32> -> vector<12x512xf32>
    %212 = arith.addf %207, %211 : vector<12x512xf32>
    %c10_168 = arith.constant 10 : index
    %c0_169 = arith.constant 0 : index
    %c0_170 = arith.constant 0 : index
    %213 = vector.load %arg7[%c10_168, %c0_169, %c0_170] : memref<25x12x12xbf16, #tpu.memory_space<vmem>>, vector<1x12x12xbf16>
    %214 = vector.shape_cast %213 : vector<1x12x12xbf16> to vector<12x12xbf16>
    %215 = vector.extract_strided_slice %161 {offsets = [0, 32], sizes = [12, 512], strides = [1, 1]} : vector<12x640xbf16> to vector<12x512xbf16>
    %cst_171 = arith.constant dense<0.000000e+00> : vector<12x512xf32>
    %216 = tpu.matmul %214, %215, %cst_171 {dimension_numbers = #tpu.dot_dimension_numbers<[1], [0], [0], [1], [0, 0, 1, 1], [], []>} : vector<12x12xbf16>, vector<12x512xbf16>, vector<12x512xf32> -> vector<12x512xf32>
    %217 = arith.addf %212, %216 : vector<12x512xf32>
    %c11_172 = arith.constant 11 : index
    %c0_173 = arith.constant 0 : index
    %c0_174 = arith.constant 0 : index
    %218 = vector.load %arg7[%c11_172, %c0_173, %c0_174] : memref<25x12x12xbf16, #tpu.memory_space<vmem>>, vector<1x12x12xbf16>
    %219 = vector.shape_cast %218 : vector<1x12x12xbf16> to vector<12x12xbf16>
    %220 = vector.extract_strided_slice %161 {offsets = [0, 33], sizes = [12, 512], strides = [1, 1]} : vector<12x640xbf16> to vector<12x512xbf16>
    %cst_175 = arith.constant dense<0.000000e+00> : vector<12x512xf32>
    %221 = tpu.matmul %219, %220, %cst_175 {dimension_numbers = #tpu.dot_dimension_numbers<[1], [0], [0], [1], [0, 0, 1, 1], [], []>} : vector<12x12xbf16>, vector<12x512xbf16>, vector<12x512xf32> -> vector<12x512xf32>
    %222 = arith.addf %217, %221 : vector<12x512xf32>
    %c12_176 = arith.constant 12 : index
    %c0_177 = arith.constant 0 : index
    %c0_178 = arith.constant 0 : index
    %223 = vector.load %arg7[%c12_176, %c0_177, %c0_178] : memref<25x12x12xbf16, #tpu.memory_space<vmem>>, vector<1x12x12xbf16>
    %224 = vector.shape_cast %223 : vector<1x12x12xbf16> to vector<12x12xbf16>
    %225 = vector.extract_strided_slice %161 {offsets = [0, 34], sizes = [12, 512], strides = [1, 1]} : vector<12x640xbf16> to vector<12x512xbf16>
    %cst_179 = arith.constant dense<0.000000e+00> : vector<12x512xf32>
    %226 = tpu.matmul %224, %225, %cst_179 {dimension_numbers = #tpu.dot_dimension_numbers<[1], [0], [0], [1], [0, 0, 1, 1], [], []>} : vector<12x12xbf16>, vector<12x512xbf16>, vector<12x512xf32> -> vector<12x512xf32>
    %227 = arith.addf %222, %226 : vector<12x512xf32>
    %c13_180 = arith.constant 13 : index
    %c0_181 = arith.constant 0 : index
    %c0_182 = arith.constant 0 : index
    %228 = vector.load %arg7[%c13_180, %c0_181, %c0_182] : memref<25x12x12xbf16, #tpu.memory_space<vmem>>, vector<1x12x12xbf16>
    %229 = vector.shape_cast %228 : vector<1x12x12xbf16> to vector<12x12xbf16>
    %230 = vector.extract_strided_slice %161 {offsets = [0, 35], sizes = [12, 512], strides = [1, 1]} : vector<12x640xbf16> to vector<12x512xbf16>
    %cst_183 = arith.constant dense<0.000000e+00> : vector<12x512xf32>
    %231 = tpu.matmul %229, %230, %cst_183 {dimension_numbers = #tpu.dot_dimension_numbers<[1], [0], [0], [1], [0, 0, 1, 1], [], []>} : vector<12x12xbf16>, vector<12x512xbf16>, vector<12x512xf32> -> vector<12x512xf32>
    %232 = arith.addf %227, %231 : vector<12x512xf32>
    %c14_184 = arith.constant 14 : index
    %c0_185 = arith.constant 0 : index
    %c0_186 = arith.constant 0 : index
    %233 = vector.load %arg7[%c14_184, %c0_185, %c0_186] : memref<25x12x12xbf16, #tpu.memory_space<vmem>>, vector<1x12x12xbf16>
    %234 = vector.shape_cast %233 : vector<1x12x12xbf16> to vector<12x12xbf16>
    %235 = vector.extract_strided_slice %161 {offsets = [0, 36], sizes = [12, 512], strides = [1, 1]} : vector<12x640xbf16> to vector<12x512xbf16>
    %cst_187 = arith.constant dense<0.000000e+00> : vector<12x512xf32>
    %236 = tpu.matmul %234, %235, %cst_187 {dimension_numbers = #tpu.dot_dimension_numbers<[1], [0], [0], [1], [0, 0, 1, 1], [], []>} : vector<12x12xbf16>, vector<12x512xbf16>, vector<12x512xf32> -> vector<12x512xf32>
    %237 = arith.addf %232, %236 : vector<12x512xf32>
    %c15_188 = arith.constant 15 : index
    %c0_189 = arith.constant 0 : index
    %c0_190 = arith.constant 0 : index
    %238 = vector.load %arg7[%c15_188, %c0_189, %c0_190] : memref<25x12x12xbf16, #tpu.memory_space<vmem>>, vector<1x12x12xbf16>
    %239 = vector.shape_cast %238 : vector<1x12x12xbf16> to vector<12x12xbf16>
    %240 = vector.extract_strided_slice %161 {offsets = [0, 48], sizes = [12, 512], strides = [1, 1]} : vector<12x640xbf16> to vector<12x512xbf16>
    %cst_191 = arith.constant dense<0.000000e+00> : vector<12x512xf32>
    %241 = tpu.matmul %239, %240, %cst_191 {dimension_numbers = #tpu.dot_dimension_numbers<[1], [0], [0], [1], [0, 0, 1, 1], [], []>} : vector<12x12xbf16>, vector<12x512xbf16>, vector<12x512xf32> -> vector<12x512xf32>
    %242 = arith.addf %237, %241 : vector<12x512xf32>
    %c16_192 = arith.constant 16 : index
    %c0_193 = arith.constant 0 : index
    %c0_194 = arith.constant 0 : index
    %243 = vector.load %arg7[%c16_192, %c0_193, %c0_194] : memref<25x12x12xbf16, #tpu.memory_space<vmem>>, vector<1x12x12xbf16>
    %244 = vector.shape_cast %243 : vector<1x12x12xbf16> to vector<12x12xbf16>
    %245 = vector.extract_strided_slice %161 {offsets = [0, 49], sizes = [12, 512], strides = [1, 1]} : vector<12x640xbf16> to vector<12x512xbf16>
    %cst_195 = arith.constant dense<0.000000e+00> : vector<12x512xf32>
    %246 = tpu.matmul %244, %245, %cst_195 {dimension_numbers = #tpu.dot_dimension_numbers<[1], [0], [0], [1], [0, 0, 1, 1], [], []>} : vector<12x12xbf16>, vector<12x512xbf16>, vector<12x512xf32> -> vector<12x512xf32>
    %247 = arith.addf %242, %246 : vector<12x512xf32>
    %c17_196 = arith.constant 17 : index
    %c0_197 = arith.constant 0 : index
    %c0_198 = arith.constant 0 : index
    %248 = vector.load %arg7[%c17_196, %c0_197, %c0_198] : memref<25x12x12xbf16, #tpu.memory_space<vmem>>, vector<1x12x12xbf16>
    %249 = vector.shape_cast %248 : vector<1x12x12xbf16> to vector<12x12xbf16>
    %250 = vector.extract_strided_slice %161 {offsets = [0, 50], sizes = [12, 512], strides = [1, 1]} : vector<12x640xbf16> to vector<12x512xbf16>
    %cst_199 = arith.constant dense<0.000000e+00> : vector<12x512xf32>
    %251 = tpu.matmul %249, %250, %cst_199 {dimension_numbers = #tpu.dot_dimension_numbers<[1], [0], [0], [1], [0, 0, 1, 1], [], []>} : vector<12x12xbf16>, vector<12x512xbf16>, vector<12x512xf32> -> vector<12x512xf32>
    %252 = arith.addf %247, %251 : vector<12x512xf32>
    %c18_200 = arith.constant 18 : index
    %c0_201 = arith.constant 0 : index
    %c0_202 = arith.constant 0 : index
    %253 = vector.load %arg7[%c18_200, %c0_201, %c0_202] : memref<25x12x12xbf16, #tpu.memory_space<vmem>>, vector<1x12x12xbf16>
    %254 = vector.shape_cast %253 : vector<1x12x12xbf16> to vector<12x12xbf16>
    %255 = vector.extract_strided_slice %161 {offsets = [0, 51], sizes = [12, 512], strides = [1, 1]} : vector<12x640xbf16> to vector<12x512xbf16>
    %cst_203 = arith.constant dense<0.000000e+00> : vector<12x512xf32>
    %256 = tpu.matmul %254, %255, %cst_203 {dimension_numbers = #tpu.dot_dimension_numbers<[1], [0], [0], [1], [0, 0, 1, 1], [], []>} : vector<12x12xbf16>, vector<12x512xbf16>, vector<12x512xf32> -> vector<12x512xf32>
    %257 = arith.addf %252, %256 : vector<12x512xf32>
    %c19_204 = arith.constant 19 : index
    %c0_205 = arith.constant 0 : index
    %c0_206 = arith.constant 0 : index
    %258 = vector.load %arg7[%c19_204, %c0_205, %c0_206] : memref<25x12x12xbf16, #tpu.memory_space<vmem>>, vector<1x12x12xbf16>
    %259 = vector.shape_cast %258 : vector<1x12x12xbf16> to vector<12x12xbf16>
    %260 = vector.extract_strided_slice %161 {offsets = [0, 52], sizes = [12, 512], strides = [1, 1]} : vector<12x640xbf16> to vector<12x512xbf16>
    %cst_207 = arith.constant dense<0.000000e+00> : vector<12x512xf32>
    %261 = tpu.matmul %259, %260, %cst_207 {dimension_numbers = #tpu.dot_dimension_numbers<[1], [0], [0], [1], [0, 0, 1, 1], [], []>} : vector<12x12xbf16>, vector<12x512xbf16>, vector<12x512xf32> -> vector<12x512xf32>
    %262 = arith.addf %257, %261 : vector<12x512xf32>
    %c20_208 = arith.constant 20 : index
    %c0_209 = arith.constant 0 : index
    %c0_210 = arith.constant 0 : index
    %263 = vector.load %arg7[%c20_208, %c0_209, %c0_210] : memref<25x12x12xbf16, #tpu.memory_space<vmem>>, vector<1x12x12xbf16>
    %264 = vector.shape_cast %263 : vector<1x12x12xbf16> to vector<12x12xbf16>
    %265 = vector.extract_strided_slice %161 {offsets = [0, 64], sizes = [12, 512], strides = [1, 1]} : vector<12x640xbf16> to vector<12x512xbf16>
    %cst_211 = arith.constant dense<0.000000e+00> : vector<12x512xf32>
    %266 = tpu.matmul %264, %265, %cst_211 {dimension_numbers = #tpu.dot_dimension_numbers<[1], [0], [0], [1], [0, 0, 1, 1], [], []>} : vector<12x12xbf16>, vector<12x512xbf16>, vector<12x512xf32> -> vector<12x512xf32>
    %267 = arith.addf %262, %266 : vector<12x512xf32>
    %c21_212 = arith.constant 21 : index
    %c0_213 = arith.constant 0 : index
    %c0_214 = arith.constant 0 : index
    %268 = vector.load %arg7[%c21_212, %c0_213, %c0_214] : memref<25x12x12xbf16, #tpu.memory_space<vmem>>, vector<1x12x12xbf16>
    %269 = vector.shape_cast %268 : vector<1x12x12xbf16> to vector<12x12xbf16>
    %270 = vector.extract_strided_slice %161 {offsets = [0, 65], sizes = [12, 512], strides = [1, 1]} : vector<12x640xbf16> to vector<12x512xbf16>
    %cst_215 = arith.constant dense<0.000000e+00> : vector<12x512xf32>
    %271 = tpu.matmul %269, %270, %cst_215 {dimension_numbers = #tpu.dot_dimension_numbers<[1], [0], [0], [1], [0, 0, 1, 1], [], []>} : vector<12x12xbf16>, vector<12x512xbf16>, vector<12x512xf32> -> vector<12x512xf32>
    %272 = arith.addf %267, %271 : vector<12x512xf32>
    %c22_216 = arith.constant 22 : index
    %c0_217 = arith.constant 0 : index
    %c0_218 = arith.constant 0 : index
    %273 = vector.load %arg7[%c22_216, %c0_217, %c0_218] : memref<25x12x12xbf16, #tpu.memory_space<vmem>>, vector<1x12x12xbf16>
    %274 = vector.shape_cast %273 : vector<1x12x12xbf16> to vector<12x12xbf16>
    %275 = vector.extract_strided_slice %161 {offsets = [0, 66], sizes = [12, 512], strides = [1, 1]} : vector<12x640xbf16> to vector<12x512xbf16>
    %cst_219 = arith.constant dense<0.000000e+00> : vector<12x512xf32>
    %276 = tpu.matmul %274, %275, %cst_219 {dimension_numbers = #tpu.dot_dimension_numbers<[1], [0], [0], [1], [0, 0, 1, 1], [], []>} : vector<12x12xbf16>, vector<12x512xbf16>, vector<12x512xf32> -> vector<12x512xf32>
    %277 = arith.addf %272, %276 : vector<12x512xf32>
    %c23_220 = arith.constant 23 : index
    %c0_221 = arith.constant 0 : index
    %c0_222 = arith.constant 0 : index
    %278 = vector.load %arg7[%c23_220, %c0_221, %c0_222] : memref<25x12x12xbf16, #tpu.memory_space<vmem>>, vector<1x12x12xbf16>
    %279 = vector.shape_cast %278 : vector<1x12x12xbf16> to vector<12x12xbf16>
    %280 = vector.extract_strided_slice %161 {offsets = [0, 67], sizes = [12, 512], strides = [1, 1]} : vector<12x640xbf16> to vector<12x512xbf16>
    %cst_223 = arith.constant dense<0.000000e+00> : vector<12x512xf32>
    %281 = tpu.matmul %279, %280, %cst_223 {dimension_numbers = #tpu.dot_dimension_numbers<[1], [0], [0], [1], [0, 0, 1, 1], [], []>} : vector<12x12xbf16>, vector<12x512xbf16>, vector<12x512xf32> -> vector<12x512xf32>
    %282 = arith.addf %277, %281 : vector<12x512xf32>
    %c24_224 = arith.constant 24 : index
    %c0_225 = arith.constant 0 : index
    %c0_226 = arith.constant 0 : index
    %283 = vector.load %arg7[%c24_224, %c0_225, %c0_226] : memref<25x12x12xbf16, #tpu.memory_space<vmem>>, vector<1x12x12xbf16>
    %284 = vector.shape_cast %283 : vector<1x12x12xbf16> to vector<12x12xbf16>
    %285 = vector.extract_strided_slice %161 {offsets = [0, 68], sizes = [12, 512], strides = [1, 1]} : vector<12x640xbf16> to vector<12x512xbf16>
    %cst_227 = arith.constant dense<0.000000e+00> : vector<12x512xf32>
    %286 = tpu.matmul %284, %285, %cst_227 {dimension_numbers = #tpu.dot_dimension_numbers<[1], [0], [0], [1], [0, 0, 1, 1], [], []>} : vector<12x12xbf16>, vector<12x512xbf16>, vector<12x512xf32> -> vector<12x512xf32>
    %287 = arith.addf %282, %286 : vector<12x512xf32>
    %c0_228 = arith.constant 0 : index
    %c0_229 = arith.constant 0 : index
    %288 = vector.load %arg8[%c0_228, %c0_229] : memref<12x1xf32, #tpu.memory_space<vmem>>, vector<12x1xf32>
    %289 = vector.broadcast %288 : vector<12x1xf32> to vector<12x512xf32>
    %290 = arith.addf %287, %289 : vector<12x512xf32>
    %c0_230 = arith.constant 0 : index
    %c0_231 = arith.constant 0 : index
    %291 = vector.load %arg11[%c0_230, %c0_231] : memref<1x512xf32, #tpu.memory_space<vmem>>, vector<1x512xf32>
    %292 = vector.broadcast %291 : vector<1x512xf32> to vector<12x512xf32>
    %293 = arith.mulf %290, %292 : vector<12x512xf32>
    %cst_232 = arith.constant dense<0.000000e+00> : vector<12xf32>
    %294 = vector.multi_reduction <add>, %293, %cst_232 [1] : vector<12x512xf32> to vector<12xf32>
    %295 = vector.shape_cast %294 : vector<12xf32> to vector<12x1xf32>
    %cst_233 = arith.constant 0.00347222225 : f32
    %296 = vector.broadcast %cst_233 : f32 to vector<12x1xf32>
    %297 = arith.mulf %295, %296 : vector<12x1xf32>
    %298 = arith.mulf %293, %293 : vector<12x512xf32>
    %cst_234 = arith.constant dense<0.000000e+00> : vector<12xf32>
    %299 = vector.multi_reduction <add>, %298, %cst_234 [1] : vector<12x512xf32> to vector<12xf32>
    %300 = vector.shape_cast %299 : vector<12xf32> to vector<12x1xf32>
    %cst_235 = arith.constant 0.00347222225 : f32
    %301 = vector.broadcast %cst_235 : f32 to vector<12x1xf32>
    %302 = arith.mulf %300, %301 : vector<12x1xf32>
    %303 = arith.mulf %297, %297 : vector<12x1xf32>
    %304 = arith.subf %302, %303 : vector<12x1xf32>
    %305 = vector.broadcast %297 : vector<12x1xf32> to vector<12x512xf32>
    %306 = arith.subf %290, %305 : vector<12x512xf32>
    %cst_236 = arith.constant 9.99999974E-6 : f32
    %307 = vector.broadcast %cst_236 : f32 to vector<12x1xf32>
    %308 = arith.addf %304, %307 : vector<12x1xf32>
    %309 = math.rsqrt %308 : vector<12x1xf32>
    %310 = vector.broadcast %309 : vector<12x1xf32> to vector<12x512xf32>
    %311 = arith.mulf %306, %310 : vector<12x512xf32>
    %c0_237 = arith.constant 0 : index
    %c0_238 = arith.constant 0 : index
    %312 = vector.load %arg9[%c0_237, %c0_238] : memref<12x1xf32, #tpu.memory_space<vmem>>, vector<12x1xf32>
    %313 = vector.broadcast %312 : vector<12x1xf32> to vector<12x512xf32>
    %314 = arith.mulf %311, %313 : vector<12x512xf32>
    %c0_239 = arith.constant 0 : index
    %c0_240 = arith.constant 0 : index
    %315 = vector.load %arg10[%c0_239, %c0_240] : memref<12x1xf32, #tpu.memory_space<vmem>>, vector<12x1xf32>
    %316 = vector.broadcast %315 : vector<12x1xf32> to vector<12x512xf32>
    %317 = arith.addf %314, %316 : vector<12x512xf32>
    %cst_241 = arith.constant 0.000000e+00 : f32
    %318 = vector.broadcast %cst_241 : f32 to vector<12x512xf32>
    %319 = arith.maximumf %317, %318 : vector<12x512xf32>
    %320 = arith.truncf %319 : vector<12x512xf32> to vector<12x512xbf16>
    %321 = vector.extract_strided_slice %320 {offsets = [0, 0], sizes = [12, 495], strides = [1, 1]} : vector<12x512xbf16> to vector<12x495xbf16>
    %322 = vector.extract_strided_slice %320 {offsets = [0, 1], sizes = [12, 495], strides = [1, 1]} : vector<12x512xbf16> to vector<12x495xbf16>
    %323 = arith.maximumf %321, %322 : vector<12x495xbf16>
    %324 = vector.extract_strided_slice %320 {offsets = [0, 16], sizes = [12, 495], strides = [1, 1]} : vector<12x512xbf16> to vector<12x495xbf16>
    %325 = vector.extract_strided_slice %320 {offsets = [0, 17], sizes = [12, 495], strides = [1, 1]} : vector<12x512xbf16> to vector<12x495xbf16>
    %326 = arith.maximumf %324, %325 : vector<12x495xbf16>
    %327 = arith.maximumf %323, %326 : vector<12x495xbf16>
    %c0_242 = arith.constant 0 : index
    %c0_243 = arith.constant 0 : index
    %328 = vector.load %arg12[%c0_242, %c0_243] : memref<495x256xbf16, #tpu.memory_space<vmem>>, vector<495x256xbf16>
    %cst_244 = arith.constant dense<0.000000e+00> : vector<12x256xf32>
    %329 = tpu.matmul %327, %328, %cst_244 {dimension_numbers = #tpu.dot_dimension_numbers<[1], [0], [0], [1], [0, 0, 1, 1], [], []>} : vector<12x495xbf16>, vector<495x256xbf16>, vector<12x256xf32> -> vector<12x256xf32>
    %330 = arith.truncf %329 : vector<12x256xf32> to vector<12x256xbf16>
    %cst_245 = arith.constant 0.000000e+00 : f32
    %331 = vector.broadcast %cst_245 : f32 to vector<24x128xf32>
    %c0_246 = arith.constant 0 : index
    %c0_247 = arith.constant 0 : index
    %c0_248 = arith.constant 0 : index
    %332 = vector.load %arg13[%c0_246, %c0_247, %c0_248] : memref<25x24x12xbf16, #tpu.memory_space<vmem>>, vector<1x24x12xbf16>
    %333 = vector.shape_cast %332 : vector<1x24x12xbf16> to vector<24x12xbf16>
    %334 = vector.extract_strided_slice %330 {offsets = [0, 0], sizes = [12, 128], strides = [1, 1]} : vector<12x256xbf16> to vector<12x128xbf16>
    %cst_249 = arith.constant dense<0.000000e+00> : vector<24x128xf32>
    %335 = tpu.matmul %333, %334, %cst_249 {dimension_numbers = #tpu.dot_dimension_numbers<[1], [0], [0], [1], [0, 0, 1, 1], [], []>} : vector<24x12xbf16>, vector<12x128xbf16>, vector<24x128xf32> -> vector<24x128xf32>
    %336 = arith.addf %331, %335 : vector<24x128xf32>
    %c1_250 = arith.constant 1 : index
    %c0_251 = arith.constant 0 : index
    %c0_252 = arith.constant 0 : index
    %337 = vector.load %arg13[%c1_250, %c0_251, %c0_252] : memref<25x24x12xbf16, #tpu.memory_space<vmem>>, vector<1x24x12xbf16>
    %338 = vector.shape_cast %337 : vector<1x24x12xbf16> to vector<24x12xbf16>
    %339 = vector.extract_strided_slice %330 {offsets = [0, 1], sizes = [12, 128], strides = [1, 1]} : vector<12x256xbf16> to vector<12x128xbf16>
    %cst_253 = arith.constant dense<0.000000e+00> : vector<24x128xf32>
    %340 = tpu.matmul %338, %339, %cst_253 {dimension_numbers = #tpu.dot_dimension_numbers<[1], [0], [0], [1], [0, 0, 1, 1], [], []>} : vector<24x12xbf16>, vector<12x128xbf16>, vector<24x128xf32> -> vector<24x128xf32>
    %341 = arith.addf %336, %340 : vector<24x128xf32>
    %c2_254 = arith.constant 2 : index
    %c0_255 = arith.constant 0 : index
    %c0_256 = arith.constant 0 : index
    %342 = vector.load %arg13[%c2_254, %c0_255, %c0_256] : memref<25x24x12xbf16, #tpu.memory_space<vmem>>, vector<1x24x12xbf16>
    %343 = vector.shape_cast %342 : vector<1x24x12xbf16> to vector<24x12xbf16>
    %344 = vector.extract_strided_slice %330 {offsets = [0, 2], sizes = [12, 128], strides = [1, 1]} : vector<12x256xbf16> to vector<12x128xbf16>
    %cst_257 = arith.constant dense<0.000000e+00> : vector<24x128xf32>
    %345 = tpu.matmul %343, %344, %cst_257 {dimension_numbers = #tpu.dot_dimension_numbers<[1], [0], [0], [1], [0, 0, 1, 1], [], []>} : vector<24x12xbf16>, vector<12x128xbf16>, vector<24x128xf32> -> vector<24x128xf32>
    %346 = arith.addf %341, %345 : vector<24x128xf32>
    %c3_258 = arith.constant 3 : index
    %c0_259 = arith.constant 0 : index
    %c0_260 = arith.constant 0 : index
    %347 = vector.load %arg13[%c3_258, %c0_259, %c0_260] : memref<25x24x12xbf16, #tpu.memory_space<vmem>>, vector<1x24x12xbf16>
    %348 = vector.shape_cast %347 : vector<1x24x12xbf16> to vector<24x12xbf16>
    %349 = vector.extract_strided_slice %330 {offsets = [0, 3], sizes = [12, 128], strides = [1, 1]} : vector<12x256xbf16> to vector<12x128xbf16>
    %cst_261 = arith.constant dense<0.000000e+00> : vector<24x128xf32>
    %350 = tpu.matmul %348, %349, %cst_261 {dimension_numbers = #tpu.dot_dimension_numbers<[1], [0], [0], [1], [0, 0, 1, 1], [], []>} : vector<24x12xbf16>, vector<12x128xbf16>, vector<24x128xf32> -> vector<24x128xf32>
    %351 = arith.addf %346, %350 : vector<24x128xf32>
    %c4_262 = arith.constant 4 : index
    %c0_263 = arith.constant 0 : index
    %c0_264 = arith.constant 0 : index
    %352 = vector.load %arg13[%c4_262, %c0_263, %c0_264] : memref<25x24x12xbf16, #tpu.memory_space<vmem>>, vector<1x24x12xbf16>
    %353 = vector.shape_cast %352 : vector<1x24x12xbf16> to vector<24x12xbf16>
    %354 = vector.extract_strided_slice %330 {offsets = [0, 4], sizes = [12, 128], strides = [1, 1]} : vector<12x256xbf16> to vector<12x128xbf16>
    %cst_265 = arith.constant dense<0.000000e+00> : vector<24x128xf32>
    %355 = tpu.matmul %353, %354, %cst_265 {dimension_numbers = #tpu.dot_dimension_numbers<[1], [0], [0], [1], [0, 0, 1, 1], [], []>} : vector<24x12xbf16>, vector<12x128xbf16>, vector<24x128xf32> -> vector<24x128xf32>
    %356 = arith.addf %351, %355 : vector<24x128xf32>
    %c5_266 = arith.constant 5 : index
    %c0_267 = arith.constant 0 : index
    %c0_268 = arith.constant 0 : index
    %357 = vector.load %arg13[%c5_266, %c0_267, %c0_268] : memref<25x24x12xbf16, #tpu.memory_space<vmem>>, vector<1x24x12xbf16>
    %358 = vector.shape_cast %357 : vector<1x24x12xbf16> to vector<24x12xbf16>
    %359 = vector.extract_strided_slice %330 {offsets = [0, 8], sizes = [12, 128], strides = [1, 1]} : vector<12x256xbf16> to vector<12x128xbf16>
    %cst_269 = arith.constant dense<0.000000e+00> : vector<24x128xf32>
    %360 = tpu.matmul %358, %359, %cst_269 {dimension_numbers = #tpu.dot_dimension_numbers<[1], [0], [0], [1], [0, 0, 1, 1], [], []>} : vector<24x12xbf16>, vector<12x128xbf16>, vector<24x128xf32> -> vector<24x128xf32>
    %361 = arith.addf %356, %360 : vector<24x128xf32>
    %c6_270 = arith.constant 6 : index
    %c0_271 = arith.constant 0 : index
    %c0_272 = arith.constant 0 : index
    %362 = vector.load %arg13[%c6_270, %c0_271, %c0_272] : memref<25x24x12xbf16, #tpu.memory_space<vmem>>, vector<1x24x12xbf16>
    %363 = vector.shape_cast %362 : vector<1x24x12xbf16> to vector<24x12xbf16>
    %364 = vector.extract_strided_slice %330 {offsets = [0, 9], sizes = [12, 128], strides = [1, 1]} : vector<12x256xbf16> to vector<12x128xbf16>
    %cst_273 = arith.constant dense<0.000000e+00> : vector<24x128xf32>
    %365 = tpu.matmul %363, %364, %cst_273 {dimension_numbers = #tpu.dot_dimension_numbers<[1], [0], [0], [1], [0, 0, 1, 1], [], []>} : vector<24x12xbf16>, vector<12x128xbf16>, vector<24x128xf32> -> vector<24x128xf32>
    %366 = arith.addf %361, %365 : vector<24x128xf32>
    %c7_274 = arith.constant 7 : index
    %c0_275 = arith.constant 0 : index
    %c0_276 = arith.constant 0 : index
    %367 = vector.load %arg13[%c7_274, %c0_275, %c0_276] : memref<25x24x12xbf16, #tpu.memory_space<vmem>>, vector<1x24x12xbf16>
    %368 = vector.shape_cast %367 : vector<1x24x12xbf16> to vector<24x12xbf16>
    %369 = vector.extract_strided_slice %330 {offsets = [0, 10], sizes = [12, 128], strides = [1, 1]} : vector<12x256xbf16> to vector<12x128xbf16>
    %cst_277 = arith.constant dense<0.000000e+00> : vector<24x128xf32>
    %370 = tpu.matmul %368, %369, %cst_277 {dimension_numbers = #tpu.dot_dimension_numbers<[1], [0], [0], [1], [0, 0, 1, 1], [], []>} : vector<24x12xbf16>, vector<12x128xbf16>, vector<24x128xf32> -> vector<24x128xf32>
    %371 = arith.addf %366, %370 : vector<24x128xf32>
    %c8_278 = arith.constant 8 : index
    %c0_279 = arith.constant 0 : index
    %c0_280 = arith.constant 0 : index
    %372 = vector.load %arg13[%c8_278, %c0_279, %c0_280] : memref<25x24x12xbf16, #tpu.memory_space<vmem>>, vector<1x24x12xbf16>
    %373 = vector.shape_cast %372 : vector<1x24x12xbf16> to vector<24x12xbf16>
    %374 = vector.extract_strided_slice %330 {offsets = [0, 11], sizes = [12, 128], strides = [1, 1]} : vector<12x256xbf16> to vector<12x128xbf16>
    %cst_281 = arith.constant dense<0.000000e+00> : vector<24x128xf32>
    %375 = tpu.matmul %373, %374, %cst_281 {dimension_numbers = #tpu.dot_dimension_numbers<[1], [0], [0], [1], [0, 0, 1, 1], [], []>} : vector<24x12xbf16>, vector<12x128xbf16>, vector<24x128xf32> -> vector<24x128xf32>
    %376 = arith.addf %371, %375 : vector<24x128xf32>
    %c9_282 = arith.constant 9 : index
    %c0_283 = arith.constant 0 : index
    %c0_284 = arith.constant 0 : index
    %377 = vector.load %arg13[%c9_282, %c0_283, %c0_284] : memref<25x24x12xbf16, #tpu.memory_space<vmem>>, vector<1x24x12xbf16>
    %378 = vector.shape_cast %377 : vector<1x24x12xbf16> to vector<24x12xbf16>
    %379 = vector.extract_strided_slice %330 {offsets = [0, 12], sizes = [12, 128], strides = [1, 1]} : vector<12x256xbf16> to vector<12x128xbf16>
    %cst_285 = arith.constant dense<0.000000e+00> : vector<24x128xf32>
    %380 = tpu.matmul %378, %379, %cst_285 {dimension_numbers = #tpu.dot_dimension_numbers<[1], [0], [0], [1], [0, 0, 1, 1], [], []>} : vector<24x12xbf16>, vector<12x128xbf16>, vector<24x128xf32> -> vector<24x128xf32>
    %381 = arith.addf %376, %380 : vector<24x128xf32>
    %c10_286 = arith.constant 10 : index
    %c0_287 = arith.constant 0 : index
    %c0_288 = arith.constant 0 : index
    %382 = vector.load %arg13[%c10_286, %c0_287, %c0_288] : memref<25x24x12xbf16, #tpu.memory_space<vmem>>, vector<1x24x12xbf16>
    %383 = vector.shape_cast %382 : vector<1x24x12xbf16> to vector<24x12xbf16>
    %384 = vector.extract_strided_slice %330 {offsets = [0, 16], sizes = [12, 128], strides = [1, 1]} : vector<12x256xbf16> to vector<12x128xbf16>
    %cst_289 = arith.constant dense<0.000000e+00> : vector<24x128xf32>
    %385 = tpu.matmul %383, %384, %cst_289 {dimension_numbers = #tpu.dot_dimension_numbers<[1], [0], [0], [1], [0, 0, 1, 1], [], []>} : vector<24x12xbf16>, vector<12x128xbf16>, vector<24x128xf32> -> vector<24x128xf32>
    %386 = arith.addf %381, %385 : vector<24x128xf32>
    %c11_290 = arith.constant 11 : index
    %c0_291 = arith.constant 0 : index
    %c0_292 = arith.constant 0 : index
    %387 = vector.load %arg13[%c11_290, %c0_291, %c0_292] : memref<25x24x12xbf16, #tpu.memory_space<vmem>>, vector<1x24x12xbf16>
    %388 = vector.shape_cast %387 : vector<1x24x12xbf16> to vector<24x12xbf16>
    %389 = vector.extract_strided_slice %330 {offsets = [0, 17], sizes = [12, 128], strides = [1, 1]} : vector<12x256xbf16> to vector<12x128xbf16>
    %cst_293 = arith.constant dense<0.000000e+00> : vector<24x128xf32>
    %390 = tpu.matmul %388, %389, %cst_293 {dimension_numbers = #tpu.dot_dimension_numbers<[1], [0], [0], [1], [0, 0, 1, 1], [], []>} : vector<24x12xbf16>, vector<12x128xbf16>, vector<24x128xf32> -> vector<24x128xf32>
    %391 = arith.addf %386, %390 : vector<24x128xf32>
    %c12_294 = arith.constant 12 : index
    %c0_295 = arith.constant 0 : index
    %c0_296 = arith.constant 0 : index
    %392 = vector.load %arg13[%c12_294, %c0_295, %c0_296] : memref<25x24x12xbf16, #tpu.memory_space<vmem>>, vector<1x24x12xbf16>
    %393 = vector.shape_cast %392 : vector<1x24x12xbf16> to vector<24x12xbf16>
    %394 = vector.extract_strided_slice %330 {offsets = [0, 18], sizes = [12, 128], strides = [1, 1]} : vector<12x256xbf16> to vector<12x128xbf16>
    %cst_297 = arith.constant dense<0.000000e+00> : vector<24x128xf32>
    %395 = tpu.matmul %393, %394, %cst_297 {dimension_numbers = #tpu.dot_dimension_numbers<[1], [0], [0], [1], [0, 0, 1, 1], [], []>} : vector<24x12xbf16>, vector<12x128xbf16>, vector<24x128xf32> -> vector<24x128xf32>
    %396 = arith.addf %391, %395 : vector<24x128xf32>
    %c13_298 = arith.constant 13 : index
    %c0_299 = arith.constant 0 : index
    %c0_300 = arith.constant 0 : index
    %397 = vector.load %arg13[%c13_298, %c0_299, %c0_300] : memref<25x24x12xbf16, #tpu.memory_space<vmem>>, vector<1x24x12xbf16>
    %398 = vector.shape_cast %397 : vector<1x24x12xbf16> to vector<24x12xbf16>
    %399 = vector.extract_strided_slice %330 {offsets = [0, 19], sizes = [12, 128], strides = [1, 1]} : vector<12x256xbf16> to vector<12x128xbf16>
    %cst_301 = arith.constant dense<0.000000e+00> : vector<24x128xf32>
    %400 = tpu.matmul %398, %399, %cst_301 {dimension_numbers = #tpu.dot_dimension_numbers<[1], [0], [0], [1], [0, 0, 1, 1], [], []>} : vector<24x12xbf16>, vector<12x128xbf16>, vector<24x128xf32> -> vector<24x128xf32>
    %401 = arith.addf %396, %400 : vector<24x128xf32>
    %c14_302 = arith.constant 14 : index
    %c0_303 = arith.constant 0 : index
    %c0_304 = arith.constant 0 : index
    %402 = vector.load %arg13[%c14_302, %c0_303, %c0_304] : memref<25x24x12xbf16, #tpu.memory_space<vmem>>, vector<1x24x12xbf16>
    %403 = vector.shape_cast %402 : vector<1x24x12xbf16> to vector<24x12xbf16>
    %404 = vector.extract_strided_slice %330 {offsets = [0, 20], sizes = [12, 128], strides = [1, 1]} : vector<12x256xbf16> to vector<12x128xbf16>
    %cst_305 = arith.constant dense<0.000000e+00> : vector<24x128xf32>
    %405 = tpu.matmul %403, %404, %cst_305 {dimension_numbers = #tpu.dot_dimension_numbers<[1], [0], [0], [1], [0, 0, 1, 1], [], []>} : vector<24x12xbf16>, vector<12x128xbf16>, vector<24x128xf32> -> vector<24x128xf32>
    %406 = arith.addf %401, %405 : vector<24x128xf32>
    %c15_306 = arith.constant 15 : index
    %c0_307 = arith.constant 0 : index
    %c0_308 = arith.constant 0 : index
    %407 = vector.load %arg13[%c15_306, %c0_307, %c0_308] : memref<25x24x12xbf16, #tpu.memory_space<vmem>>, vector<1x24x12xbf16>
    %408 = vector.shape_cast %407 : vector<1x24x12xbf16> to vector<24x12xbf16>
    %409 = vector.extract_strided_slice %330 {offsets = [0, 24], sizes = [12, 128], strides = [1, 1]} : vector<12x256xbf16> to vector<12x128xbf16>
    %cst_309 = arith.constant dense<0.000000e+00> : vector<24x128xf32>
    %410 = tpu.matmul %408, %409, %cst_309 {dimension_numbers = #tpu.dot_dimension_numbers<[1], [0], [0], [1], [0, 0, 1, 1], [], []>} : vector<24x12xbf16>, vector<12x128xbf16>, vector<24x128xf32> -> vector<24x128xf32>
    %411 = arith.addf %406, %410 : vector<24x128xf32>
    %c16_310 = arith.constant 16 : index
    %c0_311 = arith.constant 0 : index
    %c0_312 = arith.constant 0 : index
    %412 = vector.load %arg13[%c16_310, %c0_311, %c0_312] : memref<25x24x12xbf16, #tpu.memory_space<vmem>>, vector<1x24x12xbf16>
    %413 = vector.shape_cast %412 : vector<1x24x12xbf16> to vector<24x12xbf16>
    %414 = vector.extract_strided_slice %330 {offsets = [0, 25], sizes = [12, 128], strides = [1, 1]} : vector<12x256xbf16> to vector<12x128xbf16>
    %cst_313 = arith.constant dense<0.000000e+00> : vector<24x128xf32>
    %415 = tpu.matmul %413, %414, %cst_313 {dimension_numbers = #tpu.dot_dimension_numbers<[1], [0], [0], [1], [0, 0, 1, 1], [], []>} : vector<24x12xbf16>, vector<12x128xbf16>, vector<24x128xf32> -> vector<24x128xf32>
    %416 = arith.addf %411, %415 : vector<24x128xf32>
    %c17_314 = arith.constant 17 : index
    %c0_315 = arith.constant 0 : index
    %c0_316 = arith.constant 0 : index
    %417 = vector.load %arg13[%c17_314, %c0_315, %c0_316] : memref<25x24x12xbf16, #tpu.memory_space<vmem>>, vector<1x24x12xbf16>
    %418 = vector.shape_cast %417 : vector<1x24x12xbf16> to vector<24x12xbf16>
    %419 = vector.extract_strided_slice %330 {offsets = [0, 26], sizes = [12, 128], strides = [1, 1]} : vector<12x256xbf16> to vector<12x128xbf16>
    %cst_317 = arith.constant dense<0.000000e+00> : vector<24x128xf32>
    %420 = tpu.matmul %418, %419, %cst_317 {dimension_numbers = #tpu.dot_dimension_numbers<[1], [0], [0], [1], [0, 0, 1, 1], [], []>} : vector<24x12xbf16>, vector<12x128xbf16>, vector<24x128xf32> -> vector<24x128xf32>
    %421 = arith.addf %416, %420 : vector<24x128xf32>
    %c18_318 = arith.constant 18 : index
    %c0_319 = arith.constant 0 : index
    %c0_320 = arith.constant 0 : index
    %422 = vector.load %arg13[%c18_318, %c0_319, %c0_320] : memref<25x24x12xbf16, #tpu.memory_space<vmem>>, vector<1x24x12xbf16>
    %423 = vector.shape_cast %422 : vector<1x24x12xbf16> to vector<24x12xbf16>
    %424 = vector.extract_strided_slice %330 {offsets = [0, 27], sizes = [12, 128], strides = [1, 1]} : vector<12x256xbf16> to vector<12x128xbf16>
    %cst_321 = arith.constant dense<0.000000e+00> : vector<24x128xf32>
    %425 = tpu.matmul %423, %424, %cst_321 {dimension_numbers = #tpu.dot_dimension_numbers<[1], [0], [0], [1], [0, 0, 1, 1], [], []>} : vector<24x12xbf16>, vector<12x128xbf16>, vector<24x128xf32> -> vector<24x128xf32>
    %426 = arith.addf %421, %425 : vector<24x128xf32>
    %c19_322 = arith.constant 19 : index
    %c0_323 = arith.constant 0 : index
    %c0_324 = arith.constant 0 : index
    %427 = vector.load %arg13[%c19_322, %c0_323, %c0_324] : memref<25x24x12xbf16, #tpu.memory_space<vmem>>, vector<1x24x12xbf16>
    %428 = vector.shape_cast %427 : vector<1x24x12xbf16> to vector<24x12xbf16>
    %429 = vector.extract_strided_slice %330 {offsets = [0, 28], sizes = [12, 128], strides = [1, 1]} : vector<12x256xbf16> to vector<12x128xbf16>
    %cst_325 = arith.constant dense<0.000000e+00> : vector<24x128xf32>
    %430 = tpu.matmul %428, %429, %cst_325 {dimension_numbers = #tpu.dot_dimension_numbers<[1], [0], [0], [1], [0, 0, 1, 1], [], []>} : vector<24x12xbf16>, vector<12x128xbf16>, vector<24x128xf32> -> vector<24x128xf32>
    %431 = arith.addf %426, %430 : vector<24x128xf32>
    %c20_326 = arith.constant 20 : index
    %c0_327 = arith.constant 0 : index
    %c0_328 = arith.constant 0 : index
    %432 = vector.load %arg13[%c20_326, %c0_327, %c0_328] : memref<25x24x12xbf16, #tpu.memory_space<vmem>>, vector<1x24x12xbf16>
    %433 = vector.shape_cast %432 : vector<1x24x12xbf16> to vector<24x12xbf16>
    %434 = vector.extract_strided_slice %330 {offsets = [0, 32], sizes = [12, 128], strides = [1, 1]} : vector<12x256xbf16> to vector<12x128xbf16>
    %cst_329 = arith.constant dense<0.000000e+00> : vector<24x128xf32>
    %435 = tpu.matmul %433, %434, %cst_329 {dimension_numbers = #tpu.dot_dimension_numbers<[1], [0], [0], [1], [0, 0, 1, 1], [], []>} : vector<24x12xbf16>, vector<12x128xbf16>, vector<24x128xf32> -> vector<24x128xf32>
    %436 = arith.addf %431, %435 : vector<24x128xf32>
    %c21_330 = arith.constant 21 : index
    %c0_331 = arith.constant 0 : index
    %c0_332 = arith.constant 0 : index
    %437 = vector.load %arg13[%c21_330, %c0_331, %c0_332] : memref<25x24x12xbf16, #tpu.memory_space<vmem>>, vector<1x24x12xbf16>
    %438 = vector.shape_cast %437 : vector<1x24x12xbf16> to vector<24x12xbf16>
    %439 = vector.extract_strided_slice %330 {offsets = [0, 33], sizes = [12, 128], strides = [1, 1]} : vector<12x256xbf16> to vector<12x128xbf16>
    %cst_333 = arith.constant dense<0.000000e+00> : vector<24x128xf32>
    %440 = tpu.matmul %438, %439, %cst_333 {dimension_numbers = #tpu.dot_dimension_numbers<[1], [0], [0], [1], [0, 0, 1, 1], [], []>} : vector<24x12xbf16>, vector<12x128xbf16>, vector<24x128xf32> -> vector<24x128xf32>
    %441 = arith.addf %436, %440 : vector<24x128xf32>
    %c22_334 = arith.constant 22 : index
    %c0_335 = arith.constant 0 : index
    %c0_336 = arith.constant 0 : index
    %442 = vector.load %arg13[%c22_334, %c0_335, %c0_336] : memref<25x24x12xbf16, #tpu.memory_space<vmem>>, vector<1x24x12xbf16>
    %443 = vector.shape_cast %442 : vector<1x24x12xbf16> to vector<24x12xbf16>
    %444 = vector.extract_strided_slice %330 {offsets = [0, 34], sizes = [12, 128], strides = [1, 1]} : vector<12x256xbf16> to vector<12x128xbf16>
    %cst_337 = arith.constant dense<0.000000e+00> : vector<24x128xf32>
    %445 = tpu.matmul %443, %444, %cst_337 {dimension_numbers = #tpu.dot_dimension_numbers<[1], [0], [0], [1], [0, 0, 1, 1], [], []>} : vector<24x12xbf16>, vector<12x128xbf16>, vector<24x128xf32> -> vector<24x128xf32>
    %446 = arith.addf %441, %445 : vector<24x128xf32>
    %c23_338 = arith.constant 23 : index
    %c0_339 = arith.constant 0 : index
    %c0_340 = arith.constant 0 : index
    %447 = vector.load %arg13[%c23_338, %c0_339, %c0_340] : memref<25x24x12xbf16, #tpu.memory_space<vmem>>, vector<1x24x12xbf16>
    %448 = vector.shape_cast %447 : vector<1x24x12xbf16> to vector<24x12xbf16>
    %449 = vector.extract_strided_slice %330 {offsets = [0, 35], sizes = [12, 128], strides = [1, 1]} : vector<12x256xbf16> to vector<12x128xbf16>
    %cst_341 = arith.constant dense<0.000000e+00> : vector<24x128xf32>
    %450 = tpu.matmul %448, %449, %cst_341 {dimension_numbers = #tpu.dot_dimension_numbers<[1], [0], [0], [1], [0, 0, 1, 1], [], []>} : vector<24x12xbf16>, vector<12x128xbf16>, vector<24x128xf32> -> vector<24x128xf32>
    %451 = arith.addf %446, %450 : vector<24x128xf32>
    %c24_342 = arith.constant 24 : index
    %c0_343 = arith.constant 0 : index
    %c0_344 = arith.constant 0 : index
    %452 = vector.load %arg13[%c24_342, %c0_343, %c0_344] : memref<25x24x12xbf16, #tpu.memory_space<vmem>>, vector<1x24x12xbf16>
    %453 = vector.shape_cast %452 : vector<1x24x12xbf16> to vector<24x12xbf16>
    %454 = vector.extract_strided_slice %330 {offsets = [0, 36], sizes = [12, 128], strides = [1, 1]} : vector<12x256xbf16> to vector<12x128xbf16>
    %cst_345 = arith.constant dense<0.000000e+00> : vector<24x128xf32>
    %455 = tpu.matmul %453, %454, %cst_345 {dimension_numbers = #tpu.dot_dimension_numbers<[1], [0], [0], [1], [0, 0, 1, 1], [], []>} : vector<24x12xbf16>, vector<12x128xbf16>, vector<24x128xf32> -> vector<24x128xf32>
    %456 = arith.addf %451, %455 : vector<24x128xf32>
    %c0_346 = arith.constant 0 : index
    %c0_347 = arith.constant 0 : index
    %457 = vector.load %arg14[%c0_346, %c0_347] : memref<24x1xf32, #tpu.memory_space<vmem>>, vector<24x1xf32>
    %458 = vector.broadcast %457 : vector<24x1xf32> to vector<24x128xf32>
    %459 = arith.addf %456, %458 : vector<24x128xf32>
    %c0_348 = arith.constant 0 : index
    %c0_349 = arith.constant 0 : index
    %460 = vector.load %arg17[%c0_348, %c0_349] : memref<1x128xf32, #tpu.memory_space<vmem>>, vector<1x128xf32>
    %461 = vector.broadcast %460 : vector<1x128xf32> to vector<24x128xf32>
    %462 = arith.mulf %459, %461 : vector<24x128xf32>
    %cst_350 = arith.constant dense<0.000000e+00> : vector<24xf32>
    %463 = vector.multi_reduction <add>, %462, %cst_350 [1] : vector<24x128xf32> to vector<24xf32>
    %464 = vector.shape_cast %463 : vector<24xf32> to vector<24x1xf32>
    %cst_351 = arith.constant 3.125000e-02 : f32
    %465 = vector.broadcast %cst_351 : f32 to vector<24x1xf32>
    %466 = arith.mulf %464, %465 : vector<24x1xf32>
    %467 = arith.mulf %462, %462 : vector<24x128xf32>
    %cst_352 = arith.constant dense<0.000000e+00> : vector<24xf32>
    %468 = vector.multi_reduction <add>, %467, %cst_352 [1] : vector<24x128xf32> to vector<24xf32>
    %469 = vector.shape_cast %468 : vector<24xf32> to vector<24x1xf32>
    %cst_353 = arith.constant 3.125000e-02 : f32
    %470 = vector.broadcast %cst_353 : f32 to vector<24x1xf32>
    %471 = arith.mulf %469, %470 : vector<24x1xf32>
    %472 = arith.mulf %466, %466 : vector<24x1xf32>
    %473 = arith.subf %471, %472 : vector<24x1xf32>
    %474 = vector.broadcast %466 : vector<24x1xf32> to vector<24x128xf32>
    %475 = arith.subf %459, %474 : vector<24x128xf32>
    %cst_354 = arith.constant 9.99999974E-6 : f32
    %476 = vector.broadcast %cst_354 : f32 to vector<24x1xf32>
    %477 = arith.addf %473, %476 : vector<24x1xf32>
    %478 = math.rsqrt %477 : vector<24x1xf32>
    %479 = vector.broadcast %478 : vector<24x1xf32> to vector<24x128xf32>
    %480 = arith.mulf %475, %479 : vector<24x128xf32>
    %c0_355 = arith.constant 0 : index
    %c0_356 = arith.constant 0 : index
    %481 = vector.load %arg15[%c0_355, %c0_356] : memref<24x1xf32, #tpu.memory_space<vmem>>, vector<24x1xf32>
    %482 = vector.broadcast %481 : vector<24x1xf32> to vector<24x128xf32>
    %483 = arith.mulf %480, %482 : vector<24x128xf32>
    %c0_357 = arith.constant 0 : index
    %c0_358 = arith.constant 0 : index
    %484 = vector.load %arg16[%c0_357, %c0_358] : memref<24x1xf32, #tpu.memory_space<vmem>>, vector<24x1xf32>
    %485 = vector.broadcast %484 : vector<24x1xf32> to vector<24x128xf32>
    %486 = arith.addf %483, %485 : vector<24x128xf32>
    %cst_359 = arith.constant 0.000000e+00 : f32
    %487 = vector.broadcast %cst_359 : f32 to vector<24x128xf32>
    %488 = arith.maximumf %486, %487 : vector<24x128xf32>
    %489 = arith.truncf %488 : vector<24x128xf32> to vector<24x128xbf16>
    %c0_360 = arith.constant 0 : index
    %c0_361 = arith.constant 0 : index
    %490 = vector.load %arg18[%c0_360, %c0_361] : memref<128x128xbf16, #tpu.memory_space<vmem>>, vector<128x128xbf16>
    %cst_362 = arith.constant dense<0.000000e+00> : vector<24x128xf32>
    %491 = tpu.matmul %489, %490, %cst_362 {dimension_numbers = #tpu.dot_dimension_numbers<[1], [0], [0], [1], [0, 0, 1, 1], [], []>} : vector<24x128xbf16>, vector<128x128xbf16>, vector<24x128xf32> -> vector<24x128xf32>
    %492 = arith.truncf %491 : vector<24x128xf32> to vector<24x128xbf16>
    %cst_363 = arith.constant 0.000000e+00 : f32
    %493 = vector.broadcast %cst_363 : f32 to vector<24x72xf32>
    %c0_364 = arith.constant 0 : index
    %c0_365 = arith.constant 0 : index
    %c0_366 = arith.constant 0 : index
    %494 = vector.load %arg19[%c0_364, %c0_365, %c0_366] : memref<25x24x24xbf16, #tpu.memory_space<vmem>>, vector<1x24x24xbf16>
    %495 = vector.shape_cast %494 : vector<1x24x24xbf16> to vector<24x24xbf16>
    %496 = vector.extract_strided_slice %492 {offsets = [0, 0], sizes = [24, 72], strides = [1, 1]} : vector<24x128xbf16> to vector<24x72xbf16>
    %cst_367 = arith.constant dense<0.000000e+00> : vector<24x72xf32>
    %497 = tpu.matmul %495, %496, %cst_367 {dimension_numbers = #tpu.dot_dimension_numbers<[1], [0], [0], [1], [0, 0, 1, 1], [], []>} : vector<24x24xbf16>, vector<24x72xbf16>, vector<24x72xf32> -> vector<24x72xf32>
    %498 = arith.addf %493, %497 : vector<24x72xf32>
    %c1_368 = arith.constant 1 : index
    %c0_369 = arith.constant 0 : index
    %c0_370 = arith.constant 0 : index
    %499 = vector.load %arg19[%c1_368, %c0_369, %c0_370] : memref<25x24x24xbf16, #tpu.memory_space<vmem>>, vector<1x24x24xbf16>
    %500 = vector.shape_cast %499 : vector<1x24x24xbf16> to vector<24x24xbf16>
    %501 = vector.extract_strided_slice %492 {offsets = [0, 1], sizes = [24, 72], strides = [1, 1]} : vector<24x128xbf16> to vector<24x72xbf16>
    %cst_371 = arith.constant dense<0.000000e+00> : vector<24x72xf32>
    %502 = tpu.matmul %500, %501, %cst_371 {dimension_numbers = #tpu.dot_dimension_numbers<[1], [0], [0], [1], [0, 0, 1, 1], [], []>} : vector<24x24xbf16>, vector<24x72xbf16>, vector<24x72xf32> -> vector<24x72xf32>
    %503 = arith.addf %498, %502 : vector<24x72xf32>
    %c2_372 = arith.constant 2 : index
    %c0_373 = arith.constant 0 : index
    %c0_374 = arith.constant 0 : index
    %504 = vector.load %arg19[%c2_372, %c0_373, %c0_374] : memref<25x24x24xbf16, #tpu.memory_space<vmem>>, vector<1x24x24xbf16>
    %505 = vector.shape_cast %504 : vector<1x24x24xbf16> to vector<24x24xbf16>
    %506 = vector.extract_strided_slice %492 {offsets = [0, 2], sizes = [24, 72], strides = [1, 1]} : vector<24x128xbf16> to vector<24x72xbf16>
    %cst_375 = arith.constant dense<0.000000e+00> : vector<24x72xf32>
    %507 = tpu.matmul %505, %506, %cst_375 {dimension_numbers = #tpu.dot_dimension_numbers<[1], [0], [0], [1], [0, 0, 1, 1], [], []>} : vector<24x24xbf16>, vector<24x72xbf16>, vector<24x72xf32> -> vector<24x72xf32>
    %508 = arith.addf %503, %507 : vector<24x72xf32>
    %c3_376 = arith.constant 3 : index
    %c0_377 = arith.constant 0 : index
    %c0_378 = arith.constant 0 : index
    %509 = vector.load %arg19[%c3_376, %c0_377, %c0_378] : memref<25x24x24xbf16, #tpu.memory_space<vmem>>, vector<1x24x24xbf16>
    %510 = vector.shape_cast %509 : vector<1x24x24xbf16> to vector<24x24xbf16>
    %511 = vector.extract_strided_slice %492 {offsets = [0, 3], sizes = [24, 72], strides = [1, 1]} : vector<24x128xbf16> to vector<24x72xbf16>
    %cst_379 = arith.constant dense<0.000000e+00> : vector<24x72xf32>
    %512 = tpu.matmul %510, %511, %cst_379 {dimension_numbers = #tpu.dot_dimension_numbers<[1], [0], [0], [1], [0, 0, 1, 1], [], []>} : vector<24x24xbf16>, vector<24x72xbf16>, vector<24x72xf32> -> vector<24x72xf32>
    %513 = arith.addf %508, %512 : vector<24x72xf32>
    %c4_380 = arith.constant 4 : index
    %c0_381 = arith.constant 0 : index
    %c0_382 = arith.constant 0 : index
    %514 = vector.load %arg19[%c4_380, %c0_381, %c0_382] : memref<25x24x24xbf16, #tpu.memory_space<vmem>>, vector<1x24x24xbf16>
    %515 = vector.shape_cast %514 : vector<1x24x24xbf16> to vector<24x24xbf16>
    %516 = vector.extract_strided_slice %492 {offsets = [0, 4], sizes = [24, 72], strides = [1, 1]} : vector<24x128xbf16> to vector<24x72xbf16>
    %cst_383 = arith.constant dense<0.000000e+00> : vector<24x72xf32>
    %517 = tpu.matmul %515, %516, %cst_383 {dimension_numbers = #tpu.dot_dimension_numbers<[1], [0], [0], [1], [0, 0, 1, 1], [], []>} : vector<24x24xbf16>, vector<24x72xbf16>, vector<24x72xf32> -> vector<24x72xf32>
    %518 = arith.addf %513, %517 : vector<24x72xf32>
    %c5_384 = arith.constant 5 : index
    %c0_385 = arith.constant 0 : index
    %c0_386 = arith.constant 0 : index
    %519 = vector.load %arg19[%c5_384, %c0_385, %c0_386] : memref<25x24x24xbf16, #tpu.memory_space<vmem>>, vector<1x24x24xbf16>
    %520 = vector.shape_cast %519 : vector<1x24x24xbf16> to vector<24x24xbf16>
    %521 = vector.extract_strided_slice %492 {offsets = [0, 6], sizes = [24, 72], strides = [1, 1]} : vector<24x128xbf16> to vector<24x72xbf16>
    %cst_387 = arith.constant dense<0.000000e+00> : vector<24x72xf32>
    %522 = tpu.matmul %520, %521, %cst_387 {dimension_numbers = #tpu.dot_dimension_numbers<[1], [0], [0], [1], [0, 0, 1, 1], [], []>} : vector<24x24xbf16>, vector<24x72xbf16>, vector<24x72xf32> -> vector<24x72xf32>
    %523 = arith.addf %518, %522 : vector<24x72xf32>
    %c6_388 = arith.constant 6 : index
    %c0_389 = arith.constant 0 : index
    %c0_390 = arith.constant 0 : index
    %524 = vector.load %arg19[%c6_388, %c0_389, %c0_390] : memref<25x24x24xbf16, #tpu.memory_space<vmem>>, vector<1x24x24xbf16>
    %525 = vector.shape_cast %524 : vector<1x24x24xbf16> to vector<24x24xbf16>
    %526 = vector.extract_strided_slice %492 {offsets = [0, 7], sizes = [24, 72], strides = [1, 1]} : vector<24x128xbf16> to vector<24x72xbf16>
    %cst_391 = arith.constant dense<0.000000e+00> : vector<24x72xf32>
    %527 = tpu.matmul %525, %526, %cst_391 {dimension_numbers = #tpu.dot_dimension_numbers<[1], [0], [0], [1], [0, 0, 1, 1], [], []>} : vector<24x24xbf16>, vector<24x72xbf16>, vector<24x72xf32> -> vector<24x72xf32>
    %528 = arith.addf %523, %527 : vector<24x72xf32>
    %c7_392 = arith.constant 7 : index
    %c0_393 = arith.constant 0 : index
    %c0_394 = arith.constant 0 : index
    %529 = vector.load %arg19[%c7_392, %c0_393, %c0_394] : memref<25x24x24xbf16, #tpu.memory_space<vmem>>, vector<1x24x24xbf16>
    %530 = vector.shape_cast %529 : vector<1x24x24xbf16> to vector<24x24xbf16>
    %531 = vector.extract_strided_slice %492 {offsets = [0, 8], sizes = [24, 72], strides = [1, 1]} : vector<24x128xbf16> to vector<24x72xbf16>
    %cst_395 = arith.constant dense<0.000000e+00> : vector<24x72xf32>
    %532 = tpu.matmul %530, %531, %cst_395 {dimension_numbers = #tpu.dot_dimension_numbers<[1], [0], [0], [1], [0, 0, 1, 1], [], []>} : vector<24x24xbf16>, vector<24x72xbf16>, vector<24x72xf32> -> vector<24x72xf32>
    %533 = arith.addf %528, %532 : vector<24x72xf32>
    %c8_396 = arith.constant 8 : index
    %c0_397 = arith.constant 0 : index
    %c0_398 = arith.constant 0 : index
    %534 = vector.load %arg19[%c8_396, %c0_397, %c0_398] : memref<25x24x24xbf16, #tpu.memory_space<vmem>>, vector<1x24x24xbf16>
    %535 = vector.shape_cast %534 : vector<1x24x24xbf16> to vector<24x24xbf16>
    %536 = vector.extract_strided_slice %492 {offsets = [0, 9], sizes = [24, 72], strides = [1, 1]} : vector<24x128xbf16> to vector<24x72xbf16>
    %cst_399 = arith.constant dense<0.000000e+00> : vector<24x72xf32>
    %537 = tpu.matmul %535, %536, %cst_399 {dimension_numbers = #tpu.dot_dimension_numbers<[1], [0], [0], [1], [0, 0, 1, 1], [], []>} : vector<24x24xbf16>, vector<24x72xbf16>, vector<24x72xf32> -> vector<24x72xf32>
    %538 = arith.addf %533, %537 : vector<24x72xf32>
    %c9_400 = arith.constant 9 : index
    %c0_401 = arith.constant 0 : index
    %c0_402 = arith.constant 0 : index
    %539 = vector.load %arg19[%c9_400, %c0_401, %c0_402] : memref<25x24x24xbf16, #tpu.memory_space<vmem>>, vector<1x24x24xbf16>
    %540 = vector.shape_cast %539 : vector<1x24x24xbf16> to vector<24x24xbf16>
    %541 = vector.extract_strided_slice %492 {offsets = [0, 10], sizes = [24, 72], strides = [1, 1]} : vector<24x128xbf16> to vector<24x72xbf16>
    %cst_403 = arith.constant dense<0.000000e+00> : vector<24x72xf32>
    %542 = tpu.matmul %540, %541, %cst_403 {dimension_numbers = #tpu.dot_dimension_numbers<[1], [0], [0], [1], [0, 0, 1, 1], [], []>} : vector<24x24xbf16>, vector<24x72xbf16>, vector<24x72xf32> -> vector<24x72xf32>
    %543 = arith.addf %538, %542 : vector<24x72xf32>
    %c10_404 = arith.constant 10 : index
    %c0_405 = arith.constant 0 : index
    %c0_406 = arith.constant 0 : index
    %544 = vector.load %arg19[%c10_404, %c0_405, %c0_406] : memref<25x24x24xbf16, #tpu.memory_space<vmem>>, vector<1x24x24xbf16>
    %545 = vector.shape_cast %544 : vector<1x24x24xbf16> to vector<24x24xbf16>
    %546 = vector.extract_strided_slice %492 {offsets = [0, 12], sizes = [24, 72], strides = [1, 1]} : vector<24x128xbf16> to vector<24x72xbf16>
    %cst_407 = arith.constant dense<0.000000e+00> : vector<24x72xf32>
    %547 = tpu.matmul %545, %546, %cst_407 {dimension_numbers = #tpu.dot_dimension_numbers<[1], [0], [0], [1], [0, 0, 1, 1], [], []>} : vector<24x24xbf16>, vector<24x72xbf16>, vector<24x72xf32> -> vector<24x72xf32>
    %548 = arith.addf %543, %547 : vector<24x72xf32>
    %c11_408 = arith.constant 11 : index
    %c0_409 = arith.constant 0 : index
    %c0_410 = arith.constant 0 : index
    %549 = vector.load %arg19[%c11_408, %c0_409, %c0_410] : memref<25x24x24xbf16, #tpu.memory_space<vmem>>, vector<1x24x24xbf16>
    %550 = vector.shape_cast %549 : vector<1x24x24xbf16> to vector<24x24xbf16>
    %551 = vector.extract_strided_slice %492 {offsets = [0, 13], sizes = [24, 72], strides = [1, 1]} : vector<24x128xbf16> to vector<24x72xbf16>
    %cst_411 = arith.constant dense<0.000000e+00> : vector<24x72xf32>
    %552 = tpu.matmul %550, %551, %cst_411 {dimension_numbers = #tpu.dot_dimension_numbers<[1], [0], [0], [1], [0, 0, 1, 1], [], []>} : vector<24x24xbf16>, vector<24x72xbf16>, vector<24x72xf32> -> vector<24x72xf32>
    %553 = arith.addf %548, %552 : vector<24x72xf32>
    %c12_412 = arith.constant 12 : index
    %c0_413 = arith.constant 0 : index
    %c0_414 = arith.constant 0 : index
    %554 = vector.load %arg19[%c12_412, %c0_413, %c0_414] : memref<25x24x24xbf16, #tpu.memory_space<vmem>>, vector<1x24x24xbf16>
    %555 = vector.shape_cast %554 : vector<1x24x24xbf16> to vector<24x24xbf16>
    %556 = vector.extract_strided_slice %492 {offsets = [0, 14], sizes = [24, 72], strides = [1, 1]} : vector<24x128xbf16> to vector<24x72xbf16>
    %cst_415 = arith.constant dense<0.000000e+00> : vector<24x72xf32>
    %557 = tpu.matmul %555, %556, %cst_415 {dimension_numbers = #tpu.dot_dimension_numbers<[1], [0], [0], [1], [0, 0, 1, 1], [], []>} : vector<24x24xbf16>, vector<24x72xbf16>, vector<24x72xf32> -> vector<24x72xf32>
    %558 = arith.addf %553, %557 : vector<24x72xf32>
    %c13_416 = arith.constant 13 : index
    %c0_417 = arith.constant 0 : index
    %c0_418 = arith.constant 0 : index
    %559 = vector.load %arg19[%c13_416, %c0_417, %c0_418] : memref<25x24x24xbf16, #tpu.memory_space<vmem>>, vector<1x24x24xbf16>
    %560 = vector.shape_cast %559 : vector<1x24x24xbf16> to vector<24x24xbf16>
    %561 = vector.extract_strided_slice %492 {offsets = [0, 15], sizes = [24, 72], strides = [1, 1]} : vector<24x128xbf16> to vector<24x72xbf16>
    %cst_419 = arith.constant dense<0.000000e+00> : vector<24x72xf32>
    %562 = tpu.matmul %560, %561, %cst_419 {dimension_numbers = #tpu.dot_dimension_numbers<[1], [0], [0], [1], [0, 0, 1, 1], [], []>} : vector<24x24xbf16>, vector<24x72xbf16>, vector<24x72xf32> -> vector<24x72xf32>
    %563 = arith.addf %558, %562 : vector<24x72xf32>
    %c14_420 = arith.constant 14 : index
    %c0_421 = arith.constant 0 : index
    %c0_422 = arith.constant 0 : index
    %564 = vector.load %arg19[%c14_420, %c0_421, %c0_422] : memref<25x24x24xbf16, #tpu.memory_space<vmem>>, vector<1x24x24xbf16>
    %565 = vector.shape_cast %564 : vector<1x24x24xbf16> to vector<24x24xbf16>
    %566 = vector.extract_strided_slice %492 {offsets = [0, 16], sizes = [24, 72], strides = [1, 1]} : vector<24x128xbf16> to vector<24x72xbf16>
    %cst_423 = arith.constant dense<0.000000e+00> : vector<24x72xf32>
    %567 = tpu.matmul %565, %566, %cst_423 {dimension_numbers = #tpu.dot_dimension_numbers<[1], [0], [0], [1], [0, 0, 1, 1], [], []>} : vector<24x24xbf16>, vector<24x72xbf16>, vector<24x72xf32> -> vector<24x72xf32>
    %568 = arith.addf %563, %567 : vector<24x72xf32>
    %c15_424 = arith.constant 15 : index
    %c0_425 = arith.constant 0 : index
    %c0_426 = arith.constant 0 : index
    %569 = vector.load %arg19[%c15_424, %c0_425, %c0_426] : memref<25x24x24xbf16, #tpu.memory_space<vmem>>, vector<1x24x24xbf16>
    %570 = vector.shape_cast %569 : vector<1x24x24xbf16> to vector<24x24xbf16>
    %571 = vector.extract_strided_slice %492 {offsets = [0, 18], sizes = [24, 72], strides = [1, 1]} : vector<24x128xbf16> to vector<24x72xbf16>
    %cst_427 = arith.constant dense<0.000000e+00> : vector<24x72xf32>
    %572 = tpu.matmul %570, %571, %cst_427 {dimension_numbers = #tpu.dot_dimension_numbers<[1], [0], [0], [1], [0, 0, 1, 1], [], []>} : vector<24x24xbf16>, vector<24x72xbf16>, vector<24x72xf32> -> vector<24x72xf32>
    %573 = arith.addf %568, %572 : vector<24x72xf32>
    %c16_428 = arith.constant 16 : index
    %c0_429 = arith.constant 0 : index
    %c0_430 = arith.constant 0 : index
    %574 = vector.load %arg19[%c16_428, %c0_429, %c0_430] : memref<25x24x24xbf16, #tpu.memory_space<vmem>>, vector<1x24x24xbf16>
    %575 = vector.shape_cast %574 : vector<1x24x24xbf16> to vector<24x24xbf16>
    %576 = vector.extract_strided_slice %492 {offsets = [0, 19], sizes = [24, 72], strides = [1, 1]} : vector<24x128xbf16> to vector<24x72xbf16>
    %cst_431 = arith.constant dense<0.000000e+00> : vector<24x72xf32>
    %577 = tpu.matmul %575, %576, %cst_431 {dimension_numbers = #tpu.dot_dimension_numbers<[1], [0], [0], [1], [0, 0, 1, 1], [], []>} : vector<24x24xbf16>, vector<24x72xbf16>, vector<24x72xf32> -> vector<24x72xf32>
    %578 = arith.addf %573, %577 : vector<24x72xf32>
    %c17_432 = arith.constant 17 : index
    %c0_433 = arith.constant 0 : index
    %c0_434 = arith.constant 0 : index
    %579 = vector.load %arg19[%c17_432, %c0_433, %c0_434] : memref<25x24x24xbf16, #tpu.memory_space<vmem>>, vector<1x24x24xbf16>
    %580 = vector.shape_cast %579 : vector<1x24x24xbf16> to vector<24x24xbf16>
    %581 = vector.extract_strided_slice %492 {offsets = [0, 20], sizes = [24, 72], strides = [1, 1]} : vector<24x128xbf16> to vector<24x72xbf16>
    %cst_435 = arith.constant dense<0.000000e+00> : vector<24x72xf32>
    %582 = tpu.matmul %580, %581, %cst_435 {dimension_numbers = #tpu.dot_dimension_numbers<[1], [0], [0], [1], [0, 0, 1, 1], [], []>} : vector<24x24xbf16>, vector<24x72xbf16>, vector<24x72xf32> -> vector<24x72xf32>
    %583 = arith.addf %578, %582 : vector<24x72xf32>
    %c18_436 = arith.constant 18 : index
    %c0_437 = arith.constant 0 : index
    %c0_438 = arith.constant 0 : index
    %584 = vector.load %arg19[%c18_436, %c0_437, %c0_438] : memref<25x24x24xbf16, #tpu.memory_space<vmem>>, vector<1x24x24xbf16>
    %585 = vector.shape_cast %584 : vector<1x24x24xbf16> to vector<24x24xbf16>
    %586 = vector.extract_strided_slice %492 {offsets = [0, 21], sizes = [24, 72], strides = [1, 1]} : vector<24x128xbf16> to vector<24x72xbf16>
    %cst_439 = arith.constant dense<0.000000e+00> : vector<24x72xf32>
    %587 = tpu.matmul %585, %586, %cst_439 {dimension_numbers = #tpu.dot_dimension_numbers<[1], [0], [0], [1], [0, 0, 1, 1], [], []>} : vector<24x24xbf16>, vector<24x72xbf16>, vector<24x72xf32> -> vector<24x72xf32>
    %588 = arith.addf %583, %587 : vector<24x72xf32>
    %c19_440 = arith.constant 19 : index
    %c0_441 = arith.constant 0 : index
    %c0_442 = arith.constant 0 : index
    %589 = vector.load %arg19[%c19_440, %c0_441, %c0_442] : memref<25x24x24xbf16, #tpu.memory_space<vmem>>, vector<1x24x24xbf16>
    %590 = vector.shape_cast %589 : vector<1x24x24xbf16> to vector<24x24xbf16>
    %591 = vector.extract_strided_slice %492 {offsets = [0, 22], sizes = [24, 72], strides = [1, 1]} : vector<24x128xbf16> to vector<24x72xbf16>
    %cst_443 = arith.constant dense<0.000000e+00> : vector<24x72xf32>
    %592 = tpu.matmul %590, %591, %cst_443 {dimension_numbers = #tpu.dot_dimension_numbers<[1], [0], [0], [1], [0, 0, 1, 1], [], []>} : vector<24x24xbf16>, vector<24x72xbf16>, vector<24x72xf32> -> vector<24x72xf32>
    %593 = arith.addf %588, %592 : vector<24x72xf32>
    %c20_444 = arith.constant 20 : index
    %c0_445 = arith.constant 0 : index
    %c0_446 = arith.constant 0 : index
    %594 = vector.load %arg19[%c20_444, %c0_445, %c0_446] : memref<25x24x24xbf16, #tpu.memory_space<vmem>>, vector<1x24x24xbf16>
    %595 = vector.shape_cast %594 : vector<1x24x24xbf16> to vector<24x24xbf16>
    %596 = vector.extract_strided_slice %492 {offsets = [0, 24], sizes = [24, 72], strides = [1, 1]} : vector<24x128xbf16> to vector<24x72xbf16>
    %cst_447 = arith.constant dense<0.000000e+00> : vector<24x72xf32>
    %597 = tpu.matmul %595, %596, %cst_447 {dimension_numbers = #tpu.dot_dimension_numbers<[1], [0], [0], [1], [0, 0, 1, 1], [], []>} : vector<24x24xbf16>, vector<24x72xbf16>, vector<24x72xf32> -> vector<24x72xf32>
    %598 = arith.addf %593, %597 : vector<24x72xf32>
    %c21_448 = arith.constant 21 : index
    %c0_449 = arith.constant 0 : index
    %c0_450 = arith.constant 0 : index
    %599 = vector.load %arg19[%c21_448, %c0_449, %c0_450] : memref<25x24x24xbf16, #tpu.memory_space<vmem>>, vector<1x24x24xbf16>
    %600 = vector.shape_cast %599 : vector<1x24x24xbf16> to vector<24x24xbf16>
    %601 = vector.extract_strided_slice %492 {offsets = [0, 25], sizes = [24, 72], strides = [1, 1]} : vector<24x128xbf16> to vector<24x72xbf16>
    %cst_451 = arith.constant dense<0.000000e+00> : vector<24x72xf32>
    %602 = tpu.matmul %600, %601, %cst_451 {dimension_numbers = #tpu.dot_dimension_numbers<[1], [0], [0], [1], [0, 0, 1, 1], [], []>} : vector<24x24xbf16>, vector<24x72xbf16>, vector<24x72xf32> -> vector<24x72xf32>
    %603 = arith.addf %598, %602 : vector<24x72xf32>
    %c22_452 = arith.constant 22 : index
    %c0_453 = arith.constant 0 : index
    %c0_454 = arith.constant 0 : index
    %604 = vector.load %arg19[%c22_452, %c0_453, %c0_454] : memref<25x24x24xbf16, #tpu.memory_space<vmem>>, vector<1x24x24xbf16>
    %605 = vector.shape_cast %604 : vector<1x24x24xbf16> to vector<24x24xbf16>
    %606 = vector.extract_strided_slice %492 {offsets = [0, 26], sizes = [24, 72], strides = [1, 1]} : vector<24x128xbf16> to vector<24x72xbf16>
    %cst_455 = arith.constant dense<0.000000e+00> : vector<24x72xf32>
    %607 = tpu.matmul %605, %606, %cst_455 {dimension_numbers = #tpu.dot_dimension_numbers<[1], [0], [0], [1], [0, 0, 1, 1], [], []>} : vector<24x24xbf16>, vector<24x72xbf16>, vector<24x72xf32> -> vector<24x72xf32>
    %608 = arith.addf %603, %607 : vector<24x72xf32>
    %c23_456 = arith.constant 23 : index
    %c0_457 = arith.constant 0 : index
    %c0_458 = arith.constant 0 : index
    %609 = vector.load %arg19[%c23_456, %c0_457, %c0_458] : memref<25x24x24xbf16, #tpu.memory_space<vmem>>, vector<1x24x24xbf16>
    %610 = vector.shape_cast %609 : vector<1x24x24xbf16> to vector<24x24xbf16>
    %611 = vector.extract_strided_slice %492 {offsets = [0, 27], sizes = [24, 72], strides = [1, 1]} : vector<24x128xbf16> to vector<24x72xbf16>
    %cst_459 = arith.constant dense<0.000000e+00> : vector<24x72xf32>
    %612 = tpu.matmul %610, %611, %cst_459 {dimension_numbers = #tpu.dot_dimension_numbers<[1], [0], [0], [1], [0, 0, 1, 1], [], []>} : vector<24x24xbf16>, vector<24x72xbf16>, vector<24x72xf32> -> vector<24x72xf32>
    %613 = arith.addf %608, %612 : vector<24x72xf32>
    %c24_460 = arith.constant 24 : index
    %c0_461 = arith.constant 0 : index
    %c0_462 = arith.constant 0 : index
    %614 = vector.load %arg19[%c24_460, %c0_461, %c0_462] : memref<25x24x24xbf16, #tpu.memory_space<vmem>>, vector<1x24x24xbf16>
    %615 = vector.shape_cast %614 : vector<1x24x24xbf16> to vector<24x24xbf16>
    %616 = vector.extract_strided_slice %492 {offsets = [0, 28], sizes = [24, 72], strides = [1, 1]} : vector<24x128xbf16> to vector<24x72xbf16>
    %cst_463 = arith.constant dense<0.000000e+00> : vector<24x72xf32>
    %617 = tpu.matmul %615, %616, %cst_463 {dimension_numbers = #tpu.dot_dimension_numbers<[1], [0], [0], [1], [0, 0, 1, 1], [], []>} : vector<24x24xbf16>, vector<24x72xbf16>, vector<24x72xf32> -> vector<24x72xf32>
    %618 = arith.addf %613, %617 : vector<24x72xf32>
    %c0_464 = arith.constant 0 : index
    %c0_465 = arith.constant 0 : index
    %619 = vector.load %arg20[%c0_464, %c0_465] : memref<24x1xf32, #tpu.memory_space<vmem>>, vector<24x1xf32>
    %620 = vector.broadcast %619 : vector<24x1xf32> to vector<24x72xf32>
    %621 = arith.addf %618, %620 : vector<24x72xf32>
    %c0_466 = arith.constant 0 : index
    %c0_467 = arith.constant 0 : index
    %622 = vector.load %arg23[%c0_466, %c0_467] : memref<1x72xf32, #tpu.memory_space<vmem>>, vector<1x72xf32>
    %623 = vector.broadcast %622 : vector<1x72xf32> to vector<24x72xf32>
    %624 = arith.mulf %621, %623 : vector<24x72xf32>
    %cst_468 = arith.constant dense<0.000000e+00> : vector<24xf32>
    %625 = vector.multi_reduction <add>, %624, %cst_468 [1] : vector<24x72xf32> to vector<24xf32>
    %626 = vector.shape_cast %625 : vector<24xf32> to vector<24x1xf32>
    %cst_469 = arith.constant 1.250000e-01 : f32
    %627 = vector.broadcast %cst_469 : f32 to vector<24x1xf32>
    %628 = arith.mulf %626, %627 : vector<24x1xf32>
    %629 = arith.mulf %624, %624 : vector<24x72xf32>
    %cst_470 = arith.constant dense<0.000000e+00> : vector<24xf32>
    %630 = vector.multi_reduction <add>, %629, %cst_470 [1] : vector<24x72xf32> to vector<24xf32>
    %631 = vector.shape_cast %630 : vector<24xf32> to vector<24x1xf32>
    %cst_471 = arith.constant 1.250000e-01 : f32
    %632 = vector.broadcast %cst_471 : f32 to vector<24x1xf32>
    %633 = arith.mulf %631, %632 : vector<24x1xf32>
    %634 = arith.mulf %628, %628 : vector<24x1xf32>
    %635 = arith.subf %633, %634 : vector<24x1xf32>
    %636 = vector.broadcast %628 : vector<24x1xf32> to vector<24x72xf32>
    %637 = arith.subf %621, %636 : vector<24x72xf32>
    %cst_472 = arith.constant 9.99999974E-6 : f32
    %638 = vector.broadcast %cst_472 : f32 to vector<24x1xf32>
    %639 = arith.addf %635, %638 : vector<24x1xf32>
    %640 = math.rsqrt %639 : vector<24x1xf32>
    %641 = vector.broadcast %640 : vector<24x1xf32> to vector<24x72xf32>
    %642 = arith.mulf %637, %641 : vector<24x72xf32>
    %c0_473 = arith.constant 0 : index
    %c0_474 = arith.constant 0 : index
    %643 = vector.load %arg21[%c0_473, %c0_474] : memref<24x1xf32, #tpu.memory_space<vmem>>, vector<24x1xf32>
    %644 = vector.broadcast %643 : vector<24x1xf32> to vector<24x72xf32>
    %645 = arith.mulf %642, %644 : vector<24x72xf32>
    %c0_475 = arith.constant 0 : index
    %c0_476 = arith.constant 0 : index
    %646 = vector.load %arg22[%c0_475, %c0_476] : memref<24x1xf32, #tpu.memory_space<vmem>>, vector<24x1xf32>
    %647 = vector.broadcast %646 : vector<24x1xf32> to vector<24x72xf32>
    %648 = arith.addf %645, %647 : vector<24x72xf32>
    %cst_477 = arith.constant 0.000000e+00 : f32
    %649 = vector.broadcast %cst_477 : f32 to vector<24x72xf32>
    %650 = arith.maximumf %648, %649 : vector<24x72xf32>
    %651 = arith.truncf %650 : vector<24x72xf32> to vector<24x72xbf16>
    %c0_478 = arith.constant 0 : index
    %c0_479 = arith.constant 0 : index
    %652 = vector.load %arg24[%c0_478, %c0_479] : memref<72x8xbf16, #tpu.memory_space<vmem>>, vector<72x8xbf16>
    %cst_480 = arith.constant dense<0.000000e+00> : vector<24x8xf32>
    %653 = tpu.matmul %651, %652, %cst_480 {dimension_numbers = #tpu.dot_dimension_numbers<[1], [0], [0], [1], [0, 0, 1, 1], [], []>} : vector<24x72xbf16>, vector<72x8xbf16>, vector<24x8xf32> -> vector<24x8xf32>
    %654 = arith.truncf %653 : vector<24x8xf32> to vector<24x8xbf16>
    %cst_481 = arith.constant 0.000000e+00 : f32
    %655 = vector.broadcast %cst_481 : f32 to vector<10x2xf32>
    %c0_482 = arith.constant 0 : index
    %c0_483 = arith.constant 0 : index
    %c0_484 = arith.constant 0 : index
    %656 = vector.load %arg25[%c0_482, %c0_483, %c0_484] : memref<4x10x24xbf16, #tpu.memory_space<vmem>>, vector<1x10x24xbf16>
    %657 = vector.shape_cast %656 : vector<1x10x24xbf16> to vector<10x24xbf16>
    %658 = vector.extract_strided_slice %654 {offsets = [0, 0], sizes = [24, 2], strides = [1, 1]} : vector<24x8xbf16> to vector<24x2xbf16>
    %cst_485 = arith.constant dense<0.000000e+00> : vector<10x2xf32>
    %659 = tpu.matmul %657, %658, %cst_485 {dimension_numbers = #tpu.dot_dimension_numbers<[1], [0], [0], [1], [0, 0, 1, 1], [], []>} : vector<10x24xbf16>, vector<24x2xbf16>, vector<10x2xf32> -> vector<10x2xf32>
    %660 = arith.addf %655, %659 : vector<10x2xf32>
    %c1_486 = arith.constant 1 : index
    %c0_487 = arith.constant 0 : index
    %c0_488 = arith.constant 0 : index
    %661 = vector.load %arg25[%c1_486, %c0_487, %c0_488] : memref<4x10x24xbf16, #tpu.memory_space<vmem>>, vector<1x10x24xbf16>
    %662 = vector.shape_cast %661 : vector<1x10x24xbf16> to vector<10x24xbf16>
    %663 = vector.extract_strided_slice %654 {offsets = [0, 2], sizes = [24, 2], strides = [1, 1]} : vector<24x8xbf16> to vector<24x2xbf16>
    %cst_489 = arith.constant dense<0.000000e+00> : vector<10x2xf32>
    %664 = tpu.matmul %662, %663, %cst_489 {dimension_numbers = #tpu.dot_dimension_numbers<[1], [0], [0], [1], [0, 0, 1, 1], [], []>} : vector<10x24xbf16>, vector<24x2xbf16>, vector<10x2xf32> -> vector<10x2xf32>
    %665 = arith.addf %660, %664 : vector<10x2xf32>
    %c2_490 = arith.constant 2 : index
    %c0_491 = arith.constant 0 : index
    %c0_492 = arith.constant 0 : index
    %666 = vector.load %arg25[%c2_490, %c0_491, %c0_492] : memref<4x10x24xbf16, #tpu.memory_space<vmem>>, vector<1x10x24xbf16>
    %667 = vector.shape_cast %666 : vector<1x10x24xbf16> to vector<10x24xbf16>
    %668 = vector.extract_strided_slice %654 {offsets = [0, 4], sizes = [24, 2], strides = [1, 1]} : vector<24x8xbf16> to vector<24x2xbf16>
    %cst_493 = arith.constant dense<0.000000e+00> : vector<10x2xf32>
    %669 = tpu.matmul %667, %668, %cst_493 {dimension_numbers = #tpu.dot_dimension_numbers<[1], [0], [0], [1], [0, 0, 1, 1], [], []>} : vector<10x24xbf16>, vector<24x2xbf16>, vector<10x2xf32> -> vector<10x2xf32>
    %670 = arith.addf %665, %669 : vector<10x2xf32>
    %c3_494 = arith.constant 3 : index
    %c0_495 = arith.constant 0 : index
    %c0_496 = arith.constant 0 : index
    %671 = vector.load %arg25[%c3_494, %c0_495, %c0_496] : memref<4x10x24xbf16, #tpu.memory_space<vmem>>, vector<1x10x24xbf16>
    %672 = vector.shape_cast %671 : vector<1x10x24xbf16> to vector<10x24xbf16>
    %673 = vector.extract_strided_slice %654 {offsets = [0, 6], sizes = [24, 2], strides = [1, 1]} : vector<24x8xbf16> to vector<24x2xbf16>
    %cst_497 = arith.constant dense<0.000000e+00> : vector<10x2xf32>
    %674 = tpu.matmul %672, %673, %cst_497 {dimension_numbers = #tpu.dot_dimension_numbers<[1], [0], [0], [1], [0, 0, 1, 1], [], []>} : vector<10x24xbf16>, vector<24x2xbf16>, vector<10x2xf32> -> vector<10x2xf32>
    %675 = arith.addf %670, %674 : vector<10x2xf32>
    %c0_498 = arith.constant 0 : index
    %c0_499 = arith.constant 0 : index
    %676 = vector.load %arg26[%c0_498, %c0_499] : memref<10x1xf32, #tpu.memory_space<vmem>>, vector<10x1xf32>
    %677 = vector.broadcast %676 : vector<10x1xf32> to vector<10x2xf32>
    %678 = arith.addf %675, %677 : vector<10x2xf32>
    %c0_500 = arith.constant 0 : index
    %c0_501 = arith.constant 0 : index
    %679 = vector.load %arg27[%c0_500, %c0_501] : memref<10x2xf32, #tpu.memory_space<vmem>>, vector<10x2xf32>
    tpu.vector_store %arg27[%c0_500, %c0_501], %678 {strides = array<i32>} : memref<10x2xf32, #tpu.memory_space<vmem>>, vector<10x2xf32>,
    return
  }
}

</mosaic_0001>

<bundles_post_ra>
// kernel: network_forward.1
= control target key start
LH: loop header
LB: loop body
LE: loop exit
PB: predicated region body
PF: predicated region fallthrough
CT: control target
= control target key end

     0   :  { %s18752_s0 = inlined_call_operand.vmem [shape: bf16[8,768], index: 0, kind: input, shape index: {}]   ;;  %s18753_s1 = inlined_call_operand.vmem [shape: bf16[25,12,8], index: 1, kind: input, shape index: {}]   ;;  %s18754_s2 = inlined_call_operand.vmem [shape: f32[12,1], index: 2, kind: input, shape index: {}]   ;;  %s18755_s3 = inlined_call_operand.vmem [shape: f32[12,1], index: 3, kind: input, shape index: {}]   ;;  %s18756_s4 = inlined_call_operand.vmem [shape: f32[12,1], index: 4, kind: input, shape index: {}]   ;;  %s18757_s5 = inlined_call_operand.vmem [shape: f32[1,648], index: 5, kind: input, shape index: {}]   ;;  %s18758_s6 = inlined_call_operand.hbm [shape: bf16[648,640], index: 6, kind: input, shape index: {}]   ;;  %s18759_s7 = inlined_call_operand.vmem [shape: bf16[25,12,12], index: 7, kind: input, shape index: {}]   ;;  %s18760_s8 = inlined_call_operand.vmem [shape: f32[12,1], index: 8, kind: input, shape index: {}]   ;;  %s18761_s9 = inlined_call_operand.vmem [shape: f32[12,1], index: 9, kind: input, shape index: {}]   ;;  %s18762_s10 = inlined_call_operand.vmem [shape: f32[12,1], index: 10, kind: input, shape index: {}]   ;;  %s18763_s11 = inlined_call_operand.vmem [shape: f32[1,512], index: 11, kind: input, shape index: {}]   ;;  %s18764_s12 = inlined_call_operand.vmem [shape: bf16[495,256], index: 12, kind: input, shape index: {}]   ;;  %s18765_s13 = inlined_call_operand.vmem [shape: bf16[25,24,12], index: 13, kind: input, shape index: {}]   ;;  %s18766_s14 = inlined_call_operand.vmem [shape: f32[24,1], index: 14, kind: input, shape index: {}]   ;;  %s18767_s15 = inlined_call_operand.vmem [shape: f32[24,1], index: 15, kind: input, shape index: {}]   ;;  %s18768_s16 = inlined_call_operand.vmem [shape: f32[24,1], index: 16, kind: input, shape index: {}]   ;;  %s18769_s17 = inlined_call_operand.vmem [shape: f32[1,128], index: 17, kind: input, shape index: {}]   ;;  %s18770_s18 = inlined_call_operand.vmem [shape: bf16[128,128], index: 18, kind: input, shape index: {}]   ;;  %s18771_s19 = inlined_call_operand.vmem [shape: bf16[25,24,24], index: 19, kind: input, shape index: {}]   ;;  %s18772_s20 = inlined_call_operand.vmem [shape: f32[24,1], index: 20, kind: input, shape index: {}]   ;;  %s18773_s21 = inlined_call_operand.vmem [shape: f32[24,1], index: 21, kind: input, shape index: {}]   ;;  %s18774_s22 = inlined_call_operand.vmem [shape: f32[24,1], index: 22, kind: input, shape index: {}]   ;;  %s18775_s23 = inlined_call_operand.vmem [shape: f32[1,72], index: 23, kind: input, shape index: {}]   ;;  %s18776_s24 = inlined_call_operand.vmem [shape: bf16[72,8], index: 24, kind: input, shape index: {}]   ;;  %s18777_s25 = inlined_call_operand.vmem [shape: bf16[4,10,24], index: 25, kind: input, shape index: {}]   ;;  %s18778_s26 = inlined_call_operand.vmem [shape: f32[10,1], index: 26, kind: input, shape index: {}]   ;;  %s18779_s27 = inlined_call_operand.vmem [shape: f32[10,2], index: 27, kind: output, shape index: {}]  }
   0x1   :  { %18846 = sst [smem:[#allocation16_spill]] %s18752_s0 }
   0x2   :  { %18847 = sst [smem:[#allocation17_spill]] %s18753_s1 }
   0x3   :  { %18848 = sst [smem:[#allocation18_spill]] %s18754_s2 }
   0x4   :  { %18849 = sst [smem:[#allocation19_spill]] %s18755_s3 }
   0x5   :  { %18850 = sst [smem:[#allocation20_spill]] %s18756_s4 }
   0x6   :  { %18851 = sst [smem:[#allocation21_spill]] %s18757_s5 }
   0x7   :  { %18852 = sst [smem:[#allocation22_spill]] %s18758_s6 }
   0x8   :  { %18853 = sst [smem:[#allocation23_spill]] %s18759_s7 }
   0x9   :  { %18854 = sst [smem:[#allocation24_spill]] %s18760_s8 }
   0xa   :  { %18855 = sst [smem:[#allocation25_spill]] %s18761_s9 }
   0xb   :  { %18856 = sst [smem:[#allocation26_spill]] %s18762_s10 }
   0xc   :  { %18857 = sst [smem:[#allocation27_spill]] %s18763_s11 }
   0xd   :  { %18858 = sst [smem:[#allocation28_spill]] %s18779_s27 }
   0xe   :  { %32 = vsyncpa [#allocation3], 0  ;;  %s18859_s8 = sld [smem:[#allocation22_spill]]  ;;  %s14547_s9 = smov [#allocation2]  }
   0xf   :  { %s51_s5 = sshll.u32 %s14547_s9, 4  ;;  %s14548_s28 = smov 320   ;;  %s52_s5 = int_to_ptr.vmem [resolvable:$true] %s51_s5 }
  0x10   :  { %s14549_s0 = smov 20  }
  0x14   :  { %s49_s30 = sshll.u32 %s18859_s8, 4  ;;  %s50_s30 = int_to_ptr.hbm [resolvable:$true] %s49_s30 }
  0x15   :  { %57 = dma.hbm_to_vmem [thread:$0]  %s50_s30, 25920, %s52_s5, [#allocation3], %s14548_s28, %s14548_s28, %s14549_s0  }
  0x16   :  { %14545 = dma.done.wait [#allocation3], 25920  }
  0x17   :  { %14546 = vsyncadd [#allocation3], 4294941376  ;;  %s18860_s1 = sld [smem:[#allocation16_spill]]  ;;  %s18843_s7 = smov 127   ;;  %vm143_vm0 = vcmask 1039360   ;;  %vm18818_vm1 = vcmask 1043456  }
  0x18   :  { %s18841_s4 = smov 126   ;;  %s18821_s8 = smov 125   ;;  %vm149_vm2 = vcmask 64512   ;;  %vm386_vm3 = vcmask 1031168   ;;  %vm529_vm4 = vcmask 1022976   ;;  %vm672_vm5 = vcmask 1014784  }
  0x19   :  { %s18816_s30 = smov 124   ;;  %s18807_s9 = smov 110   ;;  %vm815_vm6 = vcmask 900096   ;;  %vm958_vm7 = vcmask 891904   ;;  %vm1101_vm8 = vcmask 883712   ;;  %vm1244_vm9 = vcmask 875520  }
  0x1a   :  { %s18801_s5 = smov 109   ;;  %s18797_s28 = smov 108   ;;  %vm1387_vm10 = vcmask 867328   ;;  %vm18813_vm11 = vcmask 752640   ;;  %vm1673_vm12 = vcmask 744448   ;;  %vm1816_vm13 = vcmask 736256  }
  0x1b   :  { %s18789_s0 = smov 107   ;;  %s18791_s2 = smov 106   ;;  %vm1959_vm14 = vcmask 728064   ;;  %vm2102_vm15 = vcmask 719872  }
  0x1c   :  { %s18793_s11 = smov 92   ;;  %s14560_s3 = smov 91  }
  0x1d   :  { %v106_v0 = vld [vmem:[%s18860_s1 + $0x8] sm:$0xff]  ;;  %v105_v1 = vld [vmem:[%s18860_s1] sm:$0xff]  ;;  %v107_v2 = vld [vmem:[%s18860_s1 + $0x10] sm:$0xff]  ;;  %s18861_s1 = sld [smem:[#allocation17_spill]]  ;;  %s14565_s10 = smov 73  }
  0x1e   :  { %v121_v3 = vunpack.c.l.b16 %v106_v0  ;;  %v119_v4 = vunpack.c.l.b16 %v105_v1  ;;  %v123_v5 = vunpack.c.l.b16 %v107_v2  ;;  %v122_v9 = vunpack.c.h.b16 %v106_v0  ;;  %s18862_s6 = sld [smem:[#allocation18_spill]]  ;;  %s18803_s29 = smov 93  }
  0x1f   :  { %v120_v10 = vunpack.c.h.b16 %v105_v1  ;;  %v124_v11 = vunpack.c.h.b16 %v107_v2  ;;  %s18939_s27 = smov 102  }
  0x20   :  { %v14759_v6 = vpack.c.b16 %v121_v3, %v121_v3  ;;  %v14761_v7 = vpack.c.b16 %v119_v4, %v119_v4  ;;  %v14763_v8 = vpack.c.b16 %v123_v5, %v123_v5  ;;  %v14771_v12 = vpack.c.b16 %v122_v9, %v122_v9 }
  0x21   :  { %v14773_v13 = vpack.c.b16 %v120_v10, %v120_v10  ;;  %v14775_v14 = vpack.c.b16 %v124_v11, %v124_v11 }
  0x22   :  { %135 = vrot.lane.b32.xlu1 %v14759_v6, %s18843_s7  ;;  %131 = vrot.lane.b32.xlu0 %v14761_v7, %s18843_s7  ;;  %v265_v35 = vsel %vm18818_vm1, %v14761_v7, 0  ;;  %v271_v37 = vsel %vm18818_vm1, %v14759_v6, 0  ;;  %v274_v38 = vsel %vm18818_vm1, %v14771_v12, 0  ;;  %v277_v39 = vsel %vm18818_vm1, %v14763_v8, 0 }
  0x23   :  { %139 = vrot.lane.b32.xlu2 %v14763_v8, %s18843_s7  ;;  %v11901_v19 = vld [vmem:[%s18861_s1 + $0x8] sm:$0xf]  ;;  %v14019_v20 = vld [vmem:[%s18861_s1 + $0x8] sm:$0x30]  ;;  %v268_v36 = vsel %vm18818_vm1, %v14773_v13, 0  ;;  %v280_v40 = vsel %vm18818_vm1, %v14775_v14, 0 }
  0x24   :  { %v11902_v24 = vor.u32 %v14019_v20, %v11901_v19  ;;  %v11911_v44 = vld [vmem:[%s18861_s1] sm:$0xf]  ;;  %v14018_v45 = vld [vmem:[%s18861_s1] sm:$0x30]  ;;  %v11923_v5 = vld [vmem:[%s18861_s1 + $0x10] sm:$0xf] }
  0x25   :  { %v11912_v50 = vor.u32 %v14018_v45, %v11911_v44  ;;  %v14020_v9 = vld [vmem:[%s18861_s1 + $0x10] sm:$0x30] }
  0x2a   :  { %137 = vrot.lane.b32.xlu1 %v14771_v12, %s18843_s7  ;;  %133 = vrot.lane.b32.xlu0 %v14773_v13, %s18843_s7 }
  0x2b   :  { %141 = vrot.lane.b32.xlu2 %v14775_v14, %s18843_s7 }
  0x32   :  { %376 = vrot.lane.b32.xlu1 %v14773_v13, %s18841_s4  ;;  %374 = vrot.lane.b32.xlu0 %v14761_v7, %s18841_s4 }
  0x33   :  { %378 = vrot.lane.b32.xlu2 %v14759_v6, %s18841_s4 }
  0x3a   :  { %382 = vrot.lane.b32.xlu1 %v14763_v8, %s18841_s4  ;;  %380 = vrot.lane.b32.xlu0 %v14771_v12, %s18841_s4 }
  0x3b   :  { %384 = vrot.lane.b32.xlu2 %v14775_v14, %s18841_s4 }
  0x42   :  { %519 = vrot.lane.b32.xlu1 %v14773_v13, %s18821_s8  ;;  %517 = vrot.lane.b32.xlu0 %v14761_v7, %s18821_s8 }
  0x43   :  { %521 = vrot.lane.b32.xlu2 %v14759_v6, %s18821_s8 }
  0x4a   :  { %523 = vrot.lane.b32.xlu0 %v14771_v12, %s18821_s8  ;;  %525 = vrot.lane.b32.xlu1 %v14763_v8, %s18821_s8 }
  0x4b   :  { %527 = vrot.lane.b32.xlu2 %v14775_v14, %s18821_s8 }
  0x52   :  { %662 = vrot.lane.b32.xlu1 %v14773_v13, %s18816_s30  ;;  %660 = vrot.lane.b32.xlu0 %v14761_v7, %s18816_s30 }
  0x53   :  { %664 = vrot.lane.b32.xlu2 %v14759_v6, %s18816_s30 }
  0x5a   :  { %668 = vrot.lane.b32.xlu1 %v14763_v8, %s18816_s30  ;;  %666 = vrot.lane.b32.xlu0 %v14771_v12, %s18816_s30 }
  0x5b   :  { %670 = vrot.lane.b32.xlu2 %v14775_v14, %s18816_s30 }
  0x62   :  { %805 = vrot.lane.b32.xlu1 %v14773_v13, %s18807_s9  ;;  %803 = vrot.lane.b32.xlu0 %v14761_v7, %s18807_s9 }
  0x63   :  { %807 = vrot.lane.b32.xlu2 %v14759_v6, %s18807_s9 }
  0x6a   :  { %809 = vrot.lane.b32.xlu0 %v14771_v12, %s18807_s9  ;;  %811 = vrot.lane.b32.xlu1 %v14763_v8, %s18807_s9 }
  0x6b   :  { %813 = vrot.lane.b32.xlu2 %v14775_v14, %s18807_s9 }
  0x72   :  { %948 = vrot.lane.b32.xlu1 %v14773_v13, %s18801_s5  ;;  %946 = vrot.lane.b32.xlu0 %v14761_v7, %s18801_s5 }
  0x73   :  { %950 = vrot.lane.b32.xlu2 %v14759_v6, %s18801_s5 }
  0x7a   :  { %954 = vrot.lane.b32.xlu1 %v14763_v8, %s18801_s5  ;;  %952 = vrot.lane.b32.xlu0 %v14771_v12, %s18801_s5 }
  0x7b   :  { %956 = vrot.lane.b32.xlu2 %v14775_v14, %s18801_s5 }
  0x7d   :  { %v140_v15 = vpop.permute.xlu2 %139 }
  0x82   :  { %1091 = vrot.lane.b32.xlu1 %v14773_v13, %s18797_s28  ;;  %1089 = vrot.lane.b32.xlu0 %v14761_v7, %s18797_s28 }
  0x83   :  { %1093 = vrot.lane.b32.xlu2 %v14759_v6, %s18797_s28 }
  0x85   :  { %v142_v18 = vpop.permute.xlu2 %141 }
  0x86   :  { %v148_v21 = vsel %vm143_vm0, %v140_v15, %v142_v18  ;;  %v170_v26 = vsel %vm18818_vm1, %v142_v18, 0 }
  0x87   :  { %v167_v25 = vsel %vm18818_vm1, %v148_v21, 0 }
  0x8a   :  { %1095 = vrot.lane.b32.xlu0 %v14771_v12, %s18797_s28  ;;  %1097 = vrot.lane.b32.xlu1 %v14763_v8, %s18797_s28 }
  0x8b   :  { %1099 = vrot.lane.b32.xlu2 %v14775_v14, %s18797_s28 }
  0x8d   :  { %v379_v43 = vpop.permute.xlu2 %378 }
  0x92   :  { %1234 = vrot.lane.b32.xlu1 %v14773_v13, %s18789_s0  ;;  %1232 = vrot.lane.b32.xlu0 %v14761_v7, %s18789_s0 }
  0x93   :  { %1236 = vrot.lane.b32.xlu2 %v14759_v6, %s18789_s0 }
  0x94   :  { %v136_v16 = vpop.permute.xlu1 %135  ;;  %v132_v17 = vpop.permute.xlu0 %131 }
  0x95   :  { %v385_v57 = vpop.permute.xlu2 %384 }
  0x96   :  { %v411_v1 = vsel %vm18818_vm1, %v385_v57, 0 }
  0x9a   :  { %1240 = vrot.lane.b32.xlu1 %v14763_v8, %s18789_s0  ;;  %1238 = vrot.lane.b32.xlu0 %v14771_v12, %s18789_s0 }
  0x9b   :  { %1242 = vrot.lane.b32.xlu2 %v14775_v14, %s18789_s0  ;;  %s14561_s0 = smov 90  }
  0x9c   :  { %v138_v22 = vpop.permute.xlu1 %137  ;;  %v134_v23 = vpop.permute.xlu0 %133 }
  0x9d   :  { %v144_v27 = vsel %vm143_vm0, %v132_v17, %v134_v23  ;;  %v145_v28 = vsel %vm143_vm0, %v134_v23, %v136_v16  ;;  %v146_v29 = vsel %vm143_vm0, %v136_v16, %v138_v22  ;;  %v147_v30 = vsel %vm143_vm0, %v138_v22, %v140_v15  ;;  %v522_v59 = vpop.permute.xlu2 %521 }
  0x9e   :  { %v155_v31 = vsel %vm18818_vm1, %v144_v27, 0  ;;  %v158_v32 = vsel %vm18818_vm1, %v145_v28, 0  ;;  %v161_v33 = vsel %vm18818_vm1, %v146_v29, 0  ;;  %v164_v34 = vsel %vm18818_vm1, %v147_v30, 0  ;;  %v14021_v27 = vld [vmem:[%s18861_s1 + $0x18] sm:$0x30] }
  0x9f   :  { %179 = vmatpush.bf16.msra.mxu0 %v155_v31  ;;  %193 = vmatpush.bf16.msra.mxu1 %v158_v32  ;;  %v11924_v15 = vor.u32 %v14020_v9, %v11923_v5 }
  0xa0   :  { %207 = vmatpush.bf16.msra.mxu2 %v161_v33  ;;  %221 = vmatpush.bf16.msra.mxu3 %v164_v34 }
  0xa2   :  { %11903 = vmatmul.msk.bf16.vlgmr.msra.gmra.mxu0 %vm149_vm2, %v11902_v24  ;;  %11904 = vmatmul.msk.bf16.vlgmr.msra.gmra.mxu1 %vm149_vm2, %v11902_v24 }
  0xa3   :  { %235 = vmatpush.bf16.msrb.mxu0 %v167_v25  ;;  %249 = vmatpush.bf16.msrb.mxu1 %v170_v26  ;;  %v11935_v26 = vld [vmem:[%s18861_s1 + $0x18] sm:$0xf] }
  0xa4   :  { %11905 = vmatmul.msk.bf16.vlgmr.msra.gmra.mxu2 %vm149_vm2, %v11902_v24  ;;  %11906 = vmatmul.msk.bf16.vlgmr.msra.gmra.mxu3 %vm149_vm2, %v11902_v24  ;;  %v377_v41 = vpop.permute.xlu1 %376  ;;  %v375_v42 = vpop.permute.xlu0 %374  ;;  %v11936_v32 = vor.u32 %v14021_v27, %v11935_v26 }
  0xa5   :  { %289 = vmatpush.bf16.msrb.mxu2 %v265_v35  ;;  %303 = vmatpush.bf16.msrb.mxu3 %v268_v36  ;;  %v387_v48 = vsel %vm386_vm3, %v375_v42, %v377_v41  ;;  %v388_v49 = vsel %vm386_vm3, %v377_v41, %v379_v43  ;;  %v528_v11 = vpop.permute.xlu2 %527 }
  0xa6   :  { %1377 = vrot.lane.b32.xlu1 %v14773_v13, %s18791_s2  ;;  %1375 = vrot.lane.b32.xlu0 %v14761_v7, %s18791_s2  ;;  %v396_v53 = vsel %vm18818_vm1, %v387_v48, 0  ;;  %v399_v54 = vsel %vm18818_vm1, %v388_v49, 0  ;;  %v554_v22 = vsel %vm18818_vm1, %v528_v11, 0 }
  0xa7   :  { %317 = vmatpush.bf16.msra.mxu0 %v271_v37  ;;  %331 = vmatpush.bf16.msra.mxu1 %v274_v38 }
  0xa8   :  { %1379 = vrot.lane.b32.xlu2 %v14759_v6, %s18791_s2 }
  0xa9   :  { %345 = vmatpush.bf16.msra.mxu2 %v277_v39  ;;  %359 = vmatpush.bf16.msra.mxu3 %v280_v40 }
  0xac   :  { %v383_v46 = vpop.permute.xlu1 %382  ;;  %v381_v47 = vpop.permute.xlu0 %380 }
  0xad   :  { %v389_v51 = vsel %vm386_vm3, %v379_v43, %v381_v47  ;;  %v390_v52 = vsel %vm386_vm3, %v381_v47, %v383_v46  ;;  %v391_v61 = vsel %vm386_vm3, %v383_v46, %v385_v57  ;;  %v665_v25 = vpop.permute.xlu2 %664 }
  0xae   :  { %1381 = vrot.lane.b32.xlu0 %v14771_v12, %s18791_s2  ;;  %1383 = vrot.lane.b32.xlu1 %v14763_v8, %s18791_s2  ;;  %v402_v55 = vsel %vm18818_vm1, %v389_v51, 0  ;;  %v405_v56 = vsel %vm18818_vm1, %v390_v52, 0  ;;  %v408_v0 = vsel %vm18818_vm1, %v391_v61, 0  ;;  %v11947_v51 = vld [vmem:[%s18861_s1 + $0x20] sm:$0xf] }
  0xaf   :  { %v14022_v52 = vld [vmem:[%s18861_s1 + $0x20] sm:$0x30] }
  0xb0   :  { %1385 = vrot.lane.b32.xlu2 %v14775_v14, %s18791_s2  ;;  %s18888_s2 = sld [smem:[#allocation23_spill]] }
  0xb2   :  { %11907 = vmatmul.msk.bf16.vlgmr.msrb.gmra.mxu0 %vm149_vm2, %v11902_v24  ;;  %11908 = vmatmul.msk.bf16.vlgmr.msrb.gmra.mxu1 %vm149_vm2, %v11902_v24 }
  0xb3   :  { %420 = vmatpush.bf16.msrb.mxu0 %v396_v53  ;;  %434 = vmatpush.bf16.msrb.mxu1 %v399_v54 }
  0xb4   :  { %11913 = vmatmul.msk.bf16.vlgmr.msrb.gmra.mxu2 %vm149_vm2, %v11912_v50  ;;  %11914 = vmatmul.msk.bf16.vlgmr.msrb.gmra.mxu3 %vm149_vm2, %v11912_v50  ;;  %v520_v58 = vpop.permute.xlu1 %519  ;;  %v518_v60 = vpop.permute.xlu0 %517 }
  0xb5   :  { %448 = vmatpush.bf16.msrb.mxu2 %v402_v55  ;;  %462 = vmatpush.bf16.msrb.mxu3 %v405_v56  ;;  %v531_v62 = vsel %vm529_vm4, %v520_v58, %v522_v59  ;;  %v530_v63 = vsel %vm529_vm4, %v518_v60, %v520_v58  ;;  %v671_v39 = vpop.permute.xlu2 %670  ;;  %v11948_v55 = vor.u32 %v14022_v52, %v11947_v51 }
  0xb6   :  { %1520 = vrot.lane.b32.xlu1 %v14773_v13, %s18793_s11  ;;  %1518 = vrot.lane.b32.xlu0 %v14761_v7, %s18793_s11  ;;  %v539_v2 = vsel %vm18818_vm1, %v530_v63, 0  ;;  %v542_v3 = vsel %vm18818_vm1, %v531_v62, 0  ;;  %v697_v47 = vsel %vm18818_vm1, %v671_v39, 0 }
  0xb8   :  { %1522 = vrot.lane.b32.xlu2 %v14759_v6, %s18793_s11 }
  0xbc   :  { %v526_v4 = vpop.permute.xlu1 %525  ;;  %v524_v10 = vpop.permute.xlu0 %523 }
  0xbd   :  { %v532_v16 = vsel %vm529_vm4, %v522_v59, %v524_v10  ;;  %v533_v17 = vsel %vm529_vm4, %v524_v10, %v526_v4  ;;  %v534_v18 = vsel %vm529_vm4, %v526_v4, %v528_v11  ;;  %v808_v41 = vpop.permute.xlu2 %807 }
  0xbe   :  { %1526 = vrot.lane.b32.xlu1 %v14763_v8, %s18793_s11  ;;  %1524 = vrot.lane.b32.xlu0 %v14771_v12, %s18793_s11  ;;  %v545_v19 = vsel %vm18818_vm1, %v532_v16, 0  ;;  %v548_v20 = vsel %vm18818_vm1, %v533_v17, 0  ;;  %v551_v21 = vsel %vm18818_vm1, %v534_v18, 0 }
  0xc0   :  { %1528 = vrot.lane.b32.xlu2 %v14775_v14, %s18793_s11  ;;  %s18865_s11 = sld [smem:[#allocation19_spill]] }
  0xc2   :  { %11915 = vmatmul.msk.bf16.vlgmr.msra.gmra.mxu0 %vm149_vm2, %v11912_v50  ;;  %11916 = vmatmul.msk.bf16.vlgmr.msra.gmra.mxu1 %vm149_vm2, %v11912_v50 }
  0xc3   :  { %476 = vmatpush.bf16.msra.mxu0 %v408_v0  ;;  %490 = vmatpush.bf16.msra.mxu1 %v411_v1 }
  0xc4   :  { %11917 = vmatmul.msk.bf16.vlgmr.msra.gmra.mxu2 %vm149_vm2, %v11912_v50  ;;  %11918 = vmatmul.msk.bf16.vlgmr.msra.gmra.mxu3 %vm149_vm2, %v11912_v50  ;;  %v663_v23 = vpop.permute.xlu1 %662  ;;  %v661_v24 = vpop.permute.xlu0 %660 }
  0xc5   :  { %563 = vmatpush.bf16.msra.mxu2 %v539_v2  ;;  %577 = vmatpush.bf16.msra.mxu3 %v542_v3  ;;  %v673_v30 = vsel %vm672_vm5, %v661_v24, %v663_v23  ;;  %v674_v31 = vsel %vm672_vm5, %v663_v23, %v665_v25  ;;  %v814_v54 = vpop.permute.xlu2 %813  ;;  %v11959_v2 = vld [vmem:[%s18861_s1 + $0x28] sm:$0xf]  ;;  %v14023_v3 = vld [vmem:[%s18861_s1 + $0x28] sm:$0x30] }
  0xc6   :  { %1663 = vrot.lane.b32.xlu1 %v14773_v13, %s14560_s3  ;;  %1661 = vrot.lane.b32.xlu0 %v14761_v7, %s14560_s3  ;;  %v682_v35 = vsel %vm18818_vm1, %v673_v30, 0  ;;  %v685_v36 = vsel %vm18818_vm1, %v674_v31, 0  ;;  %v840_v62 = vsel %vm18818_vm1, %v814_v54, 0  ;;  %v11960_v11 = vor.u32 %v14023_v3, %v11959_v2 }
  0xc8   :  { %1665 = vrot.lane.b32.xlu2 %v14759_v6, %s14560_s3 }
  0xcc   :  { %v669_v28 = vpop.permute.xlu1 %668  ;;  %v667_v29 = vpop.permute.xlu0 %666 }
  0xcd   :  { %v675_v33 = vsel %vm672_vm5, %v665_v25, %v667_v29  ;;  %v676_v34 = vsel %vm672_vm5, %v667_v29, %v669_v28  ;;  %v677_v43 = vsel %vm672_vm5, %v669_v28, %v671_v39  ;;  %v951_v1 = vpop.permute.xlu2 %950  ;;  %v11971_v39 = vld [vmem:[%s18861_s1 + $0x30] sm:$0xf] }
  0xce   :  { %1667 = vrot.lane.b32.xlu0 %v14771_v12, %s14560_s3  ;;  %1669 = vrot.lane.b32.xlu1 %v14763_v8, %s14560_s3  ;;  %v688_v37 = vsel %vm18818_vm1, %v675_v33, 0  ;;  %v691_v38 = vsel %vm18818_vm1, %v676_v34, 0  ;;  %v694_v46 = vsel %vm18818_vm1, %v677_v43, 0 }
  0xd0   :  { %1671 = vrot.lane.b32.xlu2 %v14775_v14, %s14560_s3  ;;  %s14563_s3 = smov 88  }
  0xd2   :  { %11925 = vmatmul.msk.bf16.vlgmr.msrb.gmra.mxu0 %vm149_vm2, %v11924_v15  ;;  %11926 = vmatmul.msk.bf16.vlgmr.msrb.gmra.mxu1 %vm149_vm2, %v11924_v15 }
  0xd3   :  { %591 = vmatpush.bf16.msrb.mxu0 %v545_v19  ;;  %605 = vmatpush.bf16.msrb.mxu1 %v548_v20 }
  0xd4   :  { %11927 = vmatmul.msk.bf16.vlgmr.msrb.gmra.mxu2 %vm149_vm2, %v11924_v15  ;;  %11928 = vmatmul.msk.bf16.vlgmr.msrb.gmra.mxu3 %vm149_vm2, %v11924_v15  ;;  %v806_v40 = vpop.permute.xlu1 %805  ;;  %v804_v42 = vpop.permute.xlu0 %803 }
  0xd5   :  { %619 = vmatpush.bf16.msrb.mxu2 %v551_v21  ;;  %633 = vmatpush.bf16.msrb.mxu3 %v554_v22  ;;  %v817_v44 = vsel %vm815_vm6, %v806_v40, %v808_v41  ;;  %v816_v45 = vsel %vm815_vm6, %v804_v42, %v806_v40  ;;  %v957_v21 = vpop.permute.xlu2 %956  ;;  %v14024_v40 = vld [vmem:[%s18861_s1 + $0x30] sm:$0x30] }
  0xd6   :  { %1806 = vrot.lane.b32.xlu1 %v14773_v13, %s14561_s0  ;;  %1804 = vrot.lane.b32.xlu0 %v14761_v7, %s14561_s0  ;;  %v825_v48 = vsel %vm18818_vm1, %v816_v45, 0  ;;  %v828_v49 = vsel %vm18818_vm1, %v817_v44, 0  ;;  %v983_v31 = vsel %vm18818_vm1, %v957_v21, 0  ;;  %v11972_v45 = vor.u32 %v14024_v40, %v11971_v39 }
  0xd8   :  { %1808 = vrot.lane.b32.xlu2 %v14759_v6, %s14561_s0 }
  0xdc   :  { %v812_v50 = vpop.permute.xlu1 %811  ;;  %v810_v53 = vpop.permute.xlu0 %809 }
  0xdd   :  { %v818_v56 = vsel %vm815_vm6, %v808_v41, %v810_v53  ;;  %v819_v57 = vsel %vm815_vm6, %v810_v53, %v812_v50  ;;  %v820_v58 = vsel %vm815_vm6, %v812_v50, %v814_v54  ;;  %v1094_v23 = vpop.permute.xlu2 %1093 }
  0xde   :  { %1812 = vrot.lane.b32.xlu1 %v14763_v8, %s14561_s0  ;;  %1810 = vrot.lane.b32.xlu0 %v14771_v12, %s14561_s0  ;;  %v831_v59 = vsel %vm18818_vm1, %v818_v56, 0  ;;  %v834_v60 = vsel %vm18818_vm1, %v819_v57, 0  ;;  %v837_v61 = vsel %vm18818_vm1, %v820_v58, 0 }
  0xe0   :  { %1814 = vrot.lane.b32.xlu2 %v14775_v14, %s14561_s0  ;;  %s14562_s0 = smov 89  }
  0xe2   :  { %11929 = vmatmul.msk.bf16.vlgmr.msra.gmra.mxu0 %vm149_vm2, %v11924_v15  ;;  %11930 = vmatmul.msk.bf16.vlgmr.msra.gmra.mxu1 %vm149_vm2, %v11924_v15 }
  0xe3   :  { %706 = vmatpush.bf16.msra.mxu0 %v682_v35  ;;  %720 = vmatpush.bf16.msra.mxu1 %v685_v36 }
  0xe4   :  { %11937 = vmatmul.msk.bf16.vlgmr.msra.gmra.mxu2 %vm149_vm2, %v11936_v32  ;;  %11938 = vmatmul.msk.bf16.vlgmr.msra.gmra.mxu3 %vm149_vm2, %v11936_v32  ;;  %v949_v63 = vpop.permute.xlu1 %948  ;;  %v947_v0 = vpop.permute.xlu0 %946 }
  0xe5   :  { %734 = vmatpush.bf16.msra.mxu2 %v688_v37  ;;  %748 = vmatpush.bf16.msra.mxu3 %v691_v38  ;;  %v959_v9 = vsel %vm958_vm7, %v947_v0, %v949_v63  ;;  %v960_v10 = vsel %vm958_vm7, %v949_v63, %v951_v1  ;;  %v1100_v42 = vpop.permute.xlu2 %1099  ;;  %v11983_v0 = vld [vmem:[%s18861_s1 + $0x38] sm:$0xf] }
  0xe6   :  { %1949 = vrot.lane.b32.xlu1 %v14773_v13, %s14562_s0  ;;  %1947 = vrot.lane.b32.xlu0 %v14761_v7, %s14562_s0  ;;  %v968_v17 = vsel %vm18818_vm1, %v959_v9, 0  ;;  %v971_v18 = vsel %vm18818_vm1, %v960_v10, 0  ;;  %v1126_v54 = vsel %vm18818_vm1, %v1100_v42, 0 }
  0xe8   :  { %1951 = vrot.lane.b32.xlu2 %v14759_v6, %s14562_s0 }
  0xec   :  { %v955_v4 = vpop.permute.xlu1 %954  ;;  %v953_v5 = vpop.permute.xlu0 %952 }
  0xed   :  { %v961_v15 = vsel %vm958_vm7, %v951_v1, %v953_v5  ;;  %v962_v16 = vsel %vm958_vm7, %v953_v5, %v955_v4  ;;  %v963_v25 = vsel %vm958_vm7, %v955_v4, %v957_v21  ;;  %v1237_v63 = vpop.permute.xlu2 %1236  ;;  %v14025_v1 = vld [vmem:[%s18861_s1 + $0x38] sm:$0x30] }
  0xee   :  { %1953 = vrot.lane.b32.xlu0 %v14771_v12, %s14562_s0  ;;  %1955 = vrot.lane.b32.xlu1 %v14763_v8, %s14562_s0  ;;  %v974_v19 = vsel %vm18818_vm1, %v961_v15, 0  ;;  %v977_v20 = vsel %vm18818_vm1, %v962_v16, 0  ;;  %v980_v30 = vsel %vm18818_vm1, %v963_v25, 0  ;;  %v11984_v9 = vor.u32 %v14025_v1, %v11983_v0  ;;  %v14026_v0 = vld [vmem:[%s18861_s1 + $0x40] sm:$0x30] }
  0xf0   :  { %1957 = vrot.lane.b32.xlu2 %v14775_v14, %s14562_s0  ;;  %s18799_s0 = smov 95  }
  0xf2   :  { %11939 = vmatmul.msk.bf16.vlgmr.msrb.gmra.mxu0 %vm149_vm2, %v11936_v32  ;;  %11940 = vmatmul.msk.bf16.vlgmr.msrb.gmra.mxu1 %vm149_vm2, %v11936_v32 }
  0xf3   :  { %762 = vmatpush.bf16.msrb.mxu0 %v694_v46  ;;  %776 = vmatpush.bf16.msrb.mxu1 %v697_v47 }
  0xf4   :  { %11941 = vmatmul.msk.bf16.vlgmr.msrb.gmra.mxu2 %vm149_vm2, %v11936_v32  ;;  %11942 = vmatmul.msk.bf16.vlgmr.msrb.gmra.mxu3 %vm149_vm2, %v11936_v32  ;;  %v1092_v22 = vpop.permute.xlu1 %1091  ;;  %v1090_v24 = vpop.permute.xlu0 %1089 }
  0xf5   :  { %849 = vmatpush.bf16.msrb.mxu2 %v825_v48  ;;  %863 = vmatpush.bf16.msrb.mxu3 %v828_v49  ;;  %v1103_v28 = vsel %vm1101_vm8, %v1092_v22, %v1094_v23  ;;  %v1102_v29 = vsel %vm1101_vm8, %v1090_v24, %v1092_v22 }
  0xf6   :  { %2092 = vrot.lane.b32.xlu1 %v14773_v13, %s14563_s3  ;;  %2090 = vrot.lane.b32.xlu0 %v14761_v7, %s14563_s3  ;;  %v1111_v32 = vsel %vm18818_vm1, %v1102_v29, 0  ;;  %v1114_v33 = vsel %vm18818_vm1, %v1103_v28, 0 }
  0xf8   :  { %2094 = vrot.lane.b32.xlu2 %v14759_v6, %s14563_s3 }
  0xfc   :  { %v1098_v38 = vpop.permute.xlu1 %1097  ;;  %v1096_v41 = vpop.permute.xlu0 %1095 }
  0xfd   :  { %v1104_v46 = vsel %vm1101_vm8, %v1094_v23, %v1096_v41  ;;  %v1105_v47 = vsel %vm1101_vm8, %v1096_v41, %v1098_v38  ;;  %v1106_v50 = vsel %vm1101_vm8, %v1098_v38, %v1100_v42 }
  0xfe   :  { %2098 = vrot.lane.b32.xlu1 %v14763_v8, %s14563_s3  ;;  %2096 = vrot.lane.b32.xlu0 %v14771_v12, %s14563_s3  ;;  %v1117_v51 = vsel %vm18818_vm1, %v1104_v46, 0  ;;  %v1120_v52 = vsel %vm18818_vm1, %v1105_v47, 0  ;;  %v1123_v53 = vsel %vm18818_vm1, %v1106_v50, 0 }
 0x100   :  { %2100 = vrot.lane.b32.xlu2 %v14775_v14, %s14563_s3  ;;  %s14564_s3 = smov 74  }
 0x102   :  { %11949 = vmatmul.msk.bf16.vlgmr.msra.gmra.mxu0 %vm149_vm2, %v11948_v55  ;;  %11950 = vmatmul.msk.bf16.vlgmr.msra.gmra.mxu1 %vm149_vm2, %v11948_v55 }
 0x103   :  { %877 = vmatpush.bf16.msra.mxu0 %v831_v59  ;;  %891 = vmatpush.bf16.msra.mxu1 %v834_v60 }
 0x104   :  { %11951 = vmatmul.msk.bf16.vlgmr.msra.gmra.mxu2 %vm149_vm2, %v11948_v55  ;;  %11952 = vmatmul.msk.bf16.vlgmr.msra.gmra.mxu3 %vm149_vm2, %v11948_v55  ;;  %v1233_v56 = vpop.permute.xlu0 %1232 }
 0x105   :  { %905 = vmatpush.bf16.msra.mxu2 %v837_v61  ;;  %919 = vmatpush.bf16.msra.mxu3 %v840_v62 }
 0x106   :  { %2235 = vrot.lane.b32.xlu1 %v14773_v13, %s14564_s3  ;;  %2233 = vrot.lane.b32.xlu0 %v14761_v7, %s14564_s3 }
 0x108   :  { %2237 = vrot.lane.b32.xlu2 %v14759_v6, %s14564_s3 }
 0x10c   :  { %v1239_v3 = vpop.permute.xlu0 %1238 }
 0x10e   :  { %2239 = vrot.lane.b32.xlu0 %v14771_v12, %s14564_s3  ;;  %2241 = vrot.lane.b32.xlu1 %v14763_v8, %s14564_s3 }
 0x110   :  { %2243 = vrot.lane.b32.xlu2 %v14775_v14, %s14564_s3  ;;  %s18814_s3 = smov 111  }
 0x112   :  { %11953 = vmatmul.msk.bf16.vlgmr.msrb.gmra.mxu0 %vm149_vm2, %v11948_v55  ;;  %11954 = vmatmul.msk.bf16.vlgmr.msrb.gmra.mxu1 %vm149_vm2, %v11948_v55  ;;  %v1235_v55 = vpop.permute.xlu1 %1234 }
 0x113   :  { %992 = vmatpush.bf16.msrb.mxu0 %v968_v17  ;;  %1006 = vmatpush.bf16.msrb.mxu1 %v971_v18  ;;  %v1245_v10 = vsel %vm1244_vm9, %v1233_v56, %v1235_v55 }
 0x114   :  { %11961 = vmatmul.msk.bf16.vlgmr.msrb.gmra.mxu2 %vm149_vm2, %v11960_v11  ;;  %11962 = vmatmul.msk.bf16.vlgmr.msrb.gmra.mxu3 %vm149_vm2, %v11960_v11  ;;  %v1254_v23 = vsel %vm18818_vm1, %v1245_v10, 0 }
 0x115   :  { %1020 = vmatpush.bf16.msrb.mxu2 %v974_v19  ;;  %1034 = vmatpush.bf16.msrb.mxu3 %v977_v20  ;;  %v1247_v19 = vsel %vm1244_vm9, %v1237_v63, %v1239_v3 }
 0x116   :  { %2378 = vrot.lane.b32.xlu1 %v14773_v13, %s14565_s10  ;;  %2376 = vrot.lane.b32.xlu0 %v14761_v7, %s14565_s10  ;;  %v1260_v25 = vsel %vm18818_vm1, %v1247_v19, 0 }
 0x118   :  { %2380 = vrot.lane.b32.xlu2 %v14759_v6, %s14565_s10  ;;  %v1376_v38 = vpop.permute.xlu0 %1375 }
 0x11a   :  { %v1241_v2 = vpop.permute.xlu1 %1240 }
 0x11b   :  { %v1248_v20 = vsel %vm1244_vm9, %v1239_v3, %v1241_v2 }
 0x11e   :  { %2384 = vrot.lane.b32.xlu1 %v14763_v8, %s14565_s10  ;;  %2382 = vrot.lane.b32.xlu0 %v14771_v12, %s14565_s10 }
 0x11f   :  { %v181_v26 = vpop.f32.mrf.mxu0  ;;  %v195_v27 = vpop.f32.mrf.mxu1 }
 0x120   :  { %2386 = vrot.lane.b32.xlu2 %v14775_v14, %s14565_s10  ;;  %s14566_s10 = smov 72   ;;  %v1382_v1 = vpop.permute.xlu0 %1381 }
 0x122   :  { %11963 = vmatmul.msk.bf16.vlgmr.msra.gmra.mxu0 %vm149_vm2, %v11960_v11  ;;  %11964 = vmatmul.msk.bf16.vlgmr.msra.gmra.mxu1 %vm149_vm2, %v11960_v11 }
 0x123   :  { %1048 = vmatpush.bf16.msra.mxu0 %v980_v30  ;;  %1062 = vmatpush.bf16.msra.mxu1 %v983_v31 }
 0x124   :  { %11965 = vmatmul.msk.bf16.vlgmr.msra.gmra.mxu2 %vm149_vm2, %v11960_v11  ;;  %11966 = vmatmul.msk.bf16.vlgmr.msra.gmra.mxu3 %vm149_vm2, %v11960_v11  ;;  %v1246_v11 = vsel %vm1244_vm9, %v1235_v55, %v1237_v63  ;;  %v11995_v63 = vld [vmem:[%s18861_s1 + $0x40] sm:$0xf] }
 0x125   :  { %1135 = vmatpush.bf16.msra.mxu2 %v1111_v32  ;;  %1149 = vmatpush.bf16.msra.mxu3 %v1114_v33  ;;  %v1257_v24 = vsel %vm18818_vm1, %v1246_v11, 0 }
 0x126   :  { %2521 = vrot.lane.b32.xlu1 %v14773_v13, %s14566_s10  ;;  %2519 = vrot.lane.b32.xlu0 %v14761_v7, %s14566_s10 }
 0x127   :  { %v15077_v34 = vpop.f32.mrf.mxu2  ;;  %v223_v35 = vpop.f32.mrf.mxu3 }
 0x128   :  { %v183_v36 = vpop.f32.mrf.mxu0  ;;  %v197_v37 = vpop.f32.mrf.mxu1  ;;  %2523 = vrot.lane.b32.xlu2 %v14759_v6, %s14566_s10 }
 0x12e   :  { %2525 = vrot.lane.b32.xlu0 %v14771_v12, %s14566_s10  ;;  %2527 = vrot.lane.b32.xlu1 %v14763_v8, %s14566_s10 }
 0x12f   :  { %v15088_v43 = vpop.f32.mrf.mxu2  ;;  %v15090_v44 = vpop.f32.mrf.mxu3 }
 0x130   :  { %v15095_v48 = vpop.f32.mrf.mxu0  ;;  %v15097_v49 = vpop.f32.mrf.mxu1  ;;  %2529 = vrot.lane.b32.xlu2 %v14775_v14, %s14566_s10  ;;  %s14567_s10 = smov 71  }
 0x132   :  { %11973 = vmatmul.msk.bf16.vlgmr.msrb.gmra.mxu0 %vm149_vm2, %v11972_v45  ;;  %11974 = vmatmul.msk.bf16.vlgmr.msrb.gmra.mxu1 %vm149_vm2, %v11972_v45 }
 0x133   :  { %1163 = vmatpush.bf16.msrb.mxu0 %v1117_v51  ;;  %1177 = vmatpush.bf16.msrb.mxu1 %v1120_v52 }
 0x134   :  { %11975 = vmatmul.msk.bf16.vlgmr.msrb.gmra.mxu2 %vm149_vm2, %v11972_v45  ;;  %11976 = vmatmul.msk.bf16.vlgmr.msrb.gmra.mxu3 %vm149_vm2, %v11972_v45 }
 0x135   :  { %1191 = vmatpush.bf16.msrb.mxu2 %v1123_v53  ;;  %1205 = vmatpush.bf16.msrb.mxu3 %v1126_v54 }
 0x136   :  { %2664 = vrot.lane.b32.xlu1 %v14773_v13, %s14567_s10  ;;  %2662 = vrot.lane.b32.xlu0 %v14761_v7, %s14567_s10 }
 0x137   :  { %v291_v57 = vpop.f32.mrf.mxu2  ;;  %v305_v58 = vpop.f32.mrf.mxu3 }
 0x138   :  { %v15108_v59 = vadd.f32 %v291_v57, %v181_v26  ;;  %v15110_v60 = vadd.f32 %v305_v58, %v195_v27  ;;  %v239_v61 = vpop.f32.mrf.mxu0  ;;  %v253_v62 = vpop.f32.mrf.mxu1  ;;  %v1263_v26 = vsel %vm18818_vm1, %v1248_v20, 0  ;;  %2666 = vrot.lane.b32.xlu2 %v14759_v6, %s14567_s10 }
 0x139   :  { %v1243_v27 = vpop.permute.xlu2 %1242 }
 0x13a   :  { %v1249_v41 = vsel %vm1244_vm9, %v1241_v2, %v1243_v27  ;;  %v1269_v51 = vsel %vm18818_vm1, %v1243_v27, 0  ;;  %vm2245_vm9 = vcmask 605184  }
 0x13b   :  { %v1266_v50 = vsel %vm18818_vm1, %v1249_v41, 0 }
 0x13e   :  { %2670 = vrot.lane.b32.xlu1 %v14763_v8, %s14567_s10  ;;  %2668 = vrot.lane.b32.xlu0 %v14771_v12, %s14567_s10 }
 0x13f   :  { %v293_v4 = vpop.f32.mrf.mxu2  ;;  %v307_v5 = vpop.f32.mrf.mxu3 }
 0x140   :  { %v15126_v15 = vadd.f32 %v293_v4, %v183_v36  ;;  %v15128_v16 = vadd.f32 %v307_v5, %v197_v37  ;;  %v319_v17 = vpop.f32.mrf.mxu0  ;;  %v333_v18 = vpop.f32.mrf.mxu1  ;;  %v11996_v5 = vor.u32 %v14026_v0, %v11995_v63  ;;  %2672 = vrot.lane.b32.xlu2 %v14775_v14, %s14567_s10  ;;  %s14568_s10 = smov 70  }
 0x141   :  { %v320_v21 = vadd.f32 %v319_v17, %v15077_v34  ;;  %v334_v22 = vadd.f32 %v333_v18, %v223_v35  ;;  %v1378_v36 = vpop.permute.xlu1 %1377  ;;  %v1380_v37 = vpop.permute.xlu2 %1379 }
 0x142   :  { %11977 = vmatmul.msk.bf16.vlgmr.msra.gmra.mxu0 %vm149_vm2, %v11972_v45  ;;  %11978 = vmatmul.msk.bf16.vlgmr.msra.gmra.mxu1 %vm149_vm2, %v11972_v45 }
 0x143   :  { %1278 = vmatpush.bf16.msra.mxu0 %v1254_v23  ;;  %1292 = vmatpush.bf16.msra.mxu1 %v1257_v24 }
 0x144   :  { %11985 = vmatmul.msk.bf16.vlgmr.msra.gmra.mxu2 %vm149_vm2, %v11984_v9  ;;  %11986 = vmatmul.msk.bf16.vlgmr.msra.gmra.mxu3 %vm149_vm2, %v11984_v9 }
 0x145   :  { %1306 = vmatpush.bf16.msra.mxu2 %v1260_v25  ;;  %1320 = vmatpush.bf16.msra.mxu3 %v1263_v26  ;;  %v1519_v26 = vpop.permute.xlu0 %1518 }
 0x146   :  { %2807 = vrot.lane.b32.xlu1 %v14773_v13, %s14568_s10  ;;  %2805 = vrot.lane.b32.xlu0 %v14761_v7, %s14568_s10 }
 0x147   :  { %v347_v28 = vpop.f32.mrf.mxu2  ;;  %v361_v29 = vpop.f32.mrf.mxu3 }
 0x148   :  { %v15148_v30 = vadd.f32 %v347_v28, %v15095_v48  ;;  %v15151_v31 = vadd.f32 %v361_v29, %v15097_v49  ;;  %v321_v32 = vpop.f32.mrf.mxu0  ;;  %v335_v33 = vpop.f32.mrf.mxu1  ;;  %v1389_v48 = vsel %vm1387_vm10, %v1378_v36, %v1380_v37  ;;  %2809 = vrot.lane.b32.xlu2 %v14759_v6, %s14568_s10 }
 0x149   :  { %v322_v34 = vadd.f32 %v321_v32, %v15088_v43  ;;  %v336_v35 = vadd.f32 %v335_v33, %v15090_v44  ;;  %v1388_v43 = vsel %vm1387_vm10, %v1376_v38, %v1378_v36  ;;  %v1400_v53 = vsel %vm18818_vm1, %v1389_v48, 0  ;;  %v1386_v2 = vpop.permute.xlu2 %1385  ;;  %v12007_v36 = vld [vmem:[%s18861_s1 + $0x48] sm:$0xf] }
 0x14a   :  { %v1397_v52 = vsel %vm18818_vm1, %v1388_v43, 0  ;;  %v1412_v24 = vsel %vm18818_vm1, %v1386_v2, 0 }
 0x14e   :  { %2811 = vrot.lane.b32.xlu0 %v14771_v12, %s14568_s10  ;;  %2813 = vrot.lane.b32.xlu1 %v14763_v8, %s14568_s10 }
 0x14f   :  { %v349_v39 = vpop.f32.mrf.mxu2  ;;  %v363_v40 = vpop.f32.mrf.mxu3 }
 0x150   :  { %v15156_v42 = vadd.f32 %v349_v39, %v239_v61  ;;  %v15158_v45 = vadd.f32 %v363_v40, %v253_v62  ;;  %v422_v46 = vpop.f32.mrf.mxu0  ;;  %v436_v47 = vpop.f32.mrf.mxu1  ;;  %2815 = vrot.lane.b32.xlu2 %v14775_v14, %s14568_s10  ;;  %s14569_s10 = smov 56  }
 0x151   :  { %v497_v44 = vadd.f32 %v422_v46, %v15108_v59  ;;  %v498_v49 = vadd.f32 %v436_v47, %v15110_v60  ;;  %v1384_v62 = vpop.permute.xlu1 %1383  ;;  %v1525_v39 = vpop.permute.xlu0 %1524 }
 0x152   :  { %11987 = vmatmul.msk.bf16.vlgmr.msrb.gmra.mxu0 %vm149_vm2, %v11984_v9  ;;  %11988 = vmatmul.msk.bf16.vlgmr.msrb.gmra.mxu1 %vm149_vm2, %v11984_v9  ;;  %v1391_v10 = vsel %vm1387_vm10, %v1382_v1, %v1384_v62  ;;  %v1392_v18 = vsel %vm1387_vm10, %v1384_v62, %v1386_v2 }
 0x153   :  { %1334 = vmatpush.bf16.msrb.mxu0 %v1266_v50  ;;  %1348 = vmatpush.bf16.msrb.mxu1 %v1269_v51  ;;  %v1409_v23 = vsel %vm18818_vm1, %v1392_v18, 0 }
 0x154   :  { %11989 = vmatmul.msk.bf16.vlgmr.msrb.gmra.mxu2 %vm149_vm2, %v11984_v9  ;;  %11990 = vmatmul.msk.bf16.vlgmr.msrb.gmra.mxu3 %vm149_vm2, %v11984_v9  ;;  %v1390_v9 = vsel %vm1387_vm10, %v1380_v37, %v1382_v1  ;;  %v14027_v37 = vld [vmem:[%s18861_s1 + $0x48] sm:$0x30]  ;;  %vm2388_vm10 = vcmask 596992  }
 0x155   :  { %1421 = vmatpush.bf16.msrb.mxu2 %v1397_v52  ;;  %1435 = vmatpush.bf16.msrb.mxu3 %v1400_v53 }
 0x156   :  { %2950 = vrot.lane.b32.xlu1 %v14773_v13, %s14569_s10  ;;  %2948 = vrot.lane.b32.xlu0 %v14761_v7, %s14569_s10 }
 0x157   :  { %v450_v54 = vpop.f32.mrf.mxu2  ;;  %v464_v55 = vpop.f32.mrf.mxu3 }
 0x158   :  { %v15178_v56 = vadd.f32 %v450_v54, %v320_v21  ;;  %v15180_v57 = vadd.f32 %v464_v55, %v334_v22  ;;  %v424_v58 = vpop.f32.mrf.mxu0  ;;  %v438_v59 = vpop.f32.mrf.mxu1  ;;  %v1403_v21 = vsel %vm18818_vm1, %v1390_v9, 0  ;;  %v1406_v22 = vsel %vm18818_vm1, %v1391_v10, 0  ;;  %2952 = vrot.lane.b32.xlu2 %v14759_v6, %s14569_s10 }
 0x159   :  { %v503_v60 = vadd.f32 %v424_v58, %v15126_v15  ;;  %v504_v61 = vadd.f32 %v438_v59, %v15128_v16  ;;  %v1521_v25 = vpop.permute.xlu1 %1520 }
 0x15e   :  { %2956 = vrot.lane.b32.xlu1 %v14763_v8, %s14569_s10  ;;  %2954 = vrot.lane.b32.xlu0 %v14771_v12, %s14569_s10 }
 0x15f   :  { %v452_v3 = vpop.f32.mrf.mxu2  ;;  %v466_v4 = vpop.f32.mrf.mxu3 }
 0x160   :  { %v15198_v11 = vadd.f32 %v452_v3, %v322_v34  ;;  %v15200_v15 = vadd.f32 %v466_v4, %v336_v35  ;;  %v478_v16 = vpop.f32.mrf.mxu0  ;;  %v492_v17 = vpop.f32.mrf.mxu1  ;;  %2958 = vrot.lane.b32.xlu2 %v14775_v14, %s14569_s10  ;;  %s14570_s10 = smov 55  }
 0x161   :  { %v15204_v19 = vadd.f32 %v478_v16, %v15148_v30  ;;  %v15207_v20 = vadd.f32 %v492_v17, %v15151_v31  ;;  %v1523_v35 = vpop.permute.xlu2 %1522  ;;  %v1527_v38 = vpop.permute.xlu1 %1526 }
 0x162   :  { %11997 = vmatmul.msk.bf16.vlgmr.msra.gmra.mxu0 %vm149_vm2, %v11996_v5  ;;  %11998 = vmatmul.msk.bf16.vlgmr.msra.gmra.mxu1 %vm149_vm2, %v11996_v5  ;;  %v1532_v46 = vsel %vm18813_vm11, %v1521_v25, %v1523_v35  ;;  %v1534_v50 = vsel %vm18813_vm11, %v1525_v39, %v1527_v38  ;;  %v1662_v4 = vpop.permute.xlu0 %1661 }
 0x163   :  { %1449 = vmatpush.bf16.msra.mxu0 %v1403_v21  ;;  %1463 = vmatpush.bf16.msra.mxu1 %v1406_v22  ;;  %v1543_v54 = vsel %vm18818_vm1, %v1532_v46, 0 }
 0x164   :  { %11999 = vmatmul.msk.bf16.vlgmr.msra.gmra.mxu2 %vm149_vm2, %v11996_v5  ;;  %12000 = vmatmul.msk.bf16.vlgmr.msra.gmra.mxu3 %vm149_vm2, %v11996_v5 }
 0x165   :  { %1477 = vmatpush.bf16.msra.mxu2 %v1409_v23  ;;  %1491 = vmatpush.bf16.msra.mxu3 %v1412_v24 }
 0x166   :  { %3093 = vrot.lane.b32.xlu1 %v14773_v13, %s14570_s10  ;;  %3091 = vrot.lane.b32.xlu0 %v14761_v7, %s14570_s10 }
 0x167   :  { %v565_v27 = vpop.f32.mrf.mxu2  ;;  %v579_v28 = vpop.f32.mrf.mxu3 }
 0x168   :  { %v15217_v29 = vadd.f32 %v565_v27, %v497_v44  ;;  %v15219_v30 = vadd.f32 %v579_v28, %v498_v49  ;;  %v480_v31 = vpop.f32.mrf.mxu0  ;;  %v494_v32 = vpop.f32.mrf.mxu1  ;;  %v1533_v49 = vsel %vm18813_vm11, %v1523_v35, %v1525_v39  ;;  %v12019_v35 = vld [vmem:[%s18861_s1 + $0x50] sm:$0xf]  ;;  %3095 = vrot.lane.b32.xlu2 %v14759_v6, %s14570_s10 }
 0x169   :  { %v507_v33 = vadd.f32 %v480_v31, %v15156_v42  ;;  %v508_v34 = vadd.f32 %v494_v32, %v15158_v45  ;;  %v12008_v42 = vor.u32 %v14027_v37, %v12007_v36  ;;  %v1531_v45 = vsel %vm18813_vm11, %v1519_v26, %v1521_v25  ;;  %v1664_v2 = vpop.permute.xlu1 %1663  ;;  %v14028_v36 = vld [vmem:[%s18861_s1 + $0x50] sm:$0x30] }
 0x16a   :  { %v1540_v53 = vsel %vm18818_vm1, %v1531_v45, 0  ;;  %v1546_v55 = vsel %vm18818_vm1, %v1533_v49, 0  ;;  %v1668_v37 = vpop.permute.xlu0 %1667 }
 0x16e   :  { %3097 = vrot.lane.b32.xlu0 %v14771_v12, %s14570_s10  ;;  %3099 = vrot.lane.b32.xlu1 %v14763_v8, %s14570_s10 }
 0x16f   :  { %v567_v40 = vpop.f32.mrf.mxu2  ;;  %v581_v41 = vpop.f32.mrf.mxu3 }
 0x170   :  { %v15237_v47 = vadd.f32 %v567_v40, %v503_v60  ;;  %v15239_v48 = vadd.f32 %v581_v41, %v504_v61  ;;  %v593_v43 = vpop.f32.mrf.mxu0  ;;  %v607_v44 = vpop.f32.mrf.mxu1  ;;  %v12020_v41 = vor.u32 %v14028_v36, %v12019_v35  ;;  %3101 = vrot.lane.b32.xlu2 %v14775_v14, %s14570_s10  ;;  %s14571_s10 = smov 54  }
 0x171   :  { %v642_v51 = vadd.f32 %v593_v43, %v15178_v56  ;;  %v643_v52 = vadd.f32 %v607_v44, %v15180_v57  ;;  %v1549_v56 = vsel %vm18818_vm1, %v1534_v50, 0  ;;  %v1529_v57 = vpop.permute.xlu2 %1528 }
 0x172   :  { %12001 = vmatmul.msk.bf16.vlgmr.msrb.gmra.mxu0 %vm149_vm2, %v11996_v5  ;;  %12002 = vmatmul.msk.bf16.vlgmr.msrb.gmra.mxu1 %vm149_vm2, %v11996_v5  ;;  %v1535_v10 = vsel %vm18813_vm11, %v1527_v38, %v1529_v57  ;;  %v1555_v23 = vsel %vm18818_vm1, %v1529_v57, 0 }
 0x173   :  { %1564 = vmatpush.bf16.msrb.mxu0 %v1540_v53  ;;  %1578 = vmatpush.bf16.msrb.mxu1 %v1543_v54  ;;  %v1552_v22 = vsel %vm18818_vm1, %v1535_v10, 0 }
 0x174   :  { %12009 = vmatmul.msk.bf16.vlgmr.msrb.gmra.mxu2 %vm149_vm2, %v12008_v42  ;;  %12010 = vmatmul.msk.bf16.vlgmr.msrb.gmra.mxu3 %vm149_vm2, %v12008_v42 }
 0x175   :  { %1592 = vmatpush.bf16.msrb.mxu2 %v1546_v55  ;;  %1606 = vmatpush.bf16.msrb.mxu3 %v1549_v56  ;;  %v1805_v56 = vpop.permute.xlu0 %1804 }
 0x176   :  { %3236 = vrot.lane.b32.xlu1 %v14773_v13, %s14571_s10  ;;  %3234 = vrot.lane.b32.xlu0 %v14761_v7, %s14571_s10 }
 0x177   :  { %v621_v58 = vpop.f32.mrf.mxu2  ;;  %v635_v59 = vpop.f32.mrf.mxu3 }
 0x178   :  { %v15260_v60 = vadd.f32 %v621_v58, %v15204_v19  ;;  %v15263_v61 = vadd.f32 %v635_v59, %v15207_v20  ;;  %v595_v62 = vpop.f32.mrf.mxu0  ;;  %v609_v63 = vpop.f32.mrf.mxu1  ;;  %3238 = vrot.lane.b32.xlu2 %v14759_v6, %s14571_s10 }
 0x179   :  { %v648_v0 = vadd.f32 %v595_v62, %v15198_v11  ;;  %v649_v1 = vadd.f32 %v609_v63, %v15200_v15  ;;  %v1666_v3 = vpop.permute.xlu2 %1665  ;;  %v1674_v11 = vsel %vm1673_vm12, %v1662_v4, %v1664_v2 }
 0x17a   :  { %v1675_v20 = vsel %vm1673_vm12, %v1664_v2, %v1666_v3  ;;  %v1683_v24 = vsel %vm18818_vm1, %v1674_v11, 0  ;;  %v12031_v2 = vld [vmem:[%s18861_s1 + $0x58] sm:$0xf] }
 0x17b   :  { %v1686_v25 = vsel %vm18818_vm1, %v1675_v20, 0 }
 0x17e   :  { %3242 = vrot.lane.b32.xlu1 %v14763_v8, %s14571_s10  ;;  %3240 = vrot.lane.b32.xlu0 %v14771_v12, %s14571_s10 }
 0x17f   :  { %v623_v5 = vpop.f32.mrf.mxu2  ;;  %v637_v9 = vpop.f32.mrf.mxu3 }
 0x180   :  { %v15268_v16 = vadd.f32 %v623_v5, %v507_v33  ;;  %v15270_v17 = vadd.f32 %v637_v9, %v508_v34  ;;  %v708_v18 = vpop.f32.mrf.mxu0  ;;  %v722_v19 = vpop.f32.mrf.mxu1  ;;  %3244 = vrot.lane.b32.xlu2 %v14775_v14, %s14571_s10  ;;  %s14572_s10 = smov 53  }
 0x181   :  { %v783_v15 = vadd.f32 %v708_v18, %v15217_v29  ;;  %v784_v21 = vadd.f32 %v722_v19, %v15219_v30  ;;  %v1670_v34 = vpop.permute.xlu1 %1669  ;;  %v1672_v38 = vpop.permute.xlu2 %1671 }
 0x182   :  { %12011 = vmatmul.msk.bf16.vlgmr.msra.gmra.mxu0 %vm149_vm2, %v12008_v42  ;;  %12012 = vmatmul.msk.bf16.vlgmr.msra.gmra.mxu1 %vm149_vm2, %v12008_v42  ;;  %v1677_v45 = vsel %vm1673_vm12, %v1668_v37, %v1670_v34  ;;  %v1678_v44 = vsel %vm1673_vm12, %v1670_v34, %v1672_v38  ;;  %v1698_v54 = vsel %vm18818_vm1, %v1672_v38, 0  ;;  %v1811_v5 = vpop.permute.xlu0 %1810 }
 0x183   :  { %1620 = vmatpush.bf16.msra.mxu0 %v1552_v22  ;;  %1634 = vmatpush.bf16.msra.mxu1 %v1555_v23  ;;  %v1695_v53 = vsel %vm18818_vm1, %v1678_v44, 0 }
 0x184   :  { %12013 = vmatmul.msk.bf16.vlgmr.msra.gmra.mxu2 %vm149_vm2, %v12008_v42  ;;  %12014 = vmatmul.msk.bf16.vlgmr.msra.gmra.mxu3 %vm149_vm2, %v12008_v42  ;;  %v1676_v42 = vsel %vm1673_vm12, %v1666_v3, %v1668_v37  ;;  %v14029_v3 = vld [vmem:[%s18861_s1 + $0x58] sm:$0x30]  ;;  %vm18809_vm12 = vcmask 588800  }
 0x185   :  { %1707 = vmatpush.bf16.msra.mxu2 %v1683_v24  ;;  %1721 = vmatpush.bf16.msra.mxu3 %v1686_v25 }
 0x186   :  { %3379 = vrot.lane.b32.xlu1 %v14773_v13, %s14572_s10  ;;  %3377 = vrot.lane.b32.xlu0 %v14761_v7, %s14572_s10 }
 0x187   :  { %v736_v26 = vpop.f32.mrf.mxu2  ;;  %v750_v27 = vpop.f32.mrf.mxu3 }
 0x188   :  { %v15290_v28 = vadd.f32 %v736_v26, %v642_v51  ;;  %v15292_v29 = vadd.f32 %v750_v27, %v643_v52  ;;  %v710_v30 = vpop.f32.mrf.mxu0  ;;  %v724_v31 = vpop.f32.mrf.mxu1  ;;  %v1689_v51 = vsel %vm18818_vm1, %v1676_v42, 0  ;;  %v1692_v52 = vsel %vm18818_vm1, %v1677_v45, 0  ;;  %3381 = vrot.lane.b32.xlu2 %v14759_v6, %s14572_s10 }
 0x189   :  { %v789_v32 = vadd.f32 %v710_v30, %v15237_v47  ;;  %v790_v33 = vadd.f32 %v724_v31, %v15239_v48  ;;  %v1807_v55 = vpop.permute.xlu1 %1806 }
 0x18e   :  { %3383 = vrot.lane.b32.xlu0 %v14771_v12, %s14572_s10  ;;  %3385 = vrot.lane.b32.xlu1 %v14763_v8, %s14572_s10 }
 0x18f   :  { %v738_v39 = vpop.f32.mrf.mxu2  ;;  %v752_v40 = vpop.f32.mrf.mxu3 }
 0x190   :  { %v15310_v46 = vadd.f32 %v738_v39, %v648_v0  ;;  %v15312_v47 = vadd.f32 %v752_v40, %v649_v1  ;;  %v764_v48 = vpop.f32.mrf.mxu0  ;;  %v778_v43 = vpop.f32.mrf.mxu1  ;;  %3387 = vrot.lane.b32.xlu2 %v14775_v14, %s14572_s10  ;;  %s14573_s10 = smov 52  }
 0x191   :  { %v15316_v49 = vadd.f32 %v764_v48, %v15260_v60  ;;  %v15319_v50 = vadd.f32 %v778_v43, %v15263_v61  ;;  %v1809_v1 = vpop.permute.xlu2 %1808  ;;  %v1813_v4 = vpop.permute.xlu1 %1812 }
 0x192   :  { %12021 = vmatmul.msk.bf16.vlgmr.msrb.gmra.mxu0 %vm149_vm2, %v12020_v41  ;;  %12022 = vmatmul.msk.bf16.vlgmr.msrb.gmra.mxu1 %vm149_vm2, %v12020_v41  ;;  %v1818_v18 = vsel %vm1816_vm13, %v1807_v55, %v1809_v1  ;;  %v1820_v22 = vsel %vm1816_vm13, %v1811_v5, %v1813_v4  ;;  %v1948_v40 = vpop.permute.xlu0 %1947 }
 0x193   :  { %1735 = vmatpush.bf16.msrb.mxu0 %v1689_v51  ;;  %1749 = vmatpush.bf16.msrb.mxu1 %v1692_v52  ;;  %v1829_v26 = vsel %vm18818_vm1, %v1818_v18, 0 }
 0x194   :  { %12023 = vmatmul.msk.bf16.vlgmr.msrb.gmra.mxu2 %vm149_vm2, %v12020_v41  ;;  %12024 = vmatmul.msk.bf16.vlgmr.msrb.gmra.mxu3 %vm149_vm2, %v12020_v41 }
 0x195   :  { %1763 = vmatpush.bf16.msrb.mxu2 %v1695_v53  ;;  %1777 = vmatpush.bf16.msrb.mxu3 %v1698_v54 }
 0x196   :  { %3522 = vrot.lane.b32.xlu1 %v14773_v13, %s14573_s10  ;;  %3520 = vrot.lane.b32.xlu0 %v14761_v7, %s14573_s10 }
 0x197   :  { %v851_v57 = vpop.f32.mrf.mxu2  ;;  %v865_v58 = vpop.f32.mrf.mxu3 }
 0x198   :  { %v15329_v59 = vadd.f32 %v851_v57, %v783_v15  ;;  %v15331_v60 = vadd.f32 %v865_v58, %v784_v21  ;;  %v766_v61 = vpop.f32.mrf.mxu0  ;;  %v780_v62 = vpop.f32.mrf.mxu1  ;;  %v1819_v21 = vsel %vm1816_vm13, %v1809_v1, %v1811_v5  ;;  %v12043_v1 = vld [vmem:[%s18861_s1 + $0x60] sm:$0xf]  ;;  %3524 = vrot.lane.b32.xlu2 %v14759_v6, %s14573_s10  ;;  %v12067_v6 = vld [vmem:[%s18861_s1 + $0x70] sm:$0xf] }
 0x199   :  { %v793_v63 = vadd.f32 %v766_v61, %v15268_v16  ;;  %v794_v0 = vadd.f32 %v780_v62, %v15270_v17  ;;  %v12032_v16 = vor.u32 %v14029_v3, %v12031_v2  ;;  %v1817_v17 = vsel %vm1816_vm13, %v1805_v56, %v1807_v55  ;;  %v1950_v38 = vpop.permute.xlu1 %1949  ;;  %v14030_v2 = vld [vmem:[%s18861_s1 + $0x60] sm:$0x30] }
 0x19a   :  { %v1826_v25 = vsel %vm18818_vm1, %v1817_v17, 0  ;;  %v1832_v27 = vsel %vm18818_vm1, %v1819_v21, 0  ;;  %v1954_v3 = vpop.permute.xlu0 %1953 }
 0x19e   :  { %3528 = vrot.lane.b32.xlu1 %v14763_v8, %s14573_s10  ;;  %3526 = vrot.lane.b32.xlu0 %v14771_v12, %s14573_s10 }
 0x19f   :  { %v853_v9 = vpop.f32.mrf.mxu2  ;;  %v867_v10 = vpop.f32.mrf.mxu3 }
 0x1a0   :  { %v15349_v19 = vadd.f32 %v853_v9, %v789_v32  ;;  %v15351_v20 = vadd.f32 %v867_v10, %v790_v33  ;;  %v879_v11 = vpop.f32.mrf.mxu0  ;;  %v893_v15 = vpop.f32.mrf.mxu1  ;;  %v12044_v10 = vor.u32 %v14030_v2, %v12043_v1  ;;  %3530 = vrot.lane.b32.xlu2 %v14775_v14, %s14573_s10  ;;  %s18875_s10 = sld [smem:[#allocation21_spill]] }
 0x1a1   :  { %v928_v23 = vadd.f32 %v879_v11, %v15290_v28  ;;  %v929_v24 = vadd.f32 %v893_v15, %v15292_v29  ;;  %v1835_v28 = vsel %vm18818_vm1, %v1820_v22, 0  ;;  %v1815_v29 = vpop.permute.xlu2 %1814 }
 0x1a2   :  { %12025 = vmatmul.msk.bf16.vlgmr.msra.gmra.mxu0 %vm149_vm2, %v12020_v41  ;;  %12026 = vmatmul.msk.bf16.vlgmr.msra.gmra.mxu1 %vm149_vm2, %v12020_v41  ;;  %v1821_v45 = vsel %vm1816_vm13, %v1813_v4, %v1815_v29  ;;  %v1841_v53 = vsel %vm18818_vm1, %v1815_v29, 0  ;;  %vm2674_vm13 = vcmask 580608  }
 0x1a3   :  { %1850 = vmatpush.bf16.msra.mxu0 %v1826_v25  ;;  %1864 = vmatpush.bf16.msra.mxu1 %v1829_v26  ;;  %v1838_v52 = vsel %vm18818_vm1, %v1821_v45, 0 }
 0x1a4   :  { %12033 = vmatmul.msk.bf16.vlgmr.msra.gmra.mxu2 %vm149_vm2, %v12032_v16  ;;  %12034 = vmatmul.msk.bf16.vlgmr.msra.gmra.mxu3 %vm149_vm2, %v12032_v16 }
 0x1a5   :  { %1878 = vmatpush.bf16.msra.mxu2 %v1832_v27  ;;  %1892 = vmatpush.bf16.msra.mxu3 %v1835_v28  ;;  %v2091_v28 = vpop.permute.xlu0 %2090 }
 0x1a7   :  { %v907_v30 = vpop.f32.mrf.mxu2  ;;  %v921_v31 = vpop.f32.mrf.mxu3 }
 0x1a8   :  { %v15372_v32 = vadd.f32 %v907_v30, %v15316_v49  ;;  %v15375_v33 = vadd.f32 %v921_v31, %v15319_v50  ;;  %v881_v34 = vpop.f32.mrf.mxu0  ;;  %v895_v35 = vpop.f32.mrf.mxu1 }
 0x1a9   :  { %v934_v36 = vadd.f32 %v881_v34, %v15310_v46  ;;  %v935_v37 = vadd.f32 %v895_v35, %v15312_v47  ;;  %v1952_v39 = vpop.permute.xlu2 %1951  ;;  %v1960_v46 = vsel %vm1959_vm14, %v1948_v40, %v1950_v38 }
 0x1aa   :  { %v1961_v50 = vsel %vm1959_vm14, %v1950_v38, %v1952_v39  ;;  %v1969_v54 = vsel %vm18818_vm1, %v1960_v46, 0  ;;  %v12055_v38 = vld [vmem:[%s18861_s1 + $0x68] sm:$0xf] }
 0x1ab   :  { %v1972_v55 = vsel %vm18818_vm1, %v1961_v50, 0 }
 0x1af   :  { %v909_v41 = vpop.f32.mrf.mxu2  ;;  %v923_v42 = vpop.f32.mrf.mxu3 }
 0x1b0   :  { %v15380_v48 = vadd.f32 %v909_v41, %v793_v63  ;;  %v15382_v43 = vadd.f32 %v923_v42, %v794_v0  ;;  %v994_v44 = vpop.f32.mrf.mxu0  ;;  %v1008_v49 = vpop.f32.mrf.mxu1 }
 0x1b1   :  { %v1069_v47 = vadd.f32 %v994_v44, %v15329_v59  ;;  %v1070_v51 = vadd.f32 %v1008_v49, %v15331_v60  ;;  %v1956_v0 = vpop.permute.xlu1 %1955  ;;  %v1958_v4 = vpop.permute.xlu2 %1957 }
 0x1b2   :  { %12035 = vmatmul.msk.bf16.vlgmr.msrb.gmra.mxu0 %vm149_vm2, %v12032_v16  ;;  %12036 = vmatmul.msk.bf16.vlgmr.msrb.gmra.mxu1 %vm149_vm2, %v12032_v16  ;;  %v1963_v17 = vsel %vm1959_vm14, %v1954_v3, %v1956_v0  ;;  %v1964_v15 = vsel %vm1959_vm14, %v1956_v0, %v1958_v4  ;;  %v1984_v26 = vsel %vm18818_vm1, %v1958_v4, 0  ;;  %v2097_v41 = vpop.permute.xlu0 %2096 }
 0x1b3   :  { %1906 = vmatpush.bf16.msrb.mxu0 %v1838_v52  ;;  %1920 = vmatpush.bf16.msrb.mxu1 %v1841_v53  ;;  %v1981_v25 = vsel %vm18818_vm1, %v1964_v15, 0 }
 0x1b4   :  { %12037 = vmatmul.msk.bf16.vlgmr.msrb.gmra.mxu2 %vm149_vm2, %v12032_v16  ;;  %12038 = vmatmul.msk.bf16.vlgmr.msrb.gmra.mxu3 %vm149_vm2, %v12032_v16  ;;  %v1962_v16 = vsel %vm1959_vm14, %v1952_v39, %v1954_v3  ;;  %v14031_v39 = vld [vmem:[%s18861_s1 + $0x68] sm:$0x30]  ;;  %vm2817_vm14 = vcmask 572416  }
 0x1b5   :  { %1993 = vmatpush.bf16.msrb.mxu2 %v1969_v54  ;;  %2007 = vmatpush.bf16.msrb.mxu3 %v1972_v55 }
 0x1b7   :  { %v1022_v56 = vpop.f32.mrf.mxu2  ;;  %v1036_v57 = vpop.f32.mrf.mxu3 }
 0x1b8   :  { %v15402_v58 = vadd.f32 %v1022_v56, %v928_v23  ;;  %v15404_v59 = vadd.f32 %v1036_v57, %v929_v24  ;;  %v996_v60 = vpop.f32.mrf.mxu0  ;;  %v1010_v61 = vpop.f32.mrf.mxu1  ;;  %v1975_v23 = vsel %vm18818_vm1, %v1962_v16, 0  ;;  %v1978_v24 = vsel %vm18818_vm1, %v1963_v17, 0 }
 0x1b9   :  { %v1075_v62 = vadd.f32 %v996_v60, %v15349_v19  ;;  %v1076_v63 = vadd.f32 %v1010_v61, %v15351_v20  ;;  %v2093_v27 = vpop.permute.xlu1 %2092 }
 0x1bf   :  { %v1024_v5 = vpop.f32.mrf.mxu2  ;;  %v1038_v9 = vpop.f32.mrf.mxu3 }
 0x1c0   :  { %v15422_v18 = vadd.f32 %v1024_v5, %v934_v36  ;;  %v15424_v19 = vadd.f32 %v1038_v9, %v935_v37  ;;  %v1050_v20 = vpop.f32.mrf.mxu0  ;;  %v1064_v11 = vpop.f32.mrf.mxu1 }
 0x1c1   :  { %v15428_v21 = vadd.f32 %v1050_v20, %v15372_v32  ;;  %v15431_v22 = vadd.f32 %v1064_v11, %v15375_v33  ;;  %v2095_v37 = vpop.permute.xlu2 %2094  ;;  %v2099_v40 = vpop.permute.xlu1 %2098 }
 0x1c2   :  { %12045 = vmatmul.msk.bf16.vlgmr.msra.gmra.mxu0 %vm149_vm2, %v12044_v10  ;;  %12046 = vmatmul.msk.bf16.vlgmr.msra.gmra.mxu1 %vm149_vm2, %v12044_v10  ;;  %v2104_v44 = vsel %vm2102_vm15, %v2093_v27, %v2095_v37  ;;  %v2106_v52 = vsel %vm2102_vm15, %v2097_v41, %v2099_v40  ;;  %v2234_v9 = vpop.permute.xlu0 %2233 }
 0x1c3   :  { %2021 = vmatpush.bf16.msra.mxu0 %v1975_v23  ;;  %2035 = vmatpush.bf16.msra.mxu1 %v1978_v24  ;;  %v2115_v56 = vsel %vm18818_vm1, %v2104_v44, 0 }
 0x1c4   :  { %12047 = vmatmul.msk.bf16.vlgmr.msra.gmra.mxu2 %vm149_vm2, %v12044_v10  ;;  %12048 = vmatmul.msk.bf16.vlgmr.msra.gmra.mxu3 %vm149_vm2, %v12044_v10 }
 0x1c5   :  { %2049 = vmatpush.bf16.msra.mxu2 %v1981_v25  ;;  %2063 = vmatpush.bf16.msra.mxu3 %v1984_v26 }
 0x1c7   :  { %v1137_v29 = vpop.f32.mrf.mxu2  ;;  %v1151_v30 = vpop.f32.mrf.mxu3 }
 0x1c8   :  { %v15441_v31 = vadd.f32 %v1137_v29, %v1069_v47  ;;  %v15443_v32 = vadd.f32 %v1151_v30, %v1070_v51  ;;  %v1052_v33 = vpop.f32.mrf.mxu0  ;;  %v1066_v34 = vpop.f32.mrf.mxu1  ;;  %v2105_v51 = vsel %vm2102_vm15, %v2095_v37, %v2097_v41 }
 0x1c9   :  { %v1079_v35 = vadd.f32 %v1052_v33, %v15380_v48  ;;  %v1080_v36 = vadd.f32 %v1066_v34, %v15382_v43  ;;  %v12056_v48 = vor.u32 %v14031_v39, %v12055_v38  ;;  %v2103_v43 = vsel %vm2102_vm15, %v2091_v28, %v2093_v27  ;;  %v2236_v4 = vpop.permute.xlu1 %2235 }
 0x1ca   :  { %v2112_v55 = vsel %vm18818_vm1, %v2103_v43, 0  ;;  %v2118_v57 = vsel %vm18818_vm1, %v2105_v51, 0 }
 0x1cf   :  { %v1139_v42 = vpop.f32.mrf.mxu2  ;;  %v1153_v45 = vpop.f32.mrf.mxu3 }
 0x1d0   :  { %v15461_v49 = vadd.f32 %v1139_v42, %v1075_v62  ;;  %v15463_v50 = vadd.f32 %v1153_v45, %v1076_v63  ;;  %v1165_v46 = vpop.f32.mrf.mxu0  ;;  %v1179_v47 = vpop.f32.mrf.mxu1 }
 0x1d1   :  { %v1214_v53 = vadd.f32 %v1165_v46, %v15402_v58  ;;  %v1215_v54 = vadd.f32 %v1179_v47, %v15404_v59  ;;  %v2121_v58 = vsel %vm18818_vm1, %v2106_v52, 0  ;;  %v2101_v59 = vpop.permute.xlu2 %2100  ;;  %v2242_v34 = vpop.permute.xlu1 %2241 }
 0x1d2   :  { %12049 = vmatmul.msk.bf16.vlgmr.msrb.gmra.mxu0 %vm149_vm2, %v12044_v10  ;;  %12050 = vmatmul.msk.bf16.vlgmr.msrb.gmra.mxu1 %vm149_vm2, %v12044_v10  ;;  %v2107_v17 = vsel %vm2102_vm15, %v2099_v40, %v2101_v59  ;;  %v2127_v25 = vsel %vm18818_vm1, %v2101_v59, 0  ;;  %vm2960_vm15 = vcmask 457728  }
 0x1d3   :  { %2136 = vmatpush.bf16.msrb.mxu0 %v2112_v55  ;;  %2150 = vmatpush.bf16.msrb.mxu1 %v2115_v56  ;;  %v2124_v24 = vsel %vm18818_vm1, %v2107_v17, 0 }
 0x1d4   :  { %12057 = vmatmul.msk.bf16.vlgmr.msrb.gmra.mxu2 %vm149_vm2, %v12056_v48  ;;  %12058 = vmatmul.msk.bf16.vlgmr.msrb.gmra.mxu3 %vm149_vm2, %v12056_v48 }
 0x1d5   :  { %2164 = vmatpush.bf16.msrb.mxu2 %v2118_v57  ;;  %2178 = vmatpush.bf16.msrb.mxu3 %v2121_v58 }
 0x1d7   :  { %v1193_v60 = vpop.f32.mrf.mxu2  ;;  %v1207_v61 = vpop.f32.mrf.mxu3 }
 0x1d8   :  { %v15484_v62 = vadd.f32 %v1193_v60, %v15428_v21  ;;  %v15487_v63 = vadd.f32 %v1207_v61, %v15431_v22  ;;  %v1167_v0 = vpop.f32.mrf.mxu0  ;;  %v1181_v1 = vpop.f32.mrf.mxu1 }
 0x1d9   :  { %v1220_v2 = vadd.f32 %v1167_v0, %v15422_v18  ;;  %v1221_v3 = vadd.f32 %v1181_v1, %v15424_v19  ;;  %v2238_v5 = vpop.permute.xlu2 %2237  ;;  %v2246_v18 = vsel %vm2245_vm9, %v2234_v9, %v2236_v4  ;;  %v2379_v51 = vpop.permute.xlu1 %2378 }
 0x1da   :  { %v2247_v22 = vsel %vm2245_vm9, %v2236_v4, %v2238_v5  ;;  %v2255_v26 = vsel %vm18818_vm1, %v2246_v18, 0 }
 0x1db   :  { %v2258_v27 = vsel %vm18818_vm1, %v2247_v22, 0 }
 0x1df   :  { %v1195_v10 = vpop.f32.mrf.mxu2  ;;  %v1209_v16 = vpop.f32.mrf.mxu3 }
 0x1e0   :  { %v15492_v20 = vadd.f32 %v1195_v10, %v1079_v35  ;;  %v15494_v11 = vadd.f32 %v1209_v16, %v1080_v36  ;;  %v1280_v15 = vpop.f32.mrf.mxu0  ;;  %v1294_v21 = vpop.f32.mrf.mxu1  ;;  %v14032_v35 = vld [vmem:[%s18861_s1 + $0x70] sm:$0x30] }
 0x1e1   :  { %v1355_v19 = vadd.f32 %v1280_v15, %v15441_v31  ;;  %v1356_v23 = vadd.f32 %v1294_v21, %v15443_v32  ;;  %v2240_v36 = vpop.permute.xlu0 %2239  ;;  %v2244_v37 = vpop.permute.xlu2 %2243  ;;  %v12068_v40 = vor.u32 %v14032_v35, %v12067_v6 }
 0x1e2   :  { %12059 = vmatmul.msk.bf16.vlgmr.msra.gmra.mxu0 %vm149_vm2, %v12056_v48  ;;  %12060 = vmatmul.msk.bf16.vlgmr.msra.gmra.mxu1 %vm149_vm2, %v12056_v48  ;;  %v2248_v41 = vsel %vm2245_vm9, %v2238_v5, %v2240_v36  ;;  %v2249_v8 = vsel %vm2245_vm9, %v2240_v36, %v2242_v34  ;;  %v2250_v43 = vsel %vm2245_vm9, %v2242_v34, %v2244_v37  ;;  %v2270_v47 = vsel %vm18818_vm1, %v2244_v37, 0  ;;  %v2385_v0 = vpop.permute.xlu1 %2384 }
 0x1e3   :  { %2192 = vmatpush.bf16.msra.mxu0 %v2124_v24  ;;  %2206 = vmatpush.bf16.msra.mxu1 %v2127_v25  ;;  %v2264_v46 = vsel %vm18818_vm1, %v2249_v8, 0  ;;  %v2267_v14 = vsel %vm18818_vm1, %v2250_v43, 0  ;;  %vm3103_vm9 = vcmask 449536  }
 0x1e4   :  { %12061 = vmatmul.msk.bf16.vlgmr.msra.gmra.mxu2 %vm149_vm2, %v12056_v48  ;;  %12062 = vmatmul.msk.bf16.vlgmr.msra.gmra.mxu3 %vm149_vm2, %v12056_v48 }
 0x1e5   :  { %2279 = vmatpush.bf16.msra.mxu2 %v2255_v26  ;;  %2293 = vmatpush.bf16.msra.mxu3 %v2258_v27 }
 0x1e7   :  { %v1308_v13 = vpop.f32.mrf.mxu2  ;;  %v1322_v28 = vpop.f32.mrf.mxu3 }
 0x1e8   :  { %v15514_v7 = vadd.f32 %v1308_v13, %v1214_v53  ;;  %v15516_v29 = vadd.f32 %v1322_v28, %v1215_v54  ;;  %v1282_v30 = vpop.f32.mrf.mxu0  ;;  %v1296_v31 = vpop.f32.mrf.mxu1 }
 0x1e9   :  { %v1361_v32 = vadd.f32 %v1282_v30, %v15461_v49  ;;  %v1362_v33 = vadd.f32 %v1296_v31, %v15463_v50  ;;  %v2261_v50 = vsel %vm18818_vm1, %v2248_v41, 0  ;;  %v2377_v52 = vpop.permute.xlu0 %2376  ;;  %v2381_v61 = vpop.permute.xlu2 %2380 }
 0x1ea   :  { %v2389_v5 = vsel %vm2388_vm10, %v2377_v52, %v2379_v51  ;;  %v2390_v9 = vsel %vm2388_vm10, %v2379_v51, %v2381_v61 }
 0x1eb   :  { %v2398_v18 = vsel %vm18818_vm1, %v2389_v5, 0 }
 0x1ef   :  { %v1310_v38 = vpop.f32.mrf.mxu2  ;;  %v1324_v39 = vpop.f32.mrf.mxu3 }
 0x1f0   :  { %v15534_v12 = vadd.f32 %v1310_v38, %v1220_v2  ;;  %v15536_v42 = vadd.f32 %v1324_v39, %v1221_v3  ;;  %v1336_v45 = vpop.f32.mrf.mxu0  ;;  %v1350_v48 = vpop.f32.mrf.mxu1 }
 0x1f1   :  { %v1359_v44 = vadd.f32 %v1336_v45, %v15484_v62  ;;  %v1360_v49 = vadd.f32 %v1350_v48, %v15487_v63  ;;  %v12079_v62 = vld [vmem:[%s18861_s1 + $0x78] sm:$0xf]  ;;  %v14033_v63 = vld [vmem:[%s18861_s1 + $0x78] sm:$0x30]  ;;  %v2383_v1 = vpop.permute.xlu0 %2382  ;;  %v2387_v25 = vpop.permute.xlu2 %2386 }
 0x1f2   :  { %12069 = vmatmul.msk.bf16.vlgmr.msrb.gmra.mxu0 %vm149_vm2, %v12068_v40  ;;  %12070 = vmatmul.msk.bf16.vlgmr.msrb.gmra.mxu1 %vm149_vm2, %v12068_v40  ;;  %v12080_v4 = vor.u32 %v14033_v63, %v12079_v62  ;;  %v2392_v15 = vsel %vm2388_vm10, %v2383_v1, %v2385_v0  ;;  %v2393_v36 = vsel %vm2388_vm10, %v2385_v0, %v2387_v25  ;;  %v2413_v48 = vsel %vm18818_vm1, %v2387_v25, 0 }
 0x1f3   :  { %2307 = vmatpush.bf16.msrb.mxu0 %v2261_v50  ;;  %2321 = vmatpush.bf16.msrb.mxu1 %v2264_v46  ;;  %v2407_v24 = vsel %vm18818_vm1, %v2392_v15, 0  ;;  %v2410_v45 = vsel %vm18818_vm1, %v2393_v36, 0 }
 0x1f4   :  { %12071 = vmatmul.msk.bf16.vlgmr.msrb.gmra.mxu2 %vm149_vm2, %v12068_v40  ;;  %12072 = vmatmul.msk.bf16.vlgmr.msrb.gmra.mxu3 %vm149_vm2, %v12068_v40 }
 0x1f5   :  { %2335 = vmatpush.bf16.msrb.mxu2 %v2267_v14  ;;  %2349 = vmatpush.bf16.msrb.mxu3 %v2270_v47 }
 0x1f7   :  { %v1423_v53 = vpop.f32.mrf.mxu2  ;;  %v1437_v54 = vpop.f32.mrf.mxu3 }
 0x1f8   :  { %v1498_v55 = vadd.f32 %v1423_v53, %v1355_v19  ;;  %v1499_v56 = vadd.f32 %v1437_v54, %v1356_v23  ;;  %v1338_v57 = vpop.f32.mrf.mxu0  ;;  %v1352_v58 = vpop.f32.mrf.mxu1  ;;  %v2401_v19 = vsel %vm18818_vm1, %v2390_v9, 0 }
 0x1f9   :  { %v1365_v59 = vadd.f32 %v1338_v57, %v15492_v20  ;;  %v1366_v60 = vadd.f32 %v1352_v58, %v15494_v11  ;;  %v2391_v11 = vsel %vm2388_vm10, %v2381_v61, %v2383_v1  ;;  %v2520_v34 = vpop.permute.xlu0 %2519  ;;  %vm3246_vm10 = vcmask 441344  }
 0x1fa   :  { %v2404_v23 = vsel %vm18818_vm1, %v2391_v11, 0 }
 0x1ff   :  { %v1425_v2 = vpop.f32.mrf.mxu2  ;;  %v1439_v3 = vpop.f32.mrf.mxu3 }
 0x200   :  { %v1504_v10 = vadd.f32 %v1425_v2, %v1361_v32  ;;  %v1505_v16 = vadd.f32 %v1439_v3, %v1362_v33  ;;  %v1451_v17 = vpop.f32.mrf.mxu0  ;;  %v1465_v20 = vpop.f32.mrf.mxu1 }
 0x201   :  { %v1500_v21 = vadd.f32 %v1451_v17, %v15514_v7  ;;  %v1501_v22 = vadd.f32 %v1465_v20, %v15516_v29  ;;  %v2522_v32 = vpop.permute.xlu1 %2521  ;;  %v2524_v33 = vpop.permute.xlu2 %2523 }
 0x202   :  { %12073 = vmatmul.msk.bf16.vlgmr.msra.gmra.mxu0 %vm149_vm2, %v12068_v40  ;;  %12074 = vmatmul.msk.bf16.vlgmr.msra.gmra.mxu1 %vm149_vm2, %v12068_v40  ;;  %v2533_v41 = vsel %vm18809_vm12, %v2522_v32, %v2524_v33  ;;  %v2532_v8 = vsel %vm18809_vm12, %v2520_v34, %v2522_v32  ;;  %v2526_v57 = vpop.permute.xlu0 %2525 }
 0x203   :  { %2422 = vmatpush.bf16.msra.mxu0 %v2398_v18  ;;  %2436 = vmatpush.bf16.msra.mxu1 %v2401_v19  ;;  %v2541_v43 = vsel %vm18818_vm1, %v2532_v8, 0  ;;  %v2534_v62 = vsel %vm18809_vm12, %v2524_v33, %v2526_v57 }
 0x204   :  { %12081 = vmatmul.msk.bf16.vlgmr.msra.gmra.mxu2 %vm149_vm2, %v12080_v4  ;;  %12082 = vmatmul.msk.bf16.vlgmr.msra.gmra.mxu3 %vm149_vm2, %v12080_v4 }
 0x205   :  { %2450 = vmatpush.bf16.msra.mxu2 %v2404_v23  ;;  %2464 = vmatpush.bf16.msra.mxu3 %v2407_v24 }
 0x207   :  { %v1479_v26 = vpop.f32.mrf.mxu2  ;;  %v1493_v27 = vpop.f32.mrf.mxu3 }
 0x208   :  { %v1502_v13 = vadd.f32 %v1479_v26, %v1359_v44  ;;  %v1503_v28 = vadd.f32 %v1493_v27, %v1360_v49  ;;  %v1453_v7 = vpop.f32.mrf.mxu0  ;;  %v1467_v29 = vpop.f32.mrf.mxu1  ;;  %v2544_v44 = vsel %vm18818_vm1, %v2533_v41, 0 }
 0x209   :  { %v1506_v30 = vadd.f32 %v1453_v7, %v15534_v12  ;;  %v1507_v31 = vadd.f32 %v1467_v29, %v15536_v42  ;;  %v2528_v54 = vpop.permute.xlu1 %2527  ;;  %v2530_v58 = vpop.permute.xlu2 %2529 }
 0x20a   :  { %v2535_v63 = vsel %vm18809_vm12, %v2526_v57, %v2528_v54  ;;  %v2556_v20 = vsel %vm18818_vm1, %v2530_v58, 0  ;;  %v2663_v15 = vpop.permute.xlu0 %2662 }
 0x20f   :  { %v1481_v6 = vpop.f32.mrf.mxu2  ;;  %v1495_v35 = vpop.f32.mrf.mxu3 }
 0x210   :  { %v15574_v37 = vadd.f32 %v1481_v6, %v1365_v59  ;;  %v15576_v38 = vadd.f32 %v1495_v35, %v1366_v60  ;;  %v1566_v39 = vpop.f32.mrf.mxu0  ;;  %v1580_v40 = vpop.f32.mrf.mxu1 }
 0x211   :  { %v1641_v12 = vadd.f32 %v1566_v39, %v1498_v55  ;;  %v1642_v42 = vadd.f32 %v1580_v40, %v1499_v56  ;;  %v12091_v55 = vld [vmem:[%s18861_s1 + $0x80] sm:$0xf]  ;;  %v14034_v56 = vld [vmem:[%s18861_s1 + $0x80] sm:$0x30]  ;;  %v2665_v11 = vpop.permute.xlu1 %2664  ;;  %v2667_v27 = vpop.permute.xlu2 %2666 }
 0x212   :  { %12083 = vmatmul.msk.bf16.vlgmr.msrb.gmra.mxu0 %vm149_vm2, %v12080_v4  ;;  %12084 = vmatmul.msk.bf16.vlgmr.msrb.gmra.mxu1 %vm149_vm2, %v12080_v4  ;;  %v12092_v61 = vor.u32 %v14034_v56, %v12091_v55  ;;  %v2669_v29 = vpop.permute.xlu0 %2668  ;;  %v2675_v33 = vsel %vm2674_vm13, %v2663_v15, %v2665_v11  ;;  %v2676_v34 = vsel %vm2674_vm13, %v2665_v11, %v2667_v27 }
 0x213   :  { %2478 = vmatpush.bf16.msrb.mxu0 %v2410_v45  ;;  %2492 = vmatpush.bf16.msrb.mxu1 %v2413_v48  ;;  %v2684_v8 = vsel %vm18818_vm1, %v2675_v33, 0 }
 0x214   :  { %12085 = vmatmul.msk.bf16.vlgmr.msrb.gmra.mxu2 %vm149_vm2, %v12080_v4  ;;  %12086 = vmatmul.msk.bf16.vlgmr.msrb.gmra.mxu3 %vm149_vm2, %v12080_v4  ;;  %v2536_v4 = vsel %vm18809_vm12, %v2528_v54, %v2530_v58  ;;  %vm18811_vm12 = vcmask 769024  }
 0x215   :  { %2565 = vmatpush.bf16.msrb.mxu2 %v2541_v43  ;;  %2579 = vmatpush.bf16.msrb.mxu3 %v2544_v44  ;;  %v2553_v17 = vsel %vm18818_vm1, %v2536_v4, 0 }
 0x217   :  { %v1594_v49 = vpop.f32.mrf.mxu2  ;;  %v1608_v50 = vpop.f32.mrf.mxu3 }
 0x218   :  { %v15588_v46 = vadd.f32 %v1594_v49, %v1500_v21  ;;  %v1644_v14 = vadd.f32 %v1608_v50, %v1501_v22  ;;  %v1568_v47 = vpop.f32.mrf.mxu0  ;;  %v1582_v51 = vpop.f32.mrf.mxu1 }
 0x219   :  { %v1647_v52 = vadd.f32 %v1568_v47, %v1504_v10  ;;  %v1648_v53 = vadd.f32 %v1582_v51, %v1505_v16  ;;  %v2547_v10 = vsel %vm18818_vm1, %v2534_v62, 0  ;;  %v2550_v16 = vsel %vm18818_vm1, %v2535_v63, 0  ;;  %v2671_v7 = vpop.permute.xlu1 %2670  ;;  %v2673_v48 = vpop.permute.xlu2 %2672 }
 0x21a   :  { %v2678_v39 = vsel %vm2674_vm13, %v2669_v29, %v2671_v7  ;;  %v2806_v54 = vpop.permute.xlu0 %2805  ;;  %v2679_v57 = vsel %vm2674_vm13, %v2671_v7, %v2673_v48 }
 0x21b   :  { %v2693_v45 = vsel %vm18818_vm1, %v2678_v39, 0 }
 0x21f   :  { %v1596_v59 = vpop.f32.mrf.mxu2  ;;  %v1610_v60 = vpop.f32.mrf.mxu3 }
 0x220   :  { %v15598_v0 = vadd.f32 %v1596_v59, %v1506_v30  ;;  %v15600_v1 = vadd.f32 %v1610_v60, %v1507_v31  ;;  %v1622_v2 = vpop.f32.mrf.mxu0  ;;  %v1636_v3 = vpop.f32.mrf.mxu1 }
 0x221   :  { %v1645_v5 = vadd.f32 %v1622_v2, %v1502_v13  ;;  %v1646_v9 = vadd.f32 %v1636_v3, %v1503_v28  ;;  %v12103_v13 = vld [vmem:[%s18861_s1 + $0x88] sm:$0xf]  ;;  %v14035_v28 = vld [vmem:[%s18861_s1 + $0x88] sm:$0x30]  ;;  %v2696_v2 = vsel %vm18818_vm1, %v2679_v57, 0  ;;  %v2699_v3 = vsel %vm18818_vm1, %v2673_v48, 0 }
 0x222   :  { %12093 = vmatmul.msk.bf16.vlgmr.msra.gmra.mxu0 %vm149_vm2, %v12092_v61  ;;  %12094 = vmatmul.msk.bf16.vlgmr.msra.gmra.mxu1 %vm149_vm2, %v12092_v61  ;;  %v12104_v32 = vor.u32 %v14035_v28, %v12103_v13 }
 0x223   :  { %2593 = vmatpush.bf16.msra.mxu0 %v2547_v10  ;;  %2607 = vmatpush.bf16.msra.mxu1 %v2550_v16 }
 0x224   :  { %12095 = vmatmul.msk.bf16.vlgmr.msra.gmra.mxu2 %vm149_vm2, %v12092_v61  ;;  %12096 = vmatmul.msk.bf16.vlgmr.msra.gmra.mxu3 %vm149_vm2, %v12092_v61 }
 0x225   :  { %2621 = vmatpush.bf16.msra.mxu2 %v2553_v17  ;;  %2635 = vmatpush.bf16.msra.mxu3 %v2556_v20 }
 0x227   :  { %v1709_v21 = vpop.f32.mrf.mxu2  ;;  %v1723_v22 = vpop.f32.mrf.mxu3 }
 0x228   :  { %v1784_v18 = vadd.f32 %v1709_v21, %v1641_v12  ;;  %v1785_v19 = vadd.f32 %v1723_v22, %v1642_v42  ;;  %v1624_v23 = vpop.f32.mrf.mxu0  ;;  %v1638_v24 = vpop.f32.mrf.mxu1  ;;  %v2687_v12 = vsel %vm18818_vm1, %v2676_v34, 0 }
 0x229   :  { %v1651_v25 = vadd.f32 %v1624_v23, %v15574_v37  ;;  %v1652_v26 = vadd.f32 %v1638_v24, %v15576_v38  ;;  %v2677_v38 = vsel %vm2674_vm13, %v2667_v27, %v2669_v29  ;;  %v2812_v23 = vpop.permute.xlu0 %2811  ;;  %vm3389_vm13 = vcmask 433152  }
 0x22a   :  { %v2690_v42 = vsel %vm18818_vm1, %v2677_v38, 0 }
 0x22f   :  { %v1711_v30 = vpop.f32.mrf.mxu2  ;;  %v1725_v31 = vpop.f32.mrf.mxu3 }
 0x230   :  { %v1790_v6 = vadd.f32 %v1711_v30, %v1647_v52  ;;  %v1791_v35 = vadd.f32 %v1725_v31, %v1648_v53  ;;  %v1737_v36 = vpop.f32.mrf.mxu0  ;;  %v1751_v37 = vpop.f32.mrf.mxu1 }
 0x231   :  { %v1786_v40 = vadd.f32 %v1737_v36, %v15588_v46  ;;  %v1787_v41 = vadd.f32 %v1751_v37, %v1644_v14  ;;  %v2808_v52 = vpop.permute.xlu1 %2807  ;;  %v2810_v53 = vpop.permute.xlu2 %2809 }
 0x232   :  { %12097 = vmatmul.msk.bf16.vlgmr.msrb.gmra.mxu0 %vm149_vm2, %v12092_v61  ;;  %12098 = vmatmul.msk.bf16.vlgmr.msrb.gmra.mxu1 %vm149_vm2, %v12092_v61  ;;  %v2819_v62 = vsel %vm2817_vm14, %v2808_v52, %v2810_v53  ;;  %v2818_v63 = vsel %vm2817_vm14, %v2806_v54, %v2808_v52  ;;  %v2820_v13 = vsel %vm2817_vm14, %v2810_v53, %v2812_v23  ;;  %v2949_v39 = vpop.permute.xlu0 %2948 }
 0x233   :  { %2708 = vmatpush.bf16.msrb.mxu0 %v2684_v8  ;;  %2722 = vmatpush.bf16.msrb.mxu1 %v2687_v12  ;;  %v2827_v4 = vsel %vm18818_vm1, %v2818_v63, 0 }
 0x234   :  { %12105 = vmatmul.msk.bf16.vlgmr.msrb.gmra.mxu2 %vm149_vm2, %v12104_v32  ;;  %12106 = vmatmul.msk.bf16.vlgmr.msrb.gmra.mxu3 %vm149_vm2, %v12104_v32 }
 0x235   :  { %2736 = vmatpush.bf16.msrb.mxu2 %v2690_v42  ;;  %2750 = vmatpush.bf16.msrb.mxu3 %v2693_v45 }
 0x237   :  { %v1765_v43 = vpop.f32.mrf.mxu2  ;;  %v1779_v44 = vpop.f32.mrf.mxu3 }
 0x238   :  { %v1788_v49 = vadd.f32 %v1765_v43, %v1645_v5  ;;  %v1789_v50 = vadd.f32 %v1779_v44, %v1646_v9  ;;  %v1739_v46 = vpop.f32.mrf.mxu0  ;;  %v1753_v14 = vpop.f32.mrf.mxu1  ;;  %v2830_v5 = vsel %vm18818_vm1, %v2819_v62, 0 }
 0x239   :  { %v1792_v47 = vadd.f32 %v1739_v46, %v15598_v0  ;;  %v1793_v51 = vadd.f32 %v1753_v14, %v15600_v1  ;;  %v2814_v22 = vpop.permute.xlu1 %2813  ;;  %v2816_v24 = vpop.permute.xlu2 %2815 }
 0x23a   :  { %v2821_v28 = vsel %vm2817_vm14, %v2812_v23, %v2814_v22  ;;  %v2842_v37 = vsel %vm18818_vm1, %v2816_v24, 0  ;;  %v2955_v14 = vpop.permute.xlu0 %2954 }
 0x23f   :  { %v1767_v55 = vpop.f32.mrf.mxu2  ;;  %v1781_v56 = vpop.f32.mrf.mxu3 }
 0x240   :  { %v15635_v58 = vadd.f32 %v1767_v55, %v1651_v25  ;;  %v15637_v59 = vadd.f32 %v1781_v56, %v1652_v26  ;;  %v1852_v60 = vpop.f32.mrf.mxu0  ;;  %v1866_v61 = vpop.f32.mrf.mxu1 }
 0x241   :  { %v1927_v0 = vadd.f32 %v1852_v60, %v1784_v18  ;;  %v1928_v1 = vadd.f32 %v1866_v61, %v1785_v19  ;;  %v12115_v18 = vld [vmem:[%s18861_s1 + $0x90] sm:$0xf]  ;;  %v14036_v19 = vld [vmem:[%s18861_s1 + $0x90] sm:$0x30]  ;;  %v2951_v38 = vpop.permute.xlu1 %2950  ;;  %v2953_v44 = vpop.permute.xlu2 %2952 }
 0x242   :  { %12107 = vmatmul.msk.bf16.vlgmr.msra.gmra.mxu0 %vm149_vm2, %v12104_v32  ;;  %12108 = vmatmul.msk.bf16.vlgmr.msra.gmra.mxu1 %vm149_vm2, %v12104_v32  ;;  %v12116_v27 = vor.u32 %v14036_v19, %v12115_v18  ;;  %v2961_v53 = vsel %vm2960_vm15, %v2949_v39, %v2951_v38  ;;  %v2962_v54 = vsel %vm2960_vm15, %v2951_v38, %v2953_v44 }
 0x243   :  { %2764 = vmatpush.bf16.msra.mxu0 %v2696_v2  ;;  %2778 = vmatpush.bf16.msra.mxu1 %v2699_v3  ;;  %v2970_v63 = vsel %vm18818_vm1, %v2961_v53, 0 }
 0x244   :  { %12109 = vmatmul.msk.bf16.vlgmr.msra.gmra.mxu2 %vm149_vm2, %v12104_v32  ;;  %12110 = vmatmul.msk.bf16.vlgmr.msra.gmra.mxu3 %vm149_vm2, %v12104_v32  ;;  %v2822_v32 = vsel %vm2817_vm14, %v2814_v22, %v2816_v24  ;;  %v3092_v22 = vpop.permute.xlu0 %3091  ;;  %vm3532_vm14 = vcmask 424960  }
 0x245   :  { %2851 = vmatpush.bf16.msra.mxu2 %v2827_v4  ;;  %2865 = vmatpush.bf16.msra.mxu3 %v2830_v5  ;;  %v2839_v36 = vsel %vm18818_vm1, %v2822_v32, 0 }
 0x247   :  { %v1880_v9 = vpop.f32.mrf.mxu2  ;;  %v1894_v10 = vpop.f32.mrf.mxu3 }
 0x248   :  { %v15649_v16 = vadd.f32 %v1880_v9, %v1786_v40  ;;  %v1930_v17 = vadd.f32 %v1894_v10, %v1787_v41  ;;  %v1854_v20 = vpop.f32.mrf.mxu0  ;;  %v1868_v11 = vpop.f32.mrf.mxu1 }
 0x249   :  { %v1933_v15 = vadd.f32 %v1854_v20, %v1790_v6  ;;  %v1934_v21 = vadd.f32 %v1868_v11, %v1791_v35  ;;  %v2833_v6 = vsel %vm18818_vm1, %v2820_v13, 0  ;;  %v2836_v35 = vsel %vm18818_vm1, %v2821_v28, 0  ;;  %v2957_v46 = vpop.permute.xlu1 %2956  ;;  %v2959_v3 = vpop.permute.xlu2 %2958 }
 0x24a   :  { %v2964_v60 = vsel %vm2960_vm15, %v2955_v14, %v2957_v46  ;;  %v2965_v23 = vsel %vm2960_vm15, %v2957_v46, %v2959_v3 }
 0x24b   :  { %v2979_v2 = vsel %vm18818_vm1, %v2964_v60, 0 }
 0x24f   :  { %v1882_v25 = vpop.f32.mrf.mxu2  ;;  %v1896_v26 = vpop.f32.mrf.mxu3 }
 0x250   :  { %v15659_v7 = vadd.f32 %v1882_v25, %v1792_v47  ;;  %v15661_v29 = vadd.f32 %v1896_v26, %v1793_v51  ;;  %v1908_v30 = vpop.f32.mrf.mxu0  ;;  %v1922_v31 = vpop.f32.mrf.mxu1 }
 0x251   :  { %v1931_v33 = vadd.f32 %v1908_v30, %v1788_v49  ;;  %v1932_v34 = vadd.f32 %v1922_v31, %v1789_v50  ;;  %v12127_v49 = vld [vmem:[%s18861_s1 + $0x98] sm:$0xf]  ;;  %v14037_v50 = vld [vmem:[%s18861_s1 + $0x98] sm:$0x30]  ;;  %v2982_v30 = vsel %vm18818_vm1, %v2965_v23, 0  ;;  %v2985_v31 = vsel %vm18818_vm1, %v2959_v3, 0 }
 0x252   :  { %12117 = vmatmul.msk.bf16.vlgmr.msrb.gmra.mxu0 %vm149_vm2, %v12116_v27  ;;  %12118 = vmatmul.msk.bf16.vlgmr.msrb.gmra.mxu1 %vm149_vm2, %v12116_v27  ;;  %v12128_v52 = vor.u32 %v14037_v50, %v12127_v49 }
 0x253   :  { %2879 = vmatpush.bf16.msrb.mxu0 %v2833_v6  ;;  %2893 = vmatpush.bf16.msrb.mxu1 %v2836_v35 }
 0x254   :  { %12119 = vmatmul.msk.bf16.vlgmr.msrb.gmra.mxu2 %vm149_vm2, %v12116_v27  ;;  %12120 = vmatmul.msk.bf16.vlgmr.msrb.gmra.mxu3 %vm149_vm2, %v12116_v27 }
 0x255   :  { %2907 = vmatpush.bf16.msrb.mxu2 %v2839_v36  ;;  %2921 = vmatpush.bf16.msrb.mxu3 %v2842_v37 }
 0x257   :  { %v1995_v40 = vpop.f32.mrf.mxu2  ;;  %v2009_v41 = vpop.f32.mrf.mxu3 }
 0x258   :  { %v2070_v8 = vadd.f32 %v1995_v40, %v1927_v0  ;;  %v2071_v12 = vadd.f32 %v2009_v41, %v1928_v1  ;;  %v1910_v42 = vpop.f32.mrf.mxu0  ;;  %v1924_v45 = vpop.f32.mrf.mxu1  ;;  %v2973_v0 = vsel %vm18818_vm1, %v2962_v54, 0 }
 0x259   :  { %v1937_v48 = vadd.f32 %v1910_v42, %v15635_v58  ;;  %v1938_v43 = vadd.f32 %v1924_v45, %v15637_v59  ;;  %v2963_v59 = vsel %vm2960_vm15, %v2953_v44, %v2955_v14  ;;  %v3098_v42 = vpop.permute.xlu0 %3097  ;;  %vm3722_vm15 = vcmask 60416  }
 0x25a   :  { %v2976_v1 = vsel %vm18818_vm1, %v2963_v59, 0 }
 0x25f   :  { %v1997_v47 = vpop.f32.mrf.mxu2  ;;  %v2011_v51 = vpop.f32.mrf.mxu3 }
 0x260   :  { %v2076_v55 = vadd.f32 %v1997_v47, %v1933_v15  ;;  %v2077_v56 = vadd.f32 %v2011_v51, %v1934_v21  ;;  %v2023_v57 = vpop.f32.mrf.mxu0  ;;  %v2037_v58 = vpop.f32.mrf.mxu1 }
 0x261   :  { %v2072_v61 = vadd.f32 %v2023_v57, %v15649_v16  ;;  %v2073_v62 = vadd.f32 %v2037_v58, %v1930_v17  ;;  %v3094_v15 = vpop.permute.xlu1 %3093  ;;  %v3096_v21 = vpop.permute.xlu2 %3095 }
 0x262   :  { %12121 = vmatmul.msk.bf16.vlgmr.msra.gmra.mxu0 %vm149_vm2, %v12116_v27  ;;  %12122 = vmatmul.msk.bf16.vlgmr.msra.gmra.mxu1 %vm149_vm2, %v12116_v27  ;;  %v3105_v13 = vsel %vm3103_vm9, %v3094_v15, %v3096_v21  ;;  %v3104_v28 = vsel %vm3103_vm9, %v3092_v22, %v3094_v15  ;;  %v3106_v49 = vsel %vm3103_vm9, %v3096_v21, %v3098_v42  ;;  %v3235_v60 = vpop.permute.xlu0 %3234 }
 0x263   :  { %2994 = vmatpush.bf16.msra.mxu0 %v2970_v63  ;;  %3008 = vmatpush.bf16.msra.mxu1 %v2973_v0  ;;  %v3113_v32 = vsel %vm18818_vm1, %v3104_v28, 0 }
 0x264   :  { %12129 = vmatmul.msk.bf16.vlgmr.msra.gmra.mxu2 %vm149_vm2, %v12128_v52  ;;  %12130 = vmatmul.msk.bf16.vlgmr.msra.gmra.mxu3 %vm149_vm2, %v12128_v52 }
 0x265   :  { %3022 = vmatpush.bf16.msra.mxu2 %v2976_v1  ;;  %3036 = vmatpush.bf16.msra.mxu3 %v2979_v2 }
 0x267   :  { %v2051_v4 = vpop.f32.mrf.mxu2  ;;  %v2065_v5 = vpop.f32.mrf.mxu3 }
 0x268   :  { %v2074_v9 = vadd.f32 %v2051_v4, %v1931_v33  ;;  %v2075_v10 = vadd.f32 %v2065_v5, %v1932_v34  ;;  %v2025_v16 = vpop.f32.mrf.mxu0  ;;  %v2039_v17 = vpop.f32.mrf.mxu1  ;;  %v3116_v33 = vsel %vm18818_vm1, %v3105_v13, 0 }
 0x269   :  { %v2078_v20 = vadd.f32 %v2025_v16, %v15659_v7  ;;  %v2079_v11 = vadd.f32 %v2039_v17, %v15661_v29  ;;  %v3100_v41 = vpop.permute.xlu1 %3099  ;;  %v3102_v45 = vpop.permute.xlu2 %3101 }
 0x26a   :  { %v3107_v50 = vsel %vm3103_vm9, %v3098_v42, %v3100_v41  ;;  %v3128_v58 = vsel %vm18818_vm1, %v3102_v45, 0  ;;  %v3241_v17 = vpop.permute.xlu0 %3240 }
 0x26f   :  { %v2053_v18 = vpop.f32.mrf.mxu2  ;;  %v2067_v19 = vpop.f32.mrf.mxu3 }
 0x270   :  { %v15696_v24 = vadd.f32 %v2053_v18, %v1937_v48  ;;  %v15698_v25 = vadd.f32 %v2067_v19, %v1938_v43  ;;  %v2138_v26 = vpop.f32.mrf.mxu0  ;;  %v2152_v27 = vpop.f32.mrf.mxu1 }
 0x271   :  { %v2213_v7 = vadd.f32 %v2138_v26, %v2070_v8  ;;  %v2214_v29 = vadd.f32 %v2152_v27, %v2071_v12  ;;  %v12139_v8 = vld [vmem:[%s18861_s1 + $0xa0] sm:$0xf]  ;;  %v14038_v12 = vld [vmem:[%s18861_s1 + $0xa0] sm:$0x30]  ;;  %v3237_v59 = vpop.permute.xlu1 %3236  ;;  %v3239_v5 = vpop.permute.xlu2 %3238 }
 0x272   :  { %12131 = vmatmul.msk.bf16.vlgmr.msrb.gmra.mxu0 %vm149_vm2, %v12128_v52  ;;  %12132 = vmatmul.msk.bf16.vlgmr.msrb.gmra.mxu1 %vm149_vm2, %v12128_v52  ;;  %v12140_v44 = vor.u32 %v14038_v12, %v12139_v8  ;;  %v3247_v21 = vsel %vm3246_vm10, %v3235_v60, %v3237_v59  ;;  %v3248_v22 = vsel %vm3246_vm10, %v3237_v59, %v3239_v5 }
 0x273   :  { %3050 = vmatpush.bf16.msrb.mxu0 %v2982_v30  ;;  %3064 = vmatpush.bf16.msrb.mxu1 %v2985_v31  ;;  %v3256_v28 = vsel %vm18818_vm1, %v3247_v21, 0 }
 0x274   :  { %12133 = vmatmul.msk.bf16.vlgmr.msrb.gmra.mxu2 %vm149_vm2, %v12128_v52  ;;  %12134 = vmatmul.msk.bf16.vlgmr.msrb.gmra.mxu3 %vm149_vm2, %v12128_v52  ;;  %v3108_v52 = vsel %vm3103_vm9, %v3100_v41, %v3102_v45  ;;  %v3378_v41 = vpop.permute.xlu0 %3377 }
 0x275   :  { %3137 = vmatpush.bf16.msrb.mxu2 %v3113_v32  ;;  %3151 = vmatpush.bf16.msrb.mxu3 %v3116_v33  ;;  %v3125_v57 = vsel %vm18818_vm1, %v3108_v52, 0 }
 0x277   :  { %v2166_v34 = vpop.f32.mrf.mxu2  ;;  %v2180_v6 = vpop.f32.mrf.mxu3 }
 0x278   :  { %v15710_v35 = vadd.f32 %v2166_v34, %v2072_v61  ;;  %v2216_v36 = vadd.f32 %v2180_v6, %v2073_v62  ;;  %v2140_v37 = vpop.f32.mrf.mxu0  ;;  %v2154_v38 = vpop.f32.mrf.mxu1 }
 0x279   :  { %v2219_v39 = vadd.f32 %v2140_v37, %v2076_v55  ;;  %v2220_v40 = vadd.f32 %v2154_v38, %v2077_v56  ;;  %v3119_v55 = vsel %vm18818_vm1, %v3106_v49, 0  ;;  %v3122_v56 = vsel %vm18818_vm1, %v3107_v50, 0  ;;  %v3243_v16 = vpop.permute.xlu1 %3242  ;;  %v3245_v31 = vpop.permute.xlu2 %3244 }
 0x27a   :  { %v3250_v26 = vsel %vm3246_vm10, %v3241_v17, %v3243_v16  ;;  %v3251_v42 = vsel %vm3246_vm10, %v3243_v16, %v3245_v31 }
 0x27b   :  { %v3265_v30 = vsel %vm18818_vm1, %v3250_v26, 0 }
 0x27f   :  { %v2168_v48 = vpop.f32.mrf.mxu2  ;;  %v2182_v43 = vpop.f32.mrf.mxu3 }
 0x280   :  { %v15720_v46 = vadd.f32 %v2168_v48, %v2078_v20  ;;  %v15722_v14 = vadd.f32 %v2182_v43, %v2079_v11  ;;  %v2194_v47 = vpop.f32.mrf.mxu0  ;;  %v2208_v51 = vpop.f32.mrf.mxu1 }
 0x281   :  { %v2217_v53 = vadd.f32 %v2194_v47, %v2074_v9  ;;  %v2218_v54 = vadd.f32 %v2208_v51, %v2075_v10  ;;  %v12151_v9 = vld [vmem:[%s18861_s1 + $0xa8] sm:$0xf]  ;;  %v14039_v10 = vld [vmem:[%s18861_s1 + $0xa8] sm:$0x30]  ;;  %v3268_v47 = vsel %vm18818_vm1, %v3251_v42, 0  ;;  %v3271_v51 = vsel %vm18818_vm1, %v3245_v31, 0 }
 0x282   :  { %12141 = vmatmul.msk.bf16.vlgmr.msra.gmra.mxu0 %vm149_vm2, %v12140_v44  ;;  %12142 = vmatmul.msk.bf16.vlgmr.msra.gmra.mxu1 %vm149_vm2, %v12140_v44  ;;  %v12152_v15 = vor.u32 %v14039_v10, %v12151_v9 }
 0x283   :  { %3165 = vmatpush.bf16.msra.mxu0 %v3119_v55  ;;  %3179 = vmatpush.bf16.msra.mxu1 %v3122_v56 }
 0x284   :  { %12143 = vmatmul.msk.bf16.vlgmr.msra.gmra.mxu2 %vm149_vm2, %v12140_v44  ;;  %12144 = vmatmul.msk.bf16.vlgmr.msra.gmra.mxu3 %vm149_vm2, %v12140_v44 }
 0x285   :  { %3193 = vmatpush.bf16.msra.mxu2 %v3125_v57  ;;  %3207 = vmatpush.bf16.msra.mxu3 %v3128_v58 }
 0x287   :  { %v2281_v61 = vpop.f32.mrf.mxu2  ;;  %v2295_v62 = vpop.f32.mrf.mxu3 }
 0x288   :  { %v2356_v63 = vadd.f32 %v2281_v61, %v2213_v7  ;;  %v2357_v0 = vadd.f32 %v2295_v62, %v2214_v29  ;;  %v2196_v1 = vpop.f32.mrf.mxu0  ;;  %v2210_v2 = vpop.f32.mrf.mxu1  ;;  %v3259_v7 = vsel %vm18818_vm1, %v3248_v22, 0 }
 0x289   :  { %v2223_v3 = vadd.f32 %v2196_v1, %v15696_v24  ;;  %v2224_v4 = vadd.f32 %v2210_v2, %v15698_v25  ;;  %v3249_v25 = vsel %vm3246_vm10, %v3239_v5, %v3241_v17  ;;  %v3384_v1 = vpop.permute.xlu0 %3383 }
 0x28a   :  { %v3262_v29 = vsel %vm18818_vm1, %v3249_v25, 0 }
 0x28f   :  { %v2283_v20 = vpop.f32.mrf.mxu2  ;;  %v2297_v11 = vpop.f32.mrf.mxu3 }
 0x290   :  { %v2362_v18 = vadd.f32 %v2283_v20, %v2219_v39  ;;  %v2363_v19 = vadd.f32 %v2297_v11, %v2220_v40  ;;  %v2309_v23 = vpop.f32.mrf.mxu0  ;;  %v2323_v24 = vpop.f32.mrf.mxu1 }
 0x291   :  { %v2358_v27 = vadd.f32 %v2309_v23, %v15710_v35  ;;  %v2359_v13 = vadd.f32 %v2323_v24, %v2216_v36  ;;  %v3380_v39 = vpop.permute.xlu1 %3379  ;;  %v3382_v40 = vpop.permute.xlu2 %3381 }
 0x292   :  { %12145 = vmatmul.msk.bf16.vlgmr.msrb.gmra.mxu0 %vm149_vm2, %v12140_v44  ;;  %12146 = vmatmul.msk.bf16.vlgmr.msrb.gmra.mxu1 %vm149_vm2, %v12140_v44  ;;  %v3391_v49 = vsel %vm3389_vm13, %v3380_v39, %v3382_v40  ;;  %v3390_v50 = vsel %vm3389_vm13, %v3378_v41, %v3380_v39  ;;  %v3392_v9 = vsel %vm3389_vm13, %v3382_v40, %v3384_v1  ;;  %v3521_v26 = vpop.permute.xlu0 %3520 }
 0x293   :  { %3280 = vmatpush.bf16.msrb.mxu0 %v3256_v28  ;;  %3294 = vmatpush.bf16.msrb.mxu1 %v3259_v7  ;;  %v3399_v52 = vsel %vm18818_vm1, %v3390_v50, 0 }
 0x294   :  { %12153 = vmatmul.msk.bf16.vlgmr.msrb.gmra.mxu2 %vm149_vm2, %v12152_v15  ;;  %12154 = vmatmul.msk.bf16.vlgmr.msrb.gmra.mxu3 %vm149_vm2, %v12152_v15 }
 0x295   :  { %3308 = vmatpush.bf16.msrb.mxu2 %v3262_v29  ;;  %3322 = vmatpush.bf16.msrb.mxu3 %v3265_v30 }
 0x297   :  { %v2337_v32 = vpop.f32.mrf.mxu2  ;;  %v2351_v33 = vpop.f32.mrf.mxu3 }
 0x298   :  { %v2360_v34 = vadd.f32 %v2337_v32, %v2217_v53  ;;  %v2361_v6 = vadd.f32 %v2351_v33, %v2218_v54  ;;  %v2311_v35 = vpop.f32.mrf.mxu0  ;;  %v2325_v36 = vpop.f32.mrf.mxu1  ;;  %v3402_v53 = vsel %vm18818_vm1, %v3391_v49, 0 }
 0x299   :  { %v2364_v37 = vadd.f32 %v2311_v35, %v15720_v46  ;;  %v2365_v38 = vadd.f32 %v2325_v36, %v15722_v14  ;;  %v3386_v62 = vpop.permute.xlu1 %3385  ;;  %v3388_v2 = vpop.permute.xlu2 %3387 }
 0x29a   :  { %v3393_v10 = vsel %vm3389_vm13, %v3384_v1, %v3386_v62  ;;  %v3414_v24 = vsel %vm18818_vm1, %v3388_v2, 0  ;;  %v3527_v36 = vpop.permute.xlu0 %3526 }
 0x29f   :  { %v2339_v8 = vpop.f32.mrf.mxu2  ;;  %v2353_v12 = vpop.f32.mrf.mxu3 }
 0x2a0   :  { %v15757_v45 = vadd.f32 %v2339_v8, %v2223_v3  ;;  %v15759_v48 = vadd.f32 %v2353_v12, %v2224_v4  ;;  %v2424_v43 = vpop.f32.mrf.mxu0  ;;  %v2438_v44 = vpop.f32.mrf.mxu1 }
 0x2a1   :  { %v2499_v46 = vadd.f32 %v2424_v43, %v2356_v63  ;;  %v2500_v14 = vadd.f32 %v2438_v44, %v2357_v0  ;;  %v12163_v63 = vld [vmem:[%s18861_s1 + $0xb0] sm:$0xf]  ;;  %v14040_v0 = vld [vmem:[%s18861_s1 + $0xb0] sm:$0x30]  ;;  %v3523_v25 = vpop.permute.xlu1 %3522  ;;  %v3525_v33 = vpop.permute.xlu2 %3524 }
 0x2a2   :  { %12155 = vmatmul.msk.bf16.vlgmr.msra.gmra.mxu0 %vm149_vm2, %v12152_v15  ;;  %12156 = vmatmul.msk.bf16.vlgmr.msra.gmra.mxu1 %vm149_vm2, %v12152_v15  ;;  %v12164_v5 = vor.u32 %v14040_v0, %v12163_v63  ;;  %v3533_v39 = vsel %vm3532_vm14, %v3521_v26, %v3523_v25  ;;  %v3534_v40 = vsel %vm3532_vm14, %v3523_v25, %v3525_v33  ;;  %v14574_v63 = vmov 0   ;;  %v3655_v0 = vld [vmem:[%s18862_s6] sm:$0xff] }
 0x2a3   :  { %3336 = vmatpush.bf16.msra.mxu0 %v3268_v47  ;;  %3350 = vmatpush.bf16.msra.mxu1 %v3271_v51  ;;  %v3535_v42 = vsel %vm3532_vm14, %v3525_v33, %v3527_v36  ;;  %v3542_v44 = vsel %vm18818_vm1, %v3533_v39, 0  ;;  %v3545_v49 = vsel %vm18818_vm1, %v3534_v40, 0 }
 0x2a4   :  { %12157 = vmatmul.msk.bf16.vlgmr.msra.gmra.mxu2 %vm149_vm2, %v12152_v15  ;;  %12158 = vmatmul.msk.bf16.vlgmr.msra.gmra.mxu3 %vm149_vm2, %v12152_v15  ;;  %v3394_v15 = vsel %vm3389_vm13, %v3386_v62, %v3388_v2  ;;  %v3548_v50 = vsel %vm18818_vm1, %v3535_v42, 0 }
 0x2a5   :  { %3423 = vmatpush.bf16.msra.mxu2 %v3399_v52  ;;  %3437 = vmatpush.bf16.msra.mxu3 %v3402_v53  ;;  %v3411_v23 = vsel %vm18818_vm1, %v3394_v15, 0 }
 0x2a6   :  { %14457 = vset.pattern.permute.xlu1 %v14574_v63  ;;  %14456 = vset.pattern.permute.xlu0 %v14574_v63 }
 0x2a7   :  { %v2452_v54 = vpop.f32.mrf.mxu2  ;;  %v2466_v55 = vpop.f32.mrf.mxu3  ;;  %3659 = vperm.xlu1 %14457, %v3655_v0   ;;  %14458 = vset.pattern.permute.xlu2 %v14574_v63 }
 0x2a8   :  { %v2501_v56 = vadd.f32 %v2452_v54, %v2358_v27  ;;  %v2502_v57 = vadd.f32 %v2466_v55, %v2359_v13  ;;  %v2426_v58 = vpop.f32.mrf.mxu0  ;;  %v2440_v59 = vpop.f32.mrf.mxu1 }
 0x2a9   :  { %v15771_v60 = vadd.f32 %v2426_v58, %v2362_v18  ;;  %v15773_v61 = vadd.f32 %v2440_v59, %v2363_v19  ;;  %v3405_v18 = vsel %vm18818_vm1, %v3392_v9, 0  ;;  %v3408_v19 = vsel %vm18818_vm1, %v3393_v10, 0  ;;  %v3529_v35 = vpop.permute.xlu1 %3528  ;;  %v3531_v55 = vpop.permute.xlu2 %3530 }
 0x2aa   :  { %v3537_v58 = vsel %vm3532_vm14, %v3529_v35, %v3531_v55 }
 0x2af   :  { %v2454_v3 = vpop.f32.mrf.mxu2  ;;  %v2468_v4 = vpop.f32.mrf.mxu3 }
 0x2b0   :  { %v15783_v16 = vadd.f32 %v2454_v3, %v2364_v37  ;;  %v15785_v17 = vadd.f32 %v2468_v4, %v2365_v38  ;;  %v2480_v20 = vpop.f32.mrf.mxu0  ;;  %v2494_v11 = vpop.f32.mrf.mxu1  ;;  %v3554_v3 = vsel %vm18818_vm1, %v3537_v58, 0  ;;  %v3557_v4 = vsel %vm18818_vm1, %v3531_v55, 0 }
 0x2b1   :  { %v2503_v21 = vadd.f32 %v2480_v20, %v2360_v34  ;;  %v2504_v22 = vadd.f32 %v2494_v11, %v2361_v6  ;;  %v12175_v34 = vld [vmem:[%s18861_s1 + $0xb8] sm:$0xf]  ;;  %v14041_v6 = vld [vmem:[%s18861_s1 + $0xb8] sm:$0x30] }
 0x2b2   :  { %12165 = vmatmul.msk.bf16.vlgmr.msrb.gmra.mxu0 %vm149_vm2, %v12164_v5  ;;  %12166 = vmatmul.msk.bf16.vlgmr.msrb.gmra.mxu1 %vm149_vm2, %v12164_v5  ;;  %v12176_v12 = vor.u32 %v14041_v6, %v12175_v34 }
 0x2b3   :  { %3451 = vmatpush.bf16.msrb.mxu0 %v3405_v18  ;;  %3465 = vmatpush.bf16.msrb.mxu1 %v3408_v19  ;;  %v14042_v18 = vld [vmem:[%s18861_s1 + $0xc0] sm:$0x30] }
 0x2b4   :  { %12167 = vmatmul.msk.bf16.vlgmr.msrb.gmra.mxu2 %vm149_vm2, %v12164_v5  ;;  %12168 = vmatmul.msk.bf16.vlgmr.msrb.gmra.mxu3 %vm149_vm2, %v12164_v5 }
 0x2b5   :  { %3479 = vmatpush.bf16.msrb.mxu2 %v3411_v23  ;;  %3493 = vmatpush.bf16.msrb.mxu3 %v3414_v24 }
 0x2b7   :  { %v2567_v27 = vpop.f32.mrf.mxu2  ;;  %v2581_v13 = vpop.f32.mrf.mxu3 }
 0x2b8   :  { %v2642_v28 = vadd.f32 %v2567_v27, %v2499_v46  ;;  %v2643_v7 = vadd.f32 %v2581_v13, %v2500_v14  ;;  %v2482_v29 = vpop.f32.mrf.mxu0  ;;  %v2496_v30 = vpop.f32.mrf.mxu1 }
 0x2b9   :  { %v15797_v31 = vadd.f32 %v2482_v29, %v15757_v45  ;;  %v15800_v32 = vadd.f32 %v2496_v30, %v15759_v48  ;;  %v3536_v45 = vsel %vm3532_vm14, %v3527_v36, %v3529_v35 }
 0x2ba   :  { %v3551_v46 = vsel %vm18818_vm1, %v3536_v45, 0 }
 0x2bf   :  { %v15808_v37 = vpop.f32.mrf.mxu2  ;;  %v15810_v38 = vpop.f32.mrf.mxu3 }
 0x2c0   :  { %v2595_v41 = vpop.f32.mrf.mxu0  ;;  %v2609_v8 = vpop.f32.mrf.mxu1 }
 0x2c1   :  { %v2644_v48 = vadd.f32 %v2595_v41, %v2501_v56  ;;  %v2645_v43 = vadd.f32 %v2609_v8, %v2502_v57 }
 0x2c2   :  { %12169 = vmatmul.msk.bf16.vlgmr.msra.gmra.mxu0 %vm149_vm2, %v12164_v5  ;;  %12170 = vmatmul.msk.bf16.vlgmr.msra.gmra.mxu1 %vm149_vm2, %v12164_v5 }
 0x2c3   :  { %3566 = vmatpush.bf16.msra.mxu0 %v3542_v44  ;;  %3580 = vmatpush.bf16.msra.mxu1 %v3545_v49 }
 0x2c4   :  { %12177 = vmatmul.msk.bf16.vlgmr.msra.gmra.mxu2 %vm149_vm2, %v12176_v12  ;;  %12178 = vmatmul.msk.bf16.vlgmr.msra.gmra.mxu3 %vm149_vm2, %v12176_v12 }
 0x2c5   :  { %3594 = vmatpush.bf16.msra.mxu2 %v3548_v50  ;;  %3608 = vmatpush.bf16.msra.mxu3 %v3551_v46 }
 0x2c7   :  { %v2623_v14 = vpop.f32.mrf.mxu2  ;;  %v2637_v47 = vpop.f32.mrf.mxu3 }
 0x2c8   :  { %v2646_v51 = vadd.f32 %v2623_v14, %v2503_v21  ;;  %v2647_v52 = vadd.f32 %v2637_v47, %v2504_v22  ;;  %v15824_v53 = vpop.f32.mrf.mxu0  ;;  %v15826_v54 = vpop.f32.mrf.mxu1  ;;  %v3656_v21 = vld [vmem:[%s18862_s6 + $0x8] sm:$0xf]  ;;  %v12187_v22 = vld [vmem:[%s18861_s1 + $0xc0] sm:$0xf]  ;;  %s18887_s1 = sld [smem:[#allocation20_spill]]  ;;  %s18795_s6 = smov 96  }
 0x2c9   :  { %3664 = vperm.xlu0 %14456, %v3656_v21   ;;  %v12188_v24 = vor.u32 %v14042_v18, %v12187_v22 }
 0x2cf   :  { %v15828_v56 = vpop.f32.mrf.mxu2  ;;  %v15830_v57 = vpop.f32.mrf.mxu3 }
 0x2d0   :  { %v2710_v59 = vpop.f32.mrf.mxu0  ;;  %v2724_v62 = vpop.f32.mrf.mxu1 }
 0x2d1   :  { %v2785_v1 = vadd.f32 %v2710_v59, %v2642_v28  ;;  %v2786_v2 = vadd.f32 %v2724_v62, %v2643_v7 }
 0x2d2   :  { %12179 = vmatmul.msk.bf16.vlgmr.msrb.gmra.mxu0 %vm149_vm2, %v12176_v12  ;;  %12180 = vmatmul.msk.bf16.vlgmr.msrb.gmra.mxu1 %vm149_vm2, %v12176_v12 }
 0x2d3   :  { %3622 = vmatpush.bf16.msrb.mxu0 %v3554_v3  ;;  %3636 = vmatpush.bf16.msrb.mxu1 %v3557_v4 }
 0x2d4   :  { %12181 = vmatmul.msk.bf16.vlgmr.msrb.gmra.mxu2 %vm149_vm2, %v12176_v12  ;;  %12182 = vmatmul.msk.bf16.vlgmr.msrb.gmra.mxu3 %vm149_vm2, %v12176_v12 }
 0x2d7   :  { %v2738_v5 = vpop.f32.mrf.mxu2  ;;  %v2752_v9 = vpop.f32.mrf.mxu3 }
 0x2d8   :  { %v2787_v10 = vadd.f32 %v2738_v5, %v2644_v48  ;;  %v2788_v20 = vadd.f32 %v2752_v9, %v2645_v43  ;;  %v15842_v11 = vpop.f32.mrf.mxu0  ;;  %v15844_v15 = vpop.f32.mrf.mxu1 }
 0x2df   :  { %v15855_v19 = vpop.f32.mrf.mxu2  ;;  %v15857_v23 = vpop.f32.mrf.mxu3 }
 0x2e0   :  { %v2766_v25 = vpop.f32.mrf.mxu0  ;;  %v2780_v26 = vpop.f32.mrf.mxu1 }
 0x2e1   :  { %v2789_v27 = vadd.f32 %v2766_v25, %v2646_v51  ;;  %v2790_v13 = vadd.f32 %v2780_v26, %v2647_v52 }
 0x2e2   :  { %12189 = vmatmul.msk.bf16.vlgmr.msra.gmra.mxu0 %vm149_vm2, %v12188_v24  ;;  %12190 = vmatmul.msk.bf16.vlgmr.msra.gmra.mxu1 %vm149_vm2, %v12188_v24 }
 0x2e4   :  { %12191 = vmatmul.msk.bf16.vlgmr.msra.gmra.mxu2 %vm149_vm2, %v12188_v24  ;;  %12192 = vmatmul.msk.bf16.vlgmr.msra.gmra.mxu3 %vm149_vm2, %v12188_v24 }
 0x2e7   :  { %v2853_v28 = vpop.f32.mrf.mxu2  ;;  %v2867_v7 = vpop.f32.mrf.mxu3 }
 0x2e8   :  { %v2928_v29 = vadd.f32 %v2853_v28, %v2785_v1  ;;  %v2929_v30 = vadd.f32 %v2867_v7, %v2786_v2  ;;  %v15863_v33 = vpop.f32.mrf.mxu0  ;;  %v15865_v34 = vpop.f32.mrf.mxu1 }
 0x2ef   :  { %v15867_v6 = vpop.f32.mrf.mxu2  ;;  %v15869_v35 = vpop.f32.mrf.mxu3 }
 0x2f0   :  { %v2881_v36 = vpop.f32.mrf.mxu0  ;;  %v2895_v39 = vpop.f32.mrf.mxu1 }
 0x2f1   :  { %v2930_v40 = vadd.f32 %v2881_v36, %v2787_v10  ;;  %v2931_v41 = vadd.f32 %v2895_v39, %v2788_v20 }
 0x2f2   :  { %12193 = vmatmul.msk.bf16.vlgmr.msrb.gmra.mxu0 %vm149_vm2, %v12188_v24  ;;  %12194 = vmatmul.msk.bf16.vlgmr.msrb.gmra.mxu1 %vm149_vm2, %v12188_v24 }
 0x2f7   :  { %v2909_v8 = vpop.f32.mrf.mxu2  ;;  %v2923_v12 = vpop.f32.mrf.mxu3 }
 0x2f8   :  { %v2932_v42 = vadd.f32 %v2909_v8, %v2789_v27  ;;  %v2933_v45 = vadd.f32 %v2923_v12, %v2790_v13  ;;  %v15873_v48 = vpop.f32.mrf.mxu0  ;;  %v15875_v43 = vpop.f32.mrf.mxu1  ;;  %v3814_v8 = vld [vmem:[%s18865_s11] sm:$0xff] }
 0x2f9   :  { %3818 = vperm.xlu2 %14458, %v3814_v8  }
 0x2ff   :  { %v15877_v44 = vpop.f32.mrf.mxu2  ;;  %v15879_v49 = vpop.f32.mrf.mxu3 }
 0x300   :  { %v2996_v50 = vpop.f32.mrf.mxu0  ;;  %v3010_v46 = vpop.f32.mrf.mxu1 }
 0x301   :  { %v3071_v14 = vadd.f32 %v2996_v50, %v2928_v29  ;;  %v3072_v47 = vadd.f32 %v3010_v46, %v2929_v30 }
 0x307   :  { %v3024_v51 = vpop.f32.mrf.mxu2  ;;  %v3038_v52 = vpop.f32.mrf.mxu3 }
 0x308   :  { %v3073_v55 = vadd.f32 %v3024_v51, %v2930_v40  ;;  %v3074_v58 = vadd.f32 %v3038_v52, %v2931_v41  ;;  %v15881_v59 = vpop.f32.mrf.mxu0  ;;  %v15883_v62 = vpop.f32.mrf.mxu1 }
 0x30f   :  { %v15885_v63 = vpop.f32.mrf.mxu2  ;;  %v15887_v0 = vpop.f32.mrf.mxu3 }
 0x310   :  { %v3052_v1 = vpop.f32.mrf.mxu0  ;;  %v3066_v2 = vpop.f32.mrf.mxu1 }
 0x311   :  { %v15889_v3 = vadd.f32 %v3052_v1, %v2932_v42  ;;  %v15891_v4 = vadd.f32 %v3066_v2, %v2933_v45 }
 0x317   :  { %v3139_v5 = vpop.f32.mrf.mxu2  ;;  %v3153_v9 = vpop.f32.mrf.mxu3 }
 0x318   :  { %v3214_v10 = vadd.f32 %v3139_v5, %v3071_v14  ;;  %v3215_v20 = vadd.f32 %v3153_v9, %v3072_v47  ;;  %v15893_v21 = vpop.f32.mrf.mxu0  ;;  %v15895_v22 = vpop.f32.mrf.mxu1 }
 0x31f   :  { %v15897_v18 = vpop.f32.mrf.mxu2  ;;  %v15899_v24 = vpop.f32.mrf.mxu3 }
 0x320   :  { %v3167_v25 = vpop.f32.mrf.mxu0  ;;  %v3181_v26 = vpop.f32.mrf.mxu1 }
 0x321   :  { %v15901_v27 = vadd.f32 %v3167_v25, %v3073_v55  ;;  %v15903_v13 = vadd.f32 %v3181_v26, %v3074_v58 }
 0x327   :  { %v15905_v28 = vpop.f32.mrf.mxu2  ;;  %v15907_v7 = vpop.f32.mrf.mxu3 }
 0x328   :  { %v15909_v29 = vpop.f32.mrf.mxu0  ;;  %v15911_v30 = vpop.f32.mrf.mxu1 }
 0x32f   :  { %v15913_v36 = vpop.f32.mrf.mxu2  ;;  %v15915_v39 = vpop.f32.mrf.mxu3 }
 0x330   :  { %18863 = vst [vmem:[#allocation5_spill] sm:$0xff] %v15913_v36  ;;  %v3282_v40 = vpop.f32.mrf.mxu0  ;;  %v3296_v41 = vpop.f32.mrf.mxu1 }
 0x331   :  { %18864 = vst [vmem:[#allocation6_spill] sm:$0xff] %v15915_v39  ;;  %v3358_v36 = vadd.f32 %v3296_v41, %v3215_v20  ;;  %v15967_v20 = vpop.permute.xlu1 %3659 }
 0x337   :  { %v3310_v12 = vpop.f32.mrf.mxu2  ;;  %v3324_v42 = vpop.f32.mrf.mxu3 }
 0x338   :  { %v3284_v45 = vpop.f32.mrf.mxu0  ;;  %v3298_v50 = vpop.f32.mrf.mxu1 }
 0x33f   :  { %v15920_v46 = vpop.f32.mrf.mxu2  ;;  %v15922_v14 = vpop.f32.mrf.mxu3 }
 0x340   :  { %18866 = vst [vmem:[#allocation7_spill] sm:$0xff] %v15920_v46  ;;  %v15924_v47 = vpop.f32.mrf.mxu0  ;;  %v15926_v51 = vpop.f32.mrf.mxu1 }
 0x341   :  { %18867 = vst [vmem:[#allocation8_spill] sm:$0xff] %v15922_v14 }
 0x342   :  { %18868 = vst [vmem:[#allocation9_spill] sm:$0xff] %v15924_v47 }
 0x343   :  { %18869 = vst [vmem:[#allocation10_spill] sm:$0xff] %v15926_v51  ;;  %v2648_v51 = vadd.f32 %v15808_v37, %v15771_v60  ;;  %v2653_v60 = vadd.f32 %v15830_v57, %v15800_v32 }
 0x345   :  { %v2791_v47 = vadd.f32 %v15842_v11, %v2648_v51 }
 0x347   :  { %v3425_v52 = vpop.f32.mrf.mxu2  ;;  %v3439_v55 = vpop.f32.mrf.mxu3  ;;  %v2934_v37 = vadd.f32 %v15867_v6, %v2791_v47 }
 0x348   :  { %v15928_v58 = vpop.f32.mrf.mxu0  ;;  %v15930_v1 = vpop.f32.mrf.mxu1 }
 0x349   :  { %18870 = vst [vmem:[#allocation11_spill] sm:$0xff] %v15928_v58  ;;  %v2649_v58 = vadd.f32 %v15810_v38, %v15773_v61  ;;  %v15995_v47 = vpop.permute.xlu0 %3664 }
 0x34a   :  { %18871 = vst [vmem:[#allocation12_spill] sm:$0xff] %v15930_v1  ;;  %v2650_v1 = vadd.f32 %v15824_v53, %v15783_v16  ;;  %v3501_v53 = vadd.f32 %v3439_v55, %v3358_v36 }
 0x34b   :  { %v2792_v39 = vadd.f32 %v15844_v15, %v2649_v58 }
 0x34c   :  { %v2793_v61 = vadd.f32 %v15855_v19, %v2650_v1  ;;  %v3077_v19 = vadd.f32 %v15881_v59, %v2934_v37 }
 0x34d   :  { %v2935_v16 = vadd.f32 %v15869_v35, %v2792_v39  ;;  %v3359_v39 = vadd.f32 %v3310_v12, %v15901_v27 }
 0x34e   :  { %v2936_v32 = vadd.f32 %v15873_v48, %v2793_v61  ;;  %v3220_v59 = vadd.f32 %v15897_v18, %v3077_v19  ;;  %v18878_v61 = vld [vmem:[#allocation7_spill] sm:$0xff]  ;;  %v18881_v19 = vld [vmem:[#allocation10_spill] sm:$0xff] }
 0x34f   :  { %v3427_v2 = vpop.f32.mrf.mxu2  ;;  %v3441_v5 = vpop.f32.mrf.mxu3  ;;  %v3078_v6 = vadd.f32 %v15883_v62, %v2935_v16 }
 0x350   :  { %v3453_v9 = vpop.f32.mrf.mxu0  ;;  %v3467_v25 = vpop.f32.mrf.mxu1  ;;  %v3079_v36 = vadd.f32 %v15885_v63, %v2936_v32  ;;  %v3363_v18 = vadd.f32 %v3284_v45, %v3220_v59 }
 0x351   :  { %v3221_v62 = vadd.f32 %v15899_v24, %v3078_v6  ;;  %v3502_v12 = vadd.f32 %v3453_v9, %v3359_v39 }
 0x352   :  { %v3222_v51 = vadd.f32 %v15909_v29, %v3079_v36 }
 0x353   :  { %v3364_v24 = vadd.f32 %v3298_v50, %v3221_v62 }
 0x354   :  { %v3365_v37 = vadd.f32 %v18878_v61, %v3222_v51 }
 0x355   :  { %v3507_v55 = vadd.f32 %v3441_v5, %v3364_v24  ;;  %v18876_v5 = vld [vmem:[#allocation5_spill] sm:$0xff] }
 0x357   :  { %v15932_v26 = vpop.f32.mrf.mxu2  ;;  %v15934_v8 = vpop.f32.mrf.mxu3 }
 0x358   :  { %18872 = vst [vmem:[#allocation13_spill] sm:$0xff] %v15932_v26  ;;  %v15936_v46 = vpop.f32.mrf.mxu0  ;;  %v15938_v14 = vpop.f32.mrf.mxu1  ;;  %v3357_v26 = vadd.f32 %v3282_v40, %v3214_v10  ;;  %v3360_v40 = vadd.f32 %v3324_v42, %v15903_v13  ;;  %v3218_v13 = vadd.f32 %v15905_v28, %v15889_v3  ;;  %v3219_v28 = vadd.f32 %v15907_v7, %v15891_v4 }
 0x359   :  { %18873 = vst [vmem:[#allocation14_spill] sm:$0xff] %v15934_v8  ;;  %v2651_v8 = vadd.f32 %v15826_v54, %v15785_v17 }
 0x35a   :  { %18874 = vst [vmem:[#allocation15_spill] sm:$0xff] %v15938_v14  ;;  %v2652_v14 = vadd.f32 %v15828_v56, %v15797_v31  ;;  %v3500_v38 = vadd.f32 %v3425_v52, %v3357_v26  ;;  %v2796_v31 = vadd.f32 %v15865_v34, %v2653_v60  ;;  %v3503_v42 = vadd.f32 %v3467_v25, %v3360_v40 }
 0x35b   :  { %v2794_v17 = vadd.f32 %v15857_v23, %v2651_v8  ;;  %v15972_v23 = vld [vmem:[%s18875_s10] sm:$0x3f]  ;;  %v3506_v52 = vadd.f32 %v3427_v2, %v3363_v18  ;;  %v3362_v6 = vadd.f32 %v18881_v19, %v3219_v28  ;;  %s18805_s10 = smov 94  }
 0x35c   :  { %v2795_v54 = vadd.f32 %v15863_v33, %v2652_v14  ;;  %v2939_v48 = vadd.f32 %v15879_v49, %v2796_v31  ;;  %v18877_v8 = vld [vmem:[#allocation6_spill] sm:$0xff]  ;;  %v3685_v62 = vperm.slane %v15972_v23, 4 }
 0x35d   :  { %v2937_v33 = vadd.f32 %v15875_v43, %v2794_v17  ;;  %v3681_v43 = vperm.slane %v15972_v23, 0  ;;  %v3684_v17 = vperm.slane %v15972_v23, 3 }
 0x35e   :  { %v2938_v34 = vadd.f32 %v15877_v44, %v2795_v54  ;;  %v3682_v44 = vperm.slane %v15972_v23, 1  ;;  %v3082_v27 = vadd.f32 %v15895_v22, %v2939_v48  ;;  %v3508_v48 = vadd.f32 %v15936_v46, %v3365_v37 }
 0x35f   :  { %v15957_v11 = vpop.f32.mrf.mxu2  ;;  %v15959_v15 = vpop.f32.mrf.mxu3  ;;  %v3080_v49 = vadd.f32 %v15887_v0, %v2937_v33  ;;  %v3683_v0 = vperm.slane %v15972_v23, 2  ;;  %v18883_v33 = vld [vmem:[#allocation12_spill] sm:$0xff]  ;;  %v18884_v39 = vld [vmem:[#allocation13_spill] sm:$0xff] }
 0x360   :  { %v3568_v56 = vpop.f32.mrf.mxu0  ;;  %v3582_v57 = vpop.f32.mrf.mxu1  ;;  %v3081_v63 = vadd.f32 %v15893_v21, %v2938_v34  ;;  %v3225_v60 = vadd.f32 %v18877_v8, %v3082_v27 }
 0x361   :  { %v3643_v35 = vadd.f32 %v3568_v56, %v3500_v38  ;;  %v3644_v10 = vadd.f32 %v3582_v57, %v3501_v53  ;;  %v3223_v9 = vadd.f32 %v15911_v30, %v3080_v49  ;;  %v18879_v38 = vld [vmem:[#allocation8_spill] sm:$0xff]  ;;  %v18880_v56 = vld [vmem:[#allocation9_spill] sm:$0xff]  ;;  %v18885_v49 = vld [vmem:[#allocation14_spill] sm:$0xff] }
 0x362   :  { %v3224_v25 = vadd.f32 %v18876_v5, %v3081_v63  ;;  %v3361_v57 = vadd.f32 %v18880_v56, %v3218_v13  ;;  %v3368_v34 = vadd.f32 %v18883_v33, %v3225_v60  ;;  %v3505_v63 = vadd.f32 %v18885_v49, %v3362_v6  ;;  %v18886_v18 = vld [vmem:[#allocation15_spill] sm:$0xff] }
 0x363   :  { %v15983_v41 = vadd.f32 %v15967_v20, %v3643_v35  ;;  %v15986_v14 = vadd.f32 %v15967_v20, %v3644_v10  ;;  %v3366_v53 = vadd.f32 %v18879_v38, %v3223_v9  ;;  %v18882_v35 = vld [vmem:[#allocation11_spill] sm:$0xff] }
 0x364   :  { %v3367_v10 = vadd.f32 %v18882_v35, %v3224_v25  ;;  %v3504_v40 = vadd.f32 %v18884_v39, %v3361_v57 }
 0x365   :  { %v3693_v45 = vmul.f32 %v3681_v43, %v15983_v41  ;;  %v3694_v22 = vmul.f32 %v3682_v44, %v15986_v14  ;;  %v3509_v24 = vadd.f32 %v18886_v18, %v3366_v53 }
 0x367   :  { %v3596_v58 = vpop.f32.mrf.mxu2  ;;  %v3610_v1 = vpop.f32.mrf.mxu3  ;;  %v3729_v30 = vmul.f32 %v3693_v45, %v3693_v45  ;;  %v3730_v31 = vmul.f32 %v3694_v22, %v3694_v22 }
 0x368   :  { %v3645_v21 = vadd.f32 %v3596_v58, %v3502_v12  ;;  %v3646_v50 = vadd.f32 %v3610_v1, %v3503_v42  ;;  %v3570_v26 = vpop.f32.mrf.mxu0  ;;  %v3584_v3 = vpop.f32.mrf.mxu1  ;;  %v3705_v42 = vadd.f32 %v3694_v22, %v3693_v45 }
 0x369   :  { %v3649_v29 = vadd.f32 %v3570_v26, %v3506_v52  ;;  %v3650_v2 = vadd.f32 %v3584_v3, %v3507_v55  ;;  %v3741_v51 = vadd.f32 %v3730_v31, %v3729_v30 }
 0x36a   :  { %v16008_v16 = vadd.f32 %v15967_v20, %v3645_v21  ;;  %v16020_v32 = vadd.f32 %v15967_v20, %v3646_v50  ;;  %v3686_v50 = vperm.slane %v15972_v23, 5  ;;  %v3511_v23 = vadd.f32 %v15959_v15, %v3368_v34 }
 0x36b   :  { %v16013_v54 = vadd.f32 %v15995_v47, %v3649_v29  ;;  %v16016_v4 = vadd.f32 %v15995_v47, %v3650_v2  ;;  %v3510_v2 = vadd.f32 %v15957_v11, %v3367_v10 }
 0x36c   :  { %v3695_v7 = vmul.f32 %v3683_v0, %v16008_v16  ;;  %v3696_v52 = vmul.f32 %v3684_v17, %v16020_v32 }
 0x36d   :  { %v3699_v59 = vmul.f32 %v3681_v43, %v16013_v54  ;;  %v3700_v13 = vmul.f32 %v3682_v44, %v16016_v4 }
 0x36e   :  { %v3731_v36 = vmul.f32 %v3695_v7, %v3695_v7  ;;  %v3706_v26 = vadd.f32 %v3705_v42, %v3695_v7  ;;  %v3732_v5 = vmul.f32 %v3696_v52, %v3696_v52 }
 0x36f   :  { %v3598_v27 = vpop.f32.mrf.mxu2  ;;  %v3612_v12 = vpop.f32.mrf.mxu3  ;;  %v3735_v9 = vmul.f32 %v3699_v59, %v3699_v59  ;;  %v3736_v29 = vmul.f32 %v3700_v13, %v3700_v13  ;;  %v3713_v8 = vsel %vm18818_vm1, %v3699_v59, 0.0  ;;  %v3714_v60 = vsel %vm18818_vm1, %v3700_v13, 0.0 }
 0x370   :  { %v3651_v46 = vadd.f32 %v3598_v27, %v3508_v48  ;;  %v3624_v55 = vpop.f32.mrf.mxu0  ;;  %v3638_v58 = vpop.f32.mrf.mxu1  ;;  %v3652_v43 = vadd.f32 %v3612_v12, %v3509_v24  ;;  %v3742_v3 = vadd.f32 %v3741_v51, %v3731_v36  ;;  %v3707_v38 = vadd.f32 %v3706_v26, %v3696_v52  ;;  %v12337_v51 = vld [vmem:[#allocation2 + $0x118] sm:$0xf]  ;;  %v14080_v52 = vld [vmem:[#allocation2 + $0x128] sm:$0xf0] }
 0x371   :  { %v3647_v1 = vadd.f32 %v3624_v55, %v3504_v40  ;;  %v3648_v21 = vadd.f32 %v3638_v58, %v3505_v63  ;;  %v3749_v7 = vsel %vm18818_vm1, %v3735_v9, 0.0  ;;  %v3715_v31 = vadd.f32 %v3714_v60, %v3713_v8 }
 0x372   :  { %v16036_v28 = vadd.f32 %v15995_v47, %v3651_v46  ;;  %v16039_v44 = vadd.f32 %v15995_v47, %v3652_v43  ;;  %v12657_v46 = vld [vmem:[#allocation2 + $0x398] sm:$0xf]  ;;  %v12338_v9 = vor.u32 %v14080_v52, %v12337_v51  ;;  %v14055_v51 = vld [vmem:[#allocation2 + $0x60] sm:$0xf0]  ;;  %v12557_v52 = vld [vmem:[#allocation2 + $0x2d0] sm:$0xf] }
 0x373   :  { %v16042_v45 = vadd.f32 %v15967_v20, %v3647_v1  ;;  %v16045_v22 = vadd.f32 %v15967_v20, %v3648_v21  ;;  %v3743_v20 = vadd.f32 %v3742_v3, %v3732_v5  ;;  %v14160_v1 = vld [vmem:[#allocation2 + $0x3a8] sm:$0xf0]  ;;  %v12317_v21 = vld [vmem:[#allocation2 + $0xf0] sm:$0xf] }
 0x374   :  { %v3701_v25 = vmul.f32 %v3683_v0, %v16036_v28  ;;  %v3702_v15 = vmul.f32 %v3684_v17, %v16039_v44  ;;  %v3750_v0 = vsel %vm18818_vm1, %v3736_v29, 0.0  ;;  %v14075_v29 = vld [vmem:[#allocation2 + $0x100] sm:$0xf0]  ;;  %5194 = vmatpush.bf16.msrb.mxu2 %v12338_v9 }
 0x375   :  { %v3697_v61 = vmul.f32 %v3685_v62, %v16042_v45  ;;  %v3698_v37 = vmul.f32 %v3686_v50, %v16045_v22  ;;  %v3751_v17 = vadd.f32 %v3750_v0, %v3749_v7  ;;  %v12318_v60 = vor.u32 %v14075_v29, %v12317_v21  ;;  %v12617_v7 = vld [vmem:[#allocation2 + $0x348] sm:$0xf]  ;;  %v12277_v0 = vld [vmem:[#allocation2 + $0xa0] sm:$0xf] }
 0x376   :  { %v3737_v53 = vmul.f32 %v3701_v25, %v3701_v25  ;;  %v3716_v11 = vsel %vm18818_vm1, %v3701_v25, 0.0  ;;  %v3738_v40 = vmul.f32 %v3702_v15, %v3702_v15  ;;  %v3718_v27 = vsel %vm18818_vm1, %v3702_v15, 0.0  ;;  %v12217_v21 = vld [vmem:[#allocation2 + $0x28] sm:$0xf]  ;;  %v12757_v29 = vld [vmem:[#allocation2 + $0x460] sm:$0xf] }
 0x377   :  { %v3733_v30 = vmul.f32 %v3697_v61, %v3697_v61  ;;  %v3734_v56 = vmul.f32 %v3698_v37, %v3698_v37  ;;  %v3708_v6 = vadd.f32 %v3707_v38, %v3697_v61  ;;  %v3709_v35 = vsel %vm149_vm2, %v3698_v37, 0.0  ;;  %v12297_v38 = vld [vmem:[#allocation2 + $0xc8] sm:$0xf] }
 0x378   :  { %v3626_v57 = vpop.f32.mrf.mxu0  ;;  %v3640_v19 = vpop.f32.mrf.mxu1  ;;  %v3752_v10 = vsel %vm18818_vm1, %v3737_v53, 0.0  ;;  %v3717_v36 = vadd.f32 %v3716_v11, %v3715_v31  ;;  %v3754_v43 = vsel %vm18818_vm1, %v3738_v40, 0.0  ;;  %v14070_v53 = vld [vmem:[#allocation2 + $0xd8] sm:$0xf0]  ;;  %5195 = vmatpush.bf16.msrb.mxu2 %v12318_v60  ;;  %v14065_v31 = vld [vmem:[#allocation2 + $0xb0] sm:$0xf0] }
 0x379   :  { %v3653_v33 = vadd.f32 %v3626_v57, %v3510_v2  ;;  %v3654_v34 = vadd.f32 %v3640_v19, %v3511_v23  ;;  %v3744_v48 = vadd.f32 %v3743_v20, %v3733_v30  ;;  %v3710_v59 = vadd.f32 %v3709_v35, %v3708_v6  ;;  %v14155_v2 = vld [vmem:[#allocation2 + $0x380] sm:$0xf0]  ;;  %v14150_v11 = vld [vmem:[#allocation2 + $0x358] sm:$0xf0]  ;;  %v14145_v57 = vld [vmem:[#allocation2 + $0x330] sm:$0xf0] }
 0x37a   :  { %v3745_v39 = vsel %vm149_vm2, %v3734_v56, 0.0  ;;  %v3753_v24 = vadd.f32 %v3752_v10, %v3751_v17  ;;  %v3719_v42 = vadd.f32 %v3718_v27, %v3717_v36  ;;  %v12298_v15 = vor.u32 %v14070_v53, %v12297_v38  ;;  %v12597_v56 = vld [vmem:[#allocation2 + $0x320] sm:$0xf]  ;;  %v3815_v10 = vld [vmem:[%s18865_s11 + $0x8] sm:$0xf]  ;;  %s18819_s11 = smov 112  }
 0x37b   :  { %v16062_v49 = vadd.f32 %v15995_v47, %v3653_v33  ;;  %v16065_v63 = vadd.f32 %v15995_v47, %v3654_v34  ;;  %v3746_v18 = vadd.f32 %v3745_v39, %v3744_v48  ;;  %3711 = vadd.xlane.f32.xlu2 %v3710_v59  ;;  %v12618_v30 = vor.u32 %v14150_v11, %v12617_v7  ;;  %v3838_v35 = vld [vmem:[%s18887_s1] sm:$0xff]  ;;  %v3839_v33 = vld [vmem:[%s18887_s1 + $0x8] sm:$0xf]  ;;  %v12817_v34 = vld [vmem:[#allocation2 + $0x4d8] sm:$0xf]  ;;  %s14586_s1 = smov 64  }
 0x37c   :  { %v3755_v3 = vadd.f32 %v3754_v43, %v3753_v24  ;;  %5196 = vmatpush.bf16.msrb.mxu2 %v12298_v15  ;;  %v12278_v19 = vor.u32 %v14065_v31, %v12277_v0  ;;  %v12598_v6 = vor.u32 %v14145_v57, %v12597_v56  ;;  %v14200_v48 = vld [vmem:[#allocation2 + $0x4e8] sm:$0xf0]  ;;  %v12257_v59 = vld [vmem:[#allocation2 + $0x78] sm:$0xf]  ;;  %v12797_v24 = vld [vmem:[#allocation2 + $0x4b0] sm:$0xf] }
 0x37d   :  { %v3703_v13 = vmul.f32 %v3685_v62, %v16062_v49  ;;  %v3704_v12 = vmul.f32 %v3686_v50, %v16065_v63  ;;  %3747 = vadd.xlane.f32.xlu0 %v3746_v18  ;;  %v12658_v62 = vor.u32 %v14160_v1, %v12657_v46  ;;  %v12637_v50 = vld [vmem:[#allocation2 + $0x370] sm:$0xf]  ;;  %v12818_v36 = vor.u32 %v14200_v48, %v12817_v34  ;;  %v14060_v39 = vld [vmem:[#allocation2 + $0x88] sm:$0xf0]  ;;  %v12577_v17 = vld [vmem:[#allocation2 + $0x2f8] sm:$0xf] }
 0x37e   :  { %v12638_v37 = vor.u32 %v14155_v2, %v12637_v50  ;;  %v12258_v40 = vor.u32 %v14060_v39, %v12257_v59  ;;  %v14140_v18 = vld [vmem:[#allocation2 + $0x308] sm:$0xf0]  ;;  %v14195_v27 = vld [vmem:[#allocation2 + $0x4c0] sm:$0xf0]  ;;  %v14185_v50 = vld [vmem:[#allocation2 + $0x470] sm:$0xf0] }
 0x37f   :  { %v3739_v55 = vmul.f32 %v3703_v13, %v3703_v13  ;;  %v3720_v58 = vsel %vm18818_vm1, %v3703_v13, 0.0  ;;  %v3740_v47 = vmul.f32 %v3704_v12, %v3704_v12  ;;  %v3723_v23 = vsel %vm3722_vm15, %v3704_v12, 0.0  ;;  %5222 = vmatpush.bf16.msra.mxu0 %v12658_v62  ;;  %5236 = vmatpush.bf16.msra.mxu1 %v12818_v36  ;;  %v14130_v62 = vld [vmem:[#allocation2 + $0x2b8] sm:$0xf0]  ;;  %v12197_v60 = vld [vmem:[#allocation2] sm:$0xf] }
 0x380   :  { %v3721_v26 = vadd.f32 %v3720_v58, %v3719_v42  ;;  %5197 = vmatpush.bf16.msrb.mxu2 %v12278_v19  ;;  %v12578_v13 = vor.u32 %v14140_v18, %v12577_v17  ;;  %v12798_v12 = vor.u32 %v14195_v27, %v12797_v24  ;;  %v12237_v42 = vld [vmem:[#allocation2 + $0x50] sm:$0xf]  ;;  %v12777_v58 = vld [vmem:[#allocation2 + $0x488] sm:$0xf]  ;;  %v14125_v53 = vld [vmem:[#allocation2 + $0x290] sm:$0xf0] }
 0x381   :  { %v3756_v5 = vsel %vm18818_vm1, %v3739_v55, 0.0  ;;  %v3758_v61 = vsel %vm3722_vm15, %v3740_v47, 0.0  ;;  %v12238_v46 = vor.u32 %v14055_v51, %v12237_v42  ;;  %v14135_v55 = vld [vmem:[#allocation2 + $0x2e0] sm:$0xf0]  ;;  %v14190_v47 = vld [vmem:[#allocation2 + $0x498] sm:$0xf0] }
 0x382   :  { %v3724_v25 = vadd.f32 %v3723_v23, %v3721_v26  ;;  %v3757_v8 = vadd.f32 %v3756_v5, %v3755_v3  ;;  %v12558_v43 = vor.u32 %v14135_v55, %v12557_v52  ;;  %v12778_v1 = vor.u32 %v14190_v47, %v12777_v58  ;;  %v14050_v26 = vld [vmem:[#allocation2 + $0x38] sm:$0xf0]  ;;  %v12537_v3 = vld [vmem:[#allocation2 + $0x2a8] sm:$0xf]  ;;  %v12497_v5 = vld [vmem:[#allocation2 + $0x258] sm:$0xf] }
 0x383   :  { %5223 = vmatpush.bf16.msra.mxu0 %v12638_v37  ;;  %5237 = vmatpush.bf16.msra.mxu1 %v12798_v12  ;;  %v12218_v9 = vor.u32 %v14050_v26, %v12217_v21  ;;  %v12538_v2 = vor.u32 %v14130_v62, %v12537_v3  ;;  %v12758_v23 = vor.u32 %v14185_v50, %v12757_v29  ;;  %v12517_v37 = vld [vmem:[#allocation2 + $0x280] sm:$0xf]  ;;  %v14180_v7 = vld [vmem:[#allocation2 + $0x448] sm:$0xf0]  ;;  %v14078_v31 = vld [vmem:[#allocation2 + $0x11c] sm:$0xf]  ;;  %v16084_v12 = vpop.permute.xlu2 %3818 }
 0x384   :  { %3725 = vadd.xlane.f32.xlu1 %v3724_v25  ;;  %v3759_v20 = vadd.f32 %v3758_v61, %v3757_v8  ;;  %5198 = vmatpush.bf16.msrb.mxu2 %v12258_v40  ;;  %v14120_v25 = vld [vmem:[#allocation2 + $0x268] sm:$0xf0]  ;;  %v14045_v61 = vld [vmem:[#allocation2 + $0x10] sm:$0xf0]  ;;  %v12518_v11 = vor.u32 %v14125_v53, %v12517_v37  ;;  %v12339_v57 = vld [vmem:[#allocation2 + $0x12c] sm:$0xf0] }
 0x385   :  { %v12498_v8 = vor.u32 %v14120_v25, %v12497_v5  ;;  %v12198_v38 = vor.u32 %v14045_v61, %v12197_v60  ;;  %v14240_v0 = vld [vmem:[#allocation2 + $0x628] sm:$0xf0]  ;;  %v12477_v19 = vld [vmem:[#allocation2 + $0x230] sm:$0xf]  ;;  %v14175_v34 = vld [vmem:[#allocation2 + $0x420] sm:$0xf0] }
 0x386   :  { %3760 = vadd.xlane.f32.xlu2 %v3759_v20  ;;  %v12737_v20 = vld [vmem:[#allocation2 + $0x438] sm:$0xf]  ;;  %v12957_v48 = vld [vmem:[#allocation2 + $0x5f0] sm:$0xf]  ;;  %v14235_v59 = vld [vmem:[#allocation2 + $0x600] sm:$0xf0] }
 0x387   :  { %5224 = vmatpush.bf16.msra.mxu0 %v12618_v30  ;;  %5238 = vmatpush.bf16.msra.mxu1 %v12778_v1  ;;  %v12738_v15 = vor.u32 %v14180_v7, %v12737_v20  ;;  %v12977_v30 = vld [vmem:[#allocation2 + $0x618] sm:$0xf]  ;;  %v14073_v39 = vld [vmem:[#allocation2 + $0xf4] sm:$0xf]  ;;  %v12319_v17 = vld [vmem:[#allocation2 + $0x104] sm:$0xf0]  ;;  %v12958_v40 = vor.u32 %v14235_v59, %v12957_v48 }
 0x388   :  { %5199 = vmatpush.bf16.msrb.mxu2 %v12238_v46  ;;  %5208 = vmatpush.bf16.msrb.mxu3 %v12498_v8  ;;  %v12978_v56 = vor.u32 %v14240_v0, %v12977_v30  ;;  %v12322_v18 = vor.u32 %v14073_v39, %v12319_v17  ;;  %v12457_v24 = vld [vmem:[#allocation2 + $0x208] sm:$0xf]  ;;  %v14110_v27 = vld [vmem:[#allocation2 + $0x218] sm:$0xf0]  ;;  %v14068_v58 = vld [vmem:[#allocation2 + $0xcc] sm:$0xf] }
 0x389   :  { %v12697_v42 = vld [vmem:[#allocation2 + $0x3e8] sm:$0xf]  ;;  %v14170_v51 = vld [vmem:[#allocation2 + $0x3f8] sm:$0xf0]  ;;  %v12299_v47 = vld [vmem:[#allocation2 + $0xdc] sm:$0xf0] }
 0x38a   :  { %v12937_v52 = vld [vmem:[#allocation2 + $0x5c8] sm:$0xf]  ;;  %v12698_v46 = vor.u32 %v14170_v51, %v12697_v42  ;;  %v14230_v55 = vld [vmem:[#allocation2 + $0x5d8] sm:$0xf0]  ;;  %v12302_v1 = vor.u32 %v14068_v58, %v12299_v47  ;;  %v12437_v21 = vld [vmem:[#allocation2 + $0x1e0] sm:$0xf] }
 0x38b   :  { %5225 = vmatpush.bf16.msra.mxu0 %v12598_v6  ;;  %5239 = vmatpush.bf16.msra.mxu1 %v12758_v23  ;;  %v14115_v6 = vld [vmem:[#allocation2 + $0x240] sm:$0xf0]  ;;  %v14105_v26 = vld [vmem:[#allocation2 + $0x1f0] sm:$0xf0]  ;;  %v12917_v29 = vld [vmem:[#allocation2 + $0x5a0] sm:$0xf] }
 0x38c   :  { %5200 = vmatpush.bf16.msrb.mxu2 %v12218_v9  ;;  %v12438_v3 = vor.u32 %v14105_v26, %v12437_v21  ;;  %v12677_v9 = vld [vmem:[#allocation2 + $0x3c0] sm:$0xf]  ;;  %v14165_v62 = vld [vmem:[#allocation2 + $0x3d0] sm:$0xf0]  ;;  %v14063_v23 = vld [vmem:[#allocation2 + $0xa4] sm:$0xf] }
 0x38d   :  { %v12678_v50 = vor.u32 %v14165_v62, %v12677_v9  ;;  %v12279_v5 = vld [vmem:[#allocation2 + $0xb4] sm:$0xf0]  ;;  %v14100_v61 = vld [vmem:[#allocation2 + $0x1c8] sm:$0xf0]  ;;  %v14118_v37 = vld [vmem:[#allocation2 + $0x25c] sm:$0xf] }
 0x38e   :  { %v12282_v8 = vor.u32 %v14063_v23, %v12279_v5  ;;  %v12417_v60 = vld [vmem:[#allocation2 + $0x1b8] sm:$0xf]  ;;  %v12499_v53 = vld [vmem:[#allocation2 + $0x26c] sm:$0xf0]  ;;  %v14058_v30 = vld [vmem:[#allocation2 + $0x7c] sm:$0xf] }
 0x38f   :  { %5226 = vmatpush.bf16.msra.mxu0 %v12578_v13  ;;  %5240 = vmatpush.bf16.msra.mxu1 %v12738_v15  ;;  %v12458_v13 = vor.u32 %v14110_v27, %v12457_v24  ;;  %v12502_v7 = vor.u32 %v14118_v37, %v12499_v53  ;;  %v14220_v15 = vld [vmem:[#allocation2 + $0x588] sm:$0xf0]  ;;  %v12877_v39 = vld [vmem:[#allocation2 + $0x550] sm:$0xf]  ;;  %v14215_v17 = vld [vmem:[#allocation2 + $0x560] sm:$0xf0] }
 0x390   :  { %5201 = vmatpush.bf16.msrb.mxu2 %v12198_v38  ;;  %v12418_v38 = vor.u32 %v14100_v61, %v12417_v60  ;;  %v12878_v24 = vor.u32 %v14215_v17, %v12877_v39  ;;  %v12239_v27 = vld [vmem:[#allocation2 + $0x64] sm:$0xf0]  ;;  %v14090_v42 = vld [vmem:[#allocation2 + $0x178] sm:$0xf0]  ;;  %v14048_v26 = vld [vmem:[#allocation2 + $0x2c] sm:$0xf] }
 0x391   :  { %3842 = vperm.xlu0 %14456, %v3838_v35   ;;  %v12342_v35 = vor.u32 %v14078_v31, %v12339_v57  ;;  %v12259_v57 = vld [vmem:[#allocation2 + $0x8c] sm:$0xf0]  ;;  %v14210_v21 = vld [vmem:[#allocation2 + $0x538] sm:$0xf0]  ;;  %v12219_v62 = vld [vmem:[#allocation2 + $0x3c] sm:$0xf0] }
 0x392   :  { %v14085_v23 = vld [vmem:[#allocation2 + $0x150] sm:$0xf0]  ;;  %v14103_v5 = vld [vmem:[#allocation2 + $0x1e4] sm:$0xf]  ;;  %v12837_v61 = vld [vmem:[#allocation2 + $0x500] sm:$0xf] }
 0x393   :  { %5227 = vmatpush.bf16.msra.mxu0 %v12558_v43  ;;  %v12938_v43 = vor.u32 %v14230_v55, %v12937_v52  ;;  %v12459_v55 = vld [vmem:[#allocation2 + $0x21c] sm:$0xf0]  ;;  %v14205_v37 = vld [vmem:[#allocation2 + $0x510] sm:$0xf0]  ;;  %v14043_v53 = vld [vmem:[#allocation2 + $0x4] sm:$0xf] }
 0x394   :  { %5250 = vmatpush.bf16.msra.mxu2 %v12978_v56 }
 0x397   :  { %5228 = vmatpush.bf16.msra.mxu0 %v12538_v2  ;;  %v14225_v2 = vld [vmem:[#allocation2 + $0x5b0] sm:$0xf0] }
 0x398   :  { %5251 = vmatpush.bf16.msra.mxu2 %v12958_v40  ;;  %v12918_v25 = vor.u32 %v14225_v2, %v12917_v29  ;;  %v14053_v40 = vld [vmem:[#allocation2 + $0x54] sm:$0xf]  ;;  %v12357_v29 = vld [vmem:[#allocation2 + $0x140] sm:$0xf]  ;;  %v12222_v2 = vor.u32 %v14048_v26, %v12219_v62 }
 0x399   :  { %v12242_v51 = vor.u32 %v14053_v40, %v12239_v27 }
 0x39b   :  { %5229 = vmatpush.bf16.msra.mxu0 %v12518_v11  ;;  %v12897_v11 = vld [vmem:[#allocation2 + $0x578] sm:$0xf] }
 0x39c   :  { %5252 = vmatpush.bf16.msra.mxu2 %v12938_v43  ;;  %v12898_v56 = vor.u32 %v14220_v15, %v12897_v11  ;;  %v12358_v11 = vor.u32 %v14085_v23, %v12357_v29 }
 0x39d   :  { %3823 = vperm.xlu1 %14457, %v3815_v10   ;;  %v12478_v10 = vor.u32 %v14115_v6, %v12477_v19  ;;  %v12397_v19 = vld [vmem:[#allocation2 + $0x190] sm:$0xf] }
 0x39e   :  { %3847 = vperm.xlu2 %14458, %v3839_v33   ;;  %v12717_v33 = vld [vmem:[#allocation2 + $0x410] sm:$0xf] }
 0x39f   :  { %5278 = vmatpush.bf16.msrb.mxu0 %v12342_v35  ;;  %5209 = vmatpush.bf16.msrb.mxu3 %v12478_v10  ;;  %v12718_v36 = vor.u32 %v14175_v34, %v12717_v33  ;;  %v12262_v35 = vor.u32 %v14058_v30, %v12259_v57  ;;  %v14095_v10 = vld [vmem:[#allocation2 + $0x1a0] sm:$0xf0]  ;;  %v14113_v33 = vld [vmem:[#allocation2 + $0x234] sm:$0xf]  ;;  %v12838_v30 = vor.u32 %v14205_v37, %v12837_v61 }
 0x3a0   :  { %5253 = vmatpush.bf16.msra.mxu2 %v12918_v25  ;;  %v12398_v48 = vor.u32 %v14095_v10, %v12397_v19  ;;  %v12439_v25 = vld [vmem:[#allocation2 + $0x1f4] sm:$0xf0] }
 0x3a1   :  { %5241 = vmatpush.bf16.msra.mxu1 %v12718_v36  ;;  %v12479_v36 = vld [vmem:[#allocation2 + $0x244] sm:$0xf0]  ;;  %v12442_v15 = vor.u32 %v14103_v5, %v12439_v25 }
 0x3a2   :  { %v12482_v59 = vor.u32 %v14113_v33, %v12479_v36  ;;  %v12399_v36 = vld [vmem:[#allocation2 + $0x1a4] sm:$0xf0] }
 0x3a3   :  { %5279 = vmatpush.bf16.msrb.mxu0 %v12322_v18  ;;  %5210 = vmatpush.bf16.msrb.mxu3 %v12458_v13  ;;  %v12377_v13 = vld [vmem:[#allocation2 + $0x168] sm:$0xf] }
 0x3a4   :  { %5254 = vmatpush.bf16.msra.mxu2 %v12898_v56  ;;  %v12378_v52 = vor.u32 %v14090_v42, %v12377_v13  ;;  %v12419_v56 = vld [vmem:[#allocation2 + $0x1cc] sm:$0xf0] }
 0x3a5   :  { %5242 = vmatpush.bf16.msra.mxu1 %v12698_v46  ;;  %v14108_v46 = vld [vmem:[#allocation2 + $0x20c] sm:$0xf] }
 0x3a6   :  { %v12462_v47 = vor.u32 %v14108_v46, %v12459_v55  ;;  %v14083_v46 = vld [vmem:[#allocation2 + $0x144] sm:$0xf]  ;;  %v12359_v55 = vld [vmem:[#allocation2 + $0x154] sm:$0xf0] }
 0x3a7   :  { %5280 = vmatpush.bf16.msrb.mxu0 %v12302_v1  ;;  %5211 = vmatpush.bf16.msrb.mxu3 %v12438_v3  ;;  %v12857_v1 = vld [vmem:[#allocation2 + $0x528] sm:$0xf]  ;;  %v12362_v62 = vor.u32 %v14083_v46, %v12359_v55 }
 0x3a8   :  { %5255 = vmatpush.bf16.msra.mxu2 %v12878_v24  ;;  %v12858_v9 = vor.u32 %v14210_v21, %v12857_v1  ;;  %v12379_v24 = vld [vmem:[#allocation2 + $0x17c] sm:$0xf0] }
 0x3a9   :  { %5243 = vmatpush.bf16.msra.mxu1 %v12678_v50 }
 0x3ab   :  { %5281 = vmatpush.bf16.msrb.mxu0 %v12282_v8  ;;  %5212 = vmatpush.bf16.msrb.mxu3 %v12418_v38  ;;  %v16097_v38 = vld [vmem:[#allocation2 + $0x640] sm:$0xff] }
 0x3ac   :  { %5256 = vmatpush.bf16.msra.mxu2 %v12858_v9  ;;  %v4766_v57 = vunpack.c.l.b16 %v16097_v38 }
 0x3ad   :  { %5292 = vmatpush.bf16.msrb.mxu1 %v12502_v7 }
 0x3af   :  { %5282 = vmatpush.bf16.msrb.mxu0 %v12262_v35  ;;  %5213 = vmatpush.bf16.msrb.mxu3 %v12398_v48  ;;  %v14093_v48 = vld [vmem:[#allocation2 + $0x194] sm:$0xf] }
 0x3b0   :  { %5257 = vmatpush.bf16.msra.mxu2 %v12838_v30  ;;  %v12402_v17 = vor.u32 %v14093_v48, %v12399_v36 }
 0x3b1   :  { %5293 = vmatpush.bf16.msrb.mxu1 %v12482_v59 }
 0x3b3   :  { %5283 = vmatpush.bf16.msrb.mxu0 %v12242_v51  ;;  %5214 = vmatpush.bf16.msrb.mxu3 %v12378_v52 }
 0x3b5   :  { %5294 = vmatpush.bf16.msrb.mxu1 %v12462_v47 }
 0x3b7   :  { %5284 = vmatpush.bf16.msrb.mxu0 %v12222_v2  ;;  %5215 = vmatpush.bf16.msrb.mxu3 %v12358_v11 }
 0x3b9   :  { %5295 = vmatpush.bf16.msrb.mxu1 %v12442_v15 }
 0x3ee   :  { %v3712_v20 = vpop.xlane.xlu2 %3711 }
 0x3ef   :  { %v16086_v0 = vmul.f32 0.0025510204, %v3712_v20  ;;  %v12199_v20 = vld [vmem:[#allocation2 + $0x14] sm:$0xf0] }
 0x3f0   :  { %v3748_v31 = vpop.xlane.xlu0 %3747  ;;  %v12202_v19 = vor.u32 %v14043_v53, %v12199_v20 }
 0x3f1   :  { %v3762_v6 = vmul.f32 0.0025510204, %v3748_v31  ;;  %v3764_v34 = vmul.f32 %v16086_v0, %v16086_v0  ;;  %v14098_v31 = vld [vmem:[#allocation2 + $0x1bc] sm:$0xf]  ;;  %v3768_v47 = vsub.f32 %v15983_v41, %v16086_v0  ;;  %v3770_v26 = vsub.f32 %v16008_v16, %v16086_v0 }
 0x3f2   :  { %v12422_v10 = vor.u32 %v14098_v31, %v12419_v56  ;;  %5285 = vmatpush.bf16.msrb.mxu0 %v12202_v19  ;;  %v3771_v9 = vsub.f32 %v16020_v32, %v16086_v0  ;;  %v3773_v20 = vsub.f32 %v16045_v22, %v16086_v0  ;;  %v3772_v36 = vsub.f32 %v16042_v45, %v16086_v0 }
 0x3f3   :  { %v3766_v18 = vsub.f32 %v3762_v6, %v3764_v34  ;;  %v4971_v34 = vpack.c.b16 %v4766_v57, %v4766_v57 }
 0x3f4   :  { %5296 = vmatpush.bf16.msrb.mxu1 %v12422_v10 }
 0x3f5   :  { %v16090_v58 = vadd.f32 1e-05, %v3766_v18  ;;  %v5180_v39 = vsel %vm18818_vm1, %v4971_v34, 0  ;;  %v14088_v18 = vld [vmem:[#allocation2 + $0x16c] sm:$0xf] }
 0x3f6   :  { %5271 = vmatpush.bf16.msra.mxu3 %v5180_v39  ;;  %v12382_v42 = vor.u32 %v14088_v18, %v12379_v24  ;;  %v14158_v34 = vld [vmem:[#allocation2 + $0x39c] sm:$0xf]  ;;  %v12659_v18 = vld [vmem:[#allocation2 + $0x3ac] sm:$0xf0] }
 0x3f7   :  { %v3726_v43 = vpop.xlane.xlu1 %3725  ;;  %14501 = vrsqrt.f32 %v16090_v58  ;;  %vm3788_vm10 = vweird.f32 %v16090_v58  ;;  %v14198_v24 = vld [vmem:[#allocation2 + $0x4dc] sm:$0xf] }
 0x3f8   :  { %v16093_v3 = vmul.f32 0.0025510204, %v3726_v43  ;;  %5297 = vmatpush.bf16.msrb.mxu1 %v12402_v17  ;;  %v3769_v43 = vsub.f32 %v15986_v14, %v16086_v0  ;;  %v12979_v0 = vld [vmem:[#allocation2 + $0x62c] sm:$0xf0] }
 0x3f9   :  { %v3761_v50 = vpop.xlane.xlu2 %3760 }
 0x3fa   :  { %v3765_v8 = vmul.f32 %v16093_v3, %v16093_v3  ;;  %v3763_v60 = vmul.f32 0.0025510204, %v3761_v50  ;;  %v3776_v61 = vsub.f32 %v16036_v28, %v16093_v3  ;;  %v3777_v37 = vsub.f32 %v16039_v44, %v16093_v3 }
 0x3fb   :  { %v3778_v10 = vsub.f32 %v16062_v49, %v16093_v3 }
 0x3fc   :  { %v3767_v7 = vsub.f32 %v3763_v60, %v3765_v8  ;;  %5298 = vmatpush.bf16.msrb.mxu1 %v12382_v42  ;;  %v3774_v8 = vsub.f32 %v16013_v54, %v16093_v3  ;;  %v3775_v60 = vsub.f32 %v16016_v4, %v16093_v3 }
 0x3fd   :  { %v14502_v6 = vpop.eup %14501 }
 0x3fe   :  { %v3781_v35 = vadd.f32 1e-05, %v3767_v7  ;;  %v3783_v33 = vmul.f32 %v14502_v6, %v16090_v58  ;;  %vm3789_vm9 = vweird.f32 %v14502_v6  ;;  %v4767_v7 = vunpack.c.h.b16 %v16097_v38 }
 0x3ff   :  { %vm3790_vm13 = vmor %vm3788_vm10, %vm3789_vm9  ;;  %vm5665_vm10 = vcmask 97280  }
 0x400   :  { %14503 = vrsqrt.f32 %v3781_v35  ;;  %v3784_v59 = vmul.f32 %v14502_v6, %v3783_v33  ;;  %vm3798_vm15 = vweird.f32 %v3781_v35  ;;  %5299 = vmatpush.bf16.msrb.mxu1 %v12362_v62  ;;  %v3779_v33 = vsub.f32 %v16065_v63, %v16093_v3  ;;  %v14238_v3 = vld [vmem:[#allocation2 + $0x61c] sm:$0xf] }
 0x401   :  { %v16138_v38 = vpop.permute.xlu2 %3847  ;;  %v4972_v48 = vpack.c.b16 %v4767_v7, %v4767_v7 }
 0x402   :  { %v3785_v40 = vmul.f32 0.5, %v3784_v59 }
 0x403   :  { %v16132_v11 = vpop.permute.xlu0 %3842 }
 0x404   :  { %v3786_v27 = vsub.f32 1.5, %v3785_v40 }
 0x406   :  { %v14504_v13 = vpop.eup %14503  ;;  %v3787_v51 = vmul.f32 %v14502_v6, %v3786_v27  ;;  %v12819_v27 = vld [vmem:[#allocation2 + $0x4ec] sm:$0xf0] }
 0x407   :  { %v3793_v52 = vmul.f32 %v14504_v13, %v3781_v35  ;;  %vm3799_vm14 = vweird.f32 %v14504_v13 }
 0x408   :  { %v16107_v1 = vsel %vm3790_vm13, %v14502_v6, %v3787_v51  ;;  %vm3800_vm9 = vmor %vm3798_vm15, %vm3799_vm14  ;;  %vm6135_vm13 = vcmask 916480   ;;  %vm6237_vm14 = vcmask 908288   ;;  %vm18810_vm15 = vcmask 785408  }
 0x409   :  { %v3794_v21 = vmul.f32 %v14504_v13, %v3793_v52  ;;  %v3802_v58 = vmul.f32 %v16107_v1, %v3768_v47  ;;  %v3803_v50 = vmul.f32 %v16107_v1, %v3769_v43  ;;  %v3804_v41 = vmul.f32 %v16107_v1, %v3770_v26 }
 0x40a   :  { %v3805_v14 = vmul.f32 %v16107_v1, %v3771_v9  ;;  %v12662_v43 = vor.u32 %v14158_v34, %v12659_v18  ;;  %v14223_v34 = vld [vmem:[#allocation2 + $0x5a4] sm:$0xf]  ;;  %v12579_v18 = vld [vmem:[#allocation2 + $0x30c] sm:$0xf0] }
 0x40b   :  { %v3795_v29 = vmul.f32 0.5, %v3794_v21  ;;  %v3826_v23 = vmul.f32 %v16084_v12, %v3802_v58  ;;  %v3827_v32 = vmul.f32 %v16084_v12, %v3803_v50  ;;  %v3828_v5 = vmul.f32 %v16084_v12, %v3804_v41  ;;  %v12639_v50 = vld [vmem:[#allocation2 + $0x384] sm:$0xf0] }
 0x40c   :  { %v3829_v25 = vmul.f32 %v16084_v12, %v3805_v14  ;;  %v12822_v21 = vor.u32 %v14198_v24, %v12819_v27  ;;  %v12982_v41 = vor.u32 %v14238_v3, %v12979_v0  ;;  %v14193_v14 = vld [vmem:[#allocation2 + $0x4b4] sm:$0xf]  ;;  %v12739_v27 = vld [vmem:[#allocation2 + $0x44c] sm:$0xf0]  ;;  %v12505_v3 = vld [vmem:[#allocation2 + $0x260] sm:$0xf] }
 0x40d   :  { %v3796_v2 = vsub.f32 1.5, %v3795_v29  ;;  %v3850_v4 = vadd.f32 %v16132_v11, %v3826_v23  ;;  %v3851_v28 = vadd.f32 %v16132_v11, %v3827_v32  ;;  %v3852_v57 = vadd.f32 %v16132_v11, %v3828_v5  ;;  %v14153_v29 = vld [vmem:[#allocation2 + $0x374] sm:$0xf]  ;;  %v12959_v32 = vld [vmem:[#allocation2 + $0x604] sm:$0xf0] }
 0x40e   :  { %v3853_v44 = vadd.f32 %v16132_v11, %v3829_v25  ;;  %v3807_v23 = vmul.f32 %v16107_v1, %v3773_v20  ;;  %v5183_v5 = vsel %vm18818_vm1, %v4972_v48, 0  ;;  %v3806_v25 = vmul.f32 %v16107_v1, %v3772_v36  ;;  %v12619_v20 = vld [vmem:[#allocation2 + $0x35c] sm:$0xf0]  ;;  %v14228_v1 = vld [vmem:[#allocation2 + $0x5cc] sm:$0xf] }
 0x40f   :  { %v3797_v16 = vmul.f32 %v14504_v13, %v3796_v2  ;;  %v3824_v56 = vpop.permute.xlu1 %3823  ;;  %v3862_v49 = vmax.f32 %v3850_v4, 0.0  ;;  %v3864_v42 = vmax.f32 %v3852_v57, 0.0  ;;  %v12799_v2 = vld [vmem:[#allocation2 + $0x4c4] sm:$0xf0]  ;;  %v12919_v48 = vld [vmem:[#allocation2 + $0x5b4] sm:$0xf0] }
 0x410   :  { %v3865_v63 = vmax.f32 %v3853_v44, 0.0  ;;  %v3830_v4 = vmul.f32 %v16084_v12, %v3806_v25  ;;  %v14143_v44 = vld [vmem:[#allocation2 + $0x324] sm:$0xf]  ;;  %v14138_v36 = vld [vmem:[#allocation2 + $0x2fc] sm:$0xf]  ;;  %v12922_v24 = vor.u32 %v14223_v34, %v12919_v48 }
 0x411   :  { %v3801_v53 = vsel %vm3800_vm9, %v14504_v13, %v3797_v16  ;;  %v3863_v13 = vmax.f32 %v3851_v28, 0.0  ;;  %v14233_v16 = vld [vmem:[#allocation2 + $0x5f4] sm:$0xf]  ;;  %vm6744_vm9 = vcmask 777216  }
 0x412   :  { %v3808_v15 = vmul.f32 %v3801_v53, %v3774_v8  ;;  %v3809_v30 = vmul.f32 %v3801_v53, %v3775_v60  ;;  %v3810_v54 = vmul.f32 %v3801_v53, %v3776_v61  ;;  %v3811_v31 = vmul.f32 %v3801_v53, %v3777_v37  ;;  %v14133_v0 = vld [vmem:[#allocation2 + $0x2d4] sm:$0xf] }
 0x413   :  { %v3812_v55 = vmul.f32 %v3801_v53, %v3778_v10  ;;  %v3813_v47 = vmul.f32 %v3801_v53, %v3779_v33  ;;  %v12642_v8 = vor.u32 %v14153_v29, %v12639_v50  ;;  %v12802_v37 = vor.u32 %v14193_v14, %v12799_v2  ;;  %v14148_v53 = vld [vmem:[#allocation2 + $0x34c] sm:$0xf]  ;;  %v12759_v10 = vld [vmem:[#allocation2 + $0x474] sm:$0xf0]  ;;  %v12719_v29 = vld [vmem:[#allocation2 + $0x424] sm:$0xf0] }
 0x414   :  { %v3832_v19 = vmul.f32 %v3824_v56, %v3808_v15  ;;  %v3833_v6 = vmul.f32 %v3824_v56, %v3809_v30  ;;  %v3834_v22 = vmul.f32 %v3824_v56, %v3810_v54  ;;  %v3835_v35 = vmul.f32 %v3824_v56, %v3811_v31  ;;  %v14188_v15 = vld [vmem:[#allocation2 + $0x48c] sm:$0xf]  ;;  %v12779_v30 = vld [vmem:[#allocation2 + $0x49c] sm:$0xf0]  ;;  %v14213_v50 = vld [vmem:[#allocation2 + $0x554] sm:$0xf] }
 0x415   :  { %v3836_v60 = vmul.f32 %v3824_v56, %v3812_v55  ;;  %v3837_v61 = vmul.f32 %v3824_v56, %v3813_v47  ;;  %v12962_v7 = vor.u32 %v14233_v16, %v12959_v32  ;;  %v3831_v54 = vmul.f32 %v16084_v12, %v3807_v23  ;;  %v12939_v31 = vld [vmem:[#allocation2 + $0x5dc] sm:$0xf0]  ;;  %v12559_v55 = vld [vmem:[#allocation2 + $0x2e4] sm:$0xf0]  ;;  %v12485_v14 = vld [vmem:[#allocation2 + $0x238] sm:$0xf] }
 0x416   :  { %v3856_v59 = vadd.f32 %v16138_v38, %v3832_v19  ;;  %v3857_v39 = vadd.f32 %v16138_v38, %v3833_v6  ;;  %v3858_v17 = vadd.f32 %v16138_v38, %v3834_v22  ;;  %v3859_v40 = vadd.f32 %v16138_v38, %v3835_v35  ;;  %v12599_v22 = vld [vmem:[#allocation2 + $0x334] sm:$0xf0]  ;;  %v14183_v35 = vld [vmem:[#allocation2 + $0x464] sm:$0xf]  ;;  %v14116_v2 = vld [vmem:[#allocation2 + $0x248] sm:$0xf0] }
 0x417   :  { %v12622_v28 = vor.u32 %v14148_v53, %v12619_v20  ;;  %v3861_v57 = vadd.f32 %v16138_v38, %v3837_v61  ;;  %v12782_v56 = vor.u32 %v14188_v15, %v12779_v30  ;;  %v3860_v19 = vadd.f32 %v16138_v38, %v3836_v60  ;;  %v14178_v38 = vld [vmem:[#allocation2 + $0x43c] sm:$0xf]  ;;  %v14128_v32 = vld [vmem:[#allocation2 + $0x2ac] sm:$0xf]  ;;  %v12699_v61 = vld [vmem:[#allocation2 + $0x3fc] sm:$0xf0] }
 0x418   :  { %v3868_v51 = vmax.f32 %v3856_v59, 0.0  ;;  %v3869_v52 = vmax.f32 %v3857_v39, 0.0  ;;  %v3870_v46 = vmax.f32 %v3858_v17, 0.0  ;;  %v3871_v45 = vmax.f32 %v3859_v40, 0.0  ;;  %v14168_v60 = vld [vmem:[#allocation2 + $0x3ec] sm:$0xf] }
 0x419   :  { %v12942_v6 = vor.u32 %v14228_v1, %v12939_v31  ;;  %v3855_v33 = vadd.f32 %v16132_v11, %v3831_v54  ;;  %v3854_v12 = vadd.f32 %v16132_v11, %v3830_v4  ;;  %v3873_v59 = vmax.f32 %v3861_v57, 0.0  ;;  %v12859_v53 = vld [vmem:[#allocation2 + $0x53c] sm:$0xf0]  ;;  %v12465_v20 = vld [vmem:[#allocation2 + $0x210] sm:$0xf] }
 0x41a   :  { %v16150_v26 = vpack.c.bf16 %v3868_v51, %v3862_v49  ;;  %v16152_v9 = vpack.c.bf16 %v3869_v52, %v3863_v13  ;;  %v16154_v58 = vpack.c.bf16 %v3870_v46, %v3864_v42  ;;  %v16156_v62 = vpack.c.bf16 %v3871_v45, %v3865_v63  ;;  %v14218_v49 = vld [vmem:[#allocation2 + $0x57c] sm:$0xf]  ;;  %v12899_v13 = vld [vmem:[#allocation2 + $0x58c] sm:$0xf0]  ;;  %v14121_v51 = vld [vmem:[#allocation2 + $0x270] sm:$0xf0] }
 0x41b   :  { %v12602_v39 = vor.u32 %v14143_v44, %v12599_v22  ;;  %v12762_v17 = vor.u32 %v14183_v35, %v12759_v10  ;;  %v3872_v40 = vmax.f32 %v3860_v19, 0.0  ;;  %v3867_v42 = vmax.f32 %v3855_v33, 0.0  ;;  %v14123_v54 = vld [vmem:[#allocation2 + $0x284] sm:$0xf]  ;;  %v12519_v1 = vld [vmem:[#allocation2 + $0x294] sm:$0xf0] }
 0x41c   :  { %5202 = vmatmul.bf16.vlgmr.msrb.gmra.mxu2 %v16150_v26  ;;  %5216 = vmatmul.bf16.vlgmr.msrb.gmra.mxu3 %v16152_v9  ;;  %v3866_v63 = vmax.f32 %v3854_v12, 0.0  ;;  %v12582_v52 = vor.u32 %v14138_v36, %v12579_v18  ;;  %v12742_v45 = vor.u32 %v14178_v38, %v12739_v27  ;;  %v12902_v47 = vor.u32 %v14218_v49, %v12899_v13  ;;  %v14163_v31 = vld [vmem:[#allocation2 + $0x3c4] sm:$0xf]  ;;  %v12679_v57 = vld [vmem:[#allocation2 + $0x3d4] sm:$0xf0] }
 0x41d   :  { %5230 = vmatmul.bf16.vlgmr.msra.gmra.mxu0 %v16154_v58  ;;  %5244 = vmatmul.bf16.vlgmr.msra.gmra.mxu1 %v16156_v62  ;;  %v16173_v46 = vpack.c.bf16 %v3873_v59, %v3867_v42  ;;  %v12562_v23 = vor.u32 %v14133_v0, %v12559_v55  ;;  %v12702_v30 = vor.u32 %v14168_v60, %v12699_v61  ;;  %v12839_v44 = vld [vmem:[#allocation2 + $0x514] sm:$0xf0]  ;;  %v12445_v19 = vld [vmem:[#allocation2 + $0x1e8] sm:$0xf]  ;;  %v12345_v22 = vld [vmem:[#allocation2 + $0x120] sm:$0xf] }
 0x41e   :  { %5306 = vmatpush.bf16.msrb.mxu3 %v12662_v43  ;;  %5320 = vmatpush.bf16.msrb.mxu2 %v12822_v21  ;;  %v16171_v11 = vpack.c.bf16 %v3872_v40, %v3866_v63  ;;  %v12506_v43 = vor.u32 %v14121_v51, %v12505_v3  ;;  %v14173_v21 = vld [vmem:[#allocation2 + $0x414] sm:$0xf]  ;;  %v12665_v10 = vld [vmem:[#allocation2 + $0x3a0] sm:$0xf]  ;;  %v12522_v34 = vor.u32 %v14123_v54, %v12519_v1  ;;  %v12325_v27 = vld [vmem:[#allocation2 + $0xf8] sm:$0xf] }
 0x41f   :  { %5334 = vmatpush.bf16.msra.mxu0 %v12982_v41  ;;  %5355 = vmatpush.bf16.msra.mxu1 %v5183_v5  ;;  %v12879_v41 = vld [vmem:[#allocation2 + $0x564] sm:$0xf0]  ;;  %v12722_v16 = vor.u32 %v14173_v21, %v12719_v29  ;;  %v12539_v5 = vld [vmem:[#allocation2 + $0x2bc] sm:$0xf0]  ;;  %v14081_v35 = vld [vmem:[#allocation2 + $0x130] sm:$0xf0]  ;;  %v12682_v48 = vor.u32 %v14163_v31, %v12679_v57 }
 0x420   :  { %v12882_v25 = vor.u32 %v14213_v50, %v12879_v41  ;;  %v12542_v15 = vor.u32 %v14128_v32, %v12539_v5  ;;  %v14161_v33 = vld [vmem:[#allocation2 + $0x3b0] sm:$0xf0]  ;;  %v12825_v12 = vld [vmem:[#allocation2 + $0x4e0] sm:$0xf]  ;;  %v14076_v49 = vld [vmem:[#allocation2 + $0x108] sm:$0xf0] }
 0x421   :  { %v14201_v36 = vld [vmem:[#allocation2 + $0x4f0] sm:$0xf0]  ;;  %v12666_v40 = vor.u32 %v14161_v33, %v12665_v10  ;;  %v12425_v18 = vld [vmem:[#allocation2 + $0x1c0] sm:$0xf]  ;;  %v12645_v13 = vld [vmem:[#allocation2 + $0x378] sm:$0xf] }
 0x422   :  { %5307 = vmatpush.bf16.msrb.mxu3 %v12642_v8  ;;  %5321 = vmatpush.bf16.msrb.mxu2 %v12802_v37  ;;  %v12486_v8 = vor.u32 %v14116_v2, %v12485_v14  ;;  %v14208_v37 = vld [vmem:[#allocation2 + $0x52c] sm:$0xf]  ;;  %v14101_v38 = vld [vmem:[#allocation2 + $0x1d0] sm:$0xf0]  ;;  %v12805_v63 = vld [vmem:[#allocation2 + $0x4b8] sm:$0xf] }
 0x423   :  { %5335 = vmatpush.bf16.msra.mxu0 %v12962_v7  ;;  %v14111_v7 = vld [vmem:[#allocation2 + $0x220] sm:$0xf0]  ;;  %v12862_v4 = vor.u32 %v14208_v37, %v12859_v53  ;;  %v14156_v42 = vld [vmem:[#allocation2 + $0x388] sm:$0xf0]  ;;  %v12426_v51 = vor.u32 %v14101_v38, %v12425_v18  ;;  %v12625_v29 = vld [vmem:[#allocation2 + $0x350] sm:$0xf] }
 0x424   :  { %v14196_v3 = vld [vmem:[#allocation2 + $0x4c8] sm:$0xf0]  ;;  %v12646_v55 = vor.u32 %v14156_v42, %v12645_v13  ;;  %v14071_v21 = vld [vmem:[#allocation2 + $0xe0] sm:$0xf0]  ;;  %v12785_v41 = vld [vmem:[#allocation2 + $0x490] sm:$0xf] }
 0x425   :  { %v14096_v0 = vld [vmem:[#allocation2 + $0x1a8] sm:$0xf0]  ;;  %v14151_v50 = vld [vmem:[#allocation2 + $0x360] sm:$0xf0]  ;;  %v12285_v60 = vld [vmem:[#allocation2 + $0xa8] sm:$0xf] }
 0x426   :  { %5308 = vmatpush.bf16.msrb.mxu3 %v12622_v28  ;;  %5322 = vmatpush.bf16.msrb.mxu2 %v12782_v56  ;;  %v12466_v28 = vor.u32 %v14111_v7, %v12465_v20  ;;  %v14203_v56 = vld [vmem:[#allocation2 + $0x504] sm:$0xf]  ;;  %v16185_v5 = vld [vmem:[#allocation2 + $0x648] sm:$0xff]  ;;  %v14066_v61 = vld [vmem:[#allocation2 + $0xb8] sm:$0xf0] }
 0x427   :  { %5336 = vmatpush.bf16.msra.mxu0 %v12942_v6  ;;  %v14106_v6 = vld [vmem:[#allocation2 + $0x1f8] sm:$0xf0]  ;;  %v12842_v59 = vor.u32 %v14203_v56, %v12839_v44  ;;  %v14191_v14 = vld [vmem:[#allocation2 + $0x4a0] sm:$0xf0]  ;;  %v12605_v37 = vld [vmem:[#allocation2 + $0x328] sm:$0xf]  ;;  %v12286_v54 = vor.u32 %v14066_v61, %v12285_v60 }
 0x428   :  { %v14091_v32 = vld [vmem:[#allocation2 + $0x180] sm:$0xf0]  ;;  %v14146_v53 = vld [vmem:[#allocation2 + $0x338] sm:$0xf0]  ;;  %v12765_v20 = vld [vmem:[#allocation2 + $0x468] sm:$0xf] }
 0x429   :  { %v14186_v7 = vld [vmem:[#allocation2 + $0x478] sm:$0xf0]  ;;  %v12365_v1 = vld [vmem:[#allocation2 + $0x148] sm:$0xf]  ;;  %v12265_v57 = vld [vmem:[#allocation2 + $0x80] sm:$0xf] }
 0x42a   :  { %5309 = vmatpush.bf16.msrb.mxu3 %v12602_v39  ;;  %5323 = vmatpush.bf16.msrb.mxu2 %v12762_v17  ;;  %v12446_v39 = vor.u32 %v14106_v6, %v12445_v19  ;;  %v12346_v17 = vor.u32 %v14081_v35, %v12345_v22  ;;  %v14086_v31 = vld [vmem:[#allocation2 + $0x158] sm:$0xf0]  ;;  %v14061_v56 = vld [vmem:[#allocation2 + $0x90] sm:$0xf0]  ;;  %v12585_v44 = vld [vmem:[#allocation2 + $0x300] sm:$0xf] }
 0x42b   :  { %5337 = vmatpush.bf16.msra.mxu0 %v12922_v24  ;;  %v12826_v24 = vor.u32 %v14201_v36, %v12825_v12  ;;  %v14141_v19 = vld [vmem:[#allocation2 + $0x310] sm:$0xf0]  ;;  %v12745_v6 = vld [vmem:[#allocation2 + $0x440] sm:$0xf]  ;;  %v12366_v10 = vor.u32 %v14086_v31, %v12365_v1  ;;  %v12266_v33 = vor.u32 %v14061_v56, %v12265_v57  ;;  %v12725_v18 = vld [vmem:[#allocation2 + $0x418] sm:$0xf] }
 0x42c   :  { %5258 = vmatmul.bf16.vlgmr.msra.gmra.mxu2 %v16171_v11  ;;  %12995 = vmatmul.msk.bf16.vlgmr.msra.gmra.mxu3 %vm149_vm2, %v16173_v46  ;;  %v14181_v22 = vld [vmem:[#allocation2 + $0x450] sm:$0xf0]  ;;  %v12586_v12 = vor.u32 %v14141_v19, %v12585_v44  ;;  %v14176_v38 = vld [vmem:[#allocation2 + $0x428] sm:$0xf0]  ;;  %v14154_v13 = vld [vmem:[#allocation2 + $0x37c] sm:$0xf] }
 0x42d   :  { %5286 = vmatmul.bf16.vlgmr.msrb.gmra.mxu0 %v16150_v26  ;;  %5300 = vmatmul.bf16.vlgmr.msrb.gmra.mxu1 %v16152_v9  ;;  %v12746_v36 = vor.u32 %v14181_v22, %v12745_v6  ;;  %v12647_v42 = vld [vmem:[#allocation2 + $0x38c] sm:$0xf0]  ;;  %v12985_v60 = vld [vmem:[#allocation2 + $0x620] sm:$0xf]  ;;  %v14241_v61 = vld [vmem:[#allocation2 + $0x630] sm:$0xf0] }
 0x42e   :  { %5310 = vmatpush.bf16.msrb.mxu3 %v12582_v52  ;;  %5324 = vmatpush.bf16.msrb.mxu2 %v12742_v45  ;;  %v12326_v52 = vor.u32 %v14076_v49, %v12325_v27  ;;  %v12405_v45 = vld [vmem:[#allocation2 + $0x198] sm:$0xf]  ;;  %v12986_v31 = vor.u32 %v14241_v61, %v12985_v60  ;;  %v12607_v57 = vld [vmem:[#allocation2 + $0x33c] sm:$0xf0]  ;;  %v14236_v19 = vld [vmem:[#allocation2 + $0x608] sm:$0xf0] }
 0x42f   :  { %5338 = vmatpush.bf16.msra.mxu0 %v12902_v47  ;;  %5376 = vmatpush.bf16.msrb.mxu1 %v12506_v43  ;;  %v12806_v47 = vor.u32 %v14196_v3, %v12805_v63  ;;  %v12305_v43 = vld [vmem:[#allocation2 + $0xd0] sm:$0xf]  ;;  %v12406_v2 = vor.u32 %v14096_v0, %v12405_v45  ;;  %v12726_v3 = vor.u32 %v14176_v38, %v12725_v18  ;;  %v14131_v0 = vld [vmem:[#allocation2 + $0x2c0] sm:$0xf0]  ;;  %v12965_v56 = vld [vmem:[#allocation2 + $0x5f8] sm:$0xf] }
 0x430   :  { %v12545_v45 = vld [vmem:[#allocation2 + $0x2b0] sm:$0xf]  ;;  %v14074_v6 = vld [vmem:[#allocation2 + $0xfc] sm:$0xf]  ;;  %v12307_v18 = vld [vmem:[#allocation2 + $0xe4] sm:$0xf0] }
 0x431   :  { %v12327_v22 = vld [vmem:[#allocation2 + $0x10c] sm:$0xf0]  ;;  %v14109_v38 = vld [vmem:[#allocation2 + $0x214] sm:$0xf]  ;;  %v14124_v61 = vld [vmem:[#allocation2 + $0x28c] sm:$0xf] }
 0x432   :  { %5311 = vmatpush.bf16.msrb.mxu3 %v12562_v23  ;;  %5325 = vmatpush.bf16.msrb.mxu2 %v12722_v16  ;;  %v12306_v23 = vor.u32 %v14071_v21, %v12305_v43  ;;  %v12385_v16 = vld [vmem:[#allocation2 + $0x170] sm:$0xf]  ;;  %v12650_v43 = vor.u32 %v14154_v13, %v12647_v42  ;;  %v14134_v42 = vld [vmem:[#allocation2 + $0x2dc] sm:$0xf] }
 0x433   :  { %5339 = vmatpush.bf16.msra.mxu0 %v12882_v25  ;;  %5377 = vmatpush.bf16.msrb.mxu1 %v12486_v8  ;;  %v12626_v25 = vor.u32 %v14151_v50, %v12625_v29  ;;  %v12786_v8 = vor.u32 %v14191_v14, %v12785_v41  ;;  %v14149_v29 = vld [vmem:[#allocation2 + $0x354] sm:$0xf]  ;;  %v12627_v50 = vld [vmem:[#allocation2 + $0x364] sm:$0xf0]  ;;  %v12546_v14 = vor.u32 %v14131_v0, %v12545_v45  ;;  %v14064_v45 = vld [vmem:[#allocation2 + $0xac] sm:$0xf] }
 0x434   :  { %v12205_v41 = vld [vmem:[#allocation2 + $0x8] sm:$0xf]  ;;  %v12287_v0 = vld [vmem:[#allocation2 + $0xbc] sm:$0xf0] }
 0x436   :  { %5312 = vmatpush.bf16.msrb.mxu3 %v12542_v15  ;;  %5326 = vmatpush.bf16.msrb.mxu2 %v12702_v30  ;;  %v4768_v15 = vunpack.c.l.b16 %v16185_v5  ;;  %v12386_v30 = vor.u32 %v14091_v32, %v12385_v16  ;;  %v12525_v16 = vld [vmem:[#allocation2 + $0x288] sm:$0xf]  ;;  %v14126_v32 = vld [vmem:[#allocation2 + $0x298] sm:$0xf0] }
 0x437   :  { %5340 = vmatpush.bf16.msra.mxu0 %v12862_v4  ;;  %5378 = vmatpush.bf16.msrb.mxu1 %v12466_v28  ;;  %v12606_v4 = vor.u32 %v14146_v53, %v12605_v37  ;;  %v12766_v28 = vor.u32 %v14186_v7, %v12765_v20  ;;  %v14079_v37 = vld [vmem:[#allocation2 + $0x124] sm:$0xf]  ;;  %v12347_v53 = vld [vmem:[#allocation2 + $0x134] sm:$0xf0]  ;;  %v12630_v20 = vor.u32 %v14149_v29, %v12627_v50  ;;  %v14129_v50 = vld [vmem:[#allocation2 + $0x2b4] sm:$0xf] }
 0x438   :  { %v4973_v35 = vpack.c.b16 %v4768_v15, %v4768_v15  ;;  %v14119_v15 = vld [vmem:[#allocation2 + $0x264] sm:$0xf]  ;;  %v12290_v29 = vor.u32 %v14064_v45, %v12287_v0  ;;  %v12827_v45 = vld [vmem:[#allocation2 + $0x4f4] sm:$0xf0] }
 0x439   :  { %v14239_v0 = vld [vmem:[#allocation2 + $0x624] sm:$0xf] }
 0x43a   :  { %5313 = vmatpush.bf16.msrb.mxu3 %v12522_v34  ;;  %5327 = vmatpush.bf16.msrb.mxu2 %v12682_v48  ;;  %v14159_v34 = vld [vmem:[#allocation2 + $0x3a4] sm:$0xf]  ;;  %v12667_v48 = vld [vmem:[#allocation2 + $0x3b4] sm:$0xf0] }
 0x43b   :  { %5341 = vmatpush.bf16.msra.mxu0 %v12842_v59  ;;  %5379 = vmatpush.bf16.msrb.mxu1 %v12446_v39  ;;  %v12245_v59 = vld [vmem:[#allocation2 + $0x58] sm:$0xf]  ;;  %v14056_v39 = vld [vmem:[#allocation2 + $0x68] sm:$0xf0]  ;;  %v12670_v27 = vor.u32 %v14159_v34, %v12667_v48  ;;  %v12966_v34 = vor.u32 %v14236_v19, %v12965_v56  ;;  %v12330_v48 = vor.u32 %v14074_v6, %v12327_v22  ;;  %v12333_v6 = vld [vmem:[#allocation2 + $0x100] sm:$0xf] }
 0x43c   :  { %v12246_v49 = vor.u32 %v14056_v39, %v12245_v59  ;;  %v12945_v59 = vld [vmem:[#allocation2 + $0x5d0] sm:$0xf]  ;;  %v14077_v22 = vld [vmem:[#allocation2 + $0x110] sm:$0xf0] }
 0x43d   :  { %5314 = vmatmul.bf16.vlgmr.msrb.gmra.mxu3 %v16154_v58  ;;  %5328 = vmatmul.bf16.vlgmr.msrb.gmra.mxu2 %v16156_v62 }
 0x43e   :  { %5362 = vmatpush.bf16.msra.mxu3 %v12346_v17  ;;  %5390 = vmatpush.bf16.msra.mxu2 %v12666_v40  ;;  %v12565_v17 = vld [vmem:[#allocation2 + $0x2d8] sm:$0xf]  ;;  %v14136_v40 = vld [vmem:[#allocation2 + $0x2e8] sm:$0xf0] }
 0x43f   :  { %5404 = vmatpush.bf16.msrb.mxu0 %v12826_v24  ;;  %12996 = vmatmul.msk.bf16.vlgmr.msra.gmra.mxu1 %vm149_vm2, %v16173_v46  ;;  %v5186_v24 = vsel %vm18818_vm1, %v4973_v35, 0  ;;  %v12566_v63 = vor.u32 %v14136_v40, %v12565_v17  ;;  %v14114_v35 = vld [vmem:[#allocation2 + $0x23c] sm:$0xf]  ;;  %v14231_v17 = vld [vmem:[#allocation2 + $0x5e0] sm:$0xf0] }
 0x440   :  { %5342 = vmatmul.bf16.vlgmr.msra.gmra.mxu0 %v16171_v11  ;;  %5380 = vmatpush.bf16.msrb.mxu1 %v12426_v51  ;;  %v12225_v51 = vld [vmem:[#allocation2 + $0x30] sm:$0xf]  ;;  %v14069_v40 = vld [vmem:[#allocation2 + $0xd4] sm:$0xf] }
 0x441   :  { %v12310_v13 = vor.u32 %v14069_v40, %v12307_v18  ;;  %v12313_v40 = vld [vmem:[#allocation2 + $0xd8] sm:$0xf]  ;;  %v14072_v18 = vld [vmem:[#allocation2 + $0xe8] sm:$0xf0] }
 0x442   :  { %5363 = vmatpush.bf16.msra.mxu3 %v12326_v52  ;;  %5391 = vmatpush.bf16.msra.mxu2 %v12646_v55  ;;  %v14051_v52 = vld [vmem:[#allocation2 + $0x40] sm:$0xf0]  ;;  %v12705_v55 = vld [vmem:[#allocation2 + $0x3f0] sm:$0xf] }
 0x443   :  { %5405 = vmatpush.bf16.msrb.mxu0 %v12806_v47  ;;  %v14171_v47 = vld [vmem:[#allocation2 + $0x400] sm:$0xf0]  ;;  %v12226_v21 = vor.u32 %v14051_v52, %v12225_v51  ;;  %v14226_v52 = vld [vmem:[#allocation2 + $0x5b8] sm:$0xf0] }
 0x444   :  { %5381 = vmatpush.bf16.msrb.mxu1 %v12406_v2  ;;  %v12706_v2 = vor.u32 %v14171_v47, %v12705_v55  ;;  %v14104_v55 = vld [vmem:[#allocation2 + $0x1ec] sm:$0xf]  ;;  %v12447_v47 = vld [vmem:[#allocation2 + $0x1fc] sm:$0xf0] }
 0x446   :  { %5364 = vmatpush.bf16.msra.mxu3 %v12306_v23  ;;  %5392 = vmatpush.bf16.msra.mxu2 %v12626_v25  ;;  %v14046_v23 = vld [vmem:[#allocation2 + $0x18] sm:$0xf0]  ;;  %v12685_v25 = vld [vmem:[#allocation2 + $0x3c8] sm:$0xf] }
 0x447   :  { %5406 = vmatpush.bf16.msrb.mxu0 %v12786_v8  ;;  %v14166_v8 = vld [vmem:[#allocation2 + $0x3d8] sm:$0xf0]  ;;  %v12206_v7 = vor.u32 %v14046_v23, %v12205_v41  ;;  %v12547_v41 = vld [vmem:[#allocation2 + $0x2c4] sm:$0xf0]  ;;  %v14221_v23 = vld [vmem:[#allocation2 + $0x590] sm:$0xf0] }
 0x448   :  { %5382 = vmatpush.bf16.msrb.mxu1 %v12386_v30  ;;  %v12507_v30 = vld [vmem:[#allocation2 + $0x274] sm:$0xf0]  ;;  %v12686_v1 = vor.u32 %v14166_v8, %v12685_v25  ;;  %v14099_v25 = vld [vmem:[#allocation2 + $0x1c4] sm:$0xf]  ;;  %v12550_v60 = vor.u32 %v14129_v50, %v12547_v41  ;;  %v12293_v50 = vld [vmem:[#allocation2 + $0xb0] sm:$0xf] }
 0x449   :  { %v12510_v44 = vor.u32 %v14119_v15, %v12507_v30  ;;  %v12427_v8 = vld [vmem:[#allocation2 + $0x1d4] sm:$0xf0]  ;;  %v14082_v15 = vld [vmem:[#allocation2 + $0x138] sm:$0xf0]  ;;  %v14067_v41 = vld [vmem:[#allocation2 + $0xc0] sm:$0xf0] }
 0x44a   :  { %5365 = vmatpush.bf16.msra.mxu3 %v12286_v54  ;;  %5393 = vmatpush.bf16.msra.mxu2 %v12606_v4  ;;  %v12526_v54 = vor.u32 %v14126_v32, %v12525_v16  ;;  %v12350_v4 = vor.u32 %v14079_v37, %v12347_v53  ;;  %v14059_v16 = vld [vmem:[#allocation2 + $0x84] sm:$0xf]  ;;  %v12267_v32 = vld [vmem:[#allocation2 + $0x94] sm:$0xf0]  ;;  %v12430_v30 = vor.u32 %v14099_v25, %v12427_v8  ;;  %v12807_v25 = vld [vmem:[#allocation2 + $0x4cc] sm:$0xf0] }
 0x44b   :  { %5407 = vmatpush.bf16.msrb.mxu0 %v12766_v28  ;;  %v14144_v28 = vld [vmem:[#allocation2 + $0x32c] sm:$0xf]  ;;  %v12270_v53 = vor.u32 %v14059_v16, %v12267_v32  ;;  %v14162_v16 = vld [vmem:[#allocation2 + $0x3b8] sm:$0xf0] }
 0x44c   :  { %5383 = vmatpush.bf16.msrb.mxu1 %v12366_v10  ;;  %v12487_v10 = vld [vmem:[#allocation2 + $0x24c] sm:$0xf0]  ;;  %v14194_v32 = vld [vmem:[#allocation2 + $0x4bc] sm:$0xf] }
 0x44d   :  { %v12490_v39 = vor.u32 %v14114_v35, %v12487_v10  ;;  %v14234_v8 = vld [vmem:[#allocation2 + $0x5fc] sm:$0xf] }
 0x44e   :  { %5366 = vmatpush.bf16.msra.mxu3 %v12266_v33  ;;  %5394 = vmatpush.bf16.msra.mxu2 %v12586_v12  ;;  %v12610_v33 = vor.u32 %v14144_v28, %v12607_v57  ;;  %v14139_v12 = vld [vmem:[#allocation2 + $0x304] sm:$0xf]  ;;  %v14094_v28 = vld [vmem:[#allocation2 + $0x19c] sm:$0xf]  ;;  %v12407_v57 = vld [vmem:[#allocation2 + $0x1ac] sm:$0xf0] }
 0x44f   :  { %5408 = vmatpush.bf16.msrb.mxu0 %v12746_v36  ;;  %5384 = vmatmul.bf16.vlgmr.msrb.gmra.mxu1 %v16152_v9  ;;  %v12587_v36 = vld [vmem:[#allocation2 + $0x314] sm:$0xf0]  ;;  %v12410_v10 = vor.u32 %v14094_v28, %v12407_v57  ;;  %v14229_v28 = vld [vmem:[#allocation2 + $0x5d4] sm:$0xf]  ;;  %v12947_v57 = vld [vmem:[#allocation2 + $0x5e4] sm:$0xf0] }
 0x450   :  { %5439 = vmatpush.bf16.msra.mxu1 %v5186_v24  ;;  %v12467_v24 = vld [vmem:[#allocation2 + $0x224] sm:$0xf0] }
 0x451   :  { %v12470_v51 = vor.u32 %v14109_v38, %v12467_v24  ;;  %v12845_v38 = vld [vmem:[#allocation2 + $0x508] sm:$0xf]  ;;  %v4769_v24 = vunpack.c.h.b16 %v16185_v5 }
 0x452   :  { %5367 = vmatpush.bf16.msra.mxu3 %v12246_v49  ;;  %5395 = vmatpush.bf16.msra.mxu2 %v12566_v63  ;;  %v12946_v49 = vor.u32 %v14231_v17, %v12945_v59  ;;  %v12567_v63 = vld [vmem:[#allocation2 + $0x2ec] sm:$0xf0]  ;;  %v12387_v59 = vld [vmem:[#allocation2 + $0x184] sm:$0xf0] }
 0x453   :  { %5409 = vmatpush.bf16.msrb.mxu0 %v12726_v3  ;;  %v12925_v3 = vld [vmem:[#allocation2 + $0x5a8] sm:$0xf]  ;;  %v4974_v5 = vpack.c.b16 %v4769_v24, %v4769_v24  ;;  %v12613_v24 = vld [vmem:[#allocation2 + $0x330] sm:$0xf] }
 0x454   :  { %5474 = vmatpush.bf16.msrb.mxu1 %v12670_v27  ;;  %v12590_v27 = vor.u32 %v14139_v12, %v12587_v36  ;;  %v12227_v12 = vld [vmem:[#allocation2 + $0x44] sm:$0xf0]  ;;  %v14089_v36 = vld [vmem:[#allocation2 + $0x174] sm:$0xf] }
 0x456   :  { %5368 = vmatpush.bf16.msra.mxu3 %v12226_v21  ;;  %5396 = vmatpush.bf16.msra.mxu2 %v12546_v14  ;;  %v12926_v21 = vor.u32 %v14226_v52, %v12925_v3  ;;  %v12905_v14 = vld [vmem:[#allocation2 + $0x580] sm:$0xf]  ;;  %v14084_v3 = vld [vmem:[#allocation2 + $0x14c] sm:$0xf]  ;;  %v14199_v52 = vld [vmem:[#allocation2 + $0x4e4] sm:$0xf] }
 0x457   :  { %5410 = vmatpush.bf16.msrb.mxu0 %v12706_v2  ;;  %v12450_v2 = vor.u32 %v14104_v55, %v12447_v47  ;;  %v12906_v37 = vor.u32 %v14221_v23, %v12905_v14  ;;  %v12987_v55 = vld [vmem:[#allocation2 + $0x634] sm:$0xf0]  ;;  %v12314_v47 = vor.u32 %v14072_v18, %v12313_v40  ;;  %v12830_v14 = vor.u32 %v14199_v52, %v12827_v45  ;;  %v12673_v23 = vld [vmem:[#allocation2 + $0x3a8] sm:$0xf]  ;;  %v14052_v40 = vld [vmem:[#allocation2 + $0x48] sm:$0xf0] }
 0x458   :  { %5475 = vmatpush.bf16.msrb.mxu1 %v12650_v43  ;;  %v12570_v43 = vor.u32 %v14134_v42, %v12567_v63  ;;  %v14044_v42 = vld [vmem:[#allocation2 + $0xc] sm:$0xf]  ;;  %v12207_v63 = vld [vmem:[#allocation2 + $0x1c] sm:$0xf0]  ;;  %v12213_v52 = vld [vmem:[#allocation2 + $0x10] sm:$0xf] }
 0x459   :  { %v14047_v45 = vld [vmem:[#allocation2 + $0x20] sm:$0xf0] }
 0x45a   :  { %5369 = vmatpush.bf16.msra.mxu3 %v12206_v7  ;;  %5397 = vmatpush.bf16.msra.mxu2 %v12526_v54  ;;  %v12353_v7 = vld [vmem:[#allocation2 + $0x128] sm:$0xf]  ;;  %v12885_v54 = vld [vmem:[#allocation2 + $0x558] sm:$0xf] }
 0x45b   :  { %5411 = vmatpush.bf16.msrb.mxu0 %v12686_v1  ;;  %v14216_v1 = vld [vmem:[#allocation2 + $0x568] sm:$0xf0] }
 0x45c   :  { %5476 = vmatpush.bf16.msrb.mxu1 %v12630_v20  ;;  %v12527_v20 = vld [vmem:[#allocation2 + $0x29c] sm:$0xf0]  ;;  %v12886_v19 = vor.u32 %v14216_v1, %v12885_v54  ;;  %v14157_v1 = vld [vmem:[#allocation2 + $0x390] sm:$0xf0] }
 0x45d   :  { %5370 = vmatmul.bf16.vlgmr.msra.gmra.mxu3 %v16150_v26  ;;  %5398 = vmatmul.bf16.vlgmr.msra.gmra.mxu2 %v16154_v58  ;;  %v12530_v56 = vor.u32 %v14124_v61, %v12527_v20  ;;  %v5189_v61 = vsel %vm18818_vm1, %v4974_v5, 0  ;;  %v12273_v20 = vld [vmem:[#allocation2 + $0x88] sm:$0xf]  ;;  %v12653_v54 = vld [vmem:[#allocation2 + $0x380] sm:$0xf] }
 0x45e   :  { %5418 = vmatpush.bf16.msrb.mxu3 %v12986_v31  ;;  %5446 = vmatpush.bf16.msrb.mxu2 %v12350_v4  ;;  %v14054_v31 = vld [vmem:[#allocation2 + $0x5c] sm:$0xf]  ;;  %v12247_v4 = vld [vmem:[#allocation2 + $0x6c] sm:$0xf0]  ;;  %v12993_v5 = vld [vmem:[#allocation2 + $0x628] sm:$0xf] }
 0x45f   :  { %5460 = vmatpush.bf16.msra.mxu0 %v12510_v44  ;;  %12997 = vmatmul.msk.bf16.vlgmr.msra.gmra.mxu1 %vm149_vm2, %v16173_v46  ;;  %v12354_v44 = vor.u32 %v14082_v15, %v12353_v7  ;;  %v12250_v35 = vor.u32 %v14054_v31, %v12247_v4  ;;  %v14062_v7 = vld [vmem:[#allocation2 + $0x98] sm:$0xf0]  ;;  %v12810_v15 = vor.u32 %v14194_v32, %v12807_v25  ;;  %v14189_v31 = vld [vmem:[#allocation2 + $0x494] sm:$0xf]  ;;  %v12787_v4 = vld [vmem:[#allocation2 + $0x4a4] sm:$0xf0] }
 0x460   :  { %5412 = vmatmul.bf16.vlgmr.msrb.gmra.mxu0 %v16156_v62  ;;  %5477 = vmatpush.bf16.msrb.mxu1 %v12610_v33  ;;  %v12865_v33 = vld [vmem:[#allocation2 + $0x530] sm:$0xf]  ;;  %v12573_v25 = vld [vmem:[#allocation2 + $0x2e0] sm:$0xf] }
 0x462   :  { %5419 = vmatpush.bf16.msrb.mxu3 %v12966_v34  ;;  %5447 = vmatpush.bf16.msrb.mxu2 %v12330_v48  ;;  %v14211_v34 = vld [vmem:[#allocation2 + $0x540] sm:$0xf0]  ;;  %v14049_v48 = vld [vmem:[#allocation2 + $0x34] sm:$0xf] }
 0x463   :  { %5461 = vmatpush.bf16.msra.mxu0 %v12490_v39  ;;  %v12334_v39 = vor.u32 %v14077_v22, %v12333_v6  ;;  %v12866_v17 = vor.u32 %v14211_v34, %v12865_v33  ;;  %v14057_v6 = vld [vmem:[#allocation2 + $0x70] sm:$0xf0]  ;;  %v12790_v22 = vor.u32 %v14189_v31, %v12787_v4  ;;  %v14152_v33 = vld [vmem:[#allocation2 + $0x368] sm:$0xf0] }
 0x464   :  { %5478 = vmatpush.bf16.msrb.mxu1 %v12590_v27  ;;  %v12230_v27 = vor.u32 %v14049_v48, %v12227_v12  ;;  %v14184_v34 = vld [vmem:[#allocation2 + $0x46c] sm:$0xf]  ;;  %v12767_v48 = vld [vmem:[#allocation2 + $0x47c] sm:$0xf0] }
 0x465   :  { %v14224_v12 = vld [vmem:[#allocation2 + $0x5ac] sm:$0xf]  ;;  %v12770_v18 = vor.u32 %v14184_v34, %v12767_v48  ;;  %v12833_v34 = vld [vmem:[#allocation2 + $0x4e8] sm:$0xf]  ;;  %v14202_v48 = vld [vmem:[#allocation2 + $0x4f8] sm:$0xf0] }
 0x466   :  { %5420 = vmatpush.bf16.msrb.mxu3 %v12946_v49  ;;  %5448 = vmatpush.bf16.msrb.mxu2 %v12310_v13  ;;  %v12390_v49 = vor.u32 %v14089_v36, %v12387_v59  ;;  %v14206_v13 = vld [vmem:[#allocation2 + $0x518] sm:$0xf0]  ;;  %v12927_v36 = vld [vmem:[#allocation2 + $0x5bc] sm:$0xf0]  ;;  %v14132_v4 = vld [vmem:[#allocation2 + $0x2c8] sm:$0xf0] }
 0x467   :  { %5462 = vmatpush.bf16.msra.mxu0 %v12470_v51  ;;  %v12367_v51 = vld [vmem:[#allocation2 + $0x15c] sm:$0xf0] }
 0x468   :  { %5479 = vmatpush.bf16.msrb.mxu1 %v12570_v43  ;;  %v12846_v43 = vor.u32 %v14206_v13, %v12845_v38  ;;  %v12930_v38 = vor.u32 %v14224_v12, %v12927_v36  ;;  %v12747_v13 = vld [vmem:[#allocation2 + $0x454] sm:$0xf0] }
 0x46a   :  { %5421 = vmatpush.bf16.msrb.mxu3 %v12926_v21  ;;  %5449 = vmatpush.bf16.msrb.mxu2 %v12290_v29  ;;  %v12210_v21 = vor.u32 %v14044_v42, %v12207_v63  ;;  %v12370_v29 = vor.u32 %v14084_v3, %v12367_v51  ;;  %v14219_v42 = vld [vmem:[#allocation2 + $0x584] sm:$0xf]  ;;  %v12907_v63 = vld [vmem:[#allocation2 + $0x594] sm:$0xf0] }
 0x46b   :  { %5463 = vmatpush.bf16.msra.mxu0 %v12450_v2  ;;  %v12990_v2 = vor.u32 %v14239_v0, %v12987_v55  ;;  %v12910_v55 = vor.u32 %v14219_v42, %v12907_v63  ;;  %v14197_v42 = vld [vmem:[#allocation2 + $0x4d0] sm:$0xf0] }
 0x46c   :  { %5480 = vmatpush.bf16.msrb.mxu1 %v12550_v60  ;;  %v12967_v60 = vld [vmem:[#allocation2 + $0x60c] sm:$0xf0] }
 0x46e   :  { %5422 = vmatpush.bf16.msrb.mxu3 %v12906_v37  ;;  %5450 = vmatpush.bf16.msrb.mxu2 %v12270_v53  ;;  %v12294_v37 = vor.u32 %v14067_v41, %v12293_v50  ;;  %v12674_v53 = vor.u32 %v14162_v16, %v12673_v23  ;;  %v12727_v50 = vld [vmem:[#allocation2 + $0x42c] sm:$0xf0]  ;;  %v14214_v41 = vld [vmem:[#allocation2 + $0x55c] sm:$0xf] }
 0x46f   :  { %5464 = vmatpush.bf16.msra.mxu0 %v12430_v30  ;;  %v12970_v30 = vor.u32 %v14234_v8, %v12967_v60  ;;  %v14137_v8 = vld [vmem:[#allocation2 + $0x2f0] sm:$0xf0]  ;;  %v12973_v60 = vld [vmem:[#allocation2 + $0x600] sm:$0xf] }
 0x470   :  { %5481 = vmatpush.bf16.msrb.mxu1 %v12530_v56  ;;  %v12274_v56 = vor.u32 %v14062_v7, %v12273_v20  ;;  %v12707_v20 = vld [vmem:[#allocation2 + $0x404] sm:$0xf0]  ;;  %v14209_v7 = vld [vmem:[#allocation2 + $0x534] sm:$0xf] }
 0x472   :  { %5423 = vmatpush.bf16.msrb.mxu3 %v12886_v19  ;;  %5451 = vmatpush.bf16.msrb.mxu2 %v12250_v35  ;;  %v12253_v19 = vld [vmem:[#allocation2 + $0x60] sm:$0xf]  ;;  %v12950_v35 = vor.u32 %v14229_v28, %v12947_v57  ;;  %v12953_v28 = vld [vmem:[#allocation2 + $0x5d8] sm:$0xf]  ;;  %v14232_v57 = vld [vmem:[#allocation2 + $0x5e8] sm:$0xf0] }
 0x473   :  { %5465 = vmatpush.bf16.msra.mxu0 %v12410_v10  ;;  %5482 = vmatmul.bf16.vlgmr.msrb.gmra.mxu1 %v16154_v58  ;;  %v12633_v10 = vld [vmem:[#allocation2 + $0x358] sm:$0xf]  ;;  %v12254_v59 = vor.u32 %v14057_v6, %v12253_v19  ;;  %v12687_v19 = vld [vmem:[#allocation2 + $0x3dc] sm:$0xf0]  ;;  %v14204_v6 = vld [vmem:[#allocation2 + $0x50c] sm:$0xf]  ;;  %v12954_v12 = vor.u32 %v14232_v57, %v12953_v28 }
 0x474   :  { %5530 = vmatpush.bf16.msra.mxu1 %v12354_v44  ;;  %v12654_v44 = vor.u32 %v14157_v1, %v12653_v54  ;;  %v12553_v54 = vld [vmem:[#allocation2 + $0x2b8] sm:$0xf]  ;;  %v14207_v28 = vld [vmem:[#allocation2 + $0x520] sm:$0xf0] }
 0x476   :  { %5424 = vmatpush.bf16.msrb.mxu3 %v12866_v17  ;;  %5452 = vmatpush.bf16.msrb.mxu2 %v12230_v27  ;;  %v12233_v17 = vld [vmem:[#allocation2 + $0x38] sm:$0xf]  ;;  %v14147_v27 = vld [vmem:[#allocation2 + $0x340] sm:$0xf0] }
 0x477   :  { %5466 = vmatpush.bf16.msra.mxu0 %v12390_v49  ;;  %v14179_v49 = vld [vmem:[#allocation2 + $0x444] sm:$0xf]  ;;  %v12234_v3 = vor.u32 %v14052_v40, %v12233_v17  ;;  %v12614_v51 = vor.u32 %v14147_v27, %v12613_v24  ;;  %v12834_v24 = vor.u32 %v14202_v48, %v12833_v34  ;;  %v14117_v27 = vld [vmem:[#allocation2 + $0x250] sm:$0xf0] }
 0x478   :  { %5531 = vmatpush.bf16.msra.mxu1 %v12334_v39  ;;  %v12634_v39 = vor.u32 %v14152_v33, %v12633_v10  ;;  %v12750_v0 = vor.u32 %v14179_v49, %v12747_v13  ;;  %v14122_v10 = vld [vmem:[#allocation2 + $0x278] sm:$0xf0]  ;;  %v12554_v33 = vor.u32 %v14132_v4, %v12553_v54  ;;  %v12813_v13 = vld [vmem:[#allocation2 + $0x4c0] sm:$0xf]  ;;  %v12853_v4 = vld [vmem:[#allocation2 + $0x510] sm:$0xf] }
 0x479   :  { %v14182_v54 = vld [vmem:[#allocation2 + $0x458] sm:$0xf0] }
 0x47a   :  { %5425 = vmatpush.bf16.msrb.mxu3 %v12846_v43  ;;  %5453 = vmatpush.bf16.msrb.mxu2 %v12210_v21  ;;  %v14142_v43 = vld [vmem:[#allocation2 + $0x318] sm:$0xf0] }
 0x47b   :  { %5467 = vmatpush.bf16.msra.mxu0 %v12370_v29  ;;  %v14242_v21 = vld [vmem:[#allocation2 + $0x638] sm:$0xf0] }
 0x47c   :  { %5532 = vmatpush.bf16.msra.mxu1 %v12314_v47  ;;  %v12593_v47 = vld [vmem:[#allocation2 + $0x308] sm:$0xf]  ;;  %v14174_v29 = vld [vmem:[#allocation2 + $0x41c] sm:$0xf]  ;;  %v12994_v16 = vor.u32 %v14242_v21, %v12993_v5 }
 0x47d   :  { %5426 = vmatmul.bf16.vlgmr.msrb.gmra.mxu3 %v16171_v11  ;;  %5454 = vmatmul.bf16.vlgmr.msrb.gmra.mxu2 %v16150_v26  ;;  %v12594_v23 = vor.u32 %v14142_v43, %v12593_v47  ;;  %v12730_v32 = vor.u32 %v14174_v29, %v12727_v50  ;;  %v12793_v47 = vld [vmem:[#allocation2 + $0x498] sm:$0xf]  ;;  %v14192_v43 = vld [vmem:[#allocation2 + $0x4a8] sm:$0xf0]  ;;  %v12893_v29 = vld [vmem:[#allocation2 + $0x560] sm:$0xf] }
 0x47e   :  { %5488 = vmatpush.bf16.msra.mxu3 %v12830_v14  ;;  %5502 = vmatpush.bf16.msra.mxu2 %v12990_v2  ;;  %v12887_v14 = vld [vmem:[#allocation2 + $0x56c] sm:$0xf0]  ;;  %v12214_v2 = vor.u32 %v14047_v45, %v12213_v52  ;;  %v14222_v52 = vld [vmem:[#allocation2 + $0x598] sm:$0xf0]  ;;  %v12814_v45 = vor.u32 %v14197_v42, %v12813_v13  ;;  %v14217_v50 = vld [vmem:[#allocation2 + $0x570] sm:$0xf0] }
 0x47f   :  { %5523 = vmatpush.bf16.msrb.mxu0 %v5189_v61  ;;  %v12890_v61 = vor.u32 %v14214_v41, %v12887_v14  ;;  %v12794_v41 = vor.u32 %v14192_v43, %v12793_v47  ;;  %v14167_v13 = vld [vmem:[#allocation2 + $0x3e0] sm:$0xf0] }
 0x480   :  { %5468 = vmatmul.bf16.vlgmr.msra.gmra.mxu0 %v16152_v9  ;;  %5533 = vmatpush.bf16.msra.mxu1 %v12294_v37  ;;  %v14237_v37 = vld [vmem:[#allocation2 + $0x610] sm:$0xf0] }
 0x481   :  { %v12974_v1 = vor.u32 %v14237_v37, %v12973_v60  ;;  %v14212_v37 = vld [vmem:[#allocation2 + $0x548] sm:$0xf0] }
 0x482   :  { %5489 = vmatpush.bf16.msra.mxu3 %v12810_v15  ;;  %5503 = vmatpush.bf16.msra.mxu2 %v12970_v30  ;;  %v12867_v15 = vld [vmem:[#allocation2 + $0x544] sm:$0xf0]  ;;  %v12574_v30 = vor.u32 %v14137_v8, %v12573_v25  ;;  %v12894_v8 = vor.u32 %v14217_v50, %v12893_v29 }
 0x483   :  { %5558 = vmatpush.bf16.msra.mxu0 %v12674_v53  ;;  %v14169_v53 = vld [vmem:[#allocation2 + $0x3f4] sm:$0xf] }
 0x484   :  { %5534 = vmatpush.bf16.msra.mxu1 %v12274_v56  ;;  %v12710_v31 = vor.u32 %v14169_v53, %v12707_v20  ;;  %v12870_v56 = vor.u32 %v14209_v7, %v12867_v15  ;;  %v12433_v20 = vld [vmem:[#allocation2 + $0x1c8] sm:$0xf]  ;;  %v14102_v7 = vld [vmem:[#allocation2 + $0x1d8] sm:$0xf0] }
 0x486   :  { %5490 = vmatpush.bf16.msra.mxu3 %v12790_v22  ;;  %5504 = vmatpush.bf16.msra.mxu2 %v12950_v35  ;;  %v12847_v22 = vld [vmem:[#allocation2 + $0x51c] sm:$0xf0]  ;;  %v12513_v35 = vld [vmem:[#allocation2 + $0x268] sm:$0xf] }
 0x487   :  { %5559 = vmatpush.bf16.msra.mxu0 %v12654_v44  ;;  %v14164_v44 = vld [vmem:[#allocation2 + $0x3cc] sm:$0xf]  ;;  %v12850_v17 = vor.u32 %v14204_v6, %v12847_v22  ;;  %v12514_v40 = vor.u32 %v14122_v10, %v12513_v35  ;;  %v14177_v6 = vld [vmem:[#allocation2 + $0x430] sm:$0xf0]  ;;  %v12854_v35 = vor.u32 %v14207_v28, %v12853_v4  ;;  %v4122_v10 = vld [vmem:[#allocation2 + $0x650] sm:$0xf] }
 0x488   :  { %5535 = vmatpush.bf16.msra.mxu1 %v12254_v59  ;;  %v12690_v36 = vor.u32 %v14164_v44, %v12687_v19  ;;  %v12533_v59 = vld [vmem:[#allocation2 + $0x290] sm:$0xf]  ;;  %v14097_v44 = vld [vmem:[#allocation2 + $0x1b0] sm:$0xf0]  ;;  %v12733_v19 = vld [vmem:[#allocation2 + $0x420] sm:$0xf] }
 0x489   :  { %v12734_v48 = vor.u32 %v14177_v6, %v12733_v19 }
 0x48a   :  { %5491 = vmatpush.bf16.msra.mxu3 %v12770_v18  ;;  %5505 = vmatpush.bf16.msra.mxu2 %v12930_v38  ;;  %v12933_v18 = vld [vmem:[#allocation2 + $0x5b0] sm:$0xf]  ;;  %v14227_v38 = vld [vmem:[#allocation2 + $0x5c0] sm:$0xf0] }
 0x48b   :  { %5560 = vmatpush.bf16.msra.mxu0 %v12634_v39  ;;  %v14127_v39 = vld [vmem:[#allocation2 + $0x2a0] sm:$0xf0]  ;;  %v12934_v63 = vor.u32 %v14227_v38, %v12933_v18  ;;  %v4770_v18 = vunpack.c.l.b16 %v4122_v10 }
 0x48c   :  { %5536 = vmatpush.bf16.msra.mxu1 %v12234_v3  ;;  %v12534_v49 = vor.u32 %v14127_v39, %v12533_v59 }
 0x48d   :  { %v4975_v42 = vpack.c.b16 %v4770_v18, %v4770_v18 }
 0x48e   :  { %5492 = vmatpush.bf16.msra.mxu3 %v12750_v0  ;;  %5506 = vmatpush.bf16.msra.mxu2 %v12910_v55  ;;  %v12473_v0 = vld [vmem:[#allocation2 + $0x218] sm:$0xf]  ;;  %v14112_v55 = vld [vmem:[#allocation2 + $0x228] sm:$0xf0] }
 0x48f   :  { %5561 = vmatpush.bf16.msra.mxu0 %v12614_v51  ;;  %v12913_v51 = vld [vmem:[#allocation2 + $0x588] sm:$0xf]  ;;  %v12474_v21 = vor.u32 %v14112_v55, %v12473_v0  ;;  %v5192_v0 = vsel %vm18818_vm1, %v4975_v42, 0 }
 0x490   :  { %12998 = vmatmul.msk.bf16.vlgmr.msrb.gmra.mxu0 %vm149_vm2, %v16173_v46  ;;  %5537 = vmatpush.bf16.msra.mxu1 %v12214_v2  ;;  %v12914_v5 = vor.u32 %v14222_v52, %v12913_v51  ;;  %v12453_v2 = vld [vmem:[#allocation2 + $0x1f0] sm:$0xf] }
 0x492   :  { %5493 = vmatpush.bf16.msra.mxu3 %v12730_v32  ;;  %5507 = vmatpush.bf16.msra.mxu2 %v12890_v61  ;;  %v14187_v32 = vld [vmem:[#allocation2 + $0x480] sm:$0xf0]  ;;  %v12873_v61 = vld [vmem:[#allocation2 + $0x538] sm:$0xf] }
 0x493   :  { %5562 = vmatpush.bf16.msra.mxu0 %v12594_v23  ;;  %5538 = vmatmul.bf16.vlgmr.msra.gmra.mxu1 %v16150_v26  ;;  %v12493_v26 = vld [vmem:[#allocation2 + $0x240] sm:$0xf]  ;;  %v14107_v23 = vld [vmem:[#allocation2 + $0x200] sm:$0xf0] }
 0x494   :  { %5586 = vmatpush.bf16.msrb.mxu1 %v12994_v16  ;;  %v12494_v3 = vor.u32 %v14117_v27, %v12493_v26  ;;  %v12773_v16 = vld [vmem:[#allocation2 + $0x470] sm:$0xf]  ;;  %v12454_v60 = vor.u32 %v14107_v23, %v12453_v2  ;;  %v14087_v27 = vld [vmem:[#allocation2 + $0x160] sm:$0xf0] }
 0x495   :  { %v12774_v53 = vor.u32 %v14187_v32, %v12773_v16  ;;  %v12373_v26 = vld [vmem:[#allocation2 + $0x150] sm:$0xf] }
 0x496   :  { %5494 = vmatpush.bf16.msra.mxu3 %v12710_v31  ;;  %5508 = vmatpush.bf16.msra.mxu2 %v12870_v56  ;;  %v12434_v31 = vor.u32 %v14102_v7, %v12433_v20  ;;  %v12413_v56 = vld [vmem:[#allocation2 + $0x1a0] sm:$0xf] }
 0x497   :  { %5563 = vmatpush.bf16.msra.mxu0 %v12574_v30  ;;  %v12753_v30 = vld [vmem:[#allocation2 + $0x448] sm:$0xf] }
 0x498   :  { %5587 = vmatpush.bf16.msrb.mxu1 %v12974_v1  ;;  %v12874_v1 = vor.u32 %v14212_v37, %v12873_v61  ;;  %v12754_v57 = vor.u32 %v14182_v54, %v12753_v30 }
 0x49a   :  { %5495 = vmatpush.bf16.msra.mxu3 %v12690_v36  ;;  %5509 = vmatpush.bf16.msra.mxu2 %v12850_v17  ;;  %v16207_v14 = vpop.f32.mrf.mxu0  ;;  %v16209_v25 = vpop.f32.mrf.mxu1  ;;  %v14092_v36 = vld [vmem:[#allocation2 + $0x188] sm:$0xf0]  ;;  %v12713_v17 = vld [vmem:[#allocation2 + $0x3f8] sm:$0xf] }
 0x49b   :  { %5564 = vmatpush.bf16.msra.mxu0 %v12554_v33  ;;  %v12414_v33 = vor.u32 %v14097_v44, %v12413_v56 }
 0x49c   :  { %5588 = vmatpush.bf16.msrb.mxu1 %v12954_v12  ;;  %v12393_v12 = vld [vmem:[#allocation2 + $0x178] sm:$0xf] }
 0x49d   :  { %5496 = vmatmul.bf16.vlgmr.msra.gmra.mxu3 %v16156_v62  ;;  %5510 = vmatmul.bf16.vlgmr.msra.gmra.mxu2 %v16171_v11  ;;  %v12394_v38 = vor.u32 %v14092_v36, %v12393_v12 }
 0x49e   :  { %5544 = vmatpush.bf16.msrb.mxu3 %v12514_v40  ;;  %5572 = vmatpush.bf16.msrb.mxu2 %v12834_v24  ;;  %v14172_v40 = vld [vmem:[#allocation2 + $0x408] sm:$0xf0] }
 0x49f   :  { %5565 = vmatpush.bf16.msra.mxu0 %v12534_v49  ;;  %v5217_v15 = vpop.f32.mrf.mxu3  ;;  %v12714_v24 = vor.u32 %v14172_v40, %v12713_v17  ;;  %v12693_v49 = vld [vmem:[#allocation2 + $0x3d0] sm:$0xf] }
 0x4a0   :  { %5589 = vmatpush.bf16.msrb.mxu1 %v12934_v63  ;;  %v12374_v63 = vor.u32 %v14087_v27, %v12373_v26  ;;  %v12694_v51 = vor.u32 %v14167_v13, %v12693_v49 }
 0x4a2   :  { %5545 = vmatpush.bf16.msrb.mxu3 %v12494_v3  ;;  %5573 = vmatpush.bf16.msrb.mxu2 %v12814_v45  ;;  %v5233_v22 = vpop.f32.mrf.mxu0  ;;  %v5247_v34 = vpop.f32.mrf.mxu1 }
 0x4a3   :  { %5566 = vmatmul.bf16.vlgmr.msra.gmra.mxu0 %v16154_v58  ;;  %v5203_v58 = vpop.f32.mrf.mxu2 }
 0x4a4   :  { %5590 = vmatpush.bf16.msrb.mxu1 %v12914_v5 }
 0x4a6   :  { %5546 = vmatpush.bf16.msrb.mxu3 %v12474_v21  ;;  %5574 = vmatpush.bf16.msrb.mxu2 %v12794_v41  ;;  %v5218_v21 = vadd.f32 %v5217_v15, %v5203_v58 }
 0x4a7   :  { %v5219_v39 = vpop.f32.mrf.mxu3 }
 0x4a8   :  { %5591 = vmatpush.bf16.msrb.mxu1 %v12894_v8  ;;  %v5232_v32 = vadd.f32 %v16207_v14, %v5218_v21 }
 0x4aa   :  { %5547 = vmatpush.bf16.msrb.mxu3 %v12454_v60  ;;  %5575 = vmatpush.bf16.msrb.mxu2 %v12774_v53  ;;  %v5287_v3 = vpop.f32.mrf.mxu0  ;;  %v5301_v55 = vpop.f32.mrf.mxu1 }
 0x4ab   :  { %v5205_v59 = vpop.f32.mrf.mxu2  ;;  %v5302_v29 = vadd.f32 %v5301_v55, %v5287_v3 }
 0x4ac   :  { %5592 = vmatpush.bf16.msrb.mxu1 %v12874_v1  ;;  %v5220_v41 = vadd.f32 %v5219_v39, %v5205_v59 }
 0x4ae   :  { %5548 = vmatpush.bf16.msrb.mxu3 %v12434_v31  ;;  %5576 = vmatpush.bf16.msrb.mxu2 %v12754_v57 }
 0x4af   :  { %v5273_v45 = vpop.f32.mrf.mxu3 }
 0x4b0   :  { %5593 = vmatpush.bf16.msrb.mxu1 %v12854_v35 }
 0x4b2   :  { %5549 = vmatpush.bf16.msrb.mxu3 %v12414_v33  ;;  %5577 = vmatpush.bf16.msrb.mxu2 %v12734_v48  ;;  %v5289_v43 = vpop.f32.mrf.mxu0  ;;  %v5303_v5 = vpop.f32.mrf.mxu1 }
 0x4b3   :  { %5594 = vmatmul.bf16.vlgmr.msrb.gmra.mxu1 %v16171_v11  ;;  %v5259_v52 = vpop.f32.mrf.mxu2  ;;  %v5304_v61 = vadd.f32 %v5303_v5, %v5289_v43 }
 0x4b6   :  { %5550 = vmatpush.bf16.msrb.mxu3 %v12394_v38  ;;  %5578 = vmatpush.bf16.msrb.mxu2 %v12714_v24 }
 0x4b7   :  { %v5275_v47 = vpop.f32.mrf.mxu3 }
 0x4ba   :  { %5551 = vmatpush.bf16.msrb.mxu3 %v12374_v63  ;;  %5579 = vmatpush.bf16.msrb.mxu2 %v12694_v51 }
 0x4bb   :  { %v5261_v11 = vpop.f32.mrf.mxu2 }
 0x4bc   :  { %v5357_v60 = vpop.f32.mrf.mxu1 }
 0x4bd   :  { %5552 = vmatmul.bf16.vlgmr.msrb.gmra.mxu3 %v16152_v9  ;;  %5580 = vmatmul.bf16.vlgmr.msrb.gmra.mxu2 %v16156_v62  ;;  %v5343_v16 = vpop.f32.mrf.mxu0  ;;  %v5234_v9 = vadd.f32 %v5233_v22, %v5220_v41  ;;  %v5246_v62 = vadd.f32 %v16209_v25, %v5232_v32 }
 0x4be   :  { %5607 = vmatpush.bf16.msra.mxu3 %v5192_v0 }
 0x4bf   :  { %v5260_v20 = vadd.f32 %v5259_v52, %v5246_v62  ;;  %v5248_v7 = vadd.f32 %v5247_v34, %v5234_v9 }
 0x4c0   :  { %v5315_v50 = vpop.f32.mrf.mxu3 }
 0x4c1   :  { %v5316_v2 = vadd.f32 %v5315_v50, %v5302_v29  ;;  %v5262_v30 = vadd.f32 %v5261_v11, %v5248_v7  ;;  %v5274_v14 = vadd.f32 %v5273_v45, %v5260_v20 }
 0x4c3   :  { %v5329_v23 = vpop.f32.mrf.mxu2  ;;  %v5276_v57 = vadd.f32 %v5275_v47, %v5262_v30 }
 0x4c4   :  { %v5330_v8 = vadd.f32 %v5329_v23, %v5316_v2  ;;  %v5359_v28 = vpop.f32.mrf.mxu1 }
 0x4c5   :  { %v5345_v31 = vpop.f32.mrf.mxu0 }
 0x4c6   :  { %v5344_v37 = vadd.f32 %v5343_v16, %v5330_v8 }
 0x4c8   :  { %v5317_v53 = vpop.f32.mrf.mxu3  ;;  %v5358_v54 = vadd.f32 %v5357_v60, %v5344_v37 }
 0x4c9   :  { %v5318_v58 = vadd.f32 %v5317_v53, %v5304_v61 }
 0x4ca   :  { %v5614_v56 = vpack.c.bf16 %v5358_v54, %v5274_v14 }
 0x4cb   :  { %v5331_v15 = vpop.f32.mrf.mxu2 }
 0x4cc   :  { %v5332_v1 = vadd.f32 %v5331_v15, %v5318_v58  ;;  %v5636_v19 = vunpack.c.l.b16 %v5614_v56  ;;  %v5637_v25 = vunpack.c.h.b16 %v5614_v56  ;;  %v5385_v34 = vpop.f32.mrf.mxu1 }
 0x4cd   :  { %12999 = vmatmul.msk.bf16.vlgmr.msra.gmra.mxu3 %vm149_vm2, %v16173_v46  ;;  %vm5669_vm2 = vcmask 1045504  }
 0x4ce   :  { %v5346_v4 = vadd.f32 %v5345_v31, %v5332_v1 }
 0x4d0   :  { %v5360_v46 = vadd.f32 %v5359_v28, %v5346_v4 }
 0x4d2   :  { %v5617_v44 = vpack.c.bf16 %v5360_v46, %v5276_v57 }
 0x4d4   :  { %v5641_v6 = vunpack.c.l.b16 %v5617_v44  ;;  %v5642_v22 = vunpack.c.h.b16 %v5617_v44  ;;  %v5387_v59 = vpop.f32.mrf.mxu1 }
 0x4d6   :  { %v16219_v35 = vpack.c.b16 %v5641_v6, %v5636_v19  ;;  %v16221_v10 = vpack.c.b16 %v5642_v22, %v5637_v25 }
 0x4d8   :  { %5653 = vrot.lane.b32.xlu0 %v16221_v10, %s18843_s7  ;;  %5651 = vrot.lane.b32.xlu1 %v16219_v35, %s18843_s7  ;;  %v5747_v33 = vsel %vm5669_vm2, %v16219_v35, 0 }
 0x4d9   :  { %5765 = vmatpush.bf16.msra.mxu1 %v5747_v33 }
 0x4dc   :  { %v5441_v18 = vpop.f32.mrf.mxu1 }
 0x4dd   :  { %v5413_v48 = vpop.f32.mrf.mxu0 }
 0x4e0   :  { %v5371_v12 = vpop.f32.mrf.mxu3  ;;  %v5399_v36 = vpop.f32.mrf.mxu2 }
 0x4e1   :  { %v5386_v51 = vadd.f32 %v5385_v34, %v5371_v12 }
 0x4e3   :  { %v5400_v55 = vadd.f32 %v5399_v36, %v5386_v51 }
 0x4e4   :  { %v5443_v27 = vpop.f32.mrf.mxu1 }
 0x4e5   :  { %v5415_v39 = vpop.f32.mrf.mxu0  ;;  %v5414_v29 = vadd.f32 %v5413_v48, %v5400_v55  ;;  %v14244_v55 = vld [vmem:[%s18888_s2 + $0x8] sm:$0x30] }
 0x4e8   :  { %v5373_v17 = vpop.f32.mrf.mxu3  ;;  %v5401_v40 = vpop.f32.mrf.mxu2 }
 0x4e9   :  { %v5388_v52 = vadd.f32 %v5387_v59, %v5373_v17 }
 0x4eb   :  { %v5402_v5 = vadd.f32 %v5401_v40, %v5388_v52 }
 0x4ed   :  { %v5416_v23 = vadd.f32 %v5415_v39, %v5402_v5 }
 0x4f0   :  { %v5483_v3 = vpop.f32.mrf.mxu1 }
 0x4f8   :  { %v5485_v41 = vpop.f32.mrf.mxu1 }
 0x4fd   :  { %v5469_v38 = vpop.f32.mrf.mxu0 }
 0x500   :  { %v5427_v24 = vpop.f32.mrf.mxu3  ;;  %v5455_v26 = vpop.f32.mrf.mxu2 }
 0x501   :  { %v5470_v63 = vadd.f32 %v5469_v38, %v5455_v26  ;;  %v5428_v2 = vadd.f32 %v5427_v24, %v5414_v29 }
 0x503   :  { %v5484_v45 = vadd.f32 %v5483_v3, %v5470_v63  ;;  %v5442_v61 = vadd.f32 %v5441_v18, %v5428_v2 }
 0x505   :  { %v5471_v49 = vpop.f32.mrf.mxu0 }
 0x508   :  { %v5429_v13 = vpop.f32.mrf.mxu3  ;;  %v5457_v42 = vpop.f32.mrf.mxu2 }
 0x509   :  { %v5472_v21 = vadd.f32 %v5471_v49, %v5457_v42  ;;  %v5430_v8 = vadd.f32 %v5429_v13, %v5416_v23  ;;  %v13022_v23 = vld [vmem:[%s18888_s2 + $0x10] sm:$0xf] }
 0x50b   :  { %v5486_v16 = vadd.f32 %v5485_v41, %v5472_v21  ;;  %v5444_v20 = vadd.f32 %v5443_v27, %v5430_v8  ;;  %v5750_v41 = vsel %vm5669_vm2, %v16221_v10, 0 }
 0x50d   :  { %v5525_v43 = vpop.f32.mrf.mxu0 }
 0x510   :  { %v5539_v28 = vpop.f32.mrf.mxu1 }
 0x515   :  { %v5527_v53 = vpop.f32.mrf.mxu0 }
 0x518   :  { %v5541_v56 = vpop.f32.mrf.mxu1 }
 0x520   :  { %v5497_v0 = vpop.f32.mrf.mxu3  ;;  %v5511_v47 = vpop.f32.mrf.mxu2 }
 0x521   :  { %v5498_v11 = vadd.f32 %v5497_v0, %v5484_v45  ;;  %v5567_v46 = vpop.f32.mrf.mxu0  ;;  %v13004_v0 = vld [vmem:[%s18888_s2 + $0x8] sm:$0xf] }
 0x523   :  { %v5512_v50 = vadd.f32 %v5511_v47, %v5498_v11  ;;  %v16285_v11 = vor.u32 %v14244_v55, %v13004_v0  ;;  %v13012_v47 = vld [vmem:[%s18888_s2] sm:$0xf] }
 0x525   :  { %v5526_v60 = vadd.f32 %v5525_v43, %v5512_v50  ;;  %v14243_v43 = vld [vmem:[%s18888_s2] sm:$0x30] }
 0x526   :  { %v16307_v21 = vor.u32 %v14243_v43, %v13012_v47 }
 0x527   :  { %v5615_v7 = vpack.c.bf16 %v5526_v60, %v5442_v61 }
 0x528   :  { %v5499_v32 = vpop.f32.mrf.mxu3  ;;  %v5513_v62 = vpop.f32.mrf.mxu2  ;;  %13014 = vmatmul.msk.bf16.vlgmr.msra.gmra.mxu1 %vm5665_vm10, %v16307_v21 }
 0x529   :  { %v5500_v9 = vadd.f32 %v5499_v32, %v5486_v16  ;;  %v5638_v30 = vunpack.c.l.b16 %v5615_v7  ;;  %v5639_v54 = vunpack.c.h.b16 %v5615_v7  ;;  %v5569_v34 = vpop.f32.mrf.mxu0  ;;  %v14245_v16 = vld [vmem:[%s18888_s2 + $0x10] sm:$0x30] }
 0x52b   :  { %v5514_v37 = vadd.f32 %v5513_v62, %v5500_v9  ;;  %v16337_v9 = vor.u32 %v14245_v16, %v13022_v23 }
 0x52d   :  { %v5528_v58 = vadd.f32 %v5527_v53, %v5514_v37 }
 0x52f   :  { %v5618_v15 = vpack.c.bf16 %v5528_v58, %v5444_v20 }
 0x530   :  { %v5595_v33 = vpop.f32.mrf.mxu1 }
 0x531   :  { %v5643_v1 = vunpack.c.l.b16 %v5618_v15  ;;  %v5644_v31 = vunpack.c.h.b16 %v5618_v15 }
 0x533   :  { %v16229_v14 = vpack.c.b16 %v5643_v1, %v5638_v30  ;;  %v16231_v4 = vpack.c.b16 %v5644_v31, %v5639_v54 }
 0x535   :  { %5655 = vrot.lane.b32.xlu2 %v16229_v14, %s18843_s7  ;;  %5657 = vrot.lane.b32.xlu1 %v16231_v4, %s18843_s7  ;;  %v5753_v53 = vsel %vm5669_vm2, %v16229_v14, 0 }
 0x538   :  { %v5597_v27 = vpop.f32.mrf.mxu1 }
 0x53d   :  { %5824 = vrot.lane.b32.xlu2 %v16221_v10, %s18841_s4  ;;  %5826 = vrot.lane.b32.xlu1 %v16229_v14, %s18841_s4 }
 0x540   :  { %v5553_v57 = vpop.f32.mrf.mxu3  ;;  %v5581_v19 = vpop.f32.mrf.mxu2 }
 0x541   :  { %v5554_v44 = vadd.f32 %v5553_v57, %v5539_v28 }
 0x543   :  { %v5568_v6 = vadd.f32 %v5567_v46, %v5554_v44  ;;  %v5756_v44 = vsel %vm5669_vm2, %v16231_v4, 0 }
 0x545   :  { %5822 = vrot.lane.b32.xlu2 %v16219_v35, %s18841_s4  ;;  %v5582_v48 = vadd.f32 %v5581_v19, %v5568_v6 }
 0x547   :  { %v5596_v18 = vadd.f32 %v5595_v33, %v5582_v48 }
 0x548   :  { %v5555_v25 = vpop.f32.mrf.mxu3  ;;  %v5583_v59 = vpop.f32.mrf.mxu2 }
 0x549   :  { %v5556_v22 = vadd.f32 %v5555_v25, %v5541_v56 }
 0x54a   :  { %v5654_v39 = vpop.permute.xlu0 %5653  ;;  %v5652_v17 = vpop.permute.xlu1 %5651 }
 0x54b   :  { %v5570_v12 = vadd.f32 %v5569_v34, %v5556_v22  ;;  %v5661_v38 = vsel %vm143_vm0, %v5652_v17, %v5654_v39 }
 0x54c   :  { %v5671_v24 = vsel %vm5669_vm2, %v5661_v38, 0 }
 0x54d   :  { %5927 = vrot.lane.b32.xlu2 %v16229_v14, %s18821_s8  ;;  %v5584_v40 = vadd.f32 %v5583_v59, %v5570_v12  ;;  %5689 = vmatpush.bf16.msrb.mxu0 %v5671_v24 }
 0x54f   :  { %v5598_v49 = vadd.f32 %v5597_v27, %v5584_v40  ;;  %v13032_v40 = vld [vmem:[%s18888_s2 + $0x18] sm:$0xf] }
 0x550   :  { %v5609_v36 = vpop.f32.mrf.mxu3  ;;  %13006 = vmatmul.msk.bf16.vlgmr.msrb.gmra.mxu0 %vm5665_vm10, %v16285_v11 }
 0x551   :  { %v5610_v26 = vadd.f32 %v5609_v36, %v5596_v18  ;;  %v14246_v18 = vld [vmem:[%s18888_s2 + $0x18] sm:$0x30] }
 0x553   :  { %v5616_v42 = vpack.c.bf16 %v5610_v26, %v5610_v26  ;;  %v16432_v26 = vor.u32 %v14246_v18, %v13032_v40 }
 0x555   :  { %v5640_v51 = vunpack.c.l.b16 %v5616_v42 }
 0x558   :  { %v5611_v13 = vpop.f32.mrf.mxu3 }
 0x559   :  { %v5612_v63 = vadd.f32 %v5611_v13, %v5598_v49 }
 0x55b   :  { %v5619_v3 = vpack.c.bf16 %v5612_v63, %v5612_v63 }
 0x55d   :  { %v5645_v52 = vunpack.c.l.b16 %v5619_v3 }
 0x55f   :  { %v16247_v45 = vpack.c.b16 %v5645_v52, %v5640_v51 }
 0x561   :  { %5659 = vrot.lane.b32.xlu0 %v16247_v45, %s18843_s7  ;;  %5931 = vrot.lane.b32.xlu2 %v16247_v45, %s18821_s8 }
 0x562   :  { %5830 = vrot.lane.b32.xlu1 %v16247_v45, %s18841_s4 }
 0x569   :  { %5828 = vrot.lane.b32.xlu0 %v16231_v4, %s18841_s4  ;;  %6030 = vrot.lane.b32.xlu2 %v16231_v4, %s18816_s30 }
 0x56a   :  { %5929 = vrot.lane.b32.xlu1 %v16231_v4, %s18821_s8 }
 0x571   :  { %5925 = vrot.lane.b32.xlu0 %v16221_v10, %s18821_s8  ;;  %6127 = vrot.lane.b32.xlu2 %v16221_v10, %s18819_s11 }
 0x572   :  { %6026 = vrot.lane.b32.xlu1 %v16221_v10, %s18816_s30 }
 0x579   :  { %5923 = vrot.lane.b32.xlu0 %v16219_v35, %s18821_s8  ;;  %6125 = vrot.lane.b32.xlu2 %v16219_v35, %s18819_s11  ;;  %s18914_s8 = smov 112  }
 0x57a   :  { %6024 = vrot.lane.b32.xlu1 %v16219_v35, %s18816_s30 }
 0x581   :  { %6028 = vrot.lane.b32.xlu0 %v16229_v14, %s18816_s30  ;;  %6231 = vrot.lane.b32.xlu2 %v16229_v14, %s18814_s3 }
 0x582   :  { %6129 = vrot.lane.b32.xlu1 %v16229_v14, %s18819_s11 }
 0x589   :  { %6032 = vrot.lane.b32.xlu0 %v16247_v45, %s18816_s30  ;;  %6235 = vrot.lane.b32.xlu2 %v16247_v45, %s18814_s3  ;;  %s14595_s30 = smov 117  }
 0x58a   :  { %6133 = vrot.lane.b32.xlu1 %v16247_v45, %s18819_s11 }
 0x58f   :  { %v5656_v5 = vpop.permute.xlu2 %5655 }
 0x590   :  { %v5662_v29 = vsel %vm143_vm0, %v5654_v39, %v5656_v5 }
 0x591   :  { %6131 = vrot.lane.b32.xlu0 %v16231_v4, %s18819_s11  ;;  %6335 = vrot.lane.b32.xlu2 %v16231_v4, %s18807_s9  ;;  %v5674_v50 = vsel %vm5669_vm2, %v5662_v29, 0  ;;  %v13042_v29 = vld [vmem:[%s18888_s2 + $0x20] sm:$0xf] }
 0x592   :  { %6233 = vrot.lane.b32.xlu1 %v16231_v4, %s18814_s3  ;;  %5703 = vmatpush.bf16.msra.mxu2 %v5674_v50  ;;  %v14247_v50 = vld [vmem:[%s18888_s2 + $0x20] sm:$0x30] }
 0x595   :  { %13007 = vmatmul.msk.bf16.vlgmr.msra.gmra.mxu2 %vm5665_vm10, %v16285_v11 }
 0x596   :  { %5779 = vmatpush.bf16.msrb.mxu2 %v5750_v41 }
 0x597   :  { %v5825_v2 = vpop.permute.xlu2 %5824 }
 0x599   :  { %6229 = vrot.lane.b32.xlu0 %v16221_v10, %s18814_s3  ;;  %6432 = vrot.lane.b32.xlu2 %v16221_v10, %s18801_s5 }
 0x59a   :  { %6331 = vrot.lane.b32.xlu1 %v16221_v10, %s18807_s9 }
 0x59f   :  { %v5823_v32 = vpop.permute.xlu2 %5822 }
 0x5a0   :  { %v5832_v8 = vsel %vm386_vm3, %v5823_v32, %v5825_v2  ;;  %v16480_v32 = vor.u32 %v14247_v50, %v13042_v29  ;;  %v13072_v29 = vld [vmem:[%s18888_s2 + $0x38] sm:$0xf]  ;;  %v14250_v50 = vld [vmem:[%s18888_s2 + $0x38] sm:$0x30] }
 0x5a1   :  { %6227 = vrot.lane.b32.xlu0 %v16219_v35, %s18814_s3  ;;  %6430 = vrot.lane.b32.xlu2 %v16219_v35, %s18801_s5  ;;  %v5840_v60 = vsel %vm5669_vm2, %v5832_v8, 0  ;;  %s18825_s3 = smov 116  }
 0x5a2   :  { %6329 = vrot.lane.b32.xlu1 %v16219_v35, %s18807_s9  ;;  %5858 = vmatpush.bf16.msrb.mxu1 %v5840_v60 }
 0x5a5   :  { %13015 = vmatmul.msk.bf16.vlgmr.msrb.gmra.mxu2 %vm5665_vm10, %v16307_v21  ;;  %13024 = vmatmul.msk.bf16.vlgmr.msrb.gmra.mxu1 %vm5665_vm10, %v16337_v9 }
 0x5a7   :  { %v5658_v62 = vpop.permute.xlu1 %5657  ;;  %v5928_v7 = vpop.permute.xlu2 %5927 }
 0x5a8   :  { %v5663_v61 = vsel %vm143_vm0, %v5656_v5, %v5658_v62 }
 0x5a9   :  { %6333 = vrot.lane.b32.xlu0 %v16229_v14, %s18807_s9  ;;  %6535 = vrot.lane.b32.xlu2 %v16229_v14, %s18797_s28  ;;  %v5677_v37 = vsel %vm5669_vm2, %v5663_v61, 0 }
 0x5aa   :  { %6434 = vrot.lane.b32.xlu1 %v16229_v14, %s18801_s5  ;;  %5717 = vmatpush.bf16.msrb.mxu3 %v5677_v37 }
 0x5ad   :  { %13008 = vmatmul.msk.bf16.vlgmr.msrb.gmra.mxu3 %vm5665_vm10, %v16285_v11 }
 0x5ae   :  { %5793 = vmatpush.bf16.msra.mxu3 %v5753_v53 }
 0x5af   :  { %v5827_v20 = vpop.permute.xlu1 %5826 }
 0x5b0   :  { %v5833_v58 = vsel %vm386_vm3, %v5825_v2, %v5827_v20 }
 0x5b1   :  { %6337 = vrot.lane.b32.xlu0 %v16247_v45, %s18807_s9  ;;  %6539 = vrot.lane.b32.xlu2 %v16247_v45, %s18797_s28  ;;  %v5843_v15 = vsel %vm5669_vm2, %v5833_v58, 0  ;;  %v14248_v58 = vld [vmem:[%s18888_s2 + $0x28] sm:$0x30]  ;;  %s14584_s9 = smov 77  }
 0x5b2   :  { %6438 = vrot.lane.b32.xlu1 %v16247_v45, %s18801_s5  ;;  %5872 = vmatpush.bf16.msra.mxu2 %v5843_v15 }
 0x5b5   :  { %13025 = vmatmul.msk.bf16.vlgmr.msra.gmra.mxu2 %vm5665_vm10, %v16337_v9 }
 0x5b9   :  { %6436 = vrot.lane.b32.xlu0 %v16231_v4, %s18801_s5  ;;  %6638 = vrot.lane.b32.xlu2 %v16231_v4, %s18795_s6  ;;  %s18889_s5 = smov 92  }
 0x5ba   :  { %6537 = vrot.lane.b32.xlu1 %v16231_v4, %s18797_s28 }
 0x5bb   :  { %v5932_v30 = vpop.permute.xlu2 %5931 }
 0x5bd   :  { %13016 = vmatmul.msk.bf16.vlgmr.msra.gmra.mxu3 %vm5665_vm10, %v16307_v21 }
 0x5c1   :  { %6533 = vrot.lane.b32.xlu0 %v16221_v10, %s18797_s28  ;;  %6736 = vrot.lane.b32.xlu2 %v16221_v10, %s18799_s0 }
 0x5c2   :  { %6634 = vrot.lane.b32.xlu1 %v16221_v10, %s18795_s6 }
 0x5c3   :  { %v16379_v54 = vpop.permute.xlu2 %6030 }
 0x5c9   :  { %6531 = vrot.lane.b32.xlu0 %v16219_v35, %s18797_s28  ;;  %6734 = vrot.lane.b32.xlu2 %v16219_v35, %s18799_s0  ;;  %s14581_s28 = smov 80  }
 0x5ca   :  { %6632 = vrot.lane.b32.xlu1 %v16219_v35, %s18795_s6 }
 0x5cb   :  { %v16387_v1 = vpop.permute.xlu2 %6127 }
 0x5d1   :  { %6636 = vrot.lane.b32.xlu0 %v16229_v14, %s18795_s6  ;;  %6840 = vrot.lane.b32.xlu2 %v16229_v14, %s18805_s10 }
 0x5d2   :  { %6738 = vrot.lane.b32.xlu1 %v16229_v14, %s18799_s0 }
 0x5d3   :  { %v5660_v31 = vpop.permute.xlu0 %5659  ;;  %v6126_v57 = vpop.permute.xlu2 %6125 }
 0x5d4   :  { %v5664_v28 = vsel %vm143_vm0, %v5658_v62, %v5660_v31  ;;  %v5831_v56 = vpop.permute.xlu1 %5830  ;;  %v6136_v0 = vsel %vm6135_vm13, %v6126_v57, %v16387_v1 }
 0x5d5   :  { %v5680_v46 = vsel %vm5669_vm2, %v5664_v28, 0  ;;  %v6144_v55 = vsel %vm5669_vm2, %v6136_v0, 0  ;;  %v5691_v0 = vpop.f32.mrf.mxu0 }
 0x5d6   :  { %5731 = vmatpush.bf16.msra.mxu0 %v5680_v46 }
 0x5d9   :  { %6640 = vrot.lane.b32.xlu0 %v16247_v45, %s18795_s6  ;;  %6844 = vrot.lane.b32.xlu2 %v16247_v45, %s18805_s10  ;;  %s14582_s6 = smov 79  }
 0x5da   :  { %5807 = vmatpush.bf16.msrb.mxu0 %v5756_v44  ;;  %6742 = vrot.lane.b32.xlu1 %v16247_v45, %s18799_s0 }
 0x5db   :  { %13009 = vmatmul.msk.bf16.vlgmr.msra.gmra.mxu0 %vm5665_vm10, %v16285_v11  ;;  %v5829_v19 = vpop.permute.xlu0 %5828  ;;  %v16412_v12 = vpop.permute.xlu2 %6231 }
 0x5dc   :  { %v5834_v25 = vsel %vm386_vm3, %v5827_v20, %v5829_v19  ;;  %v5835_v6 = vsel %vm386_vm3, %v5829_v19, %v5831_v56  ;;  %v5930_v22 = vpop.permute.xlu1 %5929 }
 0x5dd   :  { %v5935_v33 = vsel %vm529_vm4, %v5928_v7, %v5930_v22  ;;  %v5846_v34 = vsel %vm5669_vm2, %v5834_v25, 0  ;;  %v5849_v48 = vsel %vm5669_vm2, %v5835_v6, 0  ;;  %v5936_v24 = vsel %vm529_vm4, %v5930_v22, %v5932_v30  ;;  %v5767_v6 = vpop.f32.mrf.mxu1 }
 0x5de   :  { %5886 = vmatpush.bf16.msrb.mxu3 %v5846_v34  ;;  %5900 = vmatpush.bf16.msra.mxu0 %v5849_v48  ;;  %v5947_v36 = vsel %vm5669_vm2, %v5935_v33, 0  ;;  %v5950_v49 = vsel %vm5669_vm2, %v5936_v24, 0  ;;  %v13062_v48 = vld [vmem:[%s18888_s2 + $0x30] sm:$0xf] }
 0x5e1   :  { %6740 = vrot.lane.b32.xlu0 %v16231_v4, %s18799_s0  ;;  %6944 = vrot.lane.b32.xlu2 %v16231_v4, %s18803_s29  ;;  %s14587_s0 = smov 63  }
 0x5e2   :  { %5987 = vmatpush.bf16.msra.mxu3 %v5947_v36  ;;  %6842 = vrot.lane.b32.xlu1 %v16231_v4, %s18805_s10 }
 0x5e3   :  { %13026 = vmatmul.msk.bf16.vlgmr.msrb.gmra.mxu3 %vm5665_vm10, %v16337_v9  ;;  %v5926_v59 = vpop.permute.xlu0 %5925  ;;  %v16434_v27 = vpop.permute.xlu2 %6235 }
 0x5e4   :  { %v5934_v39 = vsel %vm529_vm4, %v5926_v59, %v5928_v7  ;;  %v6027_v17 = vpop.permute.xlu1 %6026  ;;  %v13052_v7 = vld [vmem:[%s18888_s2 + $0x28] sm:$0xf] }
 0x5e5   :  { %v5944_v38 = vsel %vm5669_vm2, %v5934_v39, 0  ;;  %v16519_v28 = vor.u32 %v14248_v58, %v13052_v7 }
 0x5e6   :  { %5973 = vmatpush.bf16.msrb.mxu2 %v5944_v38 }
 0x5e9   :  { %6838 = vrot.lane.b32.xlu0 %v16221_v10, %s18805_s10  ;;  %7042 = vrot.lane.b32.xlu2 %v16221_v10, %s18889_s5 }
 0x5ea   :  { %6940 = vrot.lane.b32.xlu1 %v16221_v10, %s18803_s29  ;;  %13035 = vmatmul.msk.bf16.vlgmr.msrb.gmra.mxu2 %vm5665_vm10, %v16432_v26 }
 0x5eb   :  { %13017 = vmatmul.msk.bf16.vlgmr.msrb.gmra.mxu0 %vm5665_vm10, %v16307_v21  ;;  %v5924_v13 = vpop.permute.xlu0 %5923  ;;  %v16458_v11 = vpop.permute.xlu2 %6335 }
 0x5ec   :  { %6001 = vmatpush.bf16.msrb.mxu0 %v5950_v49  ;;  %v5933_v42 = vsel %vm529_vm4, %v5924_v13, %v5926_v59  ;;  %v6025_v63 = vpop.permute.xlu1 %6024 }
 0x5ed   :  { %v5941_v3 = vsel %vm5669_vm2, %v5933_v42, 0  ;;  %v6034_v51 = vsel %vm672_vm5, %v6025_v63, %v6027_v17 }
 0x5ee   :  { %v6042_v52 = vsel %vm5669_vm2, %v6034_v51, 0  ;;  %5959 = vmatpush.bf16.msra.mxu1 %v5941_v3 }
 0x5f1   :  { %6836 = vrot.lane.b32.xlu0 %v16219_v35, %s18805_s10  ;;  %7040 = vrot.lane.b32.xlu2 %v16219_v35, %s18889_s5  ;;  %s18900_s10 = sld [smem:[#allocation27_spill]] }
 0x5f2   :  { %6060 = vmatpush.bf16.msrb.mxu1 %v6042_v52  ;;  %6938 = vrot.lane.b32.xlu1 %v16219_v35, %s18803_s29 }
 0x5f3   :  { %13034 = vmatmul.msk.bf16.vlgmr.msra.gmra.mxu1 %vm5665_vm10, %v16432_v26  ;;  %13036 = vmatmul.msk.bf16.vlgmr.msra.gmra.mxu3 %vm5665_vm10, %v16432_v26  ;;  %v6029_v47 = vpop.permute.xlu0 %6028  ;;  %v16492_v60 = vpop.permute.xlu2 %6432 }
 0x5f4   :  { %v6035_v43 = vsel %vm672_vm5, %v6027_v17, %v6029_v47  ;;  %v6036_v5 = vsel %vm672_vm5, %v6029_v47, %v16379_v54  ;;  %v6130_v21 = vpop.permute.xlu1 %6129  ;;  %v5768_v47 = vadd.f32 %v5767_v6, %v5691_v0 }
 0x5f5   :  { %v6137_v41 = vsel %vm6135_vm13, %v16387_v1, %v6130_v21  ;;  %v6045_v2 = vsel %vm5669_vm2, %v6035_v43, 0  ;;  %v6048_v23 = vsel %vm5669_vm2, %v6036_v5, 0 }
 0x5f6   :  { %6162 = vmatpush.bf16.msra.mxu1 %v6144_v55  ;;  %6074 = vmatpush.bf16.msra.mxu2 %v6045_v2  ;;  %v6147_v16 = vsel %vm5669_vm2, %v6137_v41, 0 }
 0x5f7   :  { %6088 = vmatpush.bf16.msrb.mxu3 %v6048_v23 }
 0x5f9   :  { %6942 = vrot.lane.b32.xlu0 %v16229_v14, %s18803_s29  ;;  %7145 = vrot.lane.b32.xlu2 %v16229_v14, %s14581_s28 }
 0x5fa   :  { %6176 = vmatpush.bf16.msrb.mxu2 %v6147_v16  ;;  %7044 = vrot.lane.b32.xlu1 %v16229_v14, %s18889_s5 }
 0x5fb   :  { %13027 = vmatmul.msk.bf16.vlgmr.msra.gmra.mxu0 %vm5665_vm10, %v16337_v9  ;;  %13045 = vmatmul.msk.bf16.vlgmr.msra.gmra.mxu2 %vm5665_vm10, %v16480_v32  ;;  %v6033_v8 = vpop.permute.xlu0 %6032 }
 0x5fc   :  { %v6037_v62 = vsel %vm672_vm5, %v16379_v54, %v6033_v8  ;;  %v6134_v61 = vpop.permute.xlu1 %6133  ;;  %v6431_v54 = vpop.permute.xlu2 %6430  ;;  %v16611_v8 = vor.u32 %v14250_v50, %v13072_v29 }
 0x5fd   :  { %v6051_v37 = vsel %vm5669_vm2, %v6037_v62, 0  ;;  %v6440_v55 = vsel %vm958_vm7, %v6431_v54, %v16492_v60  ;;  %v16725_v50 = vpop.f32.mrf.mxu0 }
 0x5fe   :  { %6102 = vmatpush.bf16.msra.mxu0 %v6051_v37  ;;  %v6448_v43 = vsel %vm5669_vm2, %v6440_v55, 0 }
 0x601   :  { %6946 = vrot.lane.b32.xlu0 %v16247_v45, %s18803_s29  ;;  %7149 = vrot.lane.b32.xlu2 %v16247_v45, %s14581_s28  ;;  %s14583_s29 = smov 78  }
 0x602   :  { %7048 = vrot.lane.b32.xlu1 %v16247_v45, %s18889_s5 }
 0x603   :  { %13044 = vmatmul.msk.bf16.vlgmr.msrb.gmra.mxu1 %vm5665_vm10, %v16480_v32  ;;  %13046 = vmatmul.msk.bf16.vlgmr.msrb.gmra.mxu3 %vm5665_vm10, %v16480_v32  ;;  %v6132_v9 = vpop.permute.xlu0 %6131 }
 0x604   :  { %v6138_v53 = vsel %vm6135_vm13, %v6130_v21, %v6132_v9  ;;  %v6234_v20 = vpop.permute.xlu1 %6233  ;;  %v6139_v31 = vsel %vm6135_vm13, %v6132_v9, %v6134_v61  ;;  %v16535_v25 = vpop.permute.xlu2 %6535 }
 0x605   :  { %v6240_v15 = vsel %vm6237_vm14, %v16412_v12, %v6234_v20  ;;  %v6150_v30 = vsel %vm5669_vm2, %v6138_v53, 0  ;;  %v6153_v57 = vsel %vm5669_vm2, %v6139_v31, 0  ;;  %v6241_v17 = vsel %vm6237_vm14, %v6234_v20, %v16434_v27  ;;  %v14251_v31 = vld [vmem:[%s18888_s2 + $0x40] sm:$0x30] }
 0x606   :  { %6190 = vmatpush.bf16.msra.mxu3 %v6150_v30  ;;  %v6252_v1 = vsel %vm5669_vm2, %v6240_v15, 0  ;;  %v6255_v38 = vsel %vm5669_vm2, %v6241_v17, 0 }
 0x609   :  { %7046 = vrot.lane.b32.xlu0 %v16231_v4, %s18889_s5  ;;  %7249 = vrot.lane.b32.xlu2 %v16231_v4, %s14582_s6 }
 0x60a   :  { %6292 = vmatpush.bf16.msrb.mxu3 %v6252_v1  ;;  %7147 = vrot.lane.b32.xlu1 %v16231_v4, %s14581_s28  ;;  %v13082_v1 = vld [vmem:[%s18888_s2 + $0x40] sm:$0xf] }
 0x60b   :  { %13037 = vmatmul.msk.bf16.vlgmr.msrb.gmra.mxu0 %vm5665_vm10, %v16432_v26  ;;  %13055 = vmatmul.msk.bf16.vlgmr.msrb.gmra.mxu2 %vm5665_vm10, %v16519_v28  ;;  %v6230_v56 = vpop.permute.xlu0 %6229  ;;  %v16574_v26 = vpop.f32.mrf.mxu1 }
 0x60c   :  { %6204 = vmatpush.bf16.msrb.mxu0 %v6153_v57  ;;  %v6239_v46 = vsel %vm6237_vm14, %v6230_v56, %v16412_v12  ;;  %v6332_v44 = vpop.permute.xlu1 %6331  ;;  %v14249_v12 = vld [vmem:[%s18888_s2 + $0x30] sm:$0x30]  ;;  %v16565_v18 = vpop.permute.xlu2 %6539 }
 0x60d   :  { %v6249_v19 = vsel %vm5669_vm2, %v6239_v46, 0  ;;  %v16559_v40 = vor.u32 %v14249_v12, %v13062_v48 }
 0x60e   :  { %6278 = vmatpush.bf16.msra.mxu2 %v6249_v19 }
 0x611   :  { %7143 = vrot.lane.b32.xlu0 %v16221_v10, %s14581_s28  ;;  %7347 = vrot.lane.b32.xlu2 %v16221_v10, %s14583_s29 }
 0x612   :  { %7245 = vrot.lane.b32.xlu1 %v16221_v10, %s14582_s6 }
 0x613   :  { %13054 = vmatmul.msk.bf16.vlgmr.msra.gmra.mxu1 %vm5665_vm10, %v16519_v28  ;;  %13056 = vmatmul.msk.bf16.vlgmr.msra.gmra.mxu3 %vm5665_vm10, %v16519_v28  ;;  %v6228_v22 = vpop.permute.xlu0 %6227 }
 0x614   :  { %v6238_v33 = vsel %vm6237_vm14, %v6228_v22, %v6230_v56  ;;  %v6330_v34 = vpop.permute.xlu1 %6329  ;;  %v16605_v2 = vpop.permute.xlu2 %6638 }
 0x615   :  { %v6246_v36 = vsel %vm5669_vm2, %v6238_v33, 0  ;;  %v6339_v59 = vsel %vm815_vm6, %v6330_v34, %v6332_v44 }
 0x616   :  { %v6347_v39 = vsel %vm5669_vm2, %v6339_v59, 0  ;;  %6264 = vmatpush.bf16.msrb.mxu1 %v6246_v36 }
 0x618   :  { %v5705_v42 = vpop.f32.mrf.mxu2 }
 0x619   :  { %7141 = vrot.lane.b32.xlu0 %v16219_v35, %s14581_s28  ;;  %7345 = vrot.lane.b32.xlu2 %v16219_v35, %s14583_s29  ;;  %s14588_s28 = smov 62  }
 0x61a   :  { %6365 = vmatpush.bf16.msra.mxu1 %v6347_v39  ;;  %7243 = vrot.lane.b32.xlu1 %v16219_v35, %s14582_s6 }
 0x61b   :  { %13047 = vmatmul.msk.bf16.vlgmr.msra.gmra.mxu0 %vm5665_vm10, %v16480_v32  ;;  %13065 = vmatmul.msk.bf16.vlgmr.msra.gmra.mxu2 %vm5665_vm10, %v16559_v40  ;;  %v6334_v24 = vpop.permute.xlu0 %6333 }
 0x61c   :  { %6306 = vmatpush.bf16.msra.mxu0 %v6255_v38  ;;  %v6340_v27 = vsel %vm815_vm6, %v6332_v44, %v6334_v24  ;;  %v6341_v49 = vsel %vm815_vm6, %v6334_v24, %v16458_v11  ;;  %v6435_v13 = vpop.permute.xlu1 %6434  ;;  %v16628_v20 = vpop.permute.xlu2 %6736  ;;  %v16656_v44 = vor.u32 %v14251_v31, %v13082_v1 }
 0x61d   :  { %v6441_v63 = vsel %vm958_vm7, %v16492_v60, %v6435_v13  ;;  %v6350_v3 = vsel %vm5669_vm2, %v6340_v27, 0  ;;  %v6353_v51 = vsel %vm5669_vm2, %v6341_v49, 0  ;;  %v13092_v49 = vld [vmem:[%s18888_s2 + $0x48] sm:$0xf] }
 0x61e   :  { %6379 = vmatpush.bf16.msrb.mxu2 %v6350_v3  ;;  %6393 = vmatpush.bf16.msra.mxu3 %v6353_v51  ;;  %v6451_v52 = vsel %vm5669_vm2, %v6441_v63, 0 }
 0x620   :  { %v16603_v41 = vpop.f32.mrf.mxu2 }
 0x621   :  { %7247 = vrot.lane.b32.xlu0 %v16229_v14, %s14582_s6  ;;  %7451 = vrot.lane.b32.xlu2 %v16229_v14, %s14584_s9 }
 0x622   :  { %6480 = vmatpush.bf16.msra.mxu2 %v6451_v52  ;;  %7349 = vrot.lane.b32.xlu1 %v16229_v14, %s14583_s29  ;;  %v5860_v23 = vpop.f32.mrf.mxu1 }
 0x623   :  { %13064 = vmatmul.msk.bf16.vlgmr.msrb.gmra.mxu1 %vm5665_vm10, %v16559_v40  ;;  %13066 = vmatmul.msk.bf16.vlgmr.msrb.gmra.mxu3 %vm5665_vm10, %v16559_v40  ;;  %v6338_v5 = vpop.permute.xlu0 %6337  ;;  %v16607_v16 = vadd.f32 %v5860_v23, %v5768_v47 }
 0x624   :  { %6466 = vmatpush.bf16.msrb.mxu1 %v6448_v43  ;;  %v6439_v21 = vpop.permute.xlu1 %6438  ;;  %v6342_v32 = vsel %vm815_vm6, %v16458_v11, %v6338_v5  ;;  %v6735_v19 = vpop.permute.xlu2 %6734 }
 0x625   :  { %v6356_v60 = vsel %vm5669_vm2, %v6342_v32, 0  ;;  %v6745_v29 = vsel %vm6744_vm9, %v6735_v19, %v16628_v20 }
 0x626   :  { %v6753_v23 = vsel %vm5669_vm2, %v6745_v29, 0 }
 0x628   :  { %v5781_v37 = vpop.f32.mrf.mxu2 }
 0x629   :  { %7251 = vrot.lane.b32.xlu0 %v16247_v45, %s14582_s6  ;;  %7455 = vrot.lane.b32.xlu2 %v16247_v45, %s14584_s9  ;;  %v5782_v53 = vadd.f32 %v5781_v37, %v5705_v42  ;;  %s14585_s6 = smov 76  }
 0x62a   :  { %7353 = vrot.lane.b32.xlu1 %v16247_v45, %s14583_s29 }
 0x62b   :  { %13057 = vmatmul.msk.bf16.vlgmr.msrb.gmra.mxu0 %vm5665_vm10, %v16519_v28  ;;  %13075 = vmatmul.msk.bf16.vlgmr.msrb.gmra.mxu2 %vm5665_vm10, %v16611_v8  ;;  %v6437_v11 = vpop.permute.xlu0 %6436 }
 0x62c   :  { %6407 = vmatpush.bf16.msrb.mxu0 %v6356_v60  ;;  %v6442_v62 = vsel %vm958_vm7, %v6435_v13, %v6437_v11  ;;  %v16625_v61 = vpop.permute.xlu1 %6537  ;;  %v6443_v46 = vsel %vm958_vm7, %v6437_v11, %v6439_v21  ;;  %v16685_v17 = vpop.permute.xlu2 %6840  ;;  %v14252_v13 = vld [vmem:[%s18888_s2 + $0x48] sm:$0x30]  ;;  %v13102_v11 = vld [vmem:[%s18888_s2 + $0x50] sm:$0xf] }
 0x62d   :  { %v6454_v9 = vsel %vm5669_vm2, %v6442_v62, 0  ;;  %v6543_v7 = vsel %vm1101_vm8, %v16535_v25, %v16625_v61  ;;  %v6544_v52 = vsel %vm1101_vm8, %v16625_v61, %v16565_v18  ;;  %v16705_v0 = vor.u32 %v14252_v13, %v13092_v49  ;;  %v14253_v62 = vld [vmem:[%s18888_s2 + $0x50] sm:$0x30] }
 0x62e   :  { %6494 = vmatpush.bf16.msrb.mxu3 %v6454_v9  ;;  %v6555_v58 = vsel %vm5669_vm2, %v6543_v7, 0  ;;  %v6558_v18 = vsel %vm5669_vm2, %v6544_v52, 0 }
 0x630   :  { %v5719_v28 = vpop.f32.mrf.mxu3  ;;  %v16653_v56 = vpop.f32.mrf.mxu2 }
 0x631   :  { %7351 = vrot.lane.b32.xlu0 %v16231_v4, %s14583_s29  ;;  %7555 = vrot.lane.b32.xlu2 %v16231_v4, %s14585_s6  ;;  %s18913_s29 = smov 124  }
 0x632   :  { %7453 = vrot.lane.b32.xlu1 %v16231_v4, %s14584_s9 }
 0x633   :  { %13074 = vmatmul.msk.bf16.vlgmr.msra.gmra.mxu1 %vm5665_vm10, %v16611_v8  ;;  %13076 = vmatmul.msk.bf16.vlgmr.msra.gmra.mxu3 %vm5665_vm10, %v16611_v8  ;;  %v6534_v15 = vpop.permute.xlu0 %6533 }
 0x634   :  { %6595 = vmatpush.bf16.msra.mxu3 %v6555_v58  ;;  %v6542_v30 = vsel %vm1101_vm8, %v6534_v15, %v16535_v25  ;;  %v6635_v54 = vpop.permute.xlu1 %6634  ;;  %v6457_v25 = vsel %vm5669_vm2, %v6443_v46, 0  ;;  %v16721_v21 = vpop.permute.xlu2 %6844 }
 0x635   :  { %v6552_v57 = vsel %vm5669_vm2, %v6542_v30, 0 }
 0x636   :  { %6581 = vmatpush.bf16.msrb.mxu2 %v6552_v57 }
 0x638   :  { %v16670_v34 = vpop.f32.mrf.mxu3  ;;  %v5874_v12 = vpop.f32.mrf.mxu2 }
 0x639   :  { %7449 = vrot.lane.b32.xlu0 %v16221_v10, %s14584_s9  ;;  %7653 = vrot.lane.b32.xlu2 %v16221_v10, %s14586_s1  ;;  %v16673_v36 = vadd.f32 %v5874_v12, %v5782_v53 }
 0x63a   :  { %7551 = vrot.lane.b32.xlu1 %v16221_v10, %s14585_s6 }
 0x63b   :  { %13067 = vmatmul.msk.bf16.vlgmr.msra.gmra.mxu0 %vm5665_vm10, %v16559_v40  ;;  %13085 = vmatmul.msk.bf16.vlgmr.msra.gmra.mxu2 %vm5665_vm10, %v16656_v44  ;;  %v6532_v6 = vpop.permute.xlu0 %6531 }
 0x63c   :  { %6508 = vmatpush.bf16.msra.mxu0 %v6457_v25  ;;  %v6541_v22 = vsel %vm1101_vm8, %v6532_v6, %v6534_v15  ;;  %v6633_v33 = vpop.permute.xlu1 %6632  ;;  %v16748_v37 = vpop.permute.xlu2 %6944  ;;  %v13112_v25 = vld [vmem:[%s18888_s2 + $0x58] sm:$0xf]  ;;  %v14254_v6 = vld [vmem:[%s18888_s2 + $0x58] sm:$0x30] }
 0x63d   :  { %v6549_v48 = vsel %vm5669_vm2, %v6541_v22, 0  ;;  %v6643_v59 = vsel %vm18810_vm15, %v6633_v33, %v6635_v54 }
 0x63e   :  { %6567 = vmatpush.bf16.msra.mxu1 %v6549_v48  ;;  %v6651_v39 = vsel %vm5669_vm2, %v6643_v59, 0  ;;  %v16795_v59 = vpop.f32.mrf.mxu1 }
 0x640   :  { %v5795_v42 = vpop.f32.mrf.mxu3  ;;  %v16792_v48 = vpop.f32.mrf.mxu2 }
 0x641   :  { %7447 = vrot.lane.b32.xlu0 %v16219_v35, %s14584_s9  ;;  %7651 = vrot.lane.b32.xlu2 %v16219_v35, %s14586_s1  ;;  %v16700_v51 = vadd.f32 %v5795_v42, %v5719_v28  ;;  %s18918_s9 = smov 108  }
 0x642   :  { %7549 = vrot.lane.b32.xlu1 %v16219_v35, %s14585_s6 }
 0x643   :  { %13084 = vmatmul.msk.bf16.vlgmr.msrb.gmra.mxu1 %vm5665_vm10, %v16656_v44  ;;  %13086 = vmatmul.msk.bf16.vlgmr.msrb.gmra.mxu3 %vm5665_vm10, %v16656_v44  ;;  %v6637_v40 = vpop.permute.xlu0 %6636 }
 0x644   :  { %6669 = vmatpush.bf16.msrb.mxu1 %v6651_v39  ;;  %v6644_v38 = vsel %vm18810_vm15, %v6635_v54, %v6637_v40  ;;  %v6645_v24 = vsel %vm18810_vm15, %v6637_v40, %v16605_v2  ;;  %v6739_v27 = vpop.permute.xlu1 %6738  ;;  %v16771_v28 = vpop.permute.xlu2 %7042  ;;  %v16798_v40 = vor.u32 %v14254_v6, %v13112_v25  ;;  %v5770_v6 = vadd.f32 %v16574_v26, %v16725_v50 }
 0x645   :  { %v6654_v63 = vsel %vm5669_vm2, %v6644_v38, 0  ;;  %v6657_v3 = vsel %vm5669_vm2, %v6645_v24, 0  ;;  %v6746_v55 = vsel %vm6744_vm9, %v16628_v20, %v6739_v27  ;;  %v16752_v20 = vor.u32 %v14253_v62, %v13102_v11 }
 0x646   :  { %6683 = vmatpush.bf16.msra.mxu2 %v6654_v63  ;;  %6697 = vmatpush.bf16.msrb.mxu3 %v6657_v3  ;;  %v6756_v47 = vsel %vm5669_vm2, %v6746_v55, 0 }
 0x648   :  { %v5797_v30 = vpop.f32.mrf.mxu3 }
 0x649   :  { %7553 = vrot.lane.b32.xlu0 %v16229_v14, %s14585_s6  ;;  %7757 = vrot.lane.b32.xlu2 %v16229_v14, %s14587_s0  ;;  %v5798_v13 = vadd.f32 %v5797_v30, %v16670_v34 }
 0x64a   :  { %7655 = vrot.lane.b32.xlu1 %v16229_v14, %s14586_s1 }
 0x64b   :  { %13077 = vmatmul.msk.bf16.vlgmr.msrb.gmra.mxu0 %vm5665_vm10, %v16611_v8  ;;  %13095 = vmatmul.msk.bf16.vlgmr.msrb.gmra.mxu2 %vm5665_vm10, %v16705_v0  ;;  %v6641_v43 = vpop.permute.xlu0 %6640 }
 0x64c   :  { %6609 = vmatpush.bf16.msrb.mxu0 %v6558_v18  ;;  %6785 = vmatpush.bf16.msrb.mxu2 %v6756_v47  ;;  %v6743_v5 = vpop.permute.xlu1 %6742  ;;  %v6646_v9 = vsel %vm18810_vm15, %v16605_v2, %v6641_v43  ;;  %vm18812_vm15 = vcmask 760832  }
 0x64d   :  { %v6660_v7 = vsel %vm5669_vm2, %v6646_v9, 0 }
 0x651   :  { %7557 = vrot.lane.b32.xlu0 %v16247_v45, %s14585_s6  ;;  %7761 = vrot.lane.b32.xlu2 %v16247_v45, %s14587_s0  ;;  %s18910_s6 = sld [smem:[#allocation25_spill]] }
 0x652   :  { %7659 = vrot.lane.b32.xlu1 %v16247_v45, %s14586_s1 }
 0x653   :  { %13094 = vmatmul.msk.bf16.vlgmr.msra.gmra.mxu1 %vm5665_vm10, %v16705_v0  ;;  %13096 = vmatmul.msk.bf16.vlgmr.msra.gmra.mxu3 %vm5665_vm10, %v16705_v0  ;;  %v6741_v32 = vpop.permute.xlu0 %6740 }
 0x654   :  { %6771 = vmatpush.bf16.msra.mxu1 %v6753_v23  ;;  %v6747_v8 = vsel %vm6744_vm9, %v6739_v27, %v6741_v32  ;;  %v16739_v60 = vpop.permute.xlu1 %6842  ;;  %v6748_v39 = vsel %vm6744_vm9, %v6741_v32, %v6743_v5  ;;  %v7041_v27 = vpop.permute.xlu2 %7040 }
 0x655   :  { %v6759_v61 = vsel %vm5669_vm2, %v6747_v8, 0  ;;  %v6849_v31 = vsel %vm18811_vm12, %v16685_v17, %v16739_v60  ;;  %v6762_v24 = vsel %vm5669_vm2, %v6748_v39, 0  ;;  %v13122_v8 = vld [vmem:[%s18888_s2 + $0x60] sm:$0xf]  ;;  %v6850_v9 = vsel %vm18811_vm12, %v16739_v60, %v16721_v21 }
 0x656   :  { %6799 = vmatpush.bf16.msra.mxu3 %v6759_v61  ;;  %v6861_v57 = vsel %vm5669_vm2, %v6849_v31, 0  ;;  %v6864_v21 = vsel %vm5669_vm2, %v6850_v9, 0 }
 0x658   :  { %v5733_v53 = vpop.f32.mrf.mxu0 }
 0x659   :  { %7657 = vrot.lane.b32.xlu0 %v16231_v4, %s14586_s1  ;;  %7861 = vrot.lane.b32.xlu2 %v16231_v4, %s14588_s28  ;;  %s14589_s1 = smov 61  }
 0x65a   :  { %7759 = vrot.lane.b32.xlu1 %v16231_v4, %s14587_s0 }
 0x65b   :  { %13087 = vmatmul.msk.bf16.vlgmr.msra.gmra.mxu0 %vm5665_vm10, %v16656_v44  ;;  %13105 = vmatmul.msk.bf16.vlgmr.msra.gmra.mxu2 %vm5665_vm10, %v16752_v20  ;;  %v6839_v2 = vpop.permute.xlu0 %6838 }
 0x65c   :  { %6711 = vmatpush.bf16.msra.mxu0 %v6660_v7  ;;  %v6848_v58 = vsel %vm18811_vm12, %v6839_v2, %v16685_v17  ;;  %v6941_v15 = vpop.permute.xlu1 %6940  ;;  %v16839_v11 = vpop.permute.xlu2 %7145 }
 0x65d   :  { %v6858_v54 = vsel %vm5669_vm2, %v6848_v58, 0 }
 0x65e   :  { %6887 = vmatpush.bf16.msra.mxu2 %v6858_v54 }
 0x660   :  { %v5735_v1 = vpop.f32.mrf.mxu0 }
 0x661   :  { %7755 = vrot.lane.b32.xlu0 %v16221_v10, %s14587_s0  ;;  %7959 = vrot.lane.b32.xlu2 %v16221_v10, %s14589_s1 }
 0x662   :  { %7857 = vrot.lane.b32.xlu1 %v16221_v10, %s14588_s28 }
 0x663   :  { %13104 = vmatmul.msk.bf16.vlgmr.msrb.gmra.mxu1 %vm5665_vm10, %v16752_v20  ;;  %13106 = vmatmul.msk.bf16.vlgmr.msrb.gmra.mxu3 %vm5665_vm10, %v16752_v20  ;;  %v6837_v46 = vpop.permute.xlu0 %6836 }
 0x664   :  { %6901 = vmatpush.bf16.msrb.mxu3 %v6861_v57  ;;  %v6847_v44 = vsel %vm18811_vm12, %v6837_v46, %v6839_v2  ;;  %v6939_v19 = vpop.permute.xlu1 %6938  ;;  %v16872_v39 = vpop.permute.xlu2 %7149  ;;  %vm7151_vm12 = vcmask 654336  }
 0x665   :  { %v6855_v22 = vsel %vm5669_vm2, %v6847_v44, 0 }
 0x666   :  { %v5888_v33 = vpop.f32.mrf.mxu3  ;;  %6873 = vmatpush.bf16.msrb.mxu1 %v6855_v22 }
 0x667   :  { %v5909_v12 = vadd.f32 %v5888_v33, %v16700_v51 }
 0x668   :  { %v5809_v17 = vpop.f32.mrf.mxu0 }
 0x669   :  { %v5810_v38 = vadd.f32 %v5809_v17, %v5733_v53  ;;  %7753 = vrot.lane.b32.xlu0 %v16219_v35, %s14587_s0  ;;  %7957 = vrot.lane.b32.xlu2 %v16219_v35, %s14589_s1  ;;  %s14590_s0 = smov 60   ;;  %v13132_v17 = vld [vmem:[%s18888_s2 + $0x68] sm:$0xf] }
 0x66a   :  { %7855 = vrot.lane.b32.xlu1 %v16219_v35, %s14588_s28 }
 0x66b   :  { %13097 = vmatmul.msk.bf16.vlgmr.msrb.gmra.mxu0 %vm5665_vm10, %v16705_v0  ;;  %13115 = vmatmul.msk.bf16.vlgmr.msrb.gmra.mxu2 %vm5665_vm10, %v16798_v40  ;;  %v6943_v49 = vpop.permute.xlu0 %6942  ;;  %v6949_v0 = vsel %vm18812_vm15, %v6939_v19, %v6941_v15 }
 0x66c   :  { %6813 = vmatpush.bf16.msrb.mxu0 %v6762_v24  ;;  %v6950_v42 = vsel %vm18812_vm15, %v6941_v15, %v6943_v49  ;;  %v7045_v63 = vpop.permute.xlu1 %7044  ;;  %v6951_v5 = vsel %vm18812_vm15, %v6943_v49, %v16748_v37  ;;  %v6957_v23 = vsel %vm5669_vm2, %v6949_v0, 0 }
 0x66d   :  { %v6960_v51 = vsel %vm5669_vm2, %v6950_v42, 0  ;;  %v5975_v55 = vpop.f32.mrf.mxu2  ;;  %v7051_v15 = vsel %vm18813_vm11, %v16771_v28, %v7045_v63 }
 0x66e   :  { %v5890_v3 = vpop.f32.mrf.mxu3  ;;  %6989 = vmatpush.bf16.msrb.mxu2 %v6960_v51  ;;  %v6009_v18 = vadd.f32 %v5975_v55, %v16673_v36  ;;  %v7061_v60 = vsel %vm5669_vm2, %v7051_v15, 0 }
 0x66f   :  { %v5913_v52 = vadd.f32 %v5890_v3, %v5798_v13 }
 0x670   :  { %v5811_v47 = vpop.f32.mrf.mxu0  ;;  %v5961_v43 = vpop.f32.mrf.mxu1 }
 0x671   :  { %v5812_v29 = vadd.f32 %v5811_v47, %v5735_v1  ;;  %v6008_v34 = vadd.f32 %v5961_v43, %v16607_v16  ;;  %7859 = vrot.lane.b32.xlu0 %v16229_v14, %s14588_s28  ;;  %8063 = vrot.lane.b32.xlu2 %v16229_v14, %s14590_s0  ;;  %v6963_v16 = vsel %vm5669_vm2, %v6951_v5, 0  ;;  %v16908_v47 = vpop.permute.xlu2 %7249 }
 0x672   :  { %7961 = vrot.lane.b32.xlu1 %v16229_v14, %s14589_s1  ;;  %v14255_v14 = vld [vmem:[%s18888_s2 + $0x60] sm:$0x30] }
 0x673   :  { %13114 = vmatmul.msk.bf16.vlgmr.msra.gmra.mxu1 %vm5665_vm10, %v16798_v40  ;;  %13116 = vmatmul.msk.bf16.vlgmr.msra.gmra.mxu3 %vm5665_vm10, %v16798_v40  ;;  %v6947_v36 = vpop.permute.xlu0 %6946  ;;  %v16844_v58 = vor.u32 %v14255_v14, %v13122_v8 }
 0x674   :  { %6975 = vmatpush.bf16.msra.mxu1 %v6957_v23  ;;  %7003 = vmatpush.bf16.msra.mxu3 %v6963_v16  ;;  %v16831_v32 = vpop.permute.xlu1 %7048  ;;  %v6952_v13 = vsel %vm18812_vm15, %v16748_v37, %v6947_v36  ;;  %vm7253_vm15 = vcmask 646144  }
 0x675   :  { %v5977_v62 = vpop.f32.mrf.mxu2  ;;  %v6966_v37 = vsel %vm5669_vm2, %v6952_v13, 0  ;;  %v14258_v13 = vld [vmem:[%s18888_s2 + $0x78] sm:$0x30] }
 0x676   :  { %v5989_v61 = vpop.f32.mrf.mxu3 }
 0x677   :  { %v6010_v53 = vadd.f32 %v5989_v61, %v5909_v12 }
 0x678   :  { %v5902_v7 = vpop.f32.mrf.mxu0  ;;  %v5963_v2 = vpop.f32.mrf.mxu1 }
 0x679   :  { %v5910_v30 = vadd.f32 %v5902_v7, %v5810_v38  ;;  %7863 = vrot.lane.b32.xlu0 %v16247_v45, %s14588_s28  ;;  %8067 = vrot.lane.b32.xlu2 %v16247_v45, %s14590_s0  ;;  %s18890_s28 = sld [smem:[#allocation24_spill]] }
 0x67a   :  { %7965 = vrot.lane.b32.xlu1 %v16247_v45, %s14589_s1  ;;  %v5784_v45 = vadd.f32 %v16653_v56, %v16603_v41 }
 0x67b   :  { %13107 = vmatmul.msk.bf16.vlgmr.msra.gmra.mxu0 %vm5665_vm10, %v16752_v20  ;;  %13125 = vmatmul.msk.bf16.vlgmr.msra.gmra.mxu2 %vm5665_vm10, %v16844_v58  ;;  %v16860_v54 = vpop.permute.xlu0 %7046  ;;  %v7050_v20 = vsel %vm18813_vm11, %v7041_v27, %v16771_v28  ;;  %v5911_v28 = vadd.f32 %v16795_v59, %v5770_v6 }
 0x67c   :  { %6915 = vmatpush.bf16.msra.mxu0 %v6864_v21  ;;  %7090 = vmatpush.bf16.msra.mxu2 %v7061_v60  ;;  %v16862_v1 = vpop.permute.xlu1 %7147  ;;  %v7052_v22 = vsel %vm18813_vm11, %v7045_v63, %v16860_v54  ;;  %v7058_v41 = vsel %vm5669_vm2, %v7050_v20, 0  ;;  %v5912_v26 = vadd.f32 %v16792_v48, %v5784_v45  ;;  %v7053_v60 = vsel %vm18813_vm11, %v16860_v54, %v16831_v32 }
 0x67d   :  { %v7064_v56 = vsel %vm5669_vm2, %v7052_v22, 0  ;;  %v6012_v24 = vadd.f32 %v5963_v2, %v5911_v28  ;;  %v16931_v2 = vpop.permute.xlu2 %7347  ;;  %v7067_v6 = vsel %vm5669_vm2, %v7053_v60, 0  ;;  %vm7355_vm11 = vcmask 637952  }
 0x67e   :  { %v5991_v31 = vpop.f32.mrf.mxu3  ;;  %v6076_v57 = vpop.f32.mrf.mxu2  ;;  %v6013_v38 = vadd.f32 %v5977_v62, %v5912_v26 }
 0x67f   :  { %v6014_v46 = vadd.f32 %v5991_v31, %v5913_v52  ;;  %v6110_v44 = vadd.f32 %v6076_v57, %v6009_v18  ;;  %v8154_v51 = vld [vmem:[%s18890_s28 + $0x8] sm:$0xf]  ;;  %v8153_v21 = vld [vmem:[%s18890_s28] sm:$0xff]  ;;  %s18915_s28 = smov 111  }
 0x680   :  { %v5904_v19 = vpop.f32.mrf.mxu0  ;;  %v6062_v25 = vpop.f32.mrf.mxu1 }
 0x681   :  { %v5914_v33 = vadd.f32 %v5904_v19, %v5812_v29  ;;  %v6109_v12 = vadd.f32 %v6062_v25, %v6008_v34  ;;  %7963 = vrot.lane.b32.xlu0 %v16231_v4, %s14589_s1  ;;  %s18916_s1 = smov 110  }
 0x682   :  { %8065 = vrot.lane.b32.xlu1 %v16231_v4, %s14590_s0  ;;  %v14256_v4 = vld [vmem:[%s18888_s2 + $0x68] sm:$0x30] }
 0x683   :  { %13124 = vmatmul.msk.bf16.vlgmr.msrb.gmra.mxu1 %vm5665_vm10, %v16844_v58  ;;  %13126 = vmatmul.msk.bf16.vlgmr.msrb.gmra.mxu3 %vm5665_vm10, %v16844_v58  ;;  %v7144_v50 = vpop.permute.xlu0 %7143  ;;  %v16899_v52 = vor.u32 %v14256_v4, %v13132_v17 }
 0x684   :  { %7076 = vmatpush.bf16.msrb.mxu1 %v7058_v41  ;;  %7104 = vmatpush.bf16.msrb.mxu3 %v7064_v56  ;;  %v16892_v48 = vpop.permute.xlu1 %7245  ;;  %v7153_v55 = vsel %vm7151_vm12, %v7144_v50, %v16839_v11 }
 0x685   :  { %v7163_v43 = vsel %vm5669_vm2, %v7153_v55, 0 }
 0x686   :  { %v6078_v27 = vpop.f32.mrf.mxu2  ;;  %v6090_v49 = vpop.f32.mrf.mxu3 }
 0x687   :  { %v6114_v59 = vadd.f32 %v6078_v27, %v6013_v38  ;;  %v6111_v42 = vadd.f32 %v6090_v49, %v6010_v53  ;;  %v7346_v38 = vpop.permute.xlu2 %7345  ;;  %v13152_v49 = vld [vmem:[%s18888_s2 + $0x78] sm:$0xf] }
 0x688   :  { %v6003_v63 = vpop.f32.mrf.mxu0  ;;  %v6064_v3 = vpop.f32.mrf.mxu1 }
 0x689   :  { %v6011_v0 = vadd.f32 %v6003_v63, %v5910_v30  ;;  %v6113_v18 = vadd.f32 %v6064_v3, %v6012_v24  ;;  %8061 = vrot.lane.b32.xlu0 %v16221_v10, %s14590_s0  ;;  %v7155_v3 = vsel %vm7151_vm12, %v16862_v1, %v16872_v39 }
 0x68a   :  { %8162 = vperm.xlu1 %14457, %v8154_v51  }
 0x68b   :  { %13117 = vmatmul.msk.bf16.vlgmr.msrb.gmra.mxu0 %vm5665_vm10, %v16798_v40  ;;  %13135 = vmatmul.msk.bf16.vlgmr.msrb.gmra.mxu2 %vm5665_vm10, %v16899_v52  ;;  %v7142_v5 = vpop.permute.xlu0 %7141  ;;  %v7154_v40 = vsel %vm7151_vm12, %v16839_v11, %v16862_v1  ;;  %v13142_v11 = vld [vmem:[%s18888_s2 + $0x70] sm:$0xf] }
 0x68c   :  { %7017 = vmatpush.bf16.msrb.mxu0 %v6966_v37  ;;  %7192 = vmatpush.bf16.msrb.mxu2 %v7163_v43  ;;  %v7152_v10 = vsel %vm7151_vm12, %v7142_v5, %v7144_v50  ;;  %v7244_v61 = vpop.permute.xlu1 %7243  ;;  %v7166_v53 = vsel %vm5669_vm2, %v7154_v40, 0  ;;  %v16974_v37 = vor.u32 %v14258_v13, %v13152_v49  ;;  %vm7457_vm12 = vcmask 629760   ;;  %v13172_v49 = vld [vmem:[%s18888_s2 + $0x88] sm:$0xf]  ;;  %v14260_v13 = vld [vmem:[%s18888_s2 + $0x88] sm:$0x30] }
 0x68d   :  { %v7160_v9 = vsel %vm5669_vm2, %v7152_v10, 0  ;;  %v7254_v41 = vsel %vm7253_vm15, %v7244_v61, %v16892_v48 }
 0x68e   :  { %v6092_v29 = vpop.f32.mrf.mxu3  ;;  %v6178_v34 = vpop.f32.mrf.mxu2  ;;  %v7262_v24 = vsel %vm5669_vm2, %v7254_v41, 0 }
 0x68f   :  { %v6115_v23 = vadd.f32 %v6092_v29, %v6014_v46  ;;  %v6212_v16 = vadd.f32 %v6178_v34, %v6110_v44  ;;  %v7169_v34 = vsel %vm5669_vm2, %v7155_v3, 0  ;;  %v7452_v10 = vpop.permute.xlu2 %7451 }
 0x690   :  { %v6005_v36 = vpop.f32.mrf.mxu0  ;;  %v6164_v8 = vpop.f32.mrf.mxu1 }
 0x691   :  { %v6015_v14 = vadd.f32 %v6005_v36, %v5914_v33  ;;  %v6211_v62 = vadd.f32 %v6164_v8, %v6109_v12  ;;  %8059 = vrot.lane.b32.xlu0 %v16219_v35, %s14590_s0  ;;  %v14257_v35 = vld [vmem:[%s18888_s2 + $0x70] sm:$0x30]  ;;  %v7356_v36 = vsel %vm7355_vm11, %v7346_v38, %v16931_v2  ;;  %s18831_s0 = smov 119  }
 0x692   :  { %v16939_v46 = vor.u32 %v14257_v35, %v13142_v11 }
 0x693   :  { %13134 = vmatmul.msk.bf16.vlgmr.msra.gmra.mxu1 %vm5665_vm10, %v16899_v52  ;;  %13136 = vmatmul.msk.bf16.vlgmr.msra.gmra.mxu3 %vm5665_vm10, %v16899_v52  ;;  %v7248_v7 = vpop.permute.xlu0 %7247 }
 0x694   :  { %7178 = vmatpush.bf16.msra.mxu1 %v7160_v9  ;;  %7206 = vmatpush.bf16.msra.mxu3 %v7166_v53  ;;  %v7255_v44 = vsel %vm7253_vm15, %v16892_v48, %v7248_v7  ;;  %v7350_v22 = vpop.permute.xlu1 %7349  ;;  %v7256_v28 = vsel %vm7253_vm15, %v7248_v7, %v16908_v47  ;;  %v7364_v7 = vsel %vm5669_vm2, %v7356_v36, 0 }
 0x695   :  { %v7265_v32 = vsel %vm5669_vm2, %v7255_v44, 0  ;;  %v7268_v48 = vsel %vm5669_vm2, %v7256_v28, 0  ;;  %v7357_v43 = vsel %vm7355_vm11, %v16931_v2, %v7350_v22  ;;  %v13162_v2 = vld [vmem:[%s18888_s2 + $0x80] sm:$0xf] }
 0x696   :  { %v6180_v15 = vpop.f32.mrf.mxu2  ;;  %v6192_v30 = vpop.f32.mrf.mxu3  ;;  %v7367_v1 = vsel %vm5669_vm2, %v7357_v43, 0 }
 0x697   :  { %v6216_v31 = vadd.f32 %v6180_v15, %v6114_v59  ;;  %v6213_v57 = vadd.f32 %v6192_v30, %v6111_v42  ;;  %v14259_v15 = vld [vmem:[%s18888_s2 + $0x80] sm:$0x30]  ;;  %v17002_v30 = vpop.permute.xlu2 %7455 }
 0x698   :  { %v6104_v45 = vpop.f32.mrf.mxu0  ;;  %v6166_v20 = vpop.f32.mrf.mxu1 }
 0x699   :  { %v6112_v19 = vadd.f32 %v6104_v45, %v6011_v0  ;;  %v6215_v25 = vadd.f32 %v6166_v20, %v6113_v18  ;;  %8157 = vperm.xlu0 %14456, %v8153_v21  }
 0x69b   :  { %13127 = vmatmul.msk.bf16.vlgmr.msra.gmra.mxu0 %vm5665_vm10, %v16844_v58  ;;  %13145 = vmatmul.msk.bf16.vlgmr.msra.gmra.mxu2 %vm5665_vm10, %v16939_v46  ;;  %v16949_v54 = vpop.permute.xlu0 %7251 }
 0x69c   :  { %7118 = vmatpush.bf16.msra.mxu0 %v7067_v6  ;;  %7294 = vmatpush.bf16.msra.mxu2 %v7265_v32  ;;  %v16969_v59 = vpop.permute.xlu1 %7353 }
 0x69e   :  { %v6194_v33 = vpop.f32.mrf.mxu3  ;;  %v6280_v12 = vpop.f32.mrf.mxu2 }
 0x69f   :  { %v6217_v26 = vadd.f32 %v6194_v33, %v6115_v23  ;;  %v6314_v56 = vadd.f32 %v6280_v12, %v6212_v16  ;;  %v17019_v38 = vpop.permute.xlu2 %7555 }
 0x6a0   :  { %v6106_v58 = vpop.f32.mrf.mxu0  ;;  %v6266_v50 = vpop.f32.mrf.mxu1 }
 0x6a1   :  { %v6116_v17 = vadd.f32 %v6106_v58, %v6015_v14  ;;  %v6313_v4 = vadd.f32 %v6266_v50, %v6211_v62 }
 0x6a3   :  { %13144 = vmatmul.msk.bf16.vlgmr.msrb.gmra.mxu1 %vm5665_vm10, %v16939_v46  ;;  %13146 = vmatmul.msk.bf16.vlgmr.msrb.gmra.mxu3 %vm5665_vm10, %v16939_v46  ;;  %v16961_v27 = vpop.permute.xlu0 %7351 }
 0x6a4   :  { %7280 = vmatpush.bf16.msrb.mxu1 %v7262_v24  ;;  %7308 = vmatpush.bf16.msrb.mxu3 %v7268_v48  ;;  %v7358_v62 = vsel %vm7355_vm11, %v7350_v22, %v16961_v27  ;;  %v16988_v53 = vpop.permute.xlu1 %7453 }
 0x6a5   :  { %v7370_v11 = vsel %vm5669_vm2, %v7358_v62, 0 }
 0x6a6   :  { %v6282_v42 = vpop.f32.mrf.mxu2  ;;  %v6294_v63 = vpop.f32.mrf.mxu3 }
 0x6a7   :  { %v6318_v51 = vadd.f32 %v6282_v42, %v6216_v31  ;;  %v6315_v55 = vadd.f32 %v6294_v63, %v6213_v57  ;;  %v7257_v31 = vsel %vm7253_vm15, %v16908_v47, %v16949_v54  ;;  %vm7559_vm15 = vcmask 621568  }
 0x6a8   :  { %v6206_v0 = vpop.f32.mrf.mxu0  ;;  %v6268_v18 = vpop.f32.mrf.mxu1  ;;  %v7271_v32 = vsel %vm5669_vm2, %v7257_v31, 0 }
 0x6a9   :  { %v6214_v5 = vadd.f32 %v6206_v0, %v6112_v19  ;;  %v6317_v29 = vadd.f32 %v6268_v18, %v6215_v25  ;;  %v17007_v19 = vor.u32 %v14259_v15, %v13162_v2  ;;  %v13182_v2 = vld [vmem:[%s18888_s2 + $0x90] sm:$0xf]  ;;  %v14261_v15 = vld [vmem:[%s18888_s2 + $0x90] sm:$0x30] }
 0x6ab   :  { %13137 = vmatmul.msk.bf16.vlgmr.msrb.gmra.mxu0 %vm5665_vm10, %v16899_v52  ;;  %13155 = vmatmul.msk.bf16.vlgmr.msrb.gmra.mxu2 %vm5665_vm10, %v16974_v37  ;;  %v7450_v39 = vpop.permute.xlu0 %7449 }
 0x6ac   :  { %7220 = vmatpush.bf16.msrb.mxu0 %v7169_v34  ;;  %7396 = vmatpush.bf16.msrb.mxu2 %v7367_v1  ;;  %v7459_v25 = vsel %vm7457_vm12, %v7450_v39, %v7452_v10  ;;  %v7552_v33 = vpop.permute.xlu1 %7551 }
 0x6ad   :  { %v7469_v47 = vsel %vm5669_vm2, %v7459_v25, 0 }
 0x6ae   :  { %v6296_v23 = vpop.f32.mrf.mxu3  ;;  %v6381_v16 = vpop.f32.mrf.mxu2 }
 0x6af   :  { %v6319_v8 = vadd.f32 %v6296_v23, %v6217_v26  ;;  %v6415_v40 = vadd.f32 %v6381_v16, %v6314_v56  ;;  %v7654_v23 = vpop.permute.xlu2 %7653 }
 0x6b0   :  { %v6208_v14 = vpop.f32.mrf.mxu0  ;;  %v6367_v52 = vpop.f32.mrf.mxu1 }
 0x6b1   :  { %v6218_v61 = vadd.f32 %v6208_v14, %v6116_v17  ;;  %v6414_v9 = vadd.f32 %v6367_v52, %v6313_v4 }
 0x6b3   :  { %13154 = vmatmul.msk.bf16.vlgmr.msra.gmra.mxu1 %vm5665_vm10, %v16974_v37  ;;  %13156 = vmatmul.msk.bf16.vlgmr.msra.gmra.mxu3 %vm5665_vm10, %v16974_v37  ;;  %v7448_v35 = vpop.permute.xlu0 %7447 }
 0x6b4   :  { %7382 = vmatpush.bf16.msra.mxu1 %v7364_v7  ;;  %7410 = vmatpush.bf16.msra.mxu3 %v7370_v11  ;;  %v7458_v26 = vsel %vm7457_vm12, %v7448_v35, %v7450_v39  ;;  %v7550_v42 = vpop.permute.xlu1 %7549 }
 0x6b5   :  { %v7466_v24 = vsel %vm5669_vm2, %v7458_v26, 0  ;;  %v7560_v36 = vsel %vm7559_vm15, %v7550_v42, %v7552_v33 }
 0x6b6   :  { %v6383_v21 = vpop.f32.mrf.mxu2  ;;  %v6395_v60 = vpop.f32.mrf.mxu3  ;;  %v7568_v7 = vsel %vm5669_vm2, %v7560_v36, 0 }
 0x6b7   :  { %v6419_v57 = vadd.f32 %v6383_v21, %v6318_v51  ;;  %v6416_v45 = vadd.f32 %v6395_v60, %v6315_v55  ;;  %v7359_v51 = vsel %vm7355_vm11, %v16961_v27, %v16969_v59  ;;  %v7652_v21 = vpop.permute.xlu2 %7651  ;;  %vm7661_vm11 = vcmask 523264  }
 0x6b8   :  { %v6308_v20 = vpop.f32.mrf.mxu0  ;;  %v6369_v44 = vpop.f32.mrf.mxu1  ;;  %v7373_v39 = vsel %vm5669_vm2, %v7359_v51, 0  ;;  %v7662_v26 = vsel %vm7661_vm11, %v7652_v21, %v7654_v23 }
 0x6b9   :  { %v6316_v6 = vadd.f32 %v6308_v20, %v6214_v5  ;;  %v6418_v22 = vadd.f32 %v6369_v44, %v6317_v29  ;;  %v17036_v5 = vor.u32 %v14260_v13, %v13172_v49  ;;  %v13192_v49 = vld [vmem:[%s18888_s2 + $0x98] sm:$0xf]  ;;  %v14262_v13 = vld [vmem:[%s18888_s2 + $0x98] sm:$0x30] }
 0x6bb   :  { %13147 = vmatmul.msk.bf16.vlgmr.msra.gmra.mxu0 %vm5665_vm10, %v16939_v46  ;;  %13165 = vmatmul.msk.bf16.vlgmr.msra.gmra.mxu2 %vm5665_vm10, %v17007_v19  ;;  %v7554_v54 = vpop.permute.xlu0 %7553  ;;  %v7460_v46 = vsel %vm7457_vm12, %v7452_v10, %v16988_v53 }
 0x6bc   :  { %7322 = vmatpush.bf16.msra.mxu0 %v7271_v32  ;;  %7498 = vmatpush.bf16.msra.mxu2 %v7469_v47  ;;  %v7472_v48 = vsel %vm5669_vm2, %v7460_v46, 0  ;;  %v7561_v29 = vsel %vm7559_vm15, %v7552_v33, %v7554_v54 }
 0x6bd   :  { %v7571_v27 = vsel %vm5669_vm2, %v7561_v29, 0  ;;  %v17098_v29 = vor.u32 %v14262_v13, %v13192_v49  ;;  %v14264_v49 = vld [vmem:[%s18888_s2 + $0xa8] sm:$0x30] }
 0x6be   :  { %v6397_v12 = vpop.f32.mrf.mxu3  ;;  %v6482_v41 = vpop.f32.mrf.mxu2 }
 0x6bf   :  { %v6420_v56 = vadd.f32 %v6397_v12, %v6319_v8  ;;  %v6516_v58 = vadd.f32 %v6482_v41, %v6415_v40 }
 0x6c0   :  { %v6310_v50 = vpop.f32.mrf.mxu0  ;;  %v6468_v28 = vpop.f32.mrf.mxu1 }
 0x6c1   :  { %v6320_v17 = vadd.f32 %v6310_v50, %v6218_v61  ;;  %v6515_v4 = vadd.f32 %v6468_v28, %v6414_v9  ;;  %v7656_v9 = vpop.permute.xlu1 %7655 }
 0x6c3   :  { %13164 = vmatmul.msk.bf16.vlgmr.msrb.gmra.mxu1 %vm5665_vm10, %v17007_v19  ;;  %13166 = vmatmul.msk.bf16.vlgmr.msrb.gmra.mxu3 %vm5665_vm10, %v17007_v19  ;;  %v17039_v1 = vpop.permute.xlu0 %7557 }
 0x6c4   :  { %7484 = vmatpush.bf16.msrb.mxu1 %v7466_v24  ;;  %7512 = vmatpush.bf16.msrb.mxu3 %v7472_v48  ;;  %v7670_v24 = vsel %vm5669_vm2, %v7662_v26, 0  ;;  %v7563_v51 = vsel %vm7559_vm15, %v17019_v38, %v17039_v1 }
 0x6c6   :  { %v6484_v63 = vpop.f32.mrf.mxu2  ;;  %v6496_v3 = vpop.f32.mrf.mxu3 }
 0x6c7   :  { %v6520_v55 = vadd.f32 %v6484_v63, %v6419_v57  ;;  %v6517_v0 = vadd.f32 %v6496_v3, %v6416_v45  ;;  %v7461_v57 = vsel %vm7457_vm12, %v16988_v53, %v17002_v30  ;;  %vm7763_vm12 = vcmask 515072  }
 0x6c8   :  { %v6409_v18 = vpop.f32.mrf.mxu0  ;;  %v6470_v43 = vpop.f32.mrf.mxu1  ;;  %v7475_v47 = vsel %vm5669_vm2, %v7461_v57, 0 }
 0x6c9   :  { %v6417_v34 = vadd.f32 %v6409_v18, %v6316_v6  ;;  %v6519_v10 = vadd.f32 %v6470_v43, %v6418_v22  ;;  %v17067_v6 = vor.u32 %v14261_v15, %v13182_v2  ;;  %v7663_v22 = vsel %vm7661_vm11, %v7654_v23, %v7656_v9  ;;  %v13202_v2 = vld [vmem:[%s18888_s2 + $0xa0] sm:$0xf]  ;;  %v14263_v15 = vld [vmem:[%s18888_s2 + $0xa0] sm:$0x30] }
 0x6ca   :  { %v7673_v53 = vsel %vm5669_vm2, %v7663_v22, 0  ;;  %v17129_v22 = vor.u32 %v14263_v15, %v13202_v2  ;;  %v14265_v2 = vld [vmem:[%s18888_s2 + $0xb0] sm:$0x30] }
 0x6cb   :  { %13157 = vmatmul.msk.bf16.vlgmr.msrb.gmra.mxu0 %vm5665_vm10, %v16974_v37  ;;  %13175 = vmatmul.msk.bf16.vlgmr.msrb.gmra.mxu2 %vm5665_vm10, %v17036_v5  ;;  %v7562_v37 = vsel %vm7559_vm15, %v7554_v54, %v17019_v38  ;;  %v17053_v11 = vpop.permute.xlu0 %7657  ;;  %v17073_v54 = vpop.permute.xlu1 %7659  ;;  %vm7865_vm15 = vcmask 506880  }
 0x6cc   :  { %7424 = vmatpush.bf16.msrb.mxu0 %v7373_v39  ;;  %7600 = vmatpush.bf16.msrb.mxu2 %v7571_v27  ;;  %v7574_v35 = vsel %vm5669_vm2, %v7562_v37, 0  ;;  %v7664_v28 = vsel %vm7661_vm11, %v7656_v9, %v17053_v11  ;;  %v7577_v27 = vsel %vm5669_vm2, %v7563_v51, 0  ;;  %v7665_v57 = vsel %vm7661_vm11, %v17053_v11, %v17073_v54 }
 0x6cd   :  { %v7676_v48 = vsel %vm5669_vm2, %v7664_v28, 0  ;;  %vm7967_vm11 = vcmask 498688  }
 0x6ce   :  { %v6498_v59 = vpop.f32.mrf.mxu3  ;;  %v6583_v16 = vpop.f32.mrf.mxu2 }
 0x6cf   :  { %v6521_v8 = vadd.f32 %v6498_v59, %v6420_v56  ;;  %v6617_v40 = vadd.f32 %v6583_v16, %v6516_v58 }
 0x6d0   :  { %v6411_v14 = vpop.f32.mrf.mxu0  ;;  %v6569_v52 = vpop.f32.mrf.mxu1 }
 0x6d1   :  { %v6421_v62 = vadd.f32 %v6411_v14, %v6320_v17  ;;  %v6616_v61 = vadd.f32 %v6569_v52, %v6515_v4  ;;  %v7758_v4 = vpop.permute.xlu2 %7757 }
 0x6d3   :  { %13174 = vmatmul.msk.bf16.vlgmr.msra.gmra.mxu1 %vm5665_vm10, %v17036_v5  ;;  %13176 = vmatmul.msk.bf16.vlgmr.msra.gmra.mxu3 %vm5665_vm10, %v17036_v5  ;;  %v7756_v30 = vpop.permute.xlu0 %7755  ;;  %v17093_v42 = vpop.permute.xlu1 %7759 }
 0x6d4   :  { %7586 = vmatpush.bf16.msra.mxu1 %v7568_v7  ;;  %7614 = vmatpush.bf16.msra.mxu3 %v7574_v35 }
 0x6d6   :  { %v6585_v60 = vpop.f32.mrf.mxu2  ;;  %v6597_v31 = vpop.f32.mrf.mxu3 }
 0x6d7   :  { %v6621_v45 = vadd.f32 %v6585_v60, %v6520_v55  ;;  %v6618_v20 = vadd.f32 %v6597_v31, %v6517_v0 }
 0x6d8   :  { %v6510_v44 = vpop.f32.mrf.mxu0  ;;  %v6571_v25 = vpop.f32.mrf.mxu1 }
 0x6d9   :  { %v6518_v32 = vadd.f32 %v6510_v44, %v6417_v34  ;;  %v6620_v33 = vadd.f32 %v6571_v25, %v6519_v10  ;;  %v7765_v34 = vsel %vm7763_vm12, %v7756_v30, %v7758_v4  ;;  %v17104_v59 = vpop.permute.xlu2 %7761 }
 0x6da   :  { %v7775_v38 = vsel %vm5669_vm2, %v7765_v34, 0  ;;  %v7767_v51 = vsel %vm7763_vm12, %v17093_v42, %v17104_v59 }
 0x6db   :  { %13167 = vmatmul.msk.bf16.vlgmr.msra.gmra.mxu0 %vm5665_vm10, %v17007_v19  ;;  %13185 = vmatmul.msk.bf16.vlgmr.msra.gmra.mxu2 %vm5665_vm10, %v17067_v6  ;;  %v7754_v23 = vpop.permute.xlu0 %7753 }
 0x6dc   :  { %7526 = vmatpush.bf16.msra.mxu0 %v7475_v47  ;;  %7702 = vmatpush.bf16.msra.mxu2 %v7673_v53  ;;  %v7764_v36 = vsel %vm7763_vm12, %v7754_v23, %v7756_v30  ;;  %v7679_v53 = vsel %vm5669_vm2, %v7665_v57, 0 }
 0x6dd   :  { %v7772_v9 = vsel %vm5669_vm2, %v7764_v36, 0 }
 0x6de   :  { %v6599_v12 = vpop.f32.mrf.mxu3  ;;  %v6685_v41 = vpop.f32.mrf.mxu2 }
 0x6df   :  { %v6622_v56 = vadd.f32 %v6599_v12, %v6521_v8  ;;  %v6719_v58 = vadd.f32 %v6685_v41, %v6617_v40 }
 0x6e0   :  { %v6512_v50 = vpop.f32.mrf.mxu0  ;;  %v6671_v19 = vpop.f32.mrf.mxu1 }
 0x6e1   :  { %v6522_v46 = vadd.f32 %v6512_v50, %v6421_v62  ;;  %v6718_v17 = vadd.f32 %v6671_v19, %v6616_v61  ;;  %v7858_v61 = vpop.permute.xlu1 %7857  ;;  %v17124_v21 = vpop.permute.xlu2 %7861 }
 0x6e3   :  { %13184 = vmatmul.msk.bf16.vlgmr.msrb.gmra.mxu1 %vm5665_vm10, %v17067_v6  ;;  %13186 = vmatmul.msk.bf16.vlgmr.msrb.gmra.mxu3 %vm5665_vm10, %v17067_v6  ;;  %v7860_v7 = vpop.permute.xlu0 %7859 }
 0x6e4   :  { %7688 = vmatpush.bf16.msrb.mxu1 %v7670_v24  ;;  %7716 = vmatpush.bf16.msrb.mxu3 %v7676_v48  ;;  %v7868_v19 = vsel %vm7865_vm15, %v7860_v7, %v17124_v21  ;;  %v13212_v48 = vld [vmem:[%s18888_s2 + $0xa8] sm:$0xf] }
 0x6e5   :  { %v7880_v24 = vsel %vm5669_vm2, %v7868_v19, 0  ;;  %v17160_v34 = vor.u32 %v14264_v49, %v13212_v48 }
 0x6e6   :  { %v6687_v63 = vpop.f32.mrf.mxu2  ;;  %v6699_v3 = vpop.f32.mrf.mxu3 }
 0x6e7   :  { %v6723_v55 = vadd.f32 %v6687_v63, %v6621_v45  ;;  %v6720_v0 = vadd.f32 %v6699_v3, %v6618_v20 }
 0x6e8   :  { %v6611_v18 = vpop.f32.mrf.mxu0  ;;  %v6673_v43 = vpop.f32.mrf.mxu1 }
 0x6e9   :  { %v6619_v10 = vadd.f32 %v6611_v18, %v6518_v32  ;;  %v6722_v39 = vadd.f32 %v6673_v43, %v6620_v33  ;;  %v7867_v32 = vsel %vm7865_vm15, %v7858_v61, %v7860_v7  ;;  %v7856_v30 = vpop.permute.xlu1 %7855 }
 0x6ea   :  { %v7877_v11 = vsel %vm5669_vm2, %v7867_v32, 0  ;;  %v7866_v26 = vsel %vm7865_vm15, %v7856_v30, %v7858_v61 }
 0x6eb   :  { %13177 = vmatmul.msk.bf16.vlgmr.msrb.gmra.mxu0 %vm5665_vm10, %v17036_v5  ;;  %13195 = vmatmul.msk.bf16.vlgmr.msrb.gmra.mxu2 %vm5665_vm10, %v17098_v29  ;;  %v7766_v5 = vsel %vm7763_vm12, %v7758_v4, %v17093_v42  ;;  %v17138_v54 = vpop.permute.xlu0 %7863  ;;  %v7874_v4 = vsel %vm5669_vm2, %v7866_v26, 0  ;;  %vm8069_vm12 = vcmask 490496  }
 0x6ec   :  { %7628 = vmatpush.bf16.msrb.mxu0 %v7577_v27  ;;  %7804 = vmatpush.bf16.msrb.mxu2 %v7775_v38  ;;  %v7778_v35 = vsel %vm5669_vm2, %v7766_v5, 0  ;;  %v7781_v38 = vsel %vm5669_vm2, %v7767_v51, 0  ;;  %v7869_v57 = vsel %vm7865_vm15, %v17124_v21, %v17138_v54 }
 0x6ee   :  { %v6701_v1 = vpop.f32.mrf.mxu3  ;;  %v6787_v16 = vpop.f32.mrf.mxu2 }
 0x6ef   :  { %v6724_v8 = vadd.f32 %v6701_v1, %v6622_v56  ;;  %v6821_v40 = vadd.f32 %v6787_v16, %v6719_v58 }
 0x6f0   :  { %v6613_v14 = vpop.f32.mrf.mxu0  ;;  %v6773_v52 = vpop.f32.mrf.mxu1 }
 0x6f1   :  { %v6623_v37 = vadd.f32 %v6613_v14, %v6522_v46  ;;  %v6820_v62 = vadd.f32 %v6773_v52, %v6718_v17  ;;  %v7960_v17 = vpop.permute.xlu2 %7959  ;;  %v7962_v13 = vpop.permute.xlu1 %7961 }
 0x6f3   :  { %13194 = vmatmul.msk.bf16.vlgmr.msra.gmra.mxu1 %vm5665_vm10, %v17098_v29  ;;  %13196 = vmatmul.msk.bf16.vlgmr.msra.gmra.mxu3 %vm5665_vm10, %v17098_v29 }
 0x6f4   :  { %7790 = vmatpush.bf16.msra.mxu1 %v7772_v9  ;;  %7818 = vmatpush.bf16.msra.mxu3 %v7778_v35  ;;  %v13222_v35 = vld [vmem:[%s18888_s2 + $0xb0] sm:$0xf] }
 0x6f6   :  { %v6789_v60 = vpop.f32.mrf.mxu2  ;;  %v6801_v31 = vpop.f32.mrf.mxu3 }
 0x6f7   :  { %v6825_v45 = vadd.f32 %v6789_v60, %v6723_v55  ;;  %v6822_v20 = vadd.f32 %v6801_v31, %v6720_v0 }
 0x6f8   :  { %v6713_v44 = vpop.f32.mrf.mxu0  ;;  %v6775_v25 = vpop.f32.mrf.mxu1 }
 0x6f9   :  { %v6721_v33 = vadd.f32 %v6713_v44, %v6619_v10  ;;  %v6824_v47 = vadd.f32 %v6775_v25, %v6722_v39  ;;  %v7969_v10 = vsel %vm7967_vm11, %v7960_v17, %v7962_v13  ;;  %v17163_v39 = vpop.permute.xlu0 %7963  ;;  %v7958_v42 = vpop.permute.xlu2 %7957  ;;  %v13223_v25 = vor.u32 %v14265_v2, %v13222_v35 }
 0x6fa   :  { %v7979_v59 = vsel %vm5669_vm2, %v7969_v10, 0  ;;  %v7968_v36 = vsel %vm7967_vm11, %v7958_v42, %v7960_v17  ;;  %v7966_v9 = vpop.permute.xlu1 %7965 }
 0x6fb   :  { %13187 = vmatmul.msk.bf16.vlgmr.msra.gmra.mxu0 %vm5665_vm10, %v17067_v6  ;;  %13205 = vmatmul.msk.bf16.vlgmr.msra.gmra.mxu2 %vm5665_vm10, %v17129_v22 }
 0x6fc   :  { %7730 = vmatpush.bf16.msra.mxu0 %v7679_v53  ;;  %7906 = vmatpush.bf16.msra.mxu2 %v7877_v11 }
 0x6fe   :  { %v6803_v12 = vpop.f32.mrf.mxu3  ;;  %v6889_v41 = vpop.f32.mrf.mxu2 }
 0x6ff   :  { %v6826_v56 = vadd.f32 %v6803_v12, %v6724_v8  ;;  %v6923_v58 = vadd.f32 %v6889_v41, %v6821_v40 }
 0x700   :  { %v6715_v50 = vpop.f32.mrf.mxu0  ;;  %v6875_v6 = vpop.f32.mrf.mxu1 }
 0x701   :  { %v6725_v28 = vadd.f32 %v6715_v50, %v6623_v37  ;;  %v6922_v46 = vadd.f32 %v6875_v6, %v6820_v62  ;;  %v7976_v62 = vsel %vm5669_vm2, %v7968_v36, 0  ;;  %v8062_v61 = vpop.permute.xlu0 %8061  ;;  %v8064_v15 = vpop.permute.xlu2 %8063 }
 0x702   :  { %v8071_v32 = vsel %vm8069_vm12, %v8062_v61, %v8064_v15  ;;  %v8066_v30 = vpop.permute.xlu1 %8065 }
 0x703   :  { %13204 = vmatmul.msk.bf16.vlgmr.msrb.gmra.mxu1 %vm5665_vm10, %v17129_v22  ;;  %13206 = vmatmul.msk.bf16.vlgmr.msrb.gmra.mxu3 %vm5665_vm10, %v17129_v22  ;;  %v8081_v53 = vsel %vm5669_vm2, %v8071_v32, 0 }
 0x704   :  { %7892 = vmatpush.bf16.msrb.mxu1 %v7874_v4  ;;  %7920 = vmatpush.bf16.msrb.mxu3 %v7880_v24  ;;  %v7971_v24 = vsel %vm7967_vm11, %v17163_v39, %v7966_v9 }
 0x705   :  { %v7985_v51 = vsel %vm5669_vm2, %v7971_v24, 0 }
 0x706   :  { %v6891_v63 = vpop.f32.mrf.mxu2  ;;  %v6903_v3 = vpop.f32.mrf.mxu3 }
 0x707   :  { %v17158_v55 = vadd.f32 %v6891_v63, %v6825_v45  ;;  %v6924_v0 = vadd.f32 %v6903_v3, %v6822_v20 }
 0x708   :  { %v6815_v18 = vpop.f32.mrf.mxu0  ;;  %v6877_v43 = vpop.f32.mrf.mxu1 }
 0x709   :  { %v6823_v23 = vadd.f32 %v6815_v18, %v6721_v33  ;;  %v17165_v27 = vadd.f32 %v6877_v43, %v6824_v47  ;;  %v7883_v47 = vsel %vm5669_vm2, %v7869_v57, 0  ;;  %v8060_v21 = vpop.permute.xlu0 %8059  ;;  %v8068_v42 = vpop.permute.xlu2 %8067 }
 0x70a   :  { %v8070_v12 = vsel %vm8069_vm12, %v8060_v21, %v8062_v61 }
 0x70b   :  { %13197 = vmatmul.msk.bf16.vlgmr.msrb.gmra.mxu0 %vm5665_vm10, %v17098_v29  ;;  %13215 = vmatmul.msk.bf16.vlgmr.msrb.gmra.mxu2 %vm5665_vm10, %v17160_v34  ;;  %v7970_v29 = vsel %vm7967_vm11, %v7962_v13, %v17163_v39  ;;  %v8078_v6 = vsel %vm5669_vm2, %v8070_v12, 0 }
 0x70c   :  { %7832 = vmatpush.bf16.msrb.mxu0 %v7781_v38  ;;  %8008 = vmatpush.bf16.msrb.mxu2 %v7979_v59  ;;  %v7982_v7 = vsel %vm5669_vm2, %v7970_v29, 0  ;;  %v14267_v38 = vld [vmem:[%s18888_s2 + $0xc0] sm:$0x30] }
 0x70e   :  { %v6905_v1 = vpop.f32.mrf.mxu3  ;;  %v6991_v16 = vpop.f32.mrf.mxu2 }
 0x70f   :  { %v17174_v8 = vadd.f32 %v6905_v1, %v6826_v56  ;;  %v7025_v40 = vadd.f32 %v6991_v16, %v6923_v58  ;;  %v8072_v58 = vsel %vm8069_vm12, %v8064_v15, %v8066_v30  ;;  %v8073_v16 = vsel %vm8069_vm12, %v8066_v30, %v8068_v42 }
 0x710   :  { %v6817_v14 = vpop.f32.mrf.mxu0  ;;  %v6977_v52 = vpop.f32.mrf.mxu1  ;;  %v8084_v19 = vsel %vm5669_vm2, %v8072_v58, 0 }
 0x711   :  { %v6827_v5 = vadd.f32 %v6817_v14, %v6725_v28  ;;  %v7024_v37 = vadd.f32 %v6977_v52, %v6922_v46  ;;  %v13232_v28 = vld [vmem:[%s18888_s2 + $0xb8] sm:$0xf]  ;;  %v14266_v46 = vld [vmem:[%s18888_s2 + $0xb8] sm:$0x30] }
 0x712   :  { %v13233_v63 = vor.u32 %v14266_v46, %v13232_v28 }
 0x713   :  { %13214 = vmatmul.msk.bf16.vlgmr.msra.gmra.mxu1 %vm5665_vm10, %v17160_v34  ;;  %13216 = vmatmul.msk.bf16.vlgmr.msra.gmra.mxu3 %vm5665_vm10, %v17160_v34 }
 0x714   :  { %7994 = vmatpush.bf16.msra.mxu1 %v7976_v62  ;;  %8022 = vmatpush.bf16.msra.mxu3 %v7982_v7 }
 0x716   :  { %v17190_v60 = vpop.f32.mrf.mxu2  ;;  %v7005_v31 = vpop.f32.mrf.mxu3 }
 0x717   :  { %v7026_v45 = vadd.f32 %v7005_v31, %v6924_v0 }
 0x718   :  { %v6917_v20 = vpop.f32.mrf.mxu0  ;;  %v17195_v44 = vpop.f32.mrf.mxu1 }
 0x719   :  { %v6925_v33 = vadd.f32 %v6917_v20, %v6823_v23 }
 0x71b   :  { %13207 = vmatmul.msk.bf16.vlgmr.msra.gmra.mxu0 %vm5665_vm10, %v17129_v22  ;;  %13225 = vmatmul.msk.bf16.vlgmr.msra.gmra.mxu2 %vm5665_vm10, %v13223_v25 }
 0x71c   :  { %7934 = vmatpush.bf16.msra.mxu0 %v7883_v47  ;;  %8110 = vmatpush.bf16.msra.mxu2 %v8081_v53 }
 0x71e   :  { %v17203_v11 = vpop.f32.mrf.mxu3  ;;  %v7092_v54 = vpop.f32.mrf.mxu2 }
 0x71f   :  { %v7126_v41 = vadd.f32 %v7092_v54, %v7025_v40 }
 0x720   :  { %v6919_v26 = vpop.f32.mrf.mxu0  ;;  %v7078_v56 = vpop.f32.mrf.mxu1 }
 0x721   :  { %v17207_v50 = vadd.f32 %v6919_v26, %v6827_v5  ;;  %v7125_v22 = vadd.f32 %v7078_v56, %v7024_v37  ;;  %v8087_v5 = vsel %vm5669_vm2, %v8073_v16, 0 }
 0x723   :  { %13224 = vmatmul.msk.bf16.vlgmr.msrb.gmra.mxu1 %vm5665_vm10, %v13223_v25  ;;  %13226 = vmatmul.msk.bf16.vlgmr.msrb.gmra.mxu3 %vm5665_vm10, %v13223_v25 }
 0x724   :  { %8096 = vmatpush.bf16.msrb.mxu1 %v8078_v6  ;;  %8124 = vmatpush.bf16.msrb.mxu3 %v8084_v19 }
 0x726   :  { %v17219_v17 = vpop.f32.mrf.mxu2  ;;  %v7106_v4 = vpop.f32.mrf.mxu3 }
 0x727   :  { %v7127_v48 = vadd.f32 %v7106_v4, %v7026_v45 }
 0x728   :  { %v7019_v49 = vpop.f32.mrf.mxu0  ;;  %v17223_v13 = vpop.f32.mrf.mxu1 }
 0x729   :  { %v7027_v3 = vadd.f32 %v7019_v49, %v6925_v33 }
 0x72b   :  { %13217 = vmatmul.msk.bf16.vlgmr.msrb.gmra.mxu0 %vm5665_vm10, %v17160_v34  ;;  %13235 = vmatmul.msk.bf16.vlgmr.msrb.gmra.mxu2 %vm5665_vm10, %v13233_v63  ;;  %v13242_v34 = vld [vmem:[%s18888_s2 + $0xc0] sm:$0xf]  ;;  %s18911_s2 = sld [smem:[#allocation26_spill]] }
 0x72c   :  { %8036 = vmatpush.bf16.msrb.mxu0 %v7985_v51  ;;  %v13243_v52 = vor.u32 %v14267_v38, %v13242_v34 }
 0x72e   :  { %v17229_v0 = vpop.f32.mrf.mxu3  ;;  %v7194_v18 = vpop.f32.mrf.mxu2 }
 0x72f   :  { %v7228_v43 = vadd.f32 %v7194_v18, %v7126_v41 }
 0x730   :  { %v17231_v10 = vpop.f32.mrf.mxu0  ;;  %v7180_v39 = vpop.f32.mrf.mxu1 }
 0x731   :  { %v7227_v23 = vadd.f32 %v7180_v39, %v7125_v22 }
 0x733   :  { %13234 = vmatmul.msk.bf16.vlgmr.msra.gmra.mxu1 %vm5665_vm10, %v13233_v63  ;;  %13236 = vmatmul.msk.bf16.vlgmr.msra.gmra.mxu3 %vm5665_vm10, %v13233_v63 }
 0x736   :  { %v17241_v59 = vpop.f32.mrf.mxu2  ;;  %v7208_v1 = vpop.f32.mrf.mxu3 }
 0x737   :  { %v7229_v36 = vadd.f32 %v7208_v1, %v7127_v48 }
 0x738   :  { %v7120_v40 = vpop.f32.mrf.mxu0  ;;  %v17244_v14 = vpop.f32.mrf.mxu1 }
 0x739   :  { %v7128_v29 = vadd.f32 %v7120_v40, %v7027_v3 }
 0x73b   :  { %13227 = vmatmul.msk.bf16.vlgmr.msra.gmra.mxu0 %vm5665_vm10, %v13223_v25  ;;  %13245 = vmatmul.msk.bf16.vlgmr.msra.gmra.mxu2 %vm5665_vm10, %v13243_v52 }
 0x73c   :  { %8138 = vmatpush.bf16.msra.mxu0 %v8087_v5 }
 0x73e   :  { %v17249_v37 = vpop.f32.mrf.mxu3  ;;  %v7296_v62 = vpop.f32.mrf.mxu2 }
 0x73f   :  { %v7330_v61 = vadd.f32 %v7296_v62, %v7228_v43 }
 0x740   :  { %v17251_v9 = vpop.f32.mrf.mxu0  ;;  %v7282_v7 = vpop.f32.mrf.mxu1 }
 0x741   :  { %v7329_v35 = vadd.f32 %v7282_v7, %v7227_v23 }
 0x743   :  { %13244 = vmatmul.msk.bf16.vlgmr.msrb.gmra.mxu1 %vm5665_vm10, %v13243_v52  ;;  %13246 = vmatmul.msk.bf16.vlgmr.msrb.gmra.mxu3 %vm5665_vm10, %v13243_v52 }
 0x746   :  { %v17255_v2 = vpop.f32.mrf.mxu2  ;;  %v7310_v15 = vpop.f32.mrf.mxu3 }
 0x747   :  { %v7331_v31 = vadd.f32 %v7310_v15, %v7229_v36 }
 0x748   :  { %v7222_v57 = vpop.f32.mrf.mxu0  ;;  %v17257_v45 = vpop.f32.mrf.mxu1 }
 0x749   :  { %v7230_v20 = vadd.f32 %v7222_v57, %v7128_v29 }
 0x74b   :  { %13237 = vmatmul.msk.bf16.vlgmr.msrb.gmra.mxu0 %vm5665_vm10, %v13233_v63 }
 0x74e   :  { %v17260_v25 = vpop.f32.mrf.mxu3  ;;  %v7398_v32 = vpop.f32.mrf.mxu2 }
 0x74f   :  { %v7432_v33 = vadd.f32 %v7398_v32, %v7330_v61 }
 0x750   :  { %v17262_v47 = vpop.f32.mrf.mxu0  ;;  %v7384_v53 = vpop.f32.mrf.mxu1 }
 0x751   :  { %v7431_v21 = vadd.f32 %v7384_v53, %v7329_v35 }
 0x756   :  { %v17264_v30 = vpop.f32.mrf.mxu2  ;;  %v7412_v54 = vpop.f32.mrf.mxu3 }
 0x757   :  { %v7433_v12 = vadd.f32 %v7412_v54, %v7331_v31 }
 0x758   :  { %v7324_v41 = vpop.f32.mrf.mxu0  ;;  %v17266_v26 = vpop.f32.mrf.mxu1 }
 0x759   :  { %v7332_v56 = vadd.f32 %v7324_v41, %v7230_v20 }
 0x75b   :  { %13247 = vmatmul.msk.bf16.vlgmr.msra.gmra.mxu0 %vm5665_vm10, %v13243_v52 }
 0x75e   :  { %v17269_v58 = vpop.f32.mrf.mxu3  ;;  %v7500_v22 = vpop.f32.mrf.mxu2 }
 0x75f   :  { %v7534_v6 = vadd.f32 %v7500_v22, %v7432_v33 }
 0x760   :  { %v17271_v19 = vpop.f32.mrf.mxu0  ;;  %v7486_v28 = vpop.f32.mrf.mxu1 }
 0x761   :  { %v7533_v46 = vadd.f32 %v7486_v28, %v7431_v21 }
 0x766   :  { %v17273_v4 = vpop.f32.mrf.mxu2  ;;  %v7514_v24 = vpop.f32.mrf.mxu3 }
 0x767   :  { %v7535_v48 = vadd.f32 %v7514_v24, %v7433_v12 }
 0x768   :  { %v7426_v49 = vpop.f32.mrf.mxu0  ;;  %v17275_v63 = vpop.f32.mrf.mxu1 }
 0x769   :  { %v7434_v3 = vadd.f32 %v7426_v49, %v7332_v56 }
 0x76e   :  { %v17277_v51 = vpop.f32.mrf.mxu3  ;;  %v7602_v18 = vpop.f32.mrf.mxu2 }
 0x76f   :  { %v17279_v43 = vadd.f32 %v7602_v18, %v7534_v6 }
 0x770   :  { %v17281_v39 = vpop.f32.mrf.mxu0  ;;  %v7588_v23 = vpop.f32.mrf.mxu1 }
 0x771   :  { %18891 = vst [vmem:[#allocation5_spill] sm:$0xff] %v17281_v39  ;;  %v7635_v34 = vadd.f32 %v7588_v23, %v7533_v46 }
 0x776   :  { %v17283_v38 = vpop.f32.mrf.mxu2  ;;  %v7616_v42 = vpop.f32.mrf.mxu3 }
 0x777   :  { %v7637_v1 = vadd.f32 %v7616_v42, %v7535_v48 }
 0x778   :  { %v7528_v16 = vpop.f32.mrf.mxu0  ;;  %v7590_v36 = vpop.f32.mrf.mxu1 }
 0x779   :  { %v7536_v40 = vadd.f32 %v7528_v16, %v7434_v3 }
 0x77e   :  { %v17285_v52 = vpop.f32.mrf.mxu3  ;;  %v7704_v29 = vpop.f32.mrf.mxu2 }
 0x780   :  { %v17287_v5 = vpop.f32.mrf.mxu0  ;;  %v7690_v62 = vpop.f32.mrf.mxu1 }
 0x781   :  { %18892 = vst [vmem:[#allocation6_spill] sm:$0xff] %v17287_v5 }
 0x786   :  { %v17289_v61 = vpop.f32.mrf.mxu2  ;;  %v7718_v7 = vpop.f32.mrf.mxu3 }
 0x788   :  { %v7630_v35 = vpop.f32.mrf.mxu0  ;;  %v7692_v15 = vpop.f32.mrf.mxu1 }
 0x789   :  { %v17291_v31 = vadd.f32 %v7630_v35, %v7536_v40  ;;  %v7028_v35 = vadd.f32 %v17195_v44, %v17165_v27 }
 0x78b   :  { %v7129_v5 = vadd.f32 %v17223_v13, %v7028_v35  ;;  %v7737_v13 = vadd.f32 %v7690_v62, %v7635_v34 }
 0x78e   :  { %v17293_v57 = vpop.f32.mrf.mxu3  ;;  %v7806_v20 = vpop.f32.mrf.mxu2 }
 0x790   :  { %v17295_v32 = vpop.f32.mrf.mxu0  ;;  %v7792_v33 = vpop.f32.mrf.mxu1 }
 0x791   :  { %18893 = vst [vmem:[#allocation7_spill] sm:$0xff] %v17295_v32  ;;  %v7029_v32 = vadd.f32 %v17190_v60, %v17158_v55 }
 0x796   :  { %v17297_v53 = vpop.f32.mrf.mxu2  ;;  %v7820_v21 = vpop.f32.mrf.mxu3 }
 0x798   :  { %v17299_v54 = vpop.f32.mrf.mxu0  ;;  %v7794_v12 = vpop.f32.mrf.mxu1 }
 0x79e   :  { %v17301_v41 = vpop.f32.mrf.mxu3  ;;  %v7908_v56 = vpop.f32.mrf.mxu2 }
 0x7a0   :  { %v17303_v22 = vpop.f32.mrf.mxu0  ;;  %v7894_v6 = vpop.f32.mrf.mxu1 }
 0x7a1   :  { %18894 = vst [vmem:[#allocation8_spill] sm:$0xff] %v17303_v22 }
 0x7a6   :  { %v7922_v28 = vpop.f32.mrf.mxu3  ;;  %v17307_v48 = vpop.f32.mrf.mxu2 }
 0x7a8   :  { %v17305_v46 = vpop.f32.mrf.mxu0  ;;  %v7896_v24 = vpop.f32.mrf.mxu1 }
 0x7a9   :  { %18895 = vst [vmem:[#allocation9_spill] sm:$0xff] %v17305_v46  ;;  %v7030_v46 = vadd.f32 %v17203_v11, %v17174_v8 }
 0x7ab   :  { %v7131_v27 = vadd.f32 %v17229_v0, %v7030_v46 }
 0x7ad   :  { %v7233_v55 = vadd.f32 %v17249_v37, %v7131_v27  ;;  %v7031_v37 = vadd.f32 %v17231_v10, %v17207_v50 }
 0x7ae   :  { %v17309_v49 = vpop.f32.mrf.mxu3  ;;  %v8010_v23 = vpop.f32.mrf.mxu2 }
 0x7af   :  { %18896 = vst [vmem:[#allocation10_spill] sm:$0xff] %v17309_v49  ;;  %v7130_v49 = vadd.f32 %v17219_v17, %v7029_v32  ;;  %v7335_v11 = vadd.f32 %v17260_v25, %v7233_v55  ;;  %v7739_v32 = vadd.f32 %v7718_v7, %v7637_v1 }
 0x7b0   :  { %v17311_v3 = vpop.f32.mrf.mxu0  ;;  %v7996_v18 = vpop.f32.mrf.mxu1  ;;  %v18903_v27 = vld [vmem:[#allocation9_spill] sm:$0xff] }
 0x7b1   :  { %18897 = vst [vmem:[#allocation11_spill] sm:$0xff] %v17311_v3  ;;  %v7232_v44 = vadd.f32 %v17241_v59, %v7130_v49  ;;  %v7437_v0 = vadd.f32 %v17269_v58, %v7335_v11  ;;  %v7738_v59 = vadd.f32 %v7704_v29, %v17279_v43  ;;  %v7132_v58 = vadd.f32 %v17251_v9, %v7031_v37  ;;  %v18907_v37 = vld [vmem:[#allocation7_spill] sm:$0xff] }
 0x7b3   :  { %v7334_v60 = vadd.f32 %v17255_v2, %v7232_v44  ;;  %v7539_v62 = vadd.f32 %v17277_v51, %v7437_v0  ;;  %v7234_v10 = vadd.f32 %v17262_v47, %v7132_v58  ;;  %v17357_v47 = vld [vmem:[%s18900_s10] sm:$0xf]  ;;  %v8163_v0 = vpop.permute.xlu1 %8162  ;;  %s18823_s10 = smov 118  }
 0x7b5   :  { %v7641_v29 = vadd.f32 %v17285_v52, %v7539_v62 }
 0x7b6   :  { %v8024_v42 = vpop.f32.mrf.mxu3  ;;  %v17317_v22 = vpop.f32.mrf.mxu2 }
 0x7b7   :  { %18899 = vst [vmem:[#allocation13_spill] sm:$0xff] %v17317_v22  ;;  %v7743_v51 = vadd.f32 %v17293_v57, %v7641_v29  ;;  %v7740_v57 = vadd.f32 %v17299_v54, %v17291_v31 }
 0x7b8   :  { %v17313_v16 = vpop.f32.mrf.mxu0  ;;  %v7998_v40 = vpop.f32.mrf.mxu1 }
 0x7b9   :  { %18898 = vst [vmem:[#allocation12_spill] sm:$0xff] %v17313_v16  ;;  %v7231_v16 = vadd.f32 %v17244_v14, %v7129_v5  ;;  %v7436_v14 = vadd.f32 %v17264_v30, %v7334_v60  ;;  %v7840_v30 = vadd.f32 %v7806_v20, %v7738_v59  ;;  %v7845_v52 = vadd.f32 %v17301_v41, %v7743_v51 }
 0x7ba   :  { %v7842_v44 = vadd.f32 %v18903_v27, %v7740_v57 }
 0x7bb   :  { %v7333_v22 = vadd.f32 %v17257_v45, %v7231_v16  ;;  %v7839_v45 = vadd.f32 %v7792_v33, %v7737_v13  ;;  %v7538_v2 = vadd.f32 %v17273_v4, %v7436_v14  ;;  %v7942_v7 = vadd.f32 %v7908_v56, %v7840_v30  ;;  %v8158_v56 = vpop.permute.xlu0 %8157  ;;  %v18908_v30 = vld [vmem:[#allocation8_spill] sm:$0xff] }
 0x7bc   :  { %v8175_v16 = vperm.slane %v17357_v47, 0  ;;  %v8177_v13 = vperm.slane %v17357_v47, 2 }
 0x7bd   :  { %v7435_v8 = vadd.f32 %v17266_v26, %v7333_v22  ;;  %v7841_v22 = vadd.f32 %v7820_v21, %v7739_v32  ;;  %v7640_v43 = vadd.f32 %v17283_v38, %v7538_v2  ;;  %v8044_v20 = vadd.f32 %v8010_v23, %v7942_v7  ;;  %v18902_v23 = vld [vmem:[#allocation10_spill] sm:$0xff] }
 0x7be   :  { %v17324_v3 = vpop.f32.mrf.mxu3  ;;  %v8112_v46 = vpop.f32.mrf.mxu2  ;;  %v7336_v38 = vadd.f32 %v17271_v19, %v7234_v10  ;;  %v7947_v41 = vadd.f32 %v18902_v23, %v7845_v52  ;;  %v18904_v55 = vld [vmem:[#allocation13_spill] sm:$0xff]  ;;  %v8178_v7 = vperm.slane %v17357_v47, 3 }
 0x7bf   :  { %v7537_v5 = vadd.f32 %v17275_v63, %v7435_v8  ;;  %v7941_v63 = vadd.f32 %v7894_v6, %v7839_v45  ;;  %v7943_v33 = vadd.f32 %v7922_v28, %v7841_v22  ;;  %v7742_v4 = vadd.f32 %v17289_v61, %v7640_v43 }
 0x7c0   :  { %v17328_v39 = vpop.f32.mrf.mxu0  ;;  %v8098_v17 = vpop.f32.mrf.mxu1  ;;  %v8176_v8 = vperm.slane %v17357_v47, 1  ;;  %v18906_v59 = vld [vmem:[#allocation12_spill] sm:$0xff] }
 0x7c1   :  { %v7639_v26 = vadd.f32 %v7590_v36, %v7537_v5  ;;  %v8043_v50 = vadd.f32 %v7996_v18, %v7941_v63  ;;  %v8045_v21 = vadd.f32 %v8024_v42, %v7943_v33  ;;  %v7844_v9 = vadd.f32 %v17297_v53, %v7742_v4  ;;  %v18901_v18 = vld [vmem:[#allocation5_spill] sm:$0xff]  ;;  %v18909_v33 = vld [vmem:[#allocation11_spill] sm:$0xff] }
 0x7c2   :  { %v7438_v19 = vadd.f32 %v18901_v18, %v7336_v38  ;;  %v7944_v32 = vadd.f32 %v18906_v59, %v7842_v44  ;;  %v8293_v59 = vld [vmem:[%s18911_s2] sm:$0xff] }
 0x7c3   :  { %v7741_v1 = vadd.f32 %v7692_v15, %v7639_v26  ;;  %v8145_v6 = vadd.f32 %v8098_v17, %v8043_v50  ;;  %v8146_v15 = vadd.f32 %v8112_v46, %v8044_v20  ;;  %v7946_v28 = vadd.f32 %v17307_v48, %v7844_v9  ;;  %v18905_v17 = vld [vmem:[#allocation6_spill] sm:$0xff] }
 0x7c4   :  { %v8049_v48 = vadd.f32 %v17324_v3, %v7947_v41  ;;  %v7540_v14 = vadd.f32 %v18905_v17, %v7438_v19 }
 0x7c5   :  { %v7843_v36 = vadd.f32 %v7794_v12, %v7741_v1  ;;  %v17364_v42 = vadd.f32 %v8158_v56, %v8145_v6  ;;  %v8048_v60 = vadd.f32 %v18904_v55, %v7946_v28 }
 0x7c6   :  { %v8126_v25 = vpop.f32.mrf.mxu3  ;;  %v8114_v35 = vpop.f32.mrf.mxu2  ;;  %v7642_v2 = vadd.f32 %v18907_v37, %v7540_v14  ;;  %v8274_v14 = vld [vmem:[%s18910_s6 + $0x8] sm:$0xf] }
 0x7c7   :  { %v7945_v49 = vadd.f32 %v7896_v24, %v7843_v36  ;;  %v8147_v61 = vadd.f32 %v8126_v25, %v8045_v21  ;;  %v8150_v5 = vadd.f32 %v8114_v35, %v8048_v60  ;;  %v8183_v45 = vmul.f32 %v8175_v16, %v17364_v42 }
 0x7c8   :  { %v8038_v34 = vpop.f32.mrf.mxu0  ;;  %v8100_v12 = vpop.f32.mrf.mxu1  ;;  %v7744_v22 = vadd.f32 %v18908_v30, %v7642_v2 }
 0x7c9   :  { %v8047_v53 = vadd.f32 %v7998_v40, %v7945_v49  ;;  %v17371_v40 = vadd.f32 %v8158_v56, %v8146_v15  ;;  %v17373_v11 = vadd.f32 %v8158_v56, %v8147_v61  ;;  %v8046_v62 = vadd.f32 %v8038_v34, %v7944_v32 }
 0x7ca   :  { %v17385_v63 = vadd.f32 %v8163_v0, %v8150_v5  ;;  %v8207_v43 = vmul.f32 %v8183_v45, %v8183_v45  ;;  %v7846_v50 = vadd.f32 %v18909_v33, %v7744_v22  ;;  %v8294_v5 = vld [vmem:[%s18911_s2 + $0x8] sm:$0xf]  ;;  %s18829_s2 = smov 120  }
 0x7cb   :  { %v8149_v31 = vadd.f32 %v8100_v12, %v8047_v53  ;;  %v8184_v3 = vmul.f32 %v8176_v8, %v17371_v40  ;;  %v8185_v25 = vmul.f32 %v8177_v13, %v17373_v11 }
 0x7cc   :  { %v7948_v34 = vadd.f32 %v17328_v39, %v7846_v50  ;;  %v8188_v21 = vmul.f32 %v8176_v8, %v17385_v63 }
 0x7cd   :  { %v17380_v26 = vadd.f32 %v8163_v0, %v8149_v31  ;;  %v8208_v4 = vmul.f32 %v8184_v3, %v8184_v3  ;;  %v8191_v36 = vadd.f32 %v8184_v3, %v8183_v45  ;;  %v8209_v51 = vmul.f32 %v8185_v25, %v8185_v25 }
 0x7ce   :  { %v8128_v54 = vpop.f32.mrf.mxu3  ;;  %v8212_v57 = vmul.f32 %v8188_v21, %v8188_v21  ;;  %v8197_v19 = vsel %vm18818_vm1, %v8188_v21, 0.0 }
 0x7cf   :  { %v8151_v46 = vadd.f32 %v8128_v54, %v8049_v48  ;;  %v8187_v10 = vmul.f32 %v8175_v16, %v17380_v26  ;;  %v8192_v49 = vadd.f32 %v8191_v36, %v8185_v25  ;;  %v8215_v38 = vadd.f32 %v8208_v4, %v8207_v43 }
 0x7d0   :  { %v8040_v24 = vpop.f32.mrf.mxu0  ;;  %v8221_v27 = vsel %vm18818_vm1, %v8212_v57, 0.0 }
 0x7d1   :  { %v17387_v1 = vadd.f32 %v8163_v0, %v8151_v46  ;;  %v8211_v52 = vmul.f32 %v8187_v10, %v8187_v10  ;;  %v8050_v15 = vadd.f32 %v8040_v24, %v7948_v34  ;;  %v8216_v12 = vadd.f32 %v8215_v38, %v8209_v51 }
 0x7d3   :  { %v8189_v6 = vmul.f32 %v8177_v13, %v17387_v1  ;;  %v8220_v24 = vsel %vm18818_vm1, %v8211_v52, 0.0 }
 0x7d4   :  { %v8222_v60 = vadd.f32 %v8221_v27, %v8220_v24 }
 0x7d5   :  { %v8213_v53 = vmul.f32 %v8189_v6, %v8189_v6  ;;  %v8199_v41 = vsel %vm18818_vm1, %v8189_v6, 0.0 }
 0x7d7   :  { %v8223_v44 = vsel %vm18818_vm1, %v8213_v53, 0.0 }
 0x7d8   :  { %v8140_v58 = vpop.f32.mrf.mxu0  ;;  %v8224_v48 = vadd.f32 %v8223_v44, %v8222_v60 }
 0x7d9   :  { %v8148_v29 = vadd.f32 %v8140_v58, %v8046_v62 }
 0x7db   :  { %v17392_v20 = vadd.f32 %v8158_v56, %v8148_v29  ;;  %v8196_v56 = vsel %vm18818_vm1, %v8187_v10, 0.0 }
 0x7dc   :  { %v8198_v16 = vadd.f32 %v8197_v19, %v8196_v56 }
 0x7dd   :  { %v8186_v9 = vmul.f32 %v8178_v7, %v17392_v20 }
 0x7de   :  { %v8200_v55 = vadd.f32 %v8199_v41, %v8198_v16 }
 0x7df   :  { %v8193_v47 = vadd.f32 %v8192_v49, %v8186_v9  ;;  %v8210_v61 = vmul.f32 %v8186_v9, %v8186_v9 }
 0x7e0   :  { %v8142_v28 = vpop.f32.mrf.mxu0 }
 0x7e1   :  { %v8152_v18 = vadd.f32 %v8142_v28, %v8050_v15  ;;  %8194 = vadd.xlane.f32.xlu2 %v8193_v47  ;;  %v8217_v39 = vadd.f32 %v8216_v12, %v8210_v61 }
 0x7e3   :  { %v17400_v23 = vadd.f32 %v8163_v0, %v8152_v18  ;;  %8218 = vadd.xlane.f32.xlu0 %v8217_v39  ;;  %v8273_v0 = vld [vmem:[%s18910_s6] sm:$0xff]  ;;  %s18917_s6 = smov 109  }
 0x7e5   :  { %v8190_v35 = vmul.f32 %v8178_v7, %v17400_v23 }
 0x7e7   :  { %v8201_v8 = vsel %vm18818_vm1, %v8190_v35, 0.0  ;;  %v8214_v31 = vmul.f32 %v8190_v35, %v8190_v35 }
 0x7e8   :  { %v8202_v54 = vadd.f32 %v8201_v8, %v8200_v55 }
 0x7e9   :  { %v8225_v13 = vsel %vm18818_vm1, %v8214_v31, 0.0 }
 0x7ea   :  { %8203 = vadd.xlane.f32.xlu1 %v8202_v54  ;;  %v8226_v17 = vadd.f32 %v8225_v13, %v8224_v48 }
 0x7ec   :  { %8227 = vadd.xlane.f32.xlu2 %v8226_v17 }
 0x7f7   :  { %8282 = vperm.xlu0 %14456, %v8274_v14  }
 0x7ff   :  { %8302 = vperm.xlu0 %14456, %v8294_v5  }
 0x803   :  { %8277 = vperm.xlu1 %14457, %v8273_v0  }
 0x804   :  { %8297 = vperm.xlu2 %14458, %v8293_v59  }
 0x854   :  { %v8195_v32 = vpop.xlane.xlu2 %8194 }
 0x855   :  { %v8205_v45 = vmul.f32 0.0034722222, %v8195_v32 }
 0x856   :  { %v8219_v46 = vpop.xlane.xlu0 %8218 }
 0x857   :  { %v8229_v37 = vmul.f32 0.0034722222, %v8219_v46  ;;  %v8231_v2 = vmul.f32 %v8205_v45, %v8205_v45  ;;  %v8235_v52 = vsub.f32 %v17364_v42, %v8205_v45  ;;  %v8236_v15 = vsub.f32 %v17371_v40, %v8205_v45 }
 0x858   :  { %v8237_v47 = vsub.f32 %v17373_v11, %v8205_v45  ;;  %v8238_v61 = vsub.f32 %v17392_v20, %v8205_v45 }
 0x859   :  { %v8233_v3 = vsub.f32 %v8229_v37, %v8231_v2 }
 0x85b   :  { %v8243_v25 = vadd.f32 1e-05, %v8233_v3 }
 0x85d   :  { %14505 = vrsqrt.f32 %v8243_v25  ;;  %v8204_v62 = vpop.xlane.xlu1 %8203  ;;  %vm8251_vm11 = vweird.f32 %v8243_v25 }
 0x85e   :  { %v8206_v30 = vmul.f32 0.0034722222, %v8204_v62 }
 0x85f   :  { %v8228_v22 = vpop.xlane.xlu2 %8227 }
 0x860   :  { %v8232_v58 = vmul.f32 %v8206_v30, %v8206_v30  ;;  %v8230_v43 = vmul.f32 0.0034722222, %v8228_v22  ;;  %v8239_v57 = vsub.f32 %v17380_v26, %v8206_v30  ;;  %v8240_v28 = vsub.f32 %v17385_v63, %v8206_v30 }
 0x861   :  { %v8241_v42 = vsub.f32 %v17387_v1, %v8206_v30  ;;  %v8242_v40 = vsub.f32 %v17400_v23, %v8206_v30 }
 0x862   :  { %v8234_v29 = vsub.f32 %v8230_v43, %v8232_v58 }
 0x863   :  { %v14506_v7 = vpop.eup %14505 }
 0x864   :  { %v8246_v33 = vmul.f32 %v14506_v7, %v8243_v25  ;;  %v8244_v50 = vadd.f32 1e-05, %v8234_v29  ;;  %vm8252_vm15 = vweird.f32 %v14506_v7  ;;  %v13306_v29 = vld [vmem:[%s18764_s12 + $0x70] sm:$0xf] }
 0x865   :  { %vm8253_vm12 = vmor %vm8251_vm11, %vm8252_vm15 }
 0x866   :  { %v8247_v10 = vmul.f32 %v14506_v7, %v8246_v33  ;;  %14507 = vrsqrt.f32 %v8244_v50  ;;  %vm8261_vm15 = vweird.f32 %v8244_v50  ;;  %v13370_v33 = vld [vmem:[%s18764_s12 + $0xf0] sm:$0xf] }
 0x867   :  { %v8298_v26 = vpop.permute.xlu2 %8297 }
 0x868   :  { %v8248_v4 = vmul.f32 0.5, %v8247_v10 }
 0x869   :  { %v8283_v49 = vpop.permute.xlu0 %8282 }
 0x86a   :  { %v8249_v36 = vsub.f32 1.5, %v8248_v4  ;;  %v14299_v4 = vld [vmem:[%s18764_s12 + $0xf4] sm:$0xf0] }
 0x86c   :  { %v14508_v51 = vpop.eup %14507  ;;  %v8250_v34 = vmul.f32 %v14506_v7, %v8249_v36  ;;  %v13434_v36 = vld [vmem:[%s18764_s12 + $0x170] sm:$0xf] }
 0x86d   :  { %v8256_v21 = vmul.f32 %v14508_v51, %v8244_v50  ;;  %vm8262_vm1 = vweird.f32 %v14508_v51 }
 0x86e   :  { %v8254_v38 = vsel %vm8253_vm12, %v14506_v7, %v8250_v34  ;;  %vm8263_vm11 = vmor %vm8261_vm15, %vm8262_vm1  ;;  %v14283_v7 = vld [vmem:[%s18764_s12 + $0x74] sm:$0xf0]  ;;  %v13371_v34 = vor.u32 %v14299_v4, %v13370_v33  ;;  %vm8817_vm1 = vcmask 1046528   ;;  %vm8818_vm12 = vcmask 1047552   ;;  %v13282_v33 = vld [vmem:[%s18764_s12 + $0x40] sm:$0xf] }
 0x86f   :  { %v8257_v6 = vmul.f32 %v14508_v51, %v8256_v21  ;;  %v8265_v56 = vmul.f32 %v8254_v38, %v8235_v52  ;;  %v8266_v53 = vmul.f32 %v8254_v38, %v8236_v15  ;;  %v8267_v18 = vmul.f32 %v8254_v38, %v8237_v47  ;;  %v14297_v52 = vld [vmem:[%s18764_s12 + $0xe4] sm:$0xf0]  ;;  %v13426_v15 = vld [vmem:[%s18764_s12 + $0x160] sm:$0xf] }
 0x870   :  { %v8268_v39 = vmul.f32 %v8254_v38, %v8238_v61  ;;  %v13307_v10 = vor.u32 %v14283_v7, %v13306_v29  ;;  %v14313_v47 = vld [vmem:[%s18764_s12 + $0x164] sm:$0xf0]  ;;  %8841 = vmatpush.bf16.msrb.mxu2 %v13371_v34  ;;  %v13482_v29 = vld [vmem:[%s18764_s12 + $0x1d0] sm:$0xf]  ;;  %v14327_v7 = vld [vmem:[%s18764_s12 + $0x1d4] sm:$0xf0] }
 0x871   :  { %v8258_v9 = vmul.f32 0.5, %v8257_v6  ;;  %v8303_v17 = vpop.permute.xlu0 %8302  ;;  %v13298_v6 = vld [vmem:[%s18764_s12 + $0x60] sm:$0xf]  ;;  %vm9332_vm15 = vcmask 957440  }
 0x872   :  { %8827 = vmatpush.bf16.msra.mxu1 %v13307_v10  ;;  %v14277_v10 = vld [vmem:[%s18764_s12 + $0x44] sm:$0xf0]  ;;  %v13346_v4 = vld [vmem:[%s18764_s12 + $0xc0] sm:$0xf] }
 0x873   :  { %v8259_v12 = vsub.f32 1.5, %v8258_v9  ;;  %v14281_v9 = vld [vmem:[%s18764_s12 + $0x64] sm:$0xf0] }
 0x874   :  { %v13299_v38 = vor.u32 %v14281_v9, %v13298_v6  ;;  %v14309_v6 = vld [vmem:[%s18764_s12 + $0x144] sm:$0xf0] }
 0x875   :  { %v8260_v19 = vmul.f32 %v14508_v51, %v8259_v12  ;;  %v8278_v41 = vpop.permute.xlu1 %8277 }
 0x876   :  { %v8285_v11 = vmul.f32 %v8278_v41, %v8265_v56  ;;  %v8286_v20 = vmul.f32 %v8278_v41, %v8266_v53  ;;  %v8287_v24 = vmul.f32 %v8278_v41, %v8267_v18  ;;  %v8288_v16 = vmul.f32 %v8278_v41, %v8268_v39  ;;  %8828 = vmatpush.bf16.msra.mxu1 %v13299_v38  ;;  %v14325_v38 = vld [vmem:[%s18764_s12 + $0x1c4] sm:$0xf0] }
 0x877   :  { %v8264_v35 = vsel %vm8263_vm11, %v14508_v51, %v8260_v19  ;;  %v14315_v51 = vld [vmem:[%s18764_s12 + $0x174] sm:$0xf0]  ;;  %vm18923_vm11 = vcmask 785408  }
 0x878   :  { %v8269_v27 = vmul.f32 %v8264_v35, %v8239_v57  ;;  %v8270_v63 = vmul.f32 %v8264_v35, %v8240_v28  ;;  %v8271_v44 = vmul.f32 %v8264_v35, %v8241_v42  ;;  %v8272_v55 = vmul.f32 %v8264_v35, %v8242_v40 }
 0x879   :  { %v17429_v60 = vadd.f32 %v8298_v26, %v8285_v11  ;;  %v17431_v8 = vadd.f32 %v8298_v26, %v8286_v20  ;;  %v8307_v31 = vadd.f32 %v8298_v26, %v8287_v24  ;;  %v8308_v1 = vadd.f32 %v8298_v26, %v8288_v16 }
 0x87a   :  { %v8289_v54 = vmul.f32 %v8283_v49, %v8269_v27  ;;  %v8290_v23 = vmul.f32 %v8283_v49, %v8270_v63  ;;  %v8291_v48 = vmul.f32 %v8283_v49, %v8271_v44  ;;  %v8292_v13 = vmul.f32 %v8283_v49, %v8272_v55  ;;  %v13362_v49 = vld [vmem:[%s18764_s12 + $0xe0] sm:$0xf] }
 0x87b   :  { %v8313_v14 = vmax.f32 %v17429_v60, 0.0  ;;  %v8314_v5 = vmax.f32 %v17431_v8, 0.0  ;;  %v8315_v0 = vmax.f32 %v8307_v31, 0.0  ;;  %v8316_v59 = vmax.f32 %v8308_v1, 0.0 }
 0x87c   :  { %v17435_v32 = vadd.f32 %v8303_v17, %v8289_v54  ;;  %v17437_v45 = vadd.f32 %v8303_v17, %v8290_v23  ;;  %v17439_v46 = vadd.f32 %v8303_v17, %v8291_v48  ;;  %v8312_v37 = vadd.f32 %v8303_v17, %v8292_v13 }
 0x87d   :  { %v14464_v30 = vpack.i.bf16 %v8316_v59, %v8315_v0  ;;  %v14459_v22 = vpack.i.bf16 %v8314_v5, %v8313_v14  ;;  %v13435_v21 = vor.u32 %v14315_v51, %v13434_v36  ;;  %v13363_v57 = vor.u32 %v14297_v52, %v13362_v49  ;;  %v14293_v36 = vld [vmem:[%s18764_s12 + $0xc4] sm:$0xf0]  ;;  %v13474_v49 = vld [vmem:[%s18764_s12 + $0x1c0] sm:$0xf] }
 0x87e   :  { %v8317_v2 = vmax.f32 %v17435_v32, 0.0  ;;  %v8318_v3 = vmax.f32 %v17437_v45, 0.0  ;;  %v8319_v25 = vmax.f32 %v17439_v46, 0.0  ;;  %v8320_v62 = vmax.f32 %v8312_v37, 0.0  ;;  %v13290_v37 = vld [vmem:[%s18764_s12 + $0x50] sm:$0xf] }
 0x87f   :  { %14465 = vrot.lane.b32.xlu2 %v14464_v30, %s18843_s7  ;;  %14460 = vrot.lane.b32.xlu1 %v14459_v22, %s18843_s7  ;;  %v13427_v28 = vor.u32 %v14313_v47, %v13426_v15  ;;  %v13418_v30 = vld [vmem:[%s18764_s12 + $0x150] sm:$0xf]  ;;  %v14311_v22 = vld [vmem:[%s18764_s12 + $0x154] sm:$0xf0]  ;;  %v13283_v51 = vor.u32 %v14277_v10, %v13282_v33  ;;  %v13347_v34 = vor.u32 %v14293_v36, %v13346_v4 }
 0x880   :  { %v14469_v58 = vpack.i.bf16 %v8318_v3, %v8317_v2  ;;  %v14474_v43 = vpack.i.bf16 %v8320_v62, %v8319_v25  ;;  %8855 = vmatpush.bf16.msra.mxu3 %v13435_v21  ;;  %8842 = vmatpush.bf16.msrb.mxu2 %v13363_v57  ;;  %v13410_v21 = vld [vmem:[%s18764_s12 + $0x140] sm:$0xf]  ;;  %v13475_v52 = vor.u32 %v14325_v38, %v13474_v49  ;;  %v13274_v15 = vld [vmem:[%s18764_s12 + $0x30] sm:$0xf]  ;;  %v14275_v47 = vld [vmem:[%s18764_s12 + $0x34] sm:$0xf0] }
 0x881   :  { %v13411_v9 = vor.u32 %v14309_v6, %v13410_v21  ;;  %v14291_v57 = vld [vmem:[%s18764_s12 + $0xb4] sm:$0xf0]  ;;  %v13308_v10 = vld [vmem:[%s18764_s12 + $0x78] sm:$0xf0]  ;;  %v14298_v4 = vld [vmem:[%s18764_s12 + $0xf4] sm:$0xf] }
 0x882   :  { %14470 = vrot.lane.b32.xlu0 %v14469_v58, %s18843_s7  ;;  %v14314_v21 = vld [vmem:[%s18764_s12 + $0x174] sm:$0xf]  ;;  %v13436_v6 = vld [vmem:[%s18764_s12 + $0x178] sm:$0xf0]  ;;  %v13442_v38 = vld [vmem:[%s18764_s12 + $0x180] sm:$0xf] }
 0x884   :  { %8856 = vmatpush.bf16.msra.mxu3 %v13427_v28  ;;  %v13402_v28 = vld [vmem:[%s18764_s12 + $0x130] sm:$0xf] }
 0x887   :  { %14475 = vrot.lane.b32.xlu1 %v14474_v43, %s18843_s7  ;;  %v13419_v43 = vor.u32 %v14311_v22, %v13418_v30  ;;  %v14269_v30 = vld [vmem:[%s18764_s12 + $0x4] sm:$0xf0]  ;;  %v13314_v22 = vld [vmem:[%s18764_s12 + $0x80] sm:$0xf] }
 0x889   :  { %8857 = vmatpush.bf16.msra.mxu3 %v13419_v43  ;;  %v14285_v43 = vld [vmem:[%s18764_s12 + $0x84] sm:$0xf0] }
 0x88a   :  { %v13315_v36 = vor.u32 %v14285_v43, %v13314_v22  ;;  %v13468_v43 = vld [vmem:[%s18764_s12 + $0x1b8] sm:$0xf0] }
 0x88d   :  { %8858 = vmatpush.bf16.msra.mxu3 %v13411_v9 }
 0x8d9   :  { %v14466_v50 = vpop.permute.xlu2 %14465 }
 0x8da   :  { %v14468_v61 = vunpack.i.h.bf16 %v14466_v50  ;;  %v14467_v12 = vunpack.i.l.bf16 %v14466_v50  ;;  %v13483_v50 = vor.u32 %v14327_v7, %v13482_v29  ;;  %v13378_v29 = vld [vmem:[%s18764_s12 + $0x100] sm:$0xf]  ;;  %v14301_v7 = vld [vmem:[%s18764_s12 + $0x104] sm:$0xf0] }
 0x8dc   :  { %v8360_v56 = vsel %vm143_vm0, %v14467_v12, %v14468_v61  ;;  %v17485_v53 = vmax.f32 %v8316_v59, %v14468_v61  ;;  %v14591_v59 = vmov 65535   ;;  %v13338_v61 = vld [vmem:[%s18764_s12 + $0xb0] sm:$0xf] }
 0x8dd   :  { %v17487_v18 = vmax.f32 %v8315_v0, %v8360_v56  ;;  %v8819_v32 = vsel %vm8817_vm1, 4294967295, %v14591_v59  ;;  %v14307_v56 = vld [vmem:[%s18764_s12 + $0x134] sm:$0xf0]  ;;  %vm18925_vm1 = vcmask 760832  }
 0x8de   :  { %v17524_v45 = vsel %vm8818_vm12, %v8819_v32, 0  ;;  %v14287_v59 = vld [vmem:[%s18764_s12 + $0x94] sm:$0xf0]  ;;  %v13386_v32 = vld [vmem:[%s18764_s12 + $0x110] sm:$0xf]  ;;  %vm18926_vm12 = vcmask 752640  }
 0x8f1   :  { %v14461_v39 = vpop.permute.xlu1 %14460 }
 0x8f2   :  { %v14463_v19 = vunpack.i.h.bf16 %v14461_v39  ;;  %v14462_v42 = vunpack.i.l.bf16 %v14461_v39  ;;  %v13339_v39 = vor.u32 %v14291_v57, %v13338_v61  ;;  %v14280_v57 = vld [vmem:[%s18764_s12 + $0x64] sm:$0xf] }
 0x8f4   :  { %v8359_v40 = vsel %vm143_vm0, %v14463_v19, %v14467_v12  ;;  %v8358_v41 = vsel %vm143_vm0, %v14462_v42, %v14463_v19  ;;  %v14471_v11 = vpop.permute.xlu0 %14470  ;;  %v13275_v12 = vor.u32 %v14275_v47, %v13274_v15  ;;  %v13403_v19 = vor.u32 %v14307_v56, %v13402_v28  ;;  %v13466_v42 = vld [vmem:[%s18764_s12 + $0x1b0] sm:$0xf]  ;;  %v14328_v15 = vld [vmem:[%s18764_s12 + $0x1e4] sm:$0xf]  ;;  %v13300_v28 = vld [vmem:[%s18764_s12 + $0x68] sm:$0xf0] }
 0x8f5   :  { %v17491_v20 = vmax.f32 %v8314_v5, %v8359_v40  ;;  %v17493_v24 = vmax.f32 %v8313_v14, %v8358_v41  ;;  %v14473_v16 = vunpack.i.h.bf16 %v14471_v11  ;;  %v14472_v35 = vunpack.i.l.bf16 %v14471_v11  ;;  %v13490_v14 = vld [vmem:[%s18764_s12 + $0x1e0] sm:$0xf]  ;;  %v14329_v5 = vld [vmem:[%s18764_s12 + $0x1e4] sm:$0xf0]  ;;  %v14323_v40 = vld [vmem:[%s18764_s12 + $0x1b4] sm:$0xf0] }
 0x8f6   :  { %v13491_v0 = vor.u32 %v14329_v5, %v13490_v14  ;;  %v13266_v41 = vld [vmem:[%s18764_s12 + $0x20] sm:$0xf]  ;;  %8859 = vmatpush.bf16.msra.mxu3 %v13403_v19  ;;  %v13467_v11 = vor.u32 %v14323_v40, %v13466_v42  ;;  %v13439_v47 = vor.u32 %v14314_v21, %v13436_v6  ;;  %v13364_v19 = vld [vmem:[%s18764_s12 + $0xe8] sm:$0xf0]  ;;  %v14312_v42 = vld [vmem:[%s18764_s12 + $0x164] sm:$0xf] }
 0x8f7   :  { %v8361_v27 = vsel %vm143_vm0, %v14472_v35, %v14473_v16  ;;  %v14479_v55 = vpack.i.bf16 %v17487_v18, %v17491_v20  ;;  %v13330_v35 = vld [vmem:[%s18764_s12 + $0xa0] sm:$0xf]  ;;  %v13428_v40 = vld [vmem:[%s18764_s12 + $0x168] sm:$0xf0]  ;;  %v14320_v6 = vld [vmem:[%s18764_s12 + $0x1a4] sm:$0xf] }
 0x8f8   :  { %v17502_v1 = vmax.f32 %v8317_v2, %v8361_v27  ;;  %v8822_v46 = vand.u32 %v13491_v0, %v17524_v45  ;;  %v14279_v2 = vld [vmem:[%s18764_s12 + $0x54] sm:$0xf0]  ;;  %v13322_v0 = vld [vmem:[%s18764_s12 + $0x90] sm:$0xf] }
 0x8f9   :  { %v14476_v26 = vpop.permute.xlu1 %14475  ;;  %14480 = vrot.lane.b32.xlu2 %v14479_v55, %s18819_s11  ;;  %v14305_v55 = vld [vmem:[%s18764_s12 + $0x124] sm:$0xf0] }
 0x8fa   :  { %v14478_v63 = vunpack.i.h.bf16 %v14476_v26  ;;  %v14477_v44 = vunpack.i.l.bf16 %v14476_v26  ;;  %v14494_v17 = vpack.i.bf16 %v17502_v1, %v17493_v24  ;;  %8870 = vmatpush.bf16.msrb.mxu0 %v8822_v46  ;;  %v14289_v26 = vld [vmem:[%s18764_s12 + $0xa4] sm:$0xf0]  ;;  %v13323_v46 = vor.u32 %v14287_v59, %v13322_v0  ;;  %v13476_v0 = vld [vmem:[%s18764_s12 + $0x1c8] sm:$0xf0] }
 0x8fc   :  { %v17498_v60 = vmax.f32 %v8320_v62, %v14478_v63  ;;  %v8362_v8 = vsel %vm143_vm0, %v14473_v16, %v14477_v44  ;;  %v8363_v31 = vsel %vm143_vm0, %v14477_v44, %v14478_v63  ;;  %v14295_v62 = vld [vmem:[%s18764_s12 + $0xd4] sm:$0xf0]  ;;  %v14273_v16 = vld [vmem:[%s18764_s12 + $0x24] sm:$0xf0]  ;;  %v13331_v63 = vor.u32 %v14289_v26, %v13330_v35  ;;  %v13394_v44 = vld [vmem:[%s18764_s12 + $0x120] sm:$0xf] }
 0x8fd   :  { %v17504_v54 = vmax.f32 %v8318_v3, %v8362_v8  ;;  %v17506_v23 = vmax.f32 %v8319_v25, %v8363_v31  ;;  %v13354_v3 = vld [vmem:[%s18764_s12 + $0xd0] sm:$0xf]  ;;  %v13291_v25 = vor.u32 %v14279_v2, %v13290_v37  ;;  %v13267_v27 = vor.u32 %v14273_v16, %v13266_v41  ;;  %v13458_v8 = vld [vmem:[%s18764_s12 + $0x1a0] sm:$0xf]  ;;  %v14303_v37 = vld [vmem:[%s18764_s12 + $0x114] sm:$0xf0] }
 0x8fe   :  { %v14489_v48 = vpack.i.bf16 %v17498_v60, %v17485_v53  ;;  %v13355_v58 = vor.u32 %v14295_v62, %v13354_v3  ;;  %8871 = vmatpush.bf16.msrb.mxu0 %v13483_v50  ;;  %v13395_v31 = vor.u32 %v14305_v55, %v13394_v44  ;;  %v13450_v2 = vld [vmem:[%s18764_s12 + $0x190] sm:$0xf]  ;;  %v14319_v3 = vld [vmem:[%s18764_s12 + $0x194] sm:$0xf0]  ;;  %v13250_v62 = vld [vmem:[%s18764_s12] sm:$0xf]  ;;  %v13303_v35 = vor.u32 %v14280_v57, %v13300_v28 }
 0x8ff   :  { %v14484_v13 = vpack.i.bf16 %v17506_v23, %v17504_v54  ;;  %8829 = vmatpush.bf16.msra.mxu1 %v13291_v25  ;;  %v13387_v25 = vor.u32 %v14303_v37, %v13386_v32  ;;  %v13251_v33 = vor.u32 %v14269_v30, %v13250_v62  ;;  %v14282_v50 = vld [vmem:[%s18764_s12 + $0x74] sm:$0xf]  ;;  %v13292_v55 = vld [vmem:[%s18764_s12 + $0x58] sm:$0xf0]  ;;  %v14276_v32 = vld [vmem:[%s18764_s12 + $0x44] sm:$0xf] }
 0x900   :  { %14490 = vrot.lane.b32.xlu1 %v14489_v48, %s18819_s11  ;;  %8843 = vmatpush.bf16.msrb.mxu2 %v13355_v58  ;;  %v14321_v48 = vld [vmem:[%s18764_s12 + $0x1a4] sm:$0xf0]  ;;  %v13451_v58 = vor.u32 %v14319_v3, %v13450_v2  ;;  %v13311_v9 = vor.u32 %v14282_v50, %v13308_v10  ;;  %v14326_v41 = vld [vmem:[%s18764_s12 + $0x1d4] sm:$0xf]  ;;  %v14292_v37 = vld [vmem:[%s18764_s12 + $0xc4] sm:$0xf] }
 0x901   :  { %14485 = vrot.lane.b32.xlu0 %v14484_v13, %s18819_s11  ;;  %14495 = vrot.lane.b32.xlu2 %v14494_v17, %s18819_s11  ;;  %v13258_v13 = vld [vmem:[%s18764_s12 + $0x10] sm:$0xf]  ;;  %v14271_v17 = vld [vmem:[%s18764_s12 + $0x14] sm:$0xf0]  ;;  %v13459_v14 = vor.u32 %v14321_v48, %v13458_v8  ;;  %s18827_s11 = smov 104  }
 0x902   :  { %8872 = vmatpush.bf16.msrb.mxu0 %v13475_v52  ;;  %v13259_v5 = vor.u32 %v14271_v17, %v13258_v13  ;;  %8860 = vmatpush.bf16.msra.mxu3 %v13395_v31  ;;  %v14317_v52 = vld [vmem:[%s18764_s12 + $0x184] sm:$0xf0]  ;;  %v14278_v44 = vld [vmem:[%s18764_s12 + $0x54] sm:$0xf]  ;;  %v13356_v31 = vld [vmem:[%s18764_s12 + $0xd8] sm:$0xf0] }
 0x903   :  { %8830 = vmatpush.bf16.msra.mxu1 %v13283_v51  ;;  %v13379_v51 = vor.u32 %v14301_v7, %v13378_v29  ;;  %v13443_v61 = vor.u32 %v14317_v52, %v13442_v38  ;;  %v13295_v8 = vor.u32 %v14278_v44, %v13292_v55  ;;  %v14310_v48 = vld [vmem:[%s18764_s12 + $0x154] sm:$0xf]  ;;  %v13420_v13 = vld [vmem:[%s18764_s12 + $0x158] sm:$0xf0]  ;;  %v13348_v3 = vld [vmem:[%s18764_s12 + $0xc8] sm:$0xf0] }
 0x904   :  { %8844 = vmatpush.bf16.msrb.mxu2 %v13347_v34  ;;  %v13372_v34 = vld [vmem:[%s18764_s12 + $0xf8] sm:$0xf0]  ;;  %v13412_v62 = vld [vmem:[%s18764_s12 + $0x148] sm:$0xf0]  ;;  %v13351_v30 = vor.u32 %v14292_v37, %v13348_v3  ;;  %v14274_v7 = vld [vmem:[%s18764_s12 + $0x34] sm:$0xf] }
 0x905   :  { %v13375_v49 = vor.u32 %v14298_v4, %v13372_v34  ;;  %v14290_v50 = vld [vmem:[%s18764_s12 + $0xb4] sm:$0xf]  ;;  %v13340_v4 = vld [vmem:[%s18764_s12 + $0xb8] sm:$0xf0]  ;;  %v13268_v52 = vld [vmem:[%s18764_s12 + $0x28] sm:$0xf0] }
 0x906   :  { %8873 = vmatpush.bf16.msrb.mxu0 %v13467_v11  ;;  %8861 = vmatpush.bf16.msra.mxu3 %v13387_v25  ;;  %v13484_v11 = vld [vmem:[%s18764_s12 + $0x1d8] sm:$0xf0]  ;;  %v14308_v25 = vld [vmem:[%s18764_s12 + $0x144] sm:$0xf]  ;;  %v13343_v34 = vor.u32 %v14290_v50, %v13340_v4  ;;  %v13396_v28 = vld [vmem:[%s18764_s12 + $0x128] sm:$0xf0] }
 0x907   :  { %8831 = vmatpush.bf16.msra.mxu1 %v13275_v12  ;;  %v13492_v12 = vld [vmem:[%s18764_s12 + $0x1e8] sm:$0xf0]  ;;  %v13415_v22 = vor.u32 %v14308_v25, %v13412_v62  ;;  %v14304_v57 = vld [vmem:[%s18764_s12 + $0x124] sm:$0xf] }
 0x908   :  { %8845 = vmatpush.bf16.msrb.mxu2 %v13339_v39  ;;  %v13495_v56 = vor.u32 %v14328_v15, %v13492_v12  ;;  %v14296_v39 = vld [vmem:[%s18764_s12 + $0xe4] sm:$0xf] }
 0x909   :  { %v13367_v26 = vor.u32 %v14296_v39, %v13364_v19  ;;  %v14288_v15 = vld [vmem:[%s18764_s12 + $0xa4] sm:$0xf]  ;;  %v13399_v39 = vor.u32 %v14304_v57, %v13396_v28  ;;  %v13452_v19 = vld [vmem:[%s18764_s12 + $0x198] sm:$0xf0] }
 0x90a   :  { %8874 = vmatpush.bf16.msrb.mxu0 %v13459_v14  ;;  %8862 = vmatpush.bf16.msra.mxu3 %v13379_v51  ;;  %v8825_v16 = vand.u32 %v13495_v56, %v17524_v45  ;;  %v14294_v45 = vld [vmem:[%s18764_s12 + $0xd4] sm:$0xf]  ;;  %v13423_v14 = vor.u32 %v14310_v48, %v13420_v13  ;;  %v13404_v51 = vld [vmem:[%s18764_s12 + $0x138] sm:$0xf0]  ;;  %v14284_v48 = vld [vmem:[%s18764_s12 + $0x84] sm:$0xf] }
 0x90b   :  { %8832 = vmatpush.bf16.msra.mxu1 %v13267_v27  ;;  %v13431_v27 = vor.u32 %v14312_v42, %v13428_v40  ;;  %v13359_v17 = vor.u32 %v14294_v45, %v13356_v31  ;;  %v14318_v56 = vld [vmem:[%s18764_s12 + $0x194] sm:$0xf]  ;;  %v13260_v40 = vld [vmem:[%s18764_s12 + $0x18] sm:$0xf0]  ;;  %v14268_v45 = vld [vmem:[%s18764_s12 + $0x4] sm:$0xf] }
 0x90c   :  { %8846 = vmatpush.bf16.msrb.mxu2 %v13331_v63  ;;  %v13487_v63 = vor.u32 %v14326_v41, %v13484_v11  ;;  %v14270_v42 = vld [vmem:[%s18764_s12 + $0x14] sm:$0xf]  ;;  %v13455_v41 = vor.u32 %v14318_v56, %v13452_v19  ;;  %v13252_v31 = vld [vmem:[%s18764_s12 + $0x8] sm:$0xf0] }
 0x90d   :  { %v14286_v11 = vld [vmem:[%s18764_s12 + $0x94] sm:$0xf]  ;;  %v13263_v44 = vor.u32 %v14270_v42, %v13260_v40  ;;  %v13316_v13 = vld [vmem:[%s18764_s12 + $0x88] sm:$0xf0] }
 0x90e   :  { %8875 = vmatpush.bf16.msrb.mxu0 %v13451_v58  ;;  %8911 = vmatpush.bf16.msrb.mxu3 %v13439_v47  ;;  %v14322_v58 = vld [vmem:[%s18764_s12 + $0x1b4] sm:$0xf]  ;;  %v13332_v47 = vld [vmem:[%s18764_s12 + $0xa8] sm:$0xf0] }
 0x90f   :  { %8833 = vmatpush.bf16.msra.mxu1 %v13259_v5  ;;  %v14324_v5 = vld [vmem:[%s18764_s12 + $0x1c4] sm:$0xf]  ;;  %v13471_v29 = vor.u32 %v14322_v58, %v13468_v43  ;;  %v13335_v12 = vor.u32 %v14288_v15, %v13332_v47 }
 0x910   :  { %8847 = vmatpush.bf16.msrb.mxu2 %v13323_v46  ;;  %v13479_v59 = vor.u32 %v14324_v5, %v13476_v0  ;;  %v13284_v46 = vld [vmem:[%s18764_s12 + $0x48] sm:$0xf0]  ;;  %v14300_v5 = vld [vmem:[%s18764_s12 + $0x104] sm:$0xf] }
 0x911   :  { %v13287_v2 = vor.u32 %v14276_v32, %v13284_v46  ;;  %v13380_v0 = vld [vmem:[%s18764_s12 + $0x108] sm:$0xf0]  ;;  %v13319_v32 = vor.u32 %v14284_v48, %v13316_v13 }
 0x912   :  { %8876 = vmatpush.bf16.msrb.mxu0 %v13443_v61  ;;  %8912 = vmatpush.bf16.msrb.mxu3 %v13431_v27  ;;  %v14316_v27 = vld [vmem:[%s18764_s12 + $0x184] sm:$0xf]  ;;  %v13383_v46 = vor.u32 %v14300_v5, %v13380_v0 }
 0x913   :  { %8834 = vmatpush.bf16.msra.mxu1 %v13251_v33  ;;  %v13276_v33 = vld [vmem:[%s18764_s12 + $0x38] sm:$0xf0] }
 0x914   :  { %8848 = vmatpush.bf16.msrb.mxu2 %v13315_v36  ;;  %v13279_v10 = vor.u32 %v14274_v7, %v13276_v33  ;;  %v14306_v36 = vld [vmem:[%s18764_s12 + $0x134] sm:$0xf] }
 0x915   :  { %v13407_v21 = vor.u32 %v14306_v36, %v13404_v51 }
 0x916   :  { %8926 = vmatpush.bf16.msra.mxu0 %v8825_v16  ;;  %8913 = vmatpush.bf16.msrb.mxu3 %v13423_v14  ;;  %v13324_v16 = vld [vmem:[%s18764_s12 + $0x98] sm:$0xf0] }
 0x917   :  { %8883 = vmatpush.bf16.msrb.mxu1 %v13311_v9  ;;  %v13460_v9 = vld [vmem:[%s18764_s12 + $0x1a8] sm:$0xf0]  ;;  %v13327_v55 = vor.u32 %v14286_v11, %v13324_v16 }
 0x918   :  { %8897 = vmatpush.bf16.msra.mxu2 %v13375_v49  ;;  %v14272_v49 = vld [vmem:[%s18764_s12 + $0x24] sm:$0xf]  ;;  %v13463_v38 = vor.u32 %v14320_v6, %v13460_v9 }
 0x919   :  { %v13271_v61 = vor.u32 %v14272_v49, %v13268_v52 }
 0x91a   :  { %8927 = vmatpush.bf16.msra.mxu0 %v13487_v63  ;;  %8914 = vmatpush.bf16.msrb.mxu3 %v13415_v22  ;;  %v13444_v63 = vld [vmem:[%s18764_s12 + $0x188] sm:$0xf0] }
 0x91b   :  { %8884 = vmatpush.bf16.msrb.mxu1 %v13303_v35  ;;  %v14302_v35 = vld [vmem:[%s18764_s12 + $0x114] sm:$0xf]  ;;  %v13447_v14 = vor.u32 %v14316_v27, %v13444_v63 }
 0x91c   :  { %8898 = vmatpush.bf16.msra.mxu2 %v13367_v26  ;;  %v13388_v26 = vld [vmem:[%s18764_s12 + $0x118] sm:$0xf0]  ;;  %s18912_s12 = smov 125  }
 0x91e   :  { %8928 = vmatpush.bf16.msra.mxu0 %v13479_v59  ;;  %8915 = vmatpush.bf16.msrb.mxu3 %v13407_v21  ;;  %v13255_v59 = vor.u32 %v14268_v45, %v13252_v31 }
 0x91f   :  { %8885 = vmatpush.bf16.msrb.mxu1 %v13295_v8  ;;  %v13391_v8 = vor.u32 %v14302_v35, %v13388_v26 }
 0x920   :  { %8899 = vmatpush.bf16.msra.mxu2 %v13359_v17 }
 0x922   :  { %8929 = vmatpush.bf16.msra.mxu0 %v13471_v29  ;;  %8916 = vmatpush.bf16.msrb.mxu3 %v13399_v39 }
 0x923   :  { %8886 = vmatpush.bf16.msrb.mxu1 %v13287_v2 }
 0x924   :  { %8900 = vmatpush.bf16.msra.mxu2 %v13351_v30 }
 0x926   :  { %8930 = vmatpush.bf16.msra.mxu0 %v13463_v38  ;;  %8917 = vmatpush.bf16.msrb.mxu3 %v13391_v8 }
 0x927   :  { %8887 = vmatpush.bf16.msrb.mxu1 %v13279_v10 }
 0x928   :  { %8901 = vmatpush.bf16.msra.mxu2 %v13343_v34 }
 0x92a   :  { %8931 = vmatpush.bf16.msra.mxu0 %v13455_v41  ;;  %8918 = vmatpush.bf16.msrb.mxu3 %v13383_v46 }
 0x92b   :  { %8888 = vmatpush.bf16.msrb.mxu1 %v13271_v61 }
 0x92c   :  { %8902 = vmatpush.bf16.msra.mxu2 %v13335_v12 }
 0x92e   :  { %8932 = vmatpush.bf16.msra.mxu0 %v13447_v14 }
 0x92f   :  { %8889 = vmatpush.bf16.msrb.mxu1 %v13263_v44 }
 0x930   :  { %8903 = vmatpush.bf16.msra.mxu2 %v13327_v55 }
 0x933   :  { %8890 = vmatpush.bf16.msrb.mxu1 %v13255_v59 }
 0x934   :  { %8904 = vmatpush.bf16.msra.mxu2 %v13319_v32 }
 0x953   :  { %v14481_v17 = vpop.permute.xlu2 %14480 }
 0x954   :  { %v14483_v37 = vunpack.i.h.bf16 %v14481_v17  ;;  %v14482_v2 = vunpack.i.l.bf16 %v14481_v17 }
 0x956   :  { %v8418_v62 = vsel %vm6135_vm13, %v14482_v2, %v14483_v37 }
 0x957   :  { %v8432_v33 = vmax.f32 %v17491_v20, %v8418_v62  ;;  %v8943_v62 = vld [vmem:[%s18765_s13 + $0x8] sm:$0xf] }
 0x95b   :  { %v14496_v3 = vpop.permute.xlu2 %14495 }
 0x95c   :  { %v14497_v25 = vunpack.i.l.bf16 %v14496_v3  ;;  %v14498_v50 = vunpack.i.h.bf16 %v14496_v3  ;;  %v14330_v3 = vld [vmem:[%s18765_s13] sm:$0xff] }
 0x95e   :  { %v8417_v10 = vsel %vm6135_vm13, %v14497_v25, %v14482_v2 }
 0x95f   :  { %v8431_v20 = vmax.f32 %v17493_v24, %v8417_v10  ;;  %v14331_v10 = vld [vmem:[%s18765_s13 + $0xc] sm:$0xff] }
 0x972   :  { %v14491_v30 = vpop.permute.xlu1 %14490 }
 0x973   :  { %v14486_v22 = vpop.permute.xlu0 %14485  ;;  %v14493_v58 = vunpack.i.h.bf16 %v14491_v30  ;;  %v14492_v43 = vunpack.i.l.bf16 %v14491_v30  ;;  %v9001_v30 = vunpack.c.l.b16 %v8943_v62  ;;  %v14337_v62 = vld [vmem:[%s18765_s13 + $0x54] sm:$0xff] }
 0x974   :  { %v14488_v29 = vunpack.i.h.bf16 %v14486_v22  ;;  %v14487_v7 = vunpack.i.l.bf16 %v14486_v22 }
 0x975   :  { %v8438_v4 = vmax.f32 %v17498_v60, %v14493_v58  ;;  %v8419_v36 = vsel %vm6135_vm13, %v14483_v37, %v14492_v43  ;;  %v8434_v51 = vmax.f32 %v17485_v53, %v14492_v43  ;;  %v9003_v22 = vpack.c.b16 %v9001_v30, %v9001_v30 }
 0x976   :  { %v8422_v34 = vsel %vm6135_vm13, %v14488_v29, %v14493_v58  ;;  %v8433_v21 = vmax.f32 %v17487_v18, %v8419_v36  ;;  %v8420_v9 = vsel %vm6135_vm13, %v14498_v50, %v14487_v7  ;;  %v8421_v49 = vsel %vm6135_vm13, %v14487_v7, %v14488_v29 }
 0x977   :  { %v8437_v6 = vmax.f32 %v17506_v23, %v8422_v34  ;;  %v8442_v38 = vpack.c.bf16 %v8438_v4, %v8434_v51  ;;  %v8435_v52 = vmax.f32 %v17502_v1, %v8420_v9  ;;  %v8436_v60 = vmax.f32 %v17504_v54, %v8421_v49  ;;  %v10123_v49 = vld [vmem:[%s18766_s14 + $0x8] sm:$0xff] }
 0x979   :  { %v8441_v15 = vpack.c.bf16 %v8437_v6, %v8433_v21  ;;  %v8439_v47 = vpack.c.bf16 %v8435_v52, %v8431_v20  ;;  %v8440_v53 = vpack.c.bf16 %v8436_v60, %v8432_v33  ;;  %13496 = vmatmul.msk.bf16.vlgmr.msrb.gmra.mxu0 %vm6237_vm14, %v8442_v38  ;;  %v10124_v20 = vld [vmem:[%s18766_s14 + $0x10] sm:$0xff]  ;;  %v10122_v52 = vld [vmem:[%s18766_s14] sm:$0xff] }
 0x97a   :  { %v14333_v60 = vld [vmem:[%s18765_s13 + $0x24] sm:$0xff] }
 0x97b   :  { %8863 = vmatmul.bf16.vlgmr.msra.gmra.mxu3 %v8441_v15  ;;  %8835 = vmatmul.bf16.vlgmr.msra.gmra.mxu1 %v8439_v47 }
 0x97c   :  { %8849 = vmatmul.bf16.vlgmr.msrb.gmra.mxu2 %v8440_v53 }
 0x989   :  { %13497 = vmatmul.msk.bf16.vlgmr.msra.gmra.mxu0 %vm6237_vm14, %v8442_v38  ;;  %v14332_v38 = vld [vmem:[%s18765_s13 + $0x18] sm:$0xff] }
 0x98b   :  { %8919 = vmatmul.bf16.vlgmr.msrb.gmra.mxu3 %v8441_v15  ;;  %8891 = vmatmul.bf16.vlgmr.msrb.gmra.mxu1 %v8439_v47  ;;  %v13500_v15 = vld [vmem:[%s18765_s13 + $0x14] sm:$0xf] }
 0x98c   :  { %8905 = vmatmul.bf16.vlgmr.msra.gmra.mxu2 %v8440_v53  ;;  %v8953_v53 = vunpack.c.l.b16 %v13500_v15 }
 0x9f6   :  { %v8878_v24 = vpop.f32.mrf.mxu0 }
 0x9f8   :  { %v8836_v18 = vpop.f32.mrf.mxu1 }
 0x9fe   :  { %v8864_v23 = vpop.f32.mrf.mxu3  ;;  %v8880_v54 = vpop.f32.mrf.mxu0 }
 0x9ff   :  { %v8850_v61 = vpop.f32.mrf.mxu2 }
 0xa00   :  { %v8838_v1 = vpop.f32.mrf.mxu1  ;;  %v8851_v40 = vadd.f32 %v8850_v61, %v8836_v18 }
 0xa02   :  { %v8865_v16 = vadd.f32 %v8864_v23, %v8851_v40 }
 0xa04   :  { %v8879_v45 = vadd.f32 %v8878_v24, %v8865_v16 }
 0xa06   :  { %v8866_v12 = vpop.f32.mrf.mxu3  ;;  %v8934_v42 = vpop.f32.mrf.mxu0 }
 0xa07   :  { %v8852_v57 = vpop.f32.mrf.mxu2 }
 0xa08   :  { %v8892_v28 = vpop.f32.mrf.mxu1  ;;  %v8853_v41 = vadd.f32 %v8852_v57, %v8838_v1  ;;  %v10217_v1 = vld [vmem:[%s18767_s15 + $0x8] sm:$0xff]  ;;  %v13515_v57 = vld [vmem:[%s18765_s13 + $0x20] sm:$0xf] }
 0xa0a   :  { %v8867_v27 = vadd.f32 %v8866_v12, %v8853_v41  ;;  %v8955_v12 = vpack.c.b16 %v8953_v53, %v8953_v53 }
 0xa0c   :  { %v8881_v48 = vadd.f32 %v8880_v54, %v8867_v27  ;;  %v10216_v54 = vld [vmem:[%s18767_s15] sm:$0xff] }
 0xa0d   :  { %v14335_v27 = vld [vmem:[%s18765_s13 + $0x3c] sm:$0xff] }
 0xa0e   :  { %v8920_v39 = vpop.f32.mrf.mxu3  ;;  %v8936_v31 = vpop.f32.mrf.mxu0 }
 0xa0f   :  { %v8906_v56 = vpop.f32.mrf.mxu2 }
 0xa10   :  { %v8907_v19 = vadd.f32 %v8906_v56, %v8892_v28  ;;  %v8894_v35 = vpop.f32.mrf.mxu1  ;;  %v13524_v28 = vld [vmem:[%s18765_s13 + $0x2c] sm:$0xf]  ;;  %v9040_v56 = vunpack.c.l.b16 %v13515_v57 }
 0xa12   :  { %v8921_v11 = vadd.f32 %v8920_v39, %v8907_v19 }
 0xa14   :  { %v8935_v63 = vadd.f32 %v8934_v42, %v8921_v11  ;;  %v9087_v42 = vunpack.c.l.b16 %v13524_v28 }
 0xa16   :  { %v8922_v55 = vpop.f32.mrf.mxu3  ;;  %v8939_v13 = vpack.c.bf16 %v8935_v63, %v8879_v45  ;;  %v9089_v63 = vpack.c.b16 %v9087_v42, %v9087_v42 }
 0xa17   :  { %v8908_v26 = vpop.f32.mrf.mxu2 }
 0xa18   :  { %v8909_v44 = vadd.f32 %v8908_v26, %v8894_v35  ;;  %v8958_v5 = vunpack.c.l.b16 %v8939_v13  ;;  %v8959_v0 = vunpack.c.h.b16 %v8939_v13  ;;  %v9042_v26 = vpack.c.b16 %v9040_v56, %v9040_v56  ;;  %v13542_v13 = vld [vmem:[%s18765_s13 + $0x44] sm:$0xf] }
 0xa1a   :  { %v8923_v8 = vadd.f32 %v8922_v55, %v8909_v44 }
 0xa1c   :  { %v8937_v17 = vadd.f32 %v8936_v31, %v8923_v8 }
 0xa1e   :  { %v8940_v14 = vpack.c.bf16 %v8937_v17, %v8881_v48  ;;  %v14334_v48 = vld [vmem:[%s18765_s13 + $0x30] sm:$0xff]  ;;  %v9181_v17 = vunpack.c.l.b16 %v13542_v13 }
 0xa20   :  { %v8960_v59 = vunpack.c.l.b16 %v8940_v14  ;;  %v8961_v32 = vunpack.c.h.b16 %v8940_v14 }
 0xa22   :  { %v17874_v46 = vpack.c.b16 %v8960_v59, %v8958_v5  ;;  %v17876_v37 = vpack.c.b16 %v8961_v32, %v8959_v0 }
 0xa24   :  { %8966 = vrot.lane.b32.xlu1 %v17876_v37, %s18843_s7  ;;  %9043 = vrot.lane.b32.xlu2 %v17874_v46, %s18841_s4  ;;  %v9011_v2 = vsel %vm5669_vm2, %v17874_v46, 0 }
 0xa25   :  { %8964 = vrot.lane.b32.xlu0 %v17874_v46, %s18843_s7  ;;  %9020 = vmatpush.bf16.msrb.mxu2 %v9011_v2  ;;  %v9183_v2 = vpack.c.b16 %v9181_v17, %v9181_v17 }
 0xa28   :  { %13511 = vmatmul.msk.bf16.vlgmr.msrb.gmra.mxu2 %vm5665_vm10, %v14330_v3 }
 0xa2c   :  { %9090 = vrot.lane.b32.xlu1 %v17874_v46, %s18912_s12  ;;  %9092 = vrot.lane.b32.xlu2 %v17876_v37, %s18912_s12 }
 0xa2d   :  { %9045 = vrot.lane.b32.xlu0 %v17876_v37, %s18841_s4 }
 0xa34   :  { %9139 = vrot.lane.b32.xlu1 %v17876_v37, %s18913_s29  ;;  %9184 = vrot.lane.b32.xlu2 %v17874_v46, %s18829_s2 }
 0xa35   :  { %9137 = vrot.lane.b32.xlu0 %v17874_v46, %s18913_s29 }
 0xa38   :  { %13512 = vmatmul.msk.bf16.gmra.mxu2 %vm5665_vm10, %v9003_v22 }
 0xa3c   :  { %9232 = vrot.lane.b32.xlu1 %v17874_v46, %s18831_s0  ;;  %9234 = vrot.lane.b32.xlu2 %v17876_v37, %s18831_s0  ;;  %s18922_s0 = smov 93  }
 0xa3d   :  { %9186 = vrot.lane.b32.xlu0 %v17876_v37, %s18829_s2  ;;  %s18921_s2 = smov 94  }
 0xa44   :  { %9282 = vrot.lane.b32.xlu1 %v17876_v37, %s18823_s10  ;;  %9328 = vrot.lane.b32.xlu2 %v17874_v46, %s14595_s30 }
 0xa45   :  { %9280 = vrot.lane.b32.xlu0 %v17874_v46, %s18823_s10  ;;  %s18835_s10 = smov 100  }
 0xa4c   :  { %9376 = vrot.lane.b32.xlu1 %v17874_v46, %s18825_s3  ;;  %9378 = vrot.lane.b32.xlu2 %v17876_v37, %s18825_s3  ;;  %s18919_s3 = smov 96  }
 0xa4d   :  { %9330 = vrot.lane.b32.xlu0 %v17876_v37, %s14595_s30  ;;  %s18833_s30 = smov 103  }
 0xa54   :  { %9426 = vrot.lane.b32.xlu1 %v17876_v37, %s18914_s8  ;;  %9471 = vrot.lane.b32.xlu2 %v17874_v46, %s18915_s28 }
 0xa55   :  { %9424 = vrot.lane.b32.xlu0 %v17874_v46, %s18914_s8 }
 0xa5c   :  { %9518 = vrot.lane.b32.xlu1 %v17874_v46, %s18916_s1  ;;  %9520 = vrot.lane.b32.xlu2 %v17876_v37, %s18916_s1 }
 0xa5d   :  { %9473 = vrot.lane.b32.xlu0 %v17876_v37, %s18915_s28  ;;  %s18837_s28 = smov 102  }
 0xa64   :  { %9567 = vrot.lane.b32.xlu1 %v17876_v37, %s18917_s6  ;;  %9612 = vrot.lane.b32.xlu2 %v17874_v46, %s18918_s9 }
 0xa65   :  { %9565 = vrot.lane.b32.xlu0 %v17874_v46, %s18917_s6 }
 0xa6c   :  { %9659 = vrot.lane.b32.xlu1 %v17874_v46, %s18827_s11  ;;  %9661 = vrot.lane.b32.xlu2 %v17876_v37, %s18827_s11  ;;  %s18839_s11 = smov 101  }
 0xa6d   :  { %9614 = vrot.lane.b32.xlu0 %v17876_v37, %s18918_s9 }
 0xa74   :  { %9709 = vrot.lane.b32.xlu1 %v17876_v37, %s18833_s30  ;;  %9755 = vrot.lane.b32.xlu2 %v17874_v46, %s18837_s28 }
 0xa75   :  { %9707 = vrot.lane.b32.xlu0 %v17874_v46, %s18833_s30  ;;  %s18920_s30 = smov 95  }
 0xa7c   :  { %9803 = vrot.lane.b32.xlu1 %v17874_v46, %s18839_s11  ;;  %9805 = vrot.lane.b32.xlu2 %v17876_v37, %s18839_s11  ;;  %s18928_s11 = smov 126  }
 0xa7d   :  { %9757 = vrot.lane.b32.xlu0 %v17876_v37, %s18837_s28  ;;  %s18930_s28 = smov 119  }
 0xa7e   :  { %v9044_v25 = vpop.permute.xlu2 %9043 }
 0xa84   :  { %9853 = vrot.lane.b32.xlu1 %v17876_v37, %s18835_s10  ;;  %9899 = vrot.lane.b32.xlu2 %v17874_v46, %s18919_s3 }
 0xa85   :  { %9851 = vrot.lane.b32.xlu0 %v17874_v46, %s18835_s10 }
 0xa86   :  { %v9093_v58 = vpop.permute.xlu2 %9092 }
 0xa8c   :  { %9946 = vrot.lane.b32.xlu1 %v17874_v46, %s18920_s30  ;;  %9948 = vrot.lane.b32.xlu2 %v17876_v37, %s18920_s30  ;;  %s18935_s30 = smov 106  }
 0xa8d   :  { %9901 = vrot.lane.b32.xlu0 %v17876_v37, %s18919_s3  ;;  %s18931_s3 = smov 120  }
 0xa8e   :  { %v9185_v43 = vpop.permute.xlu2 %9184 }
 0xa94   :  { %9995 = vrot.lane.b32.xlu1 %v17876_v37, %s18921_s2  ;;  %10040 = vrot.lane.b32.xlu2 %v17874_v46, %s18922_s0 }
 0xa95   :  { %9993 = vrot.lane.b32.xlu0 %v17874_v46, %s18921_s2  ;;  %s18932_s2 = smov 116  }
 0xa96   :  { %v8967_v29 = vpop.permute.xlu1 %8966  ;;  %v9235_v4 = vpop.permute.xlu2 %9234 }
 0xa97   :  { %v8965_v7 = vpop.permute.xlu0 %8964 }
 0xa98   :  { %v8968_v33 = vsel %vm143_vm0, %v8965_v7, %v8967_v29  ;;  %vm9236_vm0 = vcmask 973824  }
 0xa99   :  { %v8976_v50 = vsel %vm5669_vm2, %v8968_v33, 0  ;;  %v13551_v33 = vld [vmem:[%s18765_s13 + $0x50] sm:$0xf] }
 0xa9a   :  { %8985 = vmatpush.bf16.msra.mxu1 %v8976_v50  ;;  %v13560_v50 = vld [vmem:[%s18765_s13 + $0x5c] sm:$0xf] }
 0xa9c   :  { %10087 = vrot.lane.b32.xlu1 %v17874_v46, %s18889_s5  ;;  %10089 = vrot.lane.b32.xlu2 %v17876_v37, %s18889_s5  ;;  %s14602_s5 = smov 122  }
 0xa9d   :  { %10042 = vrot.lane.b32.xlu0 %v17876_v37, %s18922_s0  ;;  %13505 = vmatmul.msk.bf16.vlgmr.msra.gmra.mxu1 %vm5665_vm10, %v14331_v10  ;;  %v14336_v37 = vld [vmem:[%s18765_s13 + $0x48] sm:$0xff]  ;;  %s18934_s0 = smov 104  }
 0xa9e   :  { %v9091_v36 = vpop.permute.xlu1 %9090  ;;  %v9329_v47 = vpop.permute.xlu2 %9328 }
 0xa9f   :  { %v9094_v51 = vsel %vm529_vm4, %v9091_v36, %v9093_v58  ;;  %v9046_v34 = vpop.permute.xlu0 %9045  ;;  %vm9284_vm4 = vcmask 965632  }
 0xaa0   :  { %v9102_v21 = vsel %vm5669_vm2, %v9094_v51, 0  ;;  %v9047_v6 = vsel %vm386_vm3, %v9044_v25, %v9046_v34  ;;  %vm9188_vm3 = vcmask 982016   ;;  %v13533_v25 = vld [vmem:[%s18765_s13 + $0x38] sm:$0xf]  ;;  %v9277_v51 = vunpack.c.l.b16 %v13560_v50 }
 0xaa1   :  { %v9055_v9 = vsel %vm5669_vm2, %v9047_v6, 0  ;;  %9111 = vmatpush.bf16.msrb.mxu0 %v9102_v21  ;;  %v9134_v30 = vunpack.c.l.b16 %v13533_v25 }
 0xaa2   :  { %9064 = vmatpush.bf16.msra.mxu3 %v9055_v9 }
 0xaa3   :  { %v9136_v7 = vpack.c.b16 %v9134_v30, %v9134_v30  ;;  %v14342_v30 = vld [vmem:[%s18765_s13 + $0x90] sm:$0xff] }
 0xaa4   :  { %10132 = vperm.xlu1 %14457, %v10123_v49   ;;  %10137 = vperm.xlu2 %14458, %v10124_v20  }
 0xaa5   :  { %10127 = vperm.xlu0 %14456, %v10122_v52   ;;  %13520 = vmatmul.msk.bf16.vlgmr.msra.gmra.mxu3 %vm5665_vm10, %v14332_v38  ;;  %v14339_v38 = vld [vmem:[%s18765_s13 + $0x6c] sm:$0xff]  ;;  %v9279_v52 = vpack.c.b16 %v9277_v51, %v9277_v51 }
 0xaa6   :  { %v9140_v18 = vpop.permute.xlu1 %9139  ;;  %13529 = vmatmul.msk.bf16.vlgmr.msrb.gmra.mxu0 %vm5665_vm10, %v14333_v60  ;;  %v9379_v39 = vpop.permute.xlu2 %9378  ;;  %v14344_v51 = vld [vmem:[%s18765_s13 + $0xa8] sm:$0xff] }
 0xaa7   :  { %v9138_v24 = vpop.permute.xlu0 %9137 }
 0xaa8   :  { %v9141_v23 = vsel %vm672_vm5, %v9138_v24, %v9140_v18  ;;  %vm9380_vm5 = vcmask 949248   ;;  %v14338_v24 = vld [vmem:[%s18765_s13 + $0x60] sm:$0xff] }
 0xaa9   :  { %v9149_v61 = vsel %vm5669_vm2, %v9141_v23, 0  ;;  %v13578_v23 = vld [vmem:[%s18765_s13 + $0x74] sm:$0xf] }
 0xaaa   :  { %9158 = vmatpush.bf16.msrb.mxu1 %v9149_v61  ;;  %v9373_v61 = vunpack.c.l.b16 %v13578_v23 }
 0xaac   :  { %10226 = vperm.xlu1 %14457, %v10217_v1   ;;  %v9375_v42 = vpack.c.b16 %v9373_v61, %v9373_v61 }
 0xaad   :  { %10221 = vperm.xlu0 %14456, %v10216_v54   ;;  %13506 = vmatmul.msk.bf16.gmra.mxu1 %vm5665_vm10, %v8955_v12 }
 0xaae   :  { %v9233_v19 = vpop.permute.xlu1 %9232  ;;  %v9472_v45 = vpop.permute.xlu2 %9471 }
 0xaaf   :  { %v9237_v40 = vsel %vm9236_vm0, %v9233_v19, %v9235_v4  ;;  %v9187_v41 = vpop.permute.xlu0 %9186  ;;  %v9229_v4 = vunpack.c.l.b16 %v13551_v33  ;;  %v14340_v19 = vld [vmem:[%s18765_s13 + $0x78] sm:$0xff] }
 0xab0   :  { %v9245_v11 = vsel %vm5669_vm2, %v9237_v40, 0  ;;  %v9189_v16 = vsel %vm9188_vm3, %v9185_v43, %v9187_v41  ;;  %v13569_v40 = vld [vmem:[%s18765_s13 + $0x68] sm:$0xf] }
 0xab1   :  { %v9197_v35 = vsel %vm5669_vm2, %v9189_v16, 0  ;;  %9254 = vmatpush.bf16.msrb.mxu3 %v9245_v11  ;;  %v9231_v20 = vpack.c.b16 %v9229_v4, %v9229_v4  ;;  %v14341_v41 = vld [vmem:[%s18765_s13 + $0x84] sm:$0xff]  ;;  %v9325_v11 = vunpack.c.l.b16 %v13569_v40 }
 0xab2   :  { %9206 = vmatpush.bf16.msra.mxu2 %v9197_v35  ;;  %v14346_v40 = vld [vmem:[%s18765_s13 + $0xc0] sm:$0xff] }
 0xab5   :  { %13521 = vmatmul.msk.bf16.gmra.mxu3 %vm5665_vm10, %v9042_v26  ;;  %13547 = vmatmul.msk.bf16.vlgmr.msra.gmra.mxu2 %vm5665_vm10, %v14335_v27 }
 0xab6   :  { %v9283_v44 = vpop.permute.xlu1 %9282  ;;  %13530 = vmatmul.msk.bf16.gmra.mxu0 %vm5665_vm10, %v9089_v63  ;;  %v9521_v3 = vpop.permute.xlu2 %9520  ;;  %v9327_v63 = vpack.c.b16 %v9325_v11, %v9325_v11 }
 0xab7   :  { %v9281_v55 = vpop.permute.xlu0 %9280 }
 0xab8   :  { %v9285_v8 = vsel %vm9284_vm4, %v9281_v55, %v9283_v44  ;;  %v13587_v55 = vld [vmem:[%s18765_s13 + $0x80] sm:$0xf] }
 0xab9   :  { %v9293_v31 = vsel %vm5669_vm2, %v9285_v8, 0  ;;  %v9421_v8 = vunpack.c.l.b16 %v13587_v55 }
 0xaba   :  { %9302 = vmatpush.bf16.msra.mxu0 %v9293_v31 }
 0xabd   :  { %13538 = vmatmul.msk.bf16.vlgmr.msrb.gmra.mxu1 %vm5665_vm10, %v14334_v48 }
 0xabe   :  { %v9377_v14 = vpop.permute.xlu1 %9376  ;;  %v9613_v10 = vpop.permute.xlu2 %9612 }
 0xabf   :  { %v9381_v5 = vsel %vm9380_vm5, %v9377_v14, %v9379_v39  ;;  %v9331_v0 = vpop.permute.xlu0 %9330 }
 0xac0   :  { %v9389_v59 = vsel %vm5669_vm2, %v9381_v5, 0  ;;  %v9333_v32 = vsel %vm9332_vm15, %v9329_v47, %v9331_v0 }
 0xac1   :  { %v9341_v46 = vsel %vm5669_vm2, %v9333_v32, 0  ;;  %9398 = vmatpush.bf16.msrb.mxu2 %v9389_v59  ;;  %v9423_v59 = vpack.c.b16 %v9421_v8, %v9421_v8  ;;  %v14343_v32 = vld [vmem:[%s18765_s13 + $0x9c] sm:$0xff]  ;;  %v14349_v8 = vld [vmem:[%s18765_s13 + $0xe4] sm:$0xff] }
 0xac2   :  { %9350 = vmatpush.bf16.msra.mxu1 %v9341_v46 }
 0xac5   :  { %13556 = vmatmul.msk.bf16.vlgmr.msrb.gmra.mxu3 %vm5665_vm10, %v14336_v37  ;;  %13548 = vmatmul.msk.bf16.gmra.mxu2 %vm5665_vm10, %v9183_v2 }
 0xac6   :  { %v9427_v22 = vpop.permute.xlu1 %9426  ;;  %13565 = vmatmul.msk.bf16.vlgmr.msra.gmra.mxu0 %vm5665_vm10, %v14337_v62  ;;  %v9662_v60 = vpop.permute.xlu2 %9661 }
 0xac7   :  { %v9425_v58 = vpop.permute.xlu0 %9424 }
 0xac8   :  { %v9428_v43 = vsel %vm6135_vm13, %v9425_v58, %v9427_v22  ;;  %vm9759_vm13 = vcmask 834560   ;;  %v13614_v22 = vld [vmem:[%s18765_s13 + $0xa4] sm:$0xf]  ;;  %v9022_v58 = vpop.f32.mrf.mxu2 }
 0xac9   :  { %v9436_v29 = vsel %vm5669_vm2, %v9428_v43, 0  ;;  %v9562_v43 = vunpack.c.l.b16 %v13614_v22 }
 0xaca   :  { %9445 = vmatpush.bf16.msra.mxu3 %v9436_v29 }
 0xacd   :  { %13539 = vmatmul.msk.bf16.gmra.mxu1 %vm5665_vm10, %v9136_v7 }
 0xace   :  { %v9519_v36 = vpop.permute.xlu1 %9518  ;;  %v9756_v57 = vpop.permute.xlu2 %9755 }
 0xacf   :  { %v9522_v34 = vsel %vm815_vm6, %v9519_v36, %v9521_v3  ;;  %v9474_v21 = vpop.permute.xlu0 %9473  ;;  %vm9663_vm6 = vcmask 850944  }
 0xad0   :  { %v9530_v6 = vsel %vm5669_vm2, %v9522_v34, 0  ;;  %v9475_v9 = vsel %vm6237_vm14, %v9472_v45, %v9474_v21  ;;  %v13596_v45 = vld [vmem:[%s18765_s13 + $0x8c] sm:$0xf]  ;;  %vm9855_vm14 = vcmask 818176   ;;  %v9564_v34 = vpack.c.b16 %v9562_v43, %v9562_v43  ;;  %v13605_v21 = vld [vmem:[%s18765_s13 + $0x98] sm:$0xf] }
 0xad1   :  { %v9483_v49 = vsel %vm5669_vm2, %v9475_v9, 0  ;;  %9539 = vmatpush.bf16.msrb.mxu1 %v9530_v6  ;;  %v9468_v48 = vunpack.c.l.b16 %v13596_v45  ;;  %v14345_v6 = vld [vmem:[%s18765_s13 + $0xb4] sm:$0xff]  ;;  %v18137_v9 = vpop.f32.mrf.mxu2  ;;  %v13641_v45 = vld [vmem:[%s18765_s13 + $0xc8] sm:$0xf] }
 0xad2   :  { %9492 = vmatpush.bf16.msrb.mxu0 %v9483_v49  ;;  %v9515_v49 = vunpack.c.l.b16 %v13605_v21 }
 0xad3   :  { %v9470_v46 = vpack.c.b16 %v9468_v48, %v9468_v48  ;;  %v9704_v48 = vunpack.c.l.b16 %v13641_v45 }
 0xad5   :  { %13557 = vmatmul.msk.bf16.gmra.mxu3 %vm5665_vm10, %v9231_v20  ;;  %13583 = vmatmul.msk.bf16.vlgmr.msrb.gmra.mxu2 %vm5665_vm10, %v14339_v38 }
 0xad6   :  { %v9568_v15 = vpop.permute.xlu1 %9567  ;;  %13566 = vmatmul.msk.bf16.gmra.mxu0 %vm5665_vm10, %v9279_v52  ;;  %v9806_v44 = vpop.permute.xlu2 %9805 }
 0xad7   :  { %v9566_v47 = vpop.permute.xlu0 %9565 }
 0xad8   :  { %v9569_v53 = vsel %vm958_vm7, %v9566_v47, %v9568_v15  ;;  %vm9711_vm7 = vcmask 842752   ;;  %v9517_v15 = vpack.c.b16 %v9515_v49, %v9515_v49  ;;  %v13623_v47 = vld [vmem:[%s18765_s13 + $0xb0] sm:$0xf] }
 0xad9   :  { %v9577_v18 = vsel %vm5669_vm2, %v9569_v53, 0  ;;  %v9027_v53 = vpop.f32.mrf.mxu2 }
 0xada   :  { %9586 = vmatpush.bf16.msra.mxu2 %v9577_v18  ;;  %v13632_v18 = vld [vmem:[%s18765_s13 + $0xbc] sm:$0xf] }
 0xadb   :  { %v9656_v23 = vunpack.c.l.b16 %v13632_v18 }
 0xadd   :  { %13574 = vmatmul.msk.bf16.vlgmr.msra.gmra.mxu1 %vm5665_vm10, %v14338_v24  ;;  %v9609_v24 = vunpack.c.l.b16 %v13623_v47  ;;  %v14353_v47 = vld [vmem:[%s18765_s13 + $0x114] sm:$0xff] }
 0xade   :  { %v9660_v1 = vpop.permute.xlu1 %9659  ;;  %v9900_v37 = vpop.permute.xlu2 %9899 }
 0xadf   :  { %v9664_v12 = vsel %vm9663_vm6, %v9660_v1, %v9662_v60  ;;  %v9615_v54 = vpop.permute.xlu0 %9614 }
 0xae0   :  { %v9672_v28 = vsel %vm5669_vm2, %v9664_v12, 0  ;;  %v9616_v56 = vsel %vm1101_vm8, %v9613_v10, %v9615_v54  ;;  %vm9807_vm8 = vcmask 826368  }
 0xae1   :  { %v9624_v39 = vsel %vm5669_vm2, %v9616_v56, 0  ;;  %9681 = vmatpush.bf16.msra.mxu0 %v9672_v28  ;;  %v14347_v28 = vld [vmem:[%s18765_s13 + $0xcc] sm:$0xff]  ;;  %v9658_v56 = vpack.c.b16 %v9656_v23, %v9656_v23 }
 0xae2   :  { %9633 = vmatpush.bf16.msrb.mxu3 %v9624_v39  ;;  %v9029_v39 = vpop.f32.mrf.mxu2 }
 0xae3   :  { %v13704_v39 = vld [vmem:[%s18765_s13 + $0x11c] sm:$0xf] }
 0xae5   :  { %13592 = vmatmul.msk.bf16.vlgmr.msra.gmra.mxu3 %vm5665_vm10, %v14340_v19  ;;  %13584 = vmatmul.msk.bf16.gmra.mxu2 %vm5665_vm10, %v9375_v42 }
 0xae6   :  { %v9710_v16 = vpop.permute.xlu1 %9709  ;;  %13601 = vmatmul.msk.bf16.vlgmr.msrb.gmra.mxu0 %vm5665_vm10, %v14341_v41  ;;  %v9949_v29 = vpop.permute.xlu2 %9948 }
 0xae7   :  { %v9708_v35 = vpop.permute.xlu0 %9707 }
 0xae8   :  { %v9712_v26 = vsel %vm9711_vm7, %v9708_v35, %v9710_v16  ;;  %v13650_v16 = vld [vmem:[%s18765_s13 + $0xd4] sm:$0xf] }
 0xae9   :  { %v9720_v27 = vsel %vm5669_vm2, %v9712_v26, 0 }
 0xaea   :  { %9729 = vmatpush.bf16.msra.mxu1 %v9720_v27  ;;  %v9752_v27 = vunpack.c.l.b16 %v13650_v16 }
 0xaed   :  { %13575 = vmatmul.msk.bf16.gmra.mxu1 %vm5665_vm10, %v9327_v63  ;;  %v14348_v63 = vld [vmem:[%s18765_s13 + $0xd8] sm:$0xff] }
 0xaee   :  { %v9804_v31 = vpop.permute.xlu1 %9803  ;;  %v10041_v61 = vpop.permute.xlu2 %10040 }
 0xaef   :  { %v9808_v13 = vsel %vm9807_vm8, %v9804_v31, %v9806_v44  ;;  %v9758_v17 = vpop.permute.xlu0 %9757  ;;  %v9754_v44 = vpack.c.b16 %v9752_v27, %v9752_v27  ;;  %vm18929_vm8 = vcmask 1043456  }
 0xaf0   :  { %v9816_v14 = vsel %vm5669_vm2, %v9808_v13, 0  ;;  %v9760_v5 = vsel %vm9759_vm13, %v9756_v57, %v9758_v17  ;;  %v9611_v57 = vpack.c.b16 %v9609_v24, %v9609_v24  ;;  %vm10376_vm13 = vcmask 195584  }
 0xaf1   :  { %v9768_v0 = vsel %vm5669_vm2, %v9760_v5, 0  ;;  %9825 = vmatpush.bf16.msra.mxu3 %v9816_v14  ;;  %v9706_v14 = vpack.c.b16 %v9704_v48, %v9704_v48 }
 0xaf2   :  { %9777 = vmatpush.bf16.msrb.mxu2 %v9768_v0  ;;  %v13659_v0 = vld [vmem:[%s18765_s13 + $0xe0] sm:$0xf] }
 0xaf5   :  { %13593 = vmatmul.msk.bf16.gmra.mxu3 %vm5665_vm10, %v9423_v59  ;;  %13619 = vmatmul.msk.bf16.vlgmr.msra.gmra.mxu2 %vm5665_vm10, %v14343_v32 }
 0xaf6   :  { %v9854_v2 = vpop.permute.xlu1 %9853  ;;  %13602 = vmatmul.msk.bf16.gmra.mxu0 %vm5665_vm10, %v9470_v46  ;;  %v10090_v42 = vpop.permute.xlu2 %10089 }
 0xaf7   :  { %v9852_v3 = vpop.permute.xlu0 %9851 }
 0xaf8   :  { %v9856_v25 = vsel %vm9855_vm14, %v9852_v3, %v9854_v2  ;;  %v9800_v2 = vunpack.c.l.b16 %v13659_v0  ;;  %vm18937_vm14 = vmmov %vm18929_vm8 }
 0xaf9   :  { %v9864_v62 = vsel %vm5669_vm2, %v9856_v25, 0 }
 0xafa   :  { %9873 = vmatpush.bf16.msrb.mxu0 %v9864_v62  ;;  %v9802_v62 = vpack.c.b16 %v9800_v2, %v9800_v2 }
 0xafd   :  { %13610 = vmatmul.msk.bf16.vlgmr.msrb.gmra.mxu1 %vm5665_vm10, %v14342_v30  ;;  %v14351_v30 = vld [vmem:[%s18765_s13 + $0xfc] sm:$0xff] }
 0xafe   :  { %v9947_v7 = vpop.permute.xlu1 %9946 }
 0xaff   :  { %v9950_v33 = vsel %vm6744_vm9, %v9947_v7, %v9949_v29  ;;  %v9902_v50 = vpop.permute.xlu0 %9901  ;;  %vm18924_vm9 = vcmask 769024  }
 0xb00   :  { %v9958_v10 = vsel %vm5669_vm2, %v9950_v33, 0  ;;  %v9903_v4 = vsel %vm18923_vm11, %v9900_v37, %v9902_v50  ;;  %v13668_v37 = vld [vmem:[%s18765_s13 + $0xec] sm:$0xf]  ;;  %v14350_v50 = vld [vmem:[%s18765_s13 + $0xf0] sm:$0xff]  ;;  %vm18940_vm11 = vmmov %vm18929_vm8 }
 0xb01   :  { %v9911_v36 = vsel %vm5669_vm2, %v9903_v4, 0  ;;  %9967 = vmatpush.bf16.msra.mxu2 %v9958_v10  ;;  %v9848_v3 = vunpack.c.l.b16 %v13668_v37  ;;  %v13686_v4 = vld [vmem:[%s18765_s13 + $0x104] sm:$0xf] }
 0xb02   :  { %9920 = vmatpush.bf16.msrb.mxu1 %v9911_v36 }
 0xb05   :  { %13628 = vmatmul.msk.bf16.vlgmr.msrb.gmra.mxu3 %vm5665_vm10, %v14344_v51  ;;  %13620 = vmatmul.msk.bf16.gmra.mxu2 %vm5665_vm10, %v9564_v34 }
 0xb06   :  { %v9996_v20 = vpop.permute.xlu1 %9995  ;;  %13637 = vmatmul.msk.bf16.vlgmr.msra.gmra.mxu0 %vm5665_vm10, %v14345_v6  ;;  %v9943_v6 = vunpack.c.l.b16 %v13686_v4 }
 0xb07   :  { %v9994_v38 = vpop.permute.xlu0 %9993 }
 0xb08   :  { %v9997_v52 = vsel %vm18924_vm9, %v9994_v38, %v9996_v20  ;;  %v14352_v38 = vld [vmem:[%s18765_s13 + $0x108] sm:$0xff]  ;;  %vm18943_vm9 = vmmov %vm18929_vm8 }
 0xb09   :  { %v10005_v60 = vsel %vm5669_vm2, %v9997_v52, 0  ;;  %v9945_v52 = vpack.c.b16 %v9943_v6, %v9943_v6 }
 0xb0a   :  { %10014 = vmatpush.bf16.msrb.mxu3 %v10005_v60 }
 0xb0d   :  { %13611 = vmatmul.msk.bf16.gmra.mxu1 %vm5665_vm10, %v9517_v15  ;;  %v13677_v15 = vld [vmem:[%s18765_s13 + $0xf8] sm:$0xf] }
 0xb0e   :  { %v10088_v19 = vpop.permute.xlu1 %10087  ;;  %v9896_v18 = vunpack.c.l.b16 %v13677_v15 }
 0xb0f   :  { %v10043_v1 = vpop.permute.xlu0 %10042  ;;  %v10091_v41 = vsel %vm18926_vm12, %v10088_v19, %v10090_v42 }
 0xb10   :  { %v10044_v12 = vsel %vm18925_vm1, %v10041_v61, %v10043_v1  ;;  %v10099_v26 = vsel %vm5669_vm2, %v10091_v41, 0  ;;  %v9898_v1 = vpack.c.b16 %v9896_v18, %v9896_v18  ;;  %vm18944_vm1 = vmmov %vm18929_vm8 }
 0xb11   :  { %v10052_v54 = vsel %vm5669_vm2, %v10044_v12, 0  ;;  %vm18945_vm12 = vmmov %vm18944_vm1 }
 0xb12   :  { %10061 = vmatpush.bf16.msra.mxu0 %v10052_v54  ;;  %v13695_v54 = vld [vmem:[%s18765_s13 + $0x110] sm:$0xf] }
 0xb13   :  { %v9990_v42 = vunpack.c.l.b16 %v13695_v54 }
 0xb15   :  { %13629 = vmatmul.msk.bf16.gmra.mxu3 %vm5665_vm10, %v9611_v57  ;;  %13655 = vmatmul.msk.bf16.vlgmr.msrb.gmra.mxu2 %vm5665_vm10, %v14347_v28  ;;  %v9992_v16 = vpack.c.b16 %v9990_v42, %v9990_v42 }
 0xb16   :  { %13638 = vmatmul.msk.bf16.gmra.mxu0 %vm5665_vm10, %v9658_v56 }
 0xb1a   :  { %v8987_v11 = vpop.f32.mrf.mxu1 }
 0xb1b   :  { %v9023_v35 = vadd.f32 %v9022_v58, %v8987_v11  ;;  %v9850_v58 = vpack.c.b16 %v9848_v3, %v9848_v3 }
 0xb1d   :  { %13646 = vmatmul.msk.bf16.vlgmr.msra.gmra.mxu1 %vm5665_vm10, %v14346_v40  ;;  %v10037_v40 = vunpack.c.l.b16 %v13704_v39 }
 0xb1e   :  { %10108 = vmatpush.bf16.msra.mxu1 %v10099_v26 }
 0xb1f   :  { %v10039_v26 = vpack.c.b16 %v10037_v40, %v10037_v40 }
 0xb22   :  { %v18171_v55 = vpop.f32.mrf.mxu1 }
 0xb23   :  { %v9113_v31 = vpop.f32.mrf.mxu0 }
 0xb25   :  { %13664 = vmatmul.msk.bf16.vlgmr.msra.gmra.mxu3 %vm5665_vm10, %v14348_v63  ;;  %13656 = vmatmul.msk.bf16.gmra.mxu2 %vm5665_vm10, %v9754_v44 }
 0xb26   :  { %13673 = vmatmul.msk.bf16.vlgmr.msrb.gmra.mxu0 %vm5665_vm10, %v14349_v8  ;;  %v14354_v8 = vld [vmem:[%s18765_s13 + $0x120] sm:$0xff] }
 0xb28   :  { %v9066_v13 = vpop.f32.mrf.mxu3 }
 0xb29   :  { %v9075_v17 = vadd.f32 %v9066_v13, %v9023_v35 }
 0xb2a   :  { %v8992_v5 = vpop.f32.mrf.mxu1 }
 0xb2b   :  { %v9028_v59 = vadd.f32 %v9027_v53, %v8992_v5  ;;  %v9122_v32 = vadd.f32 %v9113_v31, %v9075_v17  ;;  %v18185_v46 = vpop.f32.mrf.mxu0 }
 0xb2d   :  { %13647 = vmatmul.msk.bf16.gmra.mxu1 %vm5665_vm10, %v9706_v14 }
 0xb30   :  { %v18191_v25 = vpop.f32.mrf.mxu3 }
 0xb32   :  { %v8994_v22 = vpop.f32.mrf.mxu1 }
 0xb33   :  { %v9118_v43 = vpop.f32.mrf.mxu0 }
 0xb35   :  { %13665 = vmatmul.msk.bf16.gmra.mxu3 %vm5665_vm10, %v9802_v62  ;;  %13691 = vmatmul.msk.bf16.vlgmr.msra.gmra.mxu2 %vm5665_vm10, %v14351_v30 }
 0xb36   :  { %13674 = vmatmul.msk.bf16.gmra.mxu0 %vm5665_vm10, %v9850_v58 }
 0xb38   :  { %v9071_v29 = vpop.f32.mrf.mxu3  ;;  %v9208_v7 = vpop.f32.mrf.mxu2 }
 0xb39   :  { %v9077_v33 = vadd.f32 %v9071_v29, %v9028_v59 }
 0xb3a   :  { %v9160_v10 = vpop.f32.mrf.mxu1 }
 0xb3b   :  { %v9124_v36 = vadd.f32 %v9118_v43, %v9077_v33  ;;  %v9169_v51 = vadd.f32 %v9160_v10, %v9122_v32  ;;  %v9120_v34 = vpop.f32.mrf.mxu0  ;;  %v13713_v32 = vld [vmem:[%s18765_s13 + $0x128] sm:$0xf]  ;;  %s14603_s13 = smov 121  }
 0xb3c   :  { %v10084_v2 = vunpack.c.l.b16 %v13713_v32 }
 0xb3d   :  { %v9217_v21 = vadd.f32 %v9208_v7, %v9169_v51  ;;  %13682 = vmatmul.msk.bf16.vlgmr.msrb.gmra.mxu1 %vm5665_vm10, %v14350_v50 }
 0xb3e   :  { %v10086_v22 = vpack.c.b16 %v10084_v2, %v10084_v2 }
 0xb40   :  { %v9073_v49 = vpop.f32.mrf.mxu3  ;;  %v18206_v20 = vpop.f32.mrf.mxu2 }
 0xb42   :  { %v18211_v60 = vpop.f32.mrf.mxu1 }
 0xb43   :  { %v9304_v53 = vpop.f32.mrf.mxu0 }
 0xb45   :  { %13700 = vmatmul.msk.bf16.vlgmr.msrb.gmra.mxu3 %vm5665_vm10, %v14352_v38  ;;  %13692 = vmatmul.msk.bf16.gmra.mxu2 %vm5665_vm10, %v9945_v52 }
 0xb46   :  { %13709 = vmatmul.msk.bf16.vlgmr.msra.gmra.mxu0 %vm5665_vm10, %v14353_v47 }
 0xb48   :  { %v9256_v24 = vpop.f32.mrf.mxu3  ;;  %v9213_v23 = vpop.f32.mrf.mxu2 }
 0xb49   :  { %v9265_v61 = vadd.f32 %v9256_v24, %v9217_v21 }
 0xb4a   :  { %v9165_v12 = vpop.f32.mrf.mxu1 }
 0xb4b   :  { %v9171_v57 = vadd.f32 %v9165_v12, %v9124_v36  ;;  %v9313_v28 = vadd.f32 %v9304_v53, %v9265_v61  ;;  %v18225_v56 = vpop.f32.mrf.mxu0 }
 0xb4d   :  { %v9219_v19 = vadd.f32 %v9213_v23, %v9171_v57  ;;  %13683 = vmatmul.msk.bf16.gmra.mxu1 %vm5665_vm10, %v9898_v1 }
 0xb50   :  { %v18231_v41 = vpop.f32.mrf.mxu3  ;;  %v9215_v11 = vpop.f32.mrf.mxu2 }
 0xb52   :  { %v9167_v35 = vpop.f32.mrf.mxu1 }
 0xb53   :  { %v9309_v27 = vpop.f32.mrf.mxu0 }
 0xb55   :  { %13701 = vmatmul.msk.bf16.gmra.mxu3 %vm5665_vm10, %v9992_v16 }
 0xb56   :  { %13710 = vmatmul.msk.bf16.gmra.mxu0 %vm5665_vm10, %v10039_v26 }
 0xb58   :  { %v9261_v63 = vpop.f32.mrf.mxu3  ;;  %v9400_v44 = vpop.f32.mrf.mxu2 }
 0xb59   :  { %v9267_v45 = vadd.f32 %v9261_v63, %v9219_v19 }
 0xb5a   :  { %v9352_v31 = vpop.f32.mrf.mxu1 }
 0xb5b   :  { %v9315_v48 = vadd.f32 %v9309_v27, %v9267_v45  ;;  %v9361_v13 = vadd.f32 %v9352_v31, %v9313_v28  ;;  %v9311_v17 = vpop.f32.mrf.mxu0  ;;  %v9025_v45 = vadd.f32 %v18137_v9, %v18171_v55 }
 0xb5d   :  { %v9409_v14 = vadd.f32 %v9400_v44, %v9361_v13  ;;  %13718 = vmatmul.msk.bf16.vlgmr.msra.gmra.mxu1 %vm5665_vm10, %v14354_v8 }
 0xb60   :  { %v9263_v5 = vpop.f32.mrf.mxu3  ;;  %v18239_v0 = vpop.f32.mrf.mxu2 }
 0xb62   :  { %v18241_v59 = vpop.f32.mrf.mxu1 }
 0xb63   :  { %v9494_v37 = vpop.f32.mrf.mxu0 }
 0xb68   :  { %v9447_v3 = vpop.f32.mrf.mxu3  ;;  %v9405_v62 = vpop.f32.mrf.mxu2 }
 0xb69   :  { %v9456_v30 = vadd.f32 %v9447_v3, %v9409_v14 }
 0xb6a   :  { %v9357_v58 = vpop.f32.mrf.mxu1 }
 0xb6b   :  { %v9363_v43 = vadd.f32 %v9357_v58, %v9315_v48  ;;  %v9503_v29 = vadd.f32 %v9494_v37, %v9456_v30  ;;  %v18246_v7 = vpop.f32.mrf.mxu0  ;;  %v9076_v48 = vadd.f32 %v18191_v25, %v9025_v45  ;;  %v14499_v45 = vld [vmem:[%s18769_s17] ss:$0 sm:$0xff]  ;;  %s14606_s17 = smov 113  }
 0xb6d   :  { %v9411_v33 = vadd.f32 %v9405_v62, %v9363_v43  ;;  %13719 = vmatmul.msk.bf16.gmra.mxu1 %vm5665_vm10, %v10086_v22  ;;  %v9123_v14 = vadd.f32 %v18185_v46, %v9076_v48 }
 0xb6f   :  { %v9170_v5 = vadd.f32 %v18211_v60, %v9123_v14 }
 0xb70   :  { %v9449_v50 = vpop.f32.mrf.mxu3  ;;  %v9407_v10 = vpop.f32.mrf.mxu2 }
 0xb71   :  { %v9218_v3 = vadd.f32 %v18206_v20, %v9170_v5 }
 0xb72   :  { %v9359_v4 = vpop.f32.mrf.mxu1 }
 0xb73   :  { %v9499_v36 = vpop.f32.mrf.mxu0  ;;  %v9266_v30 = vadd.f32 %v18231_v41, %v9218_v3 }
 0xb75   :  { %v9314_v55 = vadd.f32 %v18225_v56, %v9266_v30  ;;  %v10133_v30 = vpop.permute.xlu1 %10132 }
 0xb77   :  { %v9362_v25 = vadd.f32 %v18241_v59, %v9314_v55 }
 0xb78   :  { %v9452_v51 = vpop.f32.mrf.mxu3  ;;  %v9588_v34 = vpop.f32.mrf.mxu2 }
 0xb79   :  { %v9458_v21 = vadd.f32 %v9452_v51, %v9411_v33  ;;  %v9410_v46 = vadd.f32 %v18239_v0, %v9362_v25 }
 0xb7a   :  { %v9541_v6 = vpop.f32.mrf.mxu1 }
 0xb7b   :  { %v9505_v49 = vadd.f32 %v9499_v36, %v9458_v21  ;;  %v9550_v38 = vadd.f32 %v9541_v6, %v9503_v29  ;;  %v9501_v52 = vpop.f32.mrf.mxu0  ;;  %v9457_v33 = vadd.f32 %v9449_v50, %v9410_v46 }
 0xb7d   :  { %v9597_v15 = vadd.f32 %v9588_v34, %v9550_v38  ;;  %v9504_v20 = vadd.f32 %v18246_v7, %v9457_v33 }
 0xb80   :  { %v9454_v47 = vpop.f32.mrf.mxu3  ;;  %v9590_v53 = vpop.f32.mrf.mxu2 }
 0xb82   :  { %v9543_v18 = vpop.f32.mrf.mxu1 }
 0xb83   :  { %v9683_v24 = vpop.f32.mrf.mxu0  ;;  %v9551_v36 = vadd.f32 %v9543_v18, %v9504_v20  ;;  %v10238_v20 = vld [vmem:[%s18768_s16 + $0x8] sm:$0xff] }
 0xb85   :  { %v9598_v21 = vadd.f32 %v9590_v53, %v9551_v36  ;;  %v10239_v36 = vld [vmem:[%s18768_s16 + $0x10] sm:$0xff] }
 0xb88   :  { %v9635_v23 = vpop.f32.mrf.mxu3  ;;  %v9593_v61 = vpop.f32.mrf.mxu2 }
 0xb89   :  { %v9644_v1 = vadd.f32 %v9635_v23, %v9597_v15 }
 0xb8a   :  { %v9546_v12 = vpop.f32.mrf.mxu1 }
 0xb8b   :  { %v9552_v54 = vadd.f32 %v9546_v12, %v9505_v49  ;;  %v9692_v57 = vadd.f32 %v9683_v24, %v9644_v1  ;;  %v9685_v28 = vpop.f32.mrf.mxu0 }
 0xb8d   :  { %v9599_v39 = vadd.f32 %v9593_v61, %v9552_v54 }
 0xb90   :  { %v9637_v19 = vpop.f32.mrf.mxu3  ;;  %v9595_v42 = vpop.f32.mrf.mxu2 }
 0xb91   :  { %v9645_v49 = vadd.f32 %v9637_v19, %v9598_v21  ;;  %v14361_v21 = vld [vmem:[%s18770_s18 + $0x30] sm:$0xff] }
 0xb92   :  { %v9548_v40 = vpop.f32.mrf.mxu1 }
 0xb93   :  { %v9688_v11 = vpop.f32.mrf.mxu0  ;;  %v9693_v15 = vadd.f32 %v9685_v28, %v9645_v49  ;;  %v14359_v49 = vld [vmem:[%s18770_s18 + $0x20] sm:$0xff] }
 0xb98   :  { %v9640_v16 = vpop.f32.mrf.mxu3  ;;  %v9779_v35 = vpop.f32.mrf.mxu2 }
 0xb99   :  { %v9646_v26 = vadd.f32 %v9640_v16, %v9599_v39 }
 0xb9a   :  { %v9731_v27 = vpop.f32.mrf.mxu1 }
 0xb9b   :  { %v9694_v63 = vadd.f32 %v9688_v11, %v9646_v26  ;;  %v9690_v44 = vpop.f32.mrf.mxu0  ;;  %v9740_v6 = vadd.f32 %v9731_v27, %v9692_v57 }
 0xb9d   :  { %v9788_v38 = vadd.f32 %v9779_v35, %v9740_v6  ;;  %v14360_v6 = vld [vmem:[%s18770_s18 + $0x28] sm:$0xff] }
 0xba0   :  { %v9642_v8 = vpop.f32.mrf.mxu3  ;;  %v9781_v31 = vpop.f32.mrf.mxu2 }
 0xba2   :  { %v9733_v13 = vpop.f32.mrf.mxu1 }
 0xba3   :  { %v9875_v17 = vpop.f32.mrf.mxu0  ;;  %v9741_v24 = vadd.f32 %v9733_v13, %v9693_v15 }
 0xba5   :  { %v9789_v61 = vadd.f32 %v9781_v31, %v9741_v24  ;;  %v10128_v31 = vpop.permute.xlu0 %10127 }
 0xba8   :  { %v9827_v32 = vpop.f32.mrf.mxu3  ;;  %v9784_v37 = vpop.f32.mrf.mxu2 }
 0xba9   :  { %v9836_v0 = vadd.f32 %v9827_v32, %v9788_v38  ;;  %v14358_v38 = vld [vmem:[%s18770_s18 + $0x18] sm:$0xff] }
 0xbaa   :  { %v9736_v2 = vpop.f32.mrf.mxu1 }
 0xbab   :  { %v9877_v62 = vpop.f32.mrf.mxu0  ;;  %v9884_v23 = vadd.f32 %v9875_v17, %v9836_v0  ;;  %v9742_v39 = vadd.f32 %v9736_v2, %v9694_v63  ;;  %v14357_v0 = vld [vmem:[%s18770_s18 + $0x10] sm:$0xff] }
 0xbad   :  { %v9790_v40 = vadd.f32 %v9784_v37, %v9742_v39 }
 0xbb0   :  { %v9829_v22 = vpop.f32.mrf.mxu3  ;;  %v9786_v9 = vpop.f32.mrf.mxu2 }
 0xbb1   :  { %v9837_v12 = vadd.f32 %v9829_v22, %v9789_v61  ;;  %v14356_v61 = vld [vmem:[%s18770_s18 + $0x8] sm:$0xff] }
 0xbb2   :  { %v9738_v58 = vpop.f32.mrf.mxu1 }
 0xbb3   :  { %v9880_v43 = vpop.f32.mrf.mxu0  ;;  %v9885_v42 = vadd.f32 %v9877_v62, %v9837_v12  ;;  %v14355_v12 = vld [vmem:[%s18770_s18] sm:$0xff] }
 0xbb8   :  { %v9832_v29 = vpop.f32.mrf.mxu3  ;;  %v9969_v60 = vpop.f32.mrf.mxu2 }
 0xbb9   :  { %v9838_v28 = vadd.f32 %v9832_v29, %v9790_v40  ;;  %v10138_v29 = vpop.permute.xlu2 %10137 }
 0xbba   :  { %v9922_v10 = vpop.f32.mrf.mxu1 }
 0xbbb   :  { %v9882_v4 = vpop.f32.mrf.mxu0  ;;  %v9931_v1 = vadd.f32 %v9922_v10, %v9884_v23  ;;  %v9886_v48 = vadd.f32 %v9880_v43, %v9838_v28 }
 0xbbd   :  { %v9978_v53 = vadd.f32 %v9969_v60, %v9931_v1 }
 0xbc0   :  { %v9834_v51 = vpop.f32.mrf.mxu3  ;;  %v9971_v41 = vpop.f32.mrf.mxu2 }
 0xbc1   :  { %v10218_v51 = vld [vmem:[%s18767_s15 + $0x10] sm:$0xff]  ;;  %s14605_s15 = smov 114  }
 0xbc2   :  { %v9924_v34 = vpop.f32.mrf.mxu1 }
 0xbc3   :  { %v10063_v56 = vpop.f32.mrf.mxu0  ;;  %v9932_v11 = vadd.f32 %v9924_v34, %v9885_v42  ;;  %v14362_v34 = vld [vmem:[%s18770_s18 + $0x38] sm:$0xff]  ;;  %s18927_s18 = smov 127  }
 0xbc4   :  { %10327 = vmatpush.bf16.msrb.mxu2 %v14362_v34 }
 0xbc5   :  { %v9979_v27 = vadd.f32 %v9971_v41, %v9932_v11  ;;  %v10237_v41 = vld [vmem:[%s18768_s16] sm:$0xff]  ;;  %s18933_s16 = smov 118  }
 0xbc8   :  { %v10016_v59 = vpop.f32.mrf.mxu3  ;;  %v9974_v52 = vpop.f32.mrf.mxu2  ;;  %10328 = vmatpush.bf16.msrb.mxu2 %v14361_v21 }
 0xbc9   :  { %v10025_v19 = vadd.f32 %v10016_v59, %v9978_v53  ;;  %v10227_v59 = vpop.permute.xlu1 %10226 }
 0xbca   :  { %v9927_v47 = vpop.f32.mrf.mxu1 }
 0xbcb   :  { %v10065_v50 = vpop.f32.mrf.mxu0  ;;  %v10072_v35 = vadd.f32 %v10063_v56, %v10025_v19  ;;  %v9933_v17 = vadd.f32 %v9927_v47, %v9886_v48  ;;  %v10222_v56 = vpop.permute.xlu0 %10221 }
 0xbcc   :  { %10329 = vmatpush.bf16.msrb.mxu2 %v14360_v6 }
 0xbcd   :  { %v9980_v3 = vadd.f32 %v9974_v52, %v9933_v17 }
 0xbd0   :  { %v10018_v7 = vpop.f32.mrf.mxu3  ;;  %v9976_v18 = vpop.f32.mrf.mxu2  ;;  %10330 = vmatpush.bf16.msrb.mxu2 %v14359_v49 }
 0xbd1   :  { %v10026_v63 = vadd.f32 %v10018_v7, %v9979_v27 }
 0xbd2   :  { %v9929_v54 = vpop.f32.mrf.mxu1 }
 0xbd3   :  { %v10068_v57 = vpop.f32.mrf.mxu0  ;;  %v10073_v32 = vadd.f32 %v10065_v50, %v10026_v63 }
 0xbd4   :  { %10331 = vmatpush.bf16.msrb.mxu2 %v14358_v38 }
 0xbd8   :  { %v10021_v16 = vpop.f32.mrf.mxu3  ;;  %10332 = vmatpush.bf16.msrb.mxu2 %v14357_v0 }
 0xbd9   :  { %v10027_v22 = vadd.f32 %v10021_v16, %v9980_v3 }
 0xbda   :  { %v10110_v26 = vpop.f32.mrf.mxu1 }
 0xbdb   :  { %v10119_v44 = vadd.f32 %v10110_v26, %v10072_v35  ;;  %v10070_v8 = vpop.f32.mrf.mxu0  ;;  %v10074_v58 = vadd.f32 %v10068_v57, %v10027_v22 }
 0xbdc   :  { %10333 = vmatpush.bf16.msrb.mxu2 %v14356_v61 }
 0xbdd   :  { %v18263_v13 = vadd.f32 %v10128_v31, %v10119_v44 }
 0xbdf   :  { %v10147_v14 = vmul.f32 %v14499_v45, %v18263_v13 }
 0xbe0   :  { %v10023_v5 = vpop.f32.mrf.mxu3  ;;  %10334 = vmatpush.bf16.msrb.mxu2 %v14355_v12 }
 0xbe1   :  { %10150 = vadd.xlane.f32.xlu0 %v10147_v14  ;;  %v10159_v37 = vmul.f32 %v10147_v14, %v10147_v14 }
 0xbe2   :  { %v10112_v2 = vpop.f32.mrf.mxu1 }
 0xbe3   :  { %v10120_v62 = vadd.f32 %v10112_v2, %v10073_v32  ;;  %10162 = vadd.xlane.f32.xlu2 %v10159_v37 }
 0xbe5   :  { %v18266_v9 = vadd.f32 %v10133_v30, %v10120_v62 }
 0xbe7   :  { %v10148_v55 = vmul.f32 %v14499_v45, %v18266_v9 }
 0xbe9   :  { %10152 = vadd.xlane.f32.xlu1 %v10148_v55  ;;  %v10160_v25 = vmul.f32 %v10148_v55, %v10148_v55 }
 0xbea   :  { %v10115_v43 = vpop.f32.mrf.mxu1 }
 0xbeb   :  { %v10121_v46 = vadd.f32 %v10115_v43, %v10074_v58  ;;  %10164 = vadd.xlane.f32.xlu0 %v10160_v25 }
 0xbed   :  { %v18269_v60 = vadd.f32 %v10138_v29, %v10121_v46 }
 0xbef   :  { %v10149_v33 = vmul.f32 %v14499_v45, %v18269_v60 }
 0xbf1   :  { %10154 = vadd.xlane.f32.xlu1 %v10149_v33  ;;  %v10161_v10 = vmul.f32 %v10149_v33, %v10149_v33 }
 0xbf2   :  { %v10117_v4 = vpop.f32.mrf.mxu1 }
 0xbf3   :  { %10166 = vadd.xlane.f32.xlu2 %v10161_v10 }
 0xbff   :  { %10247 = vperm.xlu0 %14456, %v10238_v20  }
 0xc07   :  { %10252 = vperm.xlu0 %14456, %v10239_v36  }
 0xc0a   :  { %10231 = vperm.xlu1 %14457, %v10218_v51  }
 0xc0b   :  { %10242 = vperm.xlu2 %14458, %v10237_v41  }
 0xc54   :  { %v10151_v52 = vpop.xlane.xlu0 %10150 }
 0xc55   :  { %v10156_v15 = vmul.f32 0.03125, %v10151_v52 }
 0xc56   :  { %v10163_v47 = vpop.xlane.xlu2 %10162 }
 0xc57   :  { %v10171_v24 = vmul.f32 %v10156_v15, %v10156_v15  ;;  %v10168_v50 = vmul.f32 0.03125, %v10163_v47  ;;  %v10177_v32 = vsub.f32 %v18263_v13, %v10156_v15 }
 0xc59   :  { %v10174_v23 = vsub.f32 %v10168_v50, %v10171_v24 }
 0xc5b   :  { %v10180_v1 = vadd.f32 1e-05, %v10174_v23 }
 0xc5c   :  { %v10153_v7 = vpop.xlane.xlu1 %10152 }
 0xc5d   :  { %14509 = vrsqrt.f32 %v10180_v1  ;;  %v10157_v18 = vmul.f32 0.03125, %v10153_v7  ;;  %vm10189_vm10 = vweird.f32 %v10180_v1 }
 0xc5e   :  { %v10165_v54 = vpop.xlane.xlu0 %10164 }
 0xc5f   :  { %v10172_v39 = vmul.f32 %v10157_v18, %v10157_v18  ;;  %v10169_v53 = vmul.f32 0.03125, %v10165_v54  ;;  %v10178_v55 = vsub.f32 %v18266_v9, %v10157_v18 }
 0xc61   :  { %v10175_v57 = vsub.f32 %v10169_v53, %v10172_v39 }
 0xc63   :  { %v14510_v42 = vpop.eup %14509  ;;  %v10181_v19 = vadd.f32 1e-05, %v10175_v57  ;;  %v14363_v57 = vld [vmem:[%s18771_s19] sm:$0xff] }
 0xc64   :  { %v10184_v40 = vmul.f32 %v14510_v42, %v10180_v1  ;;  %v10155_v11 = vpop.xlane.xlu1 %10154  ;;  %vm10190_vm2 = vweird.f32 %v14510_v42 }
 0xc65   :  { %14511 = vrsqrt.f32 %v10181_v19  ;;  %v10158_v16 = vmul.f32 0.03125, %v10155_v11  ;;  %vm10191_vm0 = vmor %vm10189_vm10, %vm10190_vm2  ;;  %vm10199_vm4 = vweird.f32 %v10181_v19 }
 0xc66   :  { %v10185_v28 = vmul.f32 %v14510_v42, %v10184_v40  ;;  %v10167_v35 = vpop.xlane.xlu2 %10166  ;;  %v10350_v40 = vld [vmem:[%s18771_s19 + $0x8] sm:$0xf]  ;;  %vm18946_vm2 = vmmov %vm18944_vm1 }
 0xc67   :  { %v10173_v26 = vmul.f32 %v10158_v16, %v10158_v16  ;;  %v10170_v27 = vmul.f32 0.03125, %v10167_v35  ;;  %v10179_v41 = vsub.f32 %v18269_v60, %v10158_v16  ;;  %v10409_v11 = vunpack.c.l.b16 %v10350_v40  ;;  %vm18947_vm10 = vmmov %vm18944_vm1 }
 0xc68   :  { %v10186_v44 = vmul.f32 0.5, %v10185_v28 }
 0xc69   :  { %v10176_v45 = vsub.f32 %v10170_v27, %v10173_v26  ;;  %v10411_v28 = vpack.c.b16 %v10409_v11, %v10409_v11  ;;  %v14364_v26 = vld [vmem:[%s18771_s19 + $0xc] sm:$0xff] }
 0xc6a   :  { %v10187_v8 = vsub.f32 1.5, %v10186_v44 }
 0xc6b   :  { %v14512_v31 = vpop.eup %14511  ;;  %v10182_v48 = vadd.f32 1e-05, %v10176_v45 }
 0xc6c   :  { %v10194_v63 = vmul.f32 %v14512_v31, %v10181_v19  ;;  %v10188_v17 = vmul.f32 %v14510_v42, %v10187_v8  ;;  %vm10200_vm3 = vweird.f32 %v14512_v31 }
 0xc6d   :  { %14513 = vrsqrt.f32 %v10182_v48  ;;  %vm10201_vm5 = vmor %vm10199_vm4, %vm10200_vm3  ;;  %vm10209_vm6 = vweird.f32 %v10182_v48 }
 0xc6e   :  { %v10195_v14 = vmul.f32 %v14512_v31, %v10194_v63  ;;  %v10192_v5 = vsel %vm10191_vm0, %v14510_v42, %v10188_v17  ;;  %v10243_v33 = vpop.permute.xlu2 %10242  ;;  %v13754_v17 = vld [vmem:[%s18771_s19 + $0x14] sm:$0xf]  ;;  %vm18948_vm0 = vmmov %vm18944_vm1 }
 0xc6f   :  { %v10213_v2 = vmul.f32 %v10192_v5, %v10177_v32  ;;  %v10360_v5 = vunpack.c.l.b16 %v13754_v17  ;;  %vm18949_vm3 = vmmov %vm18948_vm0 }
 0xc70   :  { %v10196_v37 = vmul.f32 0.5, %v10195_v14  ;;  %v11522_v14 = vld [vmem:[%s18772_s20 + $0x8] sm:$0xff]  ;;  %vm18950_vm4 = vmmov %vm18948_vm0 }
 0xc71   :  { %v10234_v58 = vmul.f32 %v10222_v56, %v10213_v2  ;;  %v10248_v13 = vpop.permute.xlu0 %10247  ;;  %v10362_v2 = vpack.c.b16 %v10360_v5, %v10360_v5 }
 0xc72   :  { %v10197_v3 = vsub.f32 1.5, %v10196_v37 }
 0xc73   :  { %v14514_v62 = vpop.eup %14513  ;;  %v10255_v10 = vadd.f32 %v10243_v33, %v10234_v58  ;;  %v11523_v58 = vld [vmem:[%s18772_s20 + $0x10] sm:$0xff] }
 0xc74   :  { %v10204_v30 = vmul.f32 %v14514_v62, %v10182_v48  ;;  %v10198_v22 = vmul.f32 %v14512_v31, %v10197_v3  ;;  %vm10210_vm15 = vweird.f32 %v14514_v62  ;;  %v14365_v3 = vld [vmem:[%s18771_s19 + $0x18] sm:$0xff] }
 0xc75   :  { %v10258_v34 = vmax.f32 %v10255_v10, 0.0  ;;  %vm10211_vm7 = vmor %vm10209_vm6, %vm10210_vm15 }
 0xc76   :  { %v10205_v25 = vmul.f32 %v14514_v62, %v10204_v30  ;;  %v10202_v43 = vsel %vm10201_vm5, %v14512_v31, %v10198_v22  ;;  %v14366_v30 = vld [vmem:[%s18771_s19 + $0x24] sm:$0xff]  ;;  %vm18951_vm5 = vmmov %vm18948_vm0 }
 0xc77   :  { %v10214_v46 = vmul.f32 %v10202_v43, %v10178_v55  ;;  %v11623_v55 = vld [vmem:[%s18773_s21 + $0x8] sm:$0xff]  ;;  %vm18952_vm15 = vmmov %vm18948_vm0 }
 0xc78   :  { %v10206_v29 = vmul.f32 0.5, %v10205_v25  ;;  %v11521_v25 = vld [vmem:[%s18772_s20] sm:$0xff]  ;;  %vm18953_vm6 = vmmov %vm18948_vm0 }
 0xc79   :  { %v10235_v4 = vmul.f32 %v10227_v59, %v10214_v46  ;;  %v10253_v52 = vpop.permute.xlu0 %10252 }
 0xc7a   :  { %v10207_v20 = vsub.f32 1.5, %v10206_v29 }
 0xc7b   :  { %v10256_v36 = vadd.f32 %v10248_v13, %v10235_v4  ;;  %v13769_v4 = vld [vmem:[%s18771_s19 + $0x20] sm:$0xf]  ;;  %v13778_v13 = vld [vmem:[%s18771_s19 + $0x2c] sm:$0xf] }
 0xc7c   :  { %v10208_v51 = vmul.f32 %v14514_v62, %v10207_v20  ;;  %v10232_v49 = vpop.permute.xlu1 %10231  ;;  %v11643_v20 = vld [vmem:[%s18774_s22] sm:$0xff] }
 0xc7d   :  { %v10259_v21 = vmax.f32 %v10256_v36, 0.0  ;;  %v11622_v36 = vld [vmem:[%s18773_s21] sm:$0xff] }
 0xc7e   :  { %v10212_v9 = vsel %vm10211_vm7, %v14514_v62, %v10208_v51  ;;  %v10449_v51 = vunpack.c.l.b16 %v13769_v4  ;;  %vm18954_vm7 = vmmov %vm18948_vm0 }
 0xc7f   :  { %v10261_v6 = vpack.c.bf16 %v10259_v21, %v10258_v34  ;;  %v10215_v56 = vmul.f32 %v10212_v9, %v10179_v41  ;;  %v10496_v41 = vunpack.c.l.b16 %v13778_v13 }
 0xc80   :  { %v10451_v9 = vpack.c.b16 %v10449_v51, %v10449_v51  ;;  %v13841_v51 = vld [vmem:[%s18771_s19 + $0x80] sm:$0xf] }
 0xc81   :  { %10335 = vmatmul.bf16.vlgmr.msrb.gmra.mxu2 %v10261_v6  ;;  %v10236_v38 = vmul.f32 %v10232_v49, %v10215_v56  ;;  %v14367_v6 = vld [vmem:[%s18771_s19 + $0x30] sm:$0xff] }
 0xc83   :  { %v10257_v15 = vadd.f32 %v10253_v52, %v10236_v38  ;;  %v10498_v38 = vpack.c.b16 %v10496_v41, %v10496_v41  ;;  %v14368_v52 = vld [vmem:[%s18771_s19 + $0x3c] sm:$0xff]  ;;  %v13850_v41 = vld [vmem:[%s18771_s19 + $0x8c] sm:$0xf] }
 0xc85   :  { %v10260_v59 = vmax.f32 %v10257_v15, 0.0 }
 0xc87   :  { %v10262_v0 = vpack.c.bf16 %v10260_v59, %v10260_v59 }
 0xc91   :  { %10340 = vmatmul.bf16.gmra.mxu2 %v10262_v0 }
 0xd04   :  { %v10336_v47 = vpop.f32.mrf.mxu2 }
 0xd05   :  { %v10345_v24 = vpack.c.bf16 %v10336_v47, %v10336_v47 }
 0xd07   :  { %v10366_v61 = vunpack.c.l.b16 %v10345_v24 }
 0xd0c   :  { %v10338_v50 = vpop.f32.mrf.mxu2 }
 0xd0d   :  { %v10346_v23 = vpack.c.bf16 %v10338_v50, %v10338_v50  ;;  %v13787_v50 = vld [vmem:[%s18771_s19 + $0x38] sm:$0xf] }
 0xd0f   :  { %v10367_v60 = vunpack.c.l.b16 %v10346_v23  ;;  %v13796_v23 = vld [vmem:[%s18771_s19 + $0x44] sm:$0xf] }
 0xd11   :  { %v18311_v1 = vpack.c.b16 %v10367_v60, %v10366_v61  ;;  %v10543_v61 = vunpack.c.l.b16 %v13787_v50  ;;  %v10590_v60 = vunpack.c.l.b16 %v13796_v23  ;;  %v13859_v50 = vld [vmem:[%s18771_s19 + $0x98] sm:$0xf] }
 0xd13   :  { %10371 = vrot.lane.b32.xlu1 %v18311_v1, %s18927_s18 }
 0xd14   :  { %v10341_v7 = vpop.f32.mrf.mxu2 }
 0xd15   :  { %v10347_v18 = vpack.c.bf16 %v10341_v7, %v10341_v7 }
 0xd17   :  { %v10368_v12 = vunpack.c.l.b16 %v10347_v18  ;;  %v10545_v18 = vpack.c.b16 %v10543_v61, %v10543_v61  ;;  %v13868_v61 = vld [vmem:[%s18771_s19 + $0xa4] sm:$0xf] }
 0xd19   :  { %v18315_v54 = vpack.c.b16 %v10368_v12, %v10368_v12  ;;  %v14369_v12 = vld [vmem:[%s18771_s19 + $0x48] sm:$0xff] }
 0xd1b   :  { %10454 = vrot.lane.b32.xlu1 %v18315_v54, %s18928_s11  ;;  %10501 = vrot.lane.b32.xlu0 %v18315_v54, %s18912_s12  ;;  %v10420_v39 = vsel %vm18929_vm8, %v18315_v54, 0  ;;  %vm18955_vm8 = vmmov %vm18948_vm0 }
 0xd1c   :  { %10373 = vrot.lane.b32.xlu2 %v18315_v54, %s18927_s18  ;;  %v10343_v53 = vpop.f32.mrf.mxu2  ;;  %10428 = vmatpush.bf16.msrb.mxu0 %v10420_v39  ;;  %s18941_s18 = smov 100  }
 0xd1d   :  { %v14370_v53 = vld [vmem:[%s18771_s19 + $0x54] sm:$0xff] }
 0xd20   :  { %10429 = vmatpush.bf16.msrb.mxu0 %v18311_v1 }
 0xd23   :  { %10452 = vrot.lane.b32.xlu1 %v18311_v1, %s18928_s11  ;;  %10499 = vrot.lane.b32.xlu0 %v18311_v1, %s18912_s12  ;;  %s14604_s12 = smov 115  }
 0xd24   :  { %10548 = vrot.lane.b32.xlu2 %v18315_v54, %s18913_s29  ;;  %13765 = vmatmul.msk.bf16.vlgmr.msrb.gmra.mxu0 %vm10376_vm13, %v14363_v57  ;;  %v10592_v57 = vpack.c.b16 %v10590_v60, %v10590_v60  ;;  %v10919_v60 = vunpack.c.l.b16 %v13859_v50 }
 0xd2b   :  { %10736 = vrot.lane.b32.xlu1 %v18315_v54, %s18930_s28  ;;  %10689 = vrot.lane.b32.xlu0 %v18315_v54, %s18931_s3 }
 0xd2c   :  { %10546 = vrot.lane.b32.xlu2 %v18311_v1, %s18913_s29 }
 0xd33   :  { %10593 = vrot.lane.b32.xlu1 %v18311_v1, %s14602_s5  ;;  %10642 = vrot.lane.b32.xlu0 %v18315_v54, %s14603_s13 }
 0xd34   :  { %10687 = vrot.lane.b32.xlu2 %v18311_v1, %s18931_s3  ;;  %13766 = vmatmul.msk.bf16.gmra.mxu0 %vm10376_vm13, %v10411_v28  ;;  %v13805_v28 = vld [vmem:[%s18771_s19 + $0x50] sm:$0xf] }
 0xd3b   :  { %10877 = vrot.lane.b32.xlu1 %v18315_v54, %s14604_s12  ;;  %10734 = vrot.lane.b32.xlu0 %v18311_v1, %s18930_s28  ;;  %s18942_s28 = smov 103  }
 0xd3c   :  { %10595 = vrot.lane.b32.xlu2 %v18315_v54, %s14602_s5 }
 0xd43   :  { %10830 = vrot.lane.b32.xlu1 %v18315_v54, %s18932_s2  ;;  %10875 = vrot.lane.b32.xlu0 %v18311_v1, %s14604_s12 }
 0xd44   :  { %10640 = vrot.lane.b32.xlu2 %v18311_v1, %s14603_s13 }
 0xd4b   :  { %10922 = vrot.lane.b32.xlu1 %v18311_v1, %s14605_s15  ;;  %10783 = vrot.lane.b32.xlu0 %v18315_v54, %s18933_s16 }
 0xd4c   :  { %10924 = vrot.lane.b32.xlu2 %v18315_v54, %s14605_s15 }
 0xd53   :  { %11063 = vrot.lane.b32.xlu1 %v18311_v1, %s18916_s1  ;;  %10828 = vrot.lane.b32.xlu0 %v18311_v1, %s18932_s2 }
 0xd54   :  { %10781 = vrot.lane.b32.xlu2 %v18311_v1, %s18933_s16 }
 0xd5b   :  { %10971 = vrot.lane.b32.xlu1 %v18315_v54, %s14606_s17  ;;  %11112 = vrot.lane.b32.xlu0 %v18315_v54, %s18917_s6 }
 0xd5c   :  { %11065 = vrot.lane.b32.xlu2 %v18315_v54, %s18916_s1  ;;  %s18938_s1 = smov 101  }
 0xd63   :  { %11016 = vrot.lane.b32.xlu1 %v18311_v1, %s18914_s8  ;;  %10969 = vrot.lane.b32.xlu0 %v18311_v1, %s14606_s17 }
 0xd64   :  { %11018 = vrot.lane.b32.xlu2 %v18315_v54, %s18914_s8  ;;  %s18936_s8 = smov 107  }
 0xd6b   :  { %11300 = vrot.lane.b32.xlu1 %v18315_v54, %s18934_s0  ;;  %11253 = vrot.lane.b32.xlu0 %v18315_v54, %s18935_s30 }
 0xd6c   :  { %11110 = vrot.lane.b32.xlu2 %v18311_v1, %s18917_s6 }
 0xd73   :  { %11157 = vrot.lane.b32.xlu1 %v18311_v1, %s18918_s9  ;;  %11206 = vrot.lane.b32.xlu0 %v18315_v54, %s18936_s8 }
 0xd74   :  { %11251 = vrot.lane.b32.xlu2 %v18311_v1, %s18935_s30 }
 0xd76   :  { %v10374_v42 = vpop.permute.xlu2 %10373 }
 0xd77   :  { %v10384_v19 = vsel %vm18937_vm14, %v10374_v42, 0  ;;  %vm18956_vm14 = vmmov %vm18948_vm0 }
 0xd78   :  { %10392 = vmatpush.bf16.msra.mxu3 %v10384_v19 }
 0xd7b   :  { %11441 = vrot.lane.b32.xlu1 %v18315_v54, %s18938_s1  ;;  %11298 = vrot.lane.b32.xlu0 %v18311_v1, %s18934_s0 }
 0xd7c   :  { %11159 = vrot.lane.b32.xlu2 %v18315_v54, %s18918_s9 }
 0xd7e   :  { %v10549_v16 = vpop.permute.xlu2 %10548 }
 0xd7f   :  { %v10558_v27 = vsel %vm18940_vm11, %v10549_v16, 0  ;;  %vm18957_vm11 = vmmov %vm18948_vm0 }
 0xd83   :  { %11394 = vrot.lane.b32.xlu1 %v18315_v54, %s18939_s27  ;;  %11439 = vrot.lane.b32.xlu0 %v18311_v1, %s18938_s1 }
 0xd84   :  { %11204 = vrot.lane.b32.xlu2 %v18311_v1, %s18936_s8 }
 0xd85   :  { %v10372_v35 = vpop.permute.xlu1 %10371 }
 0xd86   :  { %v10547_v44 = vpop.permute.xlu2 %10546  ;;  %10393 = vmatpush.bf16.msra.mxu3 %v10372_v35  ;;  %v13814_v35 = vld [vmem:[%s18771_s19 + $0x5c] sm:$0xf] }
 0xd89   :  { %13759 = vmatmul.msk.bf16.vlgmr.msra.gmra.mxu3 %vm10376_vm13, %v14364_v26  ;;  %v10637_v26 = vunpack.c.l.b16 %v13805_v28  ;;  %v13877_v28 = vld [vmem:[%s18771_s19 + $0xb0] sm:$0xf] }
 0xd8a   :  { %10566 = vmatpush.bf16.msrb.mxu3 %v10558_v27  ;;  %v10684_v27 = vunpack.c.l.b16 %v13814_v35 }
 0xd8b   :  { %11486 = vrot.lane.b32.xlu1 %v18311_v1, %s18941_s18  ;;  %11347 = vrot.lane.b32.xlu0 %v18315_v54, %s18942_s28 }
 0xd8c   :  { %11488 = vrot.lane.b32.xlu2 %v18315_v54, %s18941_s18  ;;  %v10686_v17 = vpack.c.b16 %v10684_v27, %v10684_v27  ;;  %v11013_v27 = vunpack.c.l.b16 %v13877_v28  ;;  %v14386_v28 = vld [vmem:[%s18771_s19 + $0x114] sm:$0xff] }
 0xd8d   :  { %v10455_v45 = vpop.permute.xlu1 %10454  ;;  %v10502_v8 = vpop.permute.xlu0 %10501 }
 0xd8e   :  { %10567 = vmatpush.bf16.msrb.mxu3 %v10547_v44  ;;  %v10464_v31 = vsel %vm18943_vm9, %v10455_v45, 0  ;;  %v10511_v48 = vsel %vm18944_vm1, %v10502_v8, 0  ;;  %v10688_v63 = vpop.permute.xlu2 %10687  ;;  %v10639_v8 = vpack.c.b16 %v10637_v26, %v10637_v26  ;;  %vm18958_vm9 = vmmov %vm18948_vm0  ;;  %v13886_v26 = vld [vmem:[%s18771_s19 + $0xbc] sm:$0xf] }
 0xd8f   :  { %10472 = vmatpush.bf16.msrb.mxu1 %v10464_v31  ;;  %10519 = vmatpush.bf16.msra.mxu2 %v10511_v48  ;;  %v14371_v31 = vld [vmem:[%s18771_s19 + $0x60] sm:$0xff]  ;;  %vm18959_vm1 = vmmov %vm18948_vm0 }
 0xd93   :  { %11531 = vperm.xlu1 %14457, %v11522_v14   ;;  %11392 = vrot.lane.b32.xlu0 %v18311_v1, %s18939_s27  ;;  %v14372_v14 = vld [vmem:[%s18771_s19 + $0x6c] sm:$0xff] }
 0xd94   :  { %11345 = vrot.lane.b32.xlu2 %v18311_v1, %s18942_s28 }
 0xd95   :  { %v10453_v32 = vpop.permute.xlu1 %10452  ;;  %v10500_v37 = vpop.permute.xlu0 %10499 }
 0xd96   :  { %v10596_v62 = vpop.permute.xlu2 %10595  ;;  %10473 = vmatpush.bf16.msrb.mxu1 %v10453_v32  ;;  %10520 = vmatpush.bf16.msra.mxu2 %v10500_v37 }
 0xd97   :  { %v10605_v22 = vsel %vm18945_vm12, %v10596_v62, 0  ;;  %v13823_v62 = vld [vmem:[%s18771_s19 + $0x68] sm:$0xf]  ;;  %vm18960_vm12 = vmmov %vm18948_vm0 }
 0xd98   :  { %10613 = vmatpush.bf16.msra.mxu0 %v10605_v22  ;;  %v10731_v22 = vunpack.c.l.b16 %v13823_v62  ;;  %v13904_v62 = vld [vmem:[%s18771_s19 + $0xd4] sm:$0xf] }
 0xd99   :  { %13760 = vmatmul.msk.bf16.gmra.mxu3 %vm10376_vm13, %v10362_v2  ;;  %13774 = vmatmul.msk.bf16.vlgmr.msrb.gmra.mxu1 %vm10376_vm13, %v14365_v3 }
 0xd9a   :  { %13783 = vmatmul.msk.bf16.vlgmr.msra.gmra.mxu2 %vm10376_vm13, %v14366_v30  ;;  %v13832_v30 = vld [vmem:[%s18771_s19 + $0x74] sm:$0xf] }
 0xd9b   :  { %11632 = vperm.xlu1 %14457, %v11623_v55   ;;  %11536 = vperm.xlu0 %14456, %v11523_v58   ;;  %v10778_v55 = vunpack.c.l.b16 %v13832_v30 }
 0xd9c   :  { %11526 = vperm.xlu2 %14458, %v11521_v25  }
 0xd9d   :  { %v10737_v43 = vpop.permute.xlu1 %10736  ;;  %v10690_v46 = vpop.permute.xlu0 %10689 }
 0xd9e   :  { %v10746_v29 = vsel %vm18946_vm2, %v10737_v43, 0  ;;  %v10699_v33 = vsel %vm18947_vm10, %v10690_v46, 0  ;;  %v10641_v10 = vpop.permute.xlu2 %10640  ;;  %v10733_v43 = vpack.c.b16 %v10731_v22, %v10731_v22  ;;  %v14373_v46 = vld [vmem:[%s18771_s19 + $0x78] sm:$0xff]  ;;  %vm18961_vm2 = vmmov %vm18948_vm0  ;;  %v11154_v22 = vunpack.c.l.b16 %v13904_v62 }
 0xd9f   :  { %10707 = vmatpush.bf16.msrb.mxu2 %v10699_v33  ;;  %10754 = vmatpush.bf16.msra.mxu3 %v10746_v29  ;;  %v14374_v33 = vld [vmem:[%s18771_s19 + $0x84] sm:$0xff]  ;;  %vm18962_vm10 = vmmov %vm18948_vm0 }
 0xda1   :  { %v10431_v23 = vpop.f32.mrf.mxu0 }
 0xda3   :  { %11648 = vperm.xlu0 %14456, %v11643_v20   ;;  %10708 = vmatpush.bf16.msrb.mxu2 %v10688_v63 }
 0xda4   :  { %11627 = vperm.xlu2 %14458, %v11622_v36  }
 0xda5   :  { %v10594_v34 = vpop.permute.xlu1 %10593  ;;  %v10643_v21 = vpop.permute.xlu0 %10642 }
 0xda6   :  { %v10652_v56 = vsel %vm18948_vm0, %v10643_v21, 0  ;;  %v10925_v49 = vpop.permute.xlu2 %10924  ;;  %10614 = vmatpush.bf16.msra.mxu0 %v10594_v34  ;;  %v10825_v34 = vunpack.c.l.b16 %v13841_v51  ;;  %v10872_v21 = vunpack.c.l.b16 %v13850_v41  ;;  %v13913_v51 = vld [vmem:[%s18771_s19 + $0xe0] sm:$0xf]  ;;  %v13922_v41 = vld [vmem:[%s18771_s19 + $0xec] sm:$0xf] }
 0xda7   :  { %10660 = vmatpush.bf16.msra.mxu1 %v10652_v56  ;;  %v10934_v0 = vsel %vm18949_vm3, %v10925_v49, 0  ;;  %v14375_v49 = vld [vmem:[%s18771_s19 + $0x90] sm:$0xff]  ;;  %vm18963_vm3 = vmmov %vm18948_vm0 }
 0xda8   :  { %v10827_v56 = vpack.c.b16 %v10825_v34, %v10825_v34  ;;  %v11201_v34 = vunpack.c.l.b16 %v13913_v51  ;;  %v13967_v51 = vld [vmem:[%s18771_s19 + $0x128] sm:$0xf] }
 0xda9   :  { %13775 = vmatmul.msk.bf16.gmra.mxu1 %vm10376_vm13, %v10451_v9  ;;  %13792 = vmatmul.msk.bf16.vlgmr.msrb.gmra.mxu3 %vm10376_vm13, %v14367_v6 }
 0xdaa   :  { %13784 = vmatmul.msk.bf16.gmra.mxu2 %vm10376_vm13, %v10498_v38  ;;  %13801 = vmatmul.msk.bf16.vlgmr.msra.gmra.mxu0 %vm10376_vm13, %v14368_v52  ;;  %v10874_v52 = vpack.c.b16 %v10872_v21, %v10872_v21  ;;  %v11248_v21 = vunpack.c.l.b16 %v13922_v41 }
 0xdab   :  { %10661 = vmatpush.bf16.msra.mxu1 %v10641_v10  ;;  %v10780_v10 = vpack.c.b16 %v10778_v55, %v10778_v55 }
 0xdad   :  { %v10878_v15 = vpop.permute.xlu1 %10877  ;;  %v10735_v59 = vpop.permute.xlu0 %10734 }
 0xdae   :  { %v10887_v47 = vsel %vm18950_vm4, %v10878_v15, 0  ;;  %v10782_v24 = vpop.permute.xlu2 %10781  ;;  %10755 = vmatpush.bf16.msra.mxu3 %v10735_v59  ;;  %v14376_v15 = vld [vmem:[%s18771_s19 + $0x9c] sm:$0xff]  ;;  %vm18964_vm4 = vcmask 588800  }
 0xdaf   :  { %10895 = vmatpush.bf16.msra.mxu2 %v10887_v47 }
 0xdb2   :  { %10942 = vmatpush.bf16.msrb.mxu3 %v10934_v0 }
 0xdb5   :  { %v10831_v1 = vpop.permute.xlu1 %10830  ;;  %v10876_v7 = vpop.permute.xlu0 %10875 }
 0xdb6   :  { %v10840_v54 = vsel %vm18951_vm5, %v10831_v1, 0  ;;  %v11066_v39 = vpop.permute.xlu2 %11065  ;;  %10896 = vmatpush.bf16.msra.mxu2 %v10876_v7  ;;  %v10966_v1 = vunpack.c.l.b16 %v13868_v61  ;;  %vm18965_vm5 = vmmov %vm18964_vm4 }
 0xdb7   :  { %10848 = vmatpush.bf16.msrb.mxu1 %v10840_v54  ;;  %v11075_v42 = vsel %vm18952_vm15, %v11066_v39, 0  ;;  %v14378_v39 = vld [vmem:[%s18771_s19 + $0xb4] sm:$0xff]  ;;  %vm18966_vm15 = vmmov %vm18964_vm4 }
 0xdb9   :  { %13793 = vmatmul.msk.bf16.gmra.mxu3 %vm10376_vm13, %v10545_v18  ;;  %13810 = vmatmul.msk.bf16.vlgmr.msra.gmra.mxu1 %vm10376_vm13, %v14369_v12  ;;  %v10921_v18 = vpack.c.b16 %v10919_v60, %v10919_v60  ;;  %v14377_v12 = vld [vmem:[%s18771_s19 + $0xa8] sm:$0xff]  ;;  %v13931_v60 = vld [vmem:[%s18771_s19 + $0xf8] sm:$0xf] }
 0xdba   :  { %13819 = vmatmul.msk.bf16.vlgmr.msrb.gmra.mxu2 %vm10376_vm13, %v14370_v53  ;;  %13802 = vmatmul.msk.bf16.gmra.mxu0 %vm10376_vm13, %v10592_v57  ;;  %v18560_v53 = vpop.f32.mrf.mxu0  ;;  %v10968_v57 = vpack.c.b16 %v10966_v1, %v10966_v1 }
 0xdbb   :  { %11083 = vmatpush.bf16.msrb.mxu2 %v11075_v42 }
 0xdbd   :  { %v10923_v19 = vpop.permute.xlu1 %10922  ;;  %v10784_v40 = vpop.permute.xlu0 %10783 }
 0xdbe   :  { %v10793_v11 = vsel %vm18953_vm6, %v10784_v40, 0  ;;  %v11019_v16 = vpop.permute.xlu2 %11018  ;;  %10943 = vmatpush.bf16.msrb.mxu3 %v10923_v19  ;;  %vm18967_vm6 = vmmov %vm18964_vm4 }
 0xdbf   :  { %10801 = vmatpush.bf16.msrb.mxu0 %v10793_v11  ;;  %v11028_v48 = vsel %vm18954_vm7, %v11019_v16, 0  ;;  %vm18968_vm7 = vmmov %vm18964_vm4 }
 0xdc2   :  { %v10436_v35 = vpop.f32.mrf.mxu0 }
 0xdc3   :  { %10802 = vmatpush.bf16.msrb.mxu0 %v10782_v24 }
 0xdc5   :  { %v11064_v44 = vpop.permute.xlu1 %11063  ;;  %v10829_v45 = vpop.permute.xlu0 %10828 }
 0xdc6   :  { %v11111_v63 = vpop.permute.xlu2 %11110  ;;  %10849 = vmatpush.bf16.msrb.mxu1 %v10829_v45  ;;  %11084 = vmatpush.bf16.msrb.mxu2 %v11064_v44  ;;  %v11060_v45 = vunpack.c.l.b16 %v13886_v26 }
 0xdc9   :  { %13811 = vmatmul.msk.bf16.gmra.mxu1 %vm10376_vm13, %v10639_v8  ;;  %13828 = vmatmul.msk.bf16.vlgmr.msra.gmra.mxu3 %vm10376_vm13, %v14371_v31  ;;  %v11015_v31 = vpack.c.b16 %v11013_v27, %v11013_v27 }
 0xdca   :  { %11036 = vmatpush.bf16.msra.mxu1 %v11028_v48  ;;  %13820 = vmatmul.msk.bf16.gmra.mxu2 %vm10376_vm13, %v10686_v17  ;;  %v14379_v48 = vld [vmem:[%s18771_s19 + $0xc0] sm:$0xff]  ;;  %v10438_v17 = vpop.f32.mrf.mxu0 }
 0xdcb   :  { %13837 = vmatmul.msk.bf16.vlgmr.msrb.gmra.mxu0 %vm10376_vm13, %v14372_v14  ;;  %v14380_v14 = vld [vmem:[%s18771_s19 + $0xcc] sm:$0xff] }
 0xdcd   :  { %v10972_v5 = vpop.permute.xlu1 %10971  ;;  %v11113_v32 = vpop.permute.xlu0 %11112 }
 0xdce   :  { %v10981_v37 = vsel %vm18955_vm8, %v10972_v5, 0  ;;  %v11122_v2 = vsel %vm18956_vm14, %v11113_v32, 0  ;;  %v11252_v3 = vpop.permute.xlu2 %11251  ;;  %vm18969_vm8 = vmmov %vm18964_vm4 }
 0xdcf   :  { %10989 = vmatpush.bf16.msra.mxu0 %v10981_v37  ;;  %11130 = vmatpush.bf16.msra.mxu3 %v11122_v2  ;;  %vm18970_vm14 = vmmov %vm18948_vm0 }
 0xdd3   :  { %11131 = vmatpush.bf16.msra.mxu3 %v11111_v63  ;;  %v11062_v63 = vpack.c.b16 %v11060_v45, %v11060_v45 }
 0xdd5   :  { %v11017_v58 = vpop.permute.xlu1 %11016  ;;  %v10970_v25 = vpop.permute.xlu0 %10969 }
 0xdd6   :  { %v11160_v29 = vpop.permute.xlu2 %11159  ;;  %10990 = vmatpush.bf16.msra.mxu0 %v10970_v25  ;;  %11037 = vmatpush.bf16.msra.mxu1 %v11017_v58  ;;  %v14381_v25 = vld [vmem:[%s18771_s19 + $0xd8] sm:$0xff] }
 0xdd7   :  { %v11169_v4 = vsel %vm18957_vm11, %v11160_v29, 0 }
 0xdd9   :  { %13829 = vmatmul.msk.bf16.gmra.mxu3 %vm10376_vm13, %v10733_v43  ;;  %13846 = vmatmul.msk.bf16.vlgmr.msrb.gmra.mxu1 %vm10376_vm13, %v14373_v46  ;;  %v14382_v46 = vld [vmem:[%s18771_s19 + $0xe4] sm:$0xff] }
 0xdda   :  { %11177 = vmatpush.bf16.msrb.mxu0 %v11169_v4  ;;  %13855 = vmatmul.msk.bf16.vlgmr.msra.gmra.mxu2 %vm10376_vm13, %v14374_v33  ;;  %v11156_v33 = vpack.c.b16 %v11154_v22, %v11154_v22 }
 0xddb   :  { %13838 = vmatmul.msk.bf16.gmra.mxu0 %vm10376_vm13, %v10780_v10 }
 0xddd   :  { %v11301_v13 = vpop.permute.xlu1 %11300  ;;  %v11254_v20 = vpop.permute.xlu0 %11253 }
 0xdde   :  { %v11263_v36 = vsel %vm18958_vm9, %v11254_v20, 0  ;;  %v11310_v59 = vsel %vm18960_vm12, %v11301_v13, 0  ;;  %v11205_v0 = vpop.permute.xlu2 %11204 }
 0xddf   :  { %11271 = vmatpush.bf16.msra.mxu2 %v11263_v36 }
 0xde3   :  { %11272 = vmatpush.bf16.msra.mxu2 %v11252_v3  ;;  %v13895_v3 = vld [vmem:[%s18771_s19 + $0xc8] sm:$0xf] }
 0xde4   :  { %v11107_v30 = vunpack.c.l.b16 %v13895_v3 }
 0xde5   :  { %v11158_v9 = vpop.permute.xlu1 %11157  ;;  %v11207_v6 = vpop.permute.xlu0 %11206 }
 0xde6   :  { %v11216_v38 = vsel %vm18959_vm1, %v11207_v6, 0  ;;  %11178 = vmatpush.bf16.msrb.mxu0 %v11158_v9  ;;  %v11489_v42 = vpop.permute.xlu2 %11488  ;;  %v11109_v58 = vpack.c.b16 %v11107_v30, %v11107_v30 }
 0xde7   :  { %11224 = vmatpush.bf16.msrb.mxu1 %v11216_v38  ;;  %v11498_v5 = vsel %vm18963_vm3, %v11489_v42, 0 }
 0xde9   :  { %13847 = vmatmul.msk.bf16.gmra.mxu1 %vm10376_vm13, %v10827_v56  ;;  %13864 = vmatmul.msk.bf16.vlgmr.msrb.gmra.mxu3 %vm10376_vm13, %v14375_v49  ;;  %v11203_v56 = vpack.c.b16 %v11201_v34, %v11201_v34  ;;  %v14383_v49 = vld [vmem:[%s18771_s19 + $0xf0] sm:$0xff] }
 0xdea   :  { %13856 = vmatmul.msk.bf16.gmra.mxu2 %vm10376_vm13, %v10874_v52  ;;  %11318 = vmatpush.bf16.msrb.mxu3 %v11310_v59  ;;  %v11250_v52 = vpack.c.b16 %v11248_v21, %v11248_v21  ;;  %v11483_v21 = vunpack.c.l.b16 %v13967_v51 }
 0xdeb   :  { %11225 = vmatpush.bf16.msrb.mxu1 %v11205_v0  ;;  %13873 = vmatmul.msk.bf16.vlgmr.msra.gmra.mxu0 %vm10376_vm13, %v14376_v15  ;;  %v14384_v0 = vld [vmem:[%s18771_s19 + $0xfc] sm:$0xff] }
 0xded   :  { %v11442_v47 = vpop.permute.xlu1 %11441  ;;  %v11299_v24 = vpop.permute.xlu0 %11298 }
 0xdee   :  { %11319 = vmatpush.bf16.msrb.mxu3 %v11299_v24  ;;  %v11451_v40 = vsel %vm18962_vm10, %v11442_v47, 0  ;;  %v11346_v44 = vpop.permute.xlu2 %11345 }
 0xdf5   :  { %v11440_v7 = vpop.permute.xlu0 %11439  ;;  %v11395_v54 = vpop.permute.xlu1 %11394 }
 0xdf6   :  { %v11404_v19 = vsel %vm18961_vm2, %v11395_v54, 0 }
 0xdf9   :  { %13865 = vmatmul.msk.bf16.gmra.mxu3 %vm10376_vm13, %v10921_v18  ;;  %13882 = vmatmul.msk.bf16.vlgmr.msra.gmra.mxu1 %vm10376_vm13, %v14377_v12  ;;  %v13940_v18 = vld [vmem:[%s18771_s19 + $0x104] sm:$0xf]  ;;  %v11295_v12 = vunpack.c.l.b16 %v13931_v60 }
 0xdfa   :  { %13891 = vmatmul.msk.bf16.vlgmr.msrb.gmra.mxu2 %vm10376_vm13, %v14378_v39  ;;  %11412 = vmatpush.bf16.msra.mxu1 %v11404_v19  ;;  %v11342_v39 = vunpack.c.l.b16 %v13940_v18 }
 0xdfb   :  { %11459 = vmatpush.bf16.msrb.mxu2 %v11451_v40  ;;  %13874 = vmatmul.msk.bf16.gmra.mxu0 %vm10376_vm13, %v10968_v57  ;;  %v11297_v40 = vpack.c.b16 %v11295_v12, %v11295_v12 }
 0xdfd   :  { %v11348_v11 = vpop.permute.xlu0 %11347  ;;  %v11487_v37 = vpop.permute.xlu1 %11486 }
 0xdfe   :  { %v11357_v16 = vsel %vm18948_vm0, %v11348_v11, 0  ;;  %v14385_v11 = vld [vmem:[%s18771_s19 + $0x108] sm:$0xff] }
 0xdff   :  { %11460 = vmatpush.bf16.msrb.mxu2 %v11440_v7  ;;  %11365 = vmatpush.bf16.msra.mxu0 %v11357_v16 }
 0xe03   :  { %11366 = vmatpush.bf16.msra.mxu0 %v11346_v44  ;;  %v11344_v44 = vpack.c.b16 %v11342_v39, %v11342_v39 }
 0xe05   :  { %v11393_v8 = vpop.permute.xlu0 %11392 }
 0xe06   :  { %11413 = vmatpush.bf16.msra.mxu1 %v11393_v8 }
 0xe09   :  { %13883 = vmatmul.msk.bf16.gmra.mxu1 %vm10376_vm13, %v11015_v31  ;;  %13900 = vmatmul.msk.bf16.vlgmr.msra.gmra.mxu3 %vm10376_vm13, %v14379_v48 }
 0xe0a   :  { %13892 = vmatmul.msk.bf16.gmra.mxu2 %vm10376_vm13, %v11062_v63  ;;  %11506 = vmatpush.bf16.msra.mxu3 %v11498_v5 }
 0xe0b   :  { %13909 = vmatmul.msk.bf16.vlgmr.msrb.gmra.mxu0 %vm10376_vm13, %v14380_v14  ;;  %v13949_v14 = vld [vmem:[%s18771_s19 + $0x110] sm:$0xf] }
 0xe0c   :  { %v10395_v32 = vpop.f32.mrf.mxu3  ;;  %v11389_v3 = vunpack.c.l.b16 %v13949_v14 }
 0xe0d   :  { %v10432_v2 = vadd.f32 %v10431_v23, %v10395_v32 }
 0xe0e   :  { %11507 = vmatpush.bf16.msra.mxu3 %v11487_v37 }
 0xe14   :  { %v10397_v55 = vpop.f32.mrf.mxu3 }
 0xe15   :  { %v10434_v54 = vadd.f32 %v18560_v53, %v10397_v55  ;;  %v11391_v55 = vpack.c.b16 %v11389_v3, %v11389_v3 }
 0xe16   :  { %v10475_v43 = vpop.f32.mrf.mxu1 }
 0xe17   :  { %v10484_v29 = vadd.f32 %v10475_v43, %v10432_v2  ;;  %v13958_v2 = vld [vmem:[%s18771_s19 + $0x11c] sm:$0xf] }
 0xe18   :  { %v11436_v62 = vunpack.c.l.b16 %v13958_v2 }
 0xe19   :  { %13901 = vmatmul.msk.bf16.gmra.mxu3 %vm10376_vm13, %v11109_v58  ;;  %13918 = vmatmul.msk.bf16.vlgmr.msrb.gmra.mxu1 %vm10376_vm13, %v14381_v25  ;;  %v14387_v58 = vld [vmem:[%s18771_s19 + $0x120] sm:$0xff] }
 0xe1a   :  { %13927 = vmatmul.msk.bf16.vlgmr.msra.gmra.mxu2 %vm10376_vm13, %v14382_v46  ;;  %v11438_v46 = vpack.c.b16 %v11436_v62, %v11436_v62 }
 0xe1b   :  { %13910 = vmatmul.msk.bf16.gmra.mxu0 %vm10376_vm13, %v11156_v33 }
 0xe1c   :  { %v10400_v10 = vpop.f32.mrf.mxu3 }
 0xe1d   :  { %v10437_v4 = vadd.f32 %v10436_v35, %v10400_v10  ;;  %v10522_v13 = vpop.f32.mrf.mxu2 }
 0xe1e   :  { %v10531_v20 = vadd.f32 %v10522_v13, %v10484_v29  ;;  %v10477_v36 = vpop.f32.mrf.mxu1 }
 0xe1f   :  { %v10485_v42 = vadd.f32 %v10477_v36, %v10434_v54 }
 0xe24   :  { %v10402_v9 = vpop.f32.mrf.mxu3 }
 0xe25   :  { %v10524_v6 = vpop.f32.mrf.mxu2 }
 0xe26   :  { %v10480_v38 = vpop.f32.mrf.mxu1  ;;  %v10532_v35 = vadd.f32 %v10524_v6, %v10485_v42 }
 0xe27   :  { %v10486_v15 = vadd.f32 %v10480_v38, %v10437_v4  ;;  %v10616_v59 = vpop.f32.mrf.mxu0 }
 0xe29   :  { %13919 = vmatmul.msk.bf16.gmra.mxu1 %vm10376_vm13, %v11203_v56  ;;  %13936 = vmatmul.msk.bf16.vlgmr.msrb.gmra.mxu3 %vm10376_vm13, %v14383_v49  ;;  %v11485_v49 = vpack.c.b16 %v11483_v21, %v11483_v21 }
 0xe2a   :  { %13928 = vmatmul.msk.bf16.gmra.mxu2 %vm10376_vm13, %v11250_v52 }
 0xe2b   :  { %13945 = vmatmul.msk.bf16.vlgmr.msra.gmra.mxu0 %vm10376_vm13, %v14384_v0 }
 0xe2c   :  { %v10569_v47 = vpop.f32.mrf.mxu3 }
 0xe2d   :  { %v10527_v24 = vpop.f32.mrf.mxu2  ;;  %v10578_v50 = vadd.f32 %v10569_v47, %v10531_v20 }
 0xe2e   :  { %v10533_v23 = vadd.f32 %v10527_v24, %v10486_v15  ;;  %v10482_v61 = vpop.f32.mrf.mxu1 }
 0xe2f   :  { %v10625_v1 = vadd.f32 %v10616_v59, %v10578_v50  ;;  %v10618_v7 = vpop.f32.mrf.mxu0 }
 0xe34   :  { %v10571_v57 = vpop.f32.mrf.mxu3 }
 0xe35   :  { %v10529_v19 = vpop.f32.mrf.mxu2  ;;  %v10579_v45 = vadd.f32 %v10571_v57, %v10532_v35 }
 0xe36   :  { %v10663_v16 = vpop.f32.mrf.mxu1 }
 0xe37   :  { %v10672_v26 = vadd.f32 %v10663_v16, %v10625_v1  ;;  %v10621_v27 = vpop.f32.mrf.mxu0  ;;  %v10626_v8 = vadd.f32 %v10618_v7, %v10579_v45 }
 0xe39   :  { %13937 = vmatmul.msk.bf16.gmra.mxu3 %vm10376_vm13, %v11297_v40  ;;  %13954 = vmatmul.msk.bf16.vlgmr.msra.gmra.mxu1 %vm10376_vm13, %v14385_v11 }
 0xe3a   :  { %13963 = vmatmul.msk.bf16.vlgmr.msrb.gmra.mxu2 %vm10376_vm13, %v14386_v28 }
 0xe3b   :  { %13946 = vmatmul.msk.bf16.gmra.mxu0 %vm10376_vm13, %v11344_v44 }
 0xe3c   :  { %v10574_v53 = vpop.f32.mrf.mxu3 }
 0xe3d   :  { %v10580_v31 = vadd.f32 %v10574_v53, %v10533_v23  ;;  %v10710_v48 = vpop.f32.mrf.mxu2 }
 0xe3e   :  { %v10719_v63 = vadd.f32 %v10710_v48, %v10672_v26  ;;  %v10665_v17 = vpop.f32.mrf.mxu1 }
 0xe3f   :  { %v10627_v5 = vadd.f32 %v10621_v27, %v10580_v31  ;;  %v10673_v32 = vadd.f32 %v10665_v17, %v10626_v8  ;;  %v10623_v37 = vpop.f32.mrf.mxu0 }
 0xe44   :  { %v10576_v30 = vpop.f32.mrf.mxu3 }
 0xe45   :  { %v10712_v22 = vpop.f32.mrf.mxu2 }
 0xe46   :  { %v10720_v25 = vadd.f32 %v10712_v22, %v10673_v32  ;;  %v10668_v43 = vpop.f32.mrf.mxu1 }
 0xe47   :  { %v10674_v29 = vadd.f32 %v10668_v43, %v10627_v5 }
 0xe48   :  { %v10804_v33 = vpop.f32.mrf.mxu0 }
 0xe49   :  { %13955 = vmatmul.msk.bf16.gmra.mxu1 %vm10376_vm13, %v11391_v55  ;;  %13972 = vmatmul.msk.bf16.vlgmr.msra.gmra.mxu3 %vm10376_vm13, %v14387_v58 }
 0xe4a   :  { %13964 = vmatmul.msk.bf16.gmra.mxu2 %vm10376_vm13, %v11438_v46 }
 0xe4c   :  { %v10757_v10 = vpop.f32.mrf.mxu3 }
 0xe4d   :  { %v10715_v4 = vpop.f32.mrf.mxu2  ;;  %v10766_v13 = vadd.f32 %v10757_v10, %v10719_v63 }
 0xe4e   :  { %v10721_v20 = vadd.f32 %v10715_v4, %v10674_v29  ;;  %v10670_v36 = vpop.f32.mrf.mxu1 }
 0xe4f   :  { %v10813_v41 = vadd.f32 %v10804_v33, %v10766_v13 }
 0xe50   :  { %v10806_v34 = vpop.f32.mrf.mxu0 }
 0xe54   :  { %v10759_v9 = vpop.f32.mrf.mxu3 }
 0xe55   :  { %v10717_v6 = vpop.f32.mrf.mxu2  ;;  %v10767_v56 = vadd.f32 %v10759_v9, %v10720_v25 }
 0xe56   :  { %v10851_v38 = vpop.f32.mrf.mxu1 }
 0xe57   :  { %v10814_v52 = vadd.f32 %v10806_v34, %v10767_v56  ;;  %v10860_v15 = vadd.f32 %v10851_v38, %v10813_v41 }
 0xe58   :  { %v10809_v59 = vpop.f32.mrf.mxu0 }
 0xe59   :  { %13973 = vmatmul.msk.bf16.gmra.mxu3 %vm10376_vm13, %v11485_v49 }
 0xe5c   :  { %v10762_v0 = vpop.f32.mrf.mxu3 }
 0xe5d   :  { %v10768_v47 = vadd.f32 %v10762_v0, %v10721_v20  ;;  %v10898_v24 = vpop.f32.mrf.mxu2 }
 0xe5e   :  { %v10907_v50 = vadd.f32 %v10898_v24, %v10860_v15  ;;  %v10853_v23 = vpop.f32.mrf.mxu1 }
 0xe5f   :  { %v10815_v61 = vadd.f32 %v10809_v59, %v10768_v47  ;;  %v10861_v60 = vadd.f32 %v10853_v23, %v10814_v52 }
 0xe60   :  { %v10811_v1 = vpop.f32.mrf.mxu0 }
 0xe64   :  { %v10764_v7 = vpop.f32.mrf.mxu3 }
 0xe65   :  { %v10900_v18 = vpop.f32.mrf.mxu2 }
 0xe66   :  { %v10908_v12 = vadd.f32 %v10900_v18, %v10861_v60  ;;  %v10856_v54 = vpop.f32.mrf.mxu1 }
 0xe67   :  { %v10862_v39 = vadd.f32 %v10856_v54, %v10815_v61 }
 0xe68   :  { %v10992_v57 = vpop.f32.mrf.mxu0 }
 0xe6c   :  { %v10945_v42 = vpop.f32.mrf.mxu3 }
 0xe6d   :  { %v10903_v19 = vpop.f32.mrf.mxu2  ;;  %v10954_v40 = vadd.f32 %v10945_v42, %v10907_v50 }
 0xe6e   :  { %v10909_v11 = vadd.f32 %v10903_v19, %v10862_v39  ;;  %v10858_v16 = vpop.f32.mrf.mxu1 }
 0xe6f   :  { %v11001_v28 = vadd.f32 %v10992_v57, %v10954_v40 }
 0xe70   :  { %v10994_v35 = vpop.f32.mrf.mxu0 }
 0xe74   :  { %v10947_v26 = vpop.f32.mrf.mxu3 }
 0xe75   :  { %v10905_v27 = vpop.f32.mrf.mxu2  ;;  %v10955_v44 = vadd.f32 %v10947_v26, %v10908_v12 }
 0xe76   :  { %v11039_v45 = vpop.f32.mrf.mxu1 }
 0xe77   :  { %v11002_v53 = vadd.f32 %v10994_v35, %v10955_v44  ;;  %v11048_v8 = vadd.f32 %v11039_v45, %v11001_v28 }
 0xe78   :  { %v10997_v31 = vpop.f32.mrf.mxu0 }
 0xe7c   :  { %v10950_v48 = vpop.f32.mrf.mxu3 }
 0xe7d   :  { %v10956_v63 = vadd.f32 %v10950_v48, %v10909_v11  ;;  %v11086_v17 = vpop.f32.mrf.mxu2  ;;  %v14500_v48 = vld [vmem:[%s18775_s23] ss:$0 sm:$0xff] }
 0xe7e   :  { %v11041_v14 = vpop.f32.mrf.mxu1  ;;  %v11095_v59 = vadd.f32 %v11086_v17, %v11048_v8 }
 0xe7f   :  { %v11003_v5 = vadd.f32 %v10997_v31, %v10956_v63  ;;  %v11049_v32 = vadd.f32 %v11041_v14, %v11002_v53  ;;  %v11527_v63 = vpop.permute.xlu2 %11526 }
 0xe80   :  { %v10999_v37 = vpop.f32.mrf.mxu0 }
 0xe84   :  { %v10952_v2 = vpop.f32.mrf.mxu3 }
 0xe85   :  { %v11088_v3 = vpop.f32.mrf.mxu2 }
 0xe86   :  { %v11044_v62 = vpop.f32.mrf.mxu1  ;;  %v11096_v60 = vadd.f32 %v11088_v3, %v11049_v32 }
 0xe87   :  { %v11050_v30 = vadd.f32 %v11044_v62, %v11003_v5 }
 0xe88   :  { %v11180_v22 = vpop.f32.mrf.mxu0 }
 0xe8c   :  { %v11133_v55 = vpop.f32.mrf.mxu3 }
 0xe8d   :  { %v11091_v58 = vpop.f32.mrf.mxu2  ;;  %v11142_v47 = vadd.f32 %v11133_v55, %v11095_v59  ;;  %v11644_v59 = vld [vmem:[%s18774_s22 + $0x8] sm:$0xff] }
 0xe8e   :  { %v11046_v25 = vpop.f32.mrf.mxu1  ;;  %v11097_v40 = vadd.f32 %v11091_v58, %v11050_v30 }
 0xe8f   :  { %v11189_v50 = vadd.f32 %v11180_v22, %v11142_v47  ;;  %v11645_v47 = vld [vmem:[%s18774_s22 + $0x10] sm:$0xff] }
 0xe90   :  { %v11182_v43 = vpop.f32.mrf.mxu0 }
 0xe94   :  { %v11135_v46 = vpop.f32.mrf.mxu3 }
 0xe95   :  { %v11093_v29 = vpop.f32.mrf.mxu2  ;;  %v11143_v18 = vadd.f32 %v11135_v46, %v11096_v60 }
 0xe96   :  { %v11227_v33 = vpop.f32.mrf.mxu1  ;;  %v11532_v29 = vpop.permute.xlu1 %11531 }
 0xe97   :  { %v11236_v1 = vadd.f32 %v11227_v33, %v11189_v50  ;;  %v11190_v57 = vadd.f32 %v11182_v43, %v11143_v18 }
 0xe98   :  { %v11185_v10 = vpop.f32.mrf.mxu0 }
 0xe9c   :  { %v11138_v4 = vpop.f32.mrf.mxu3 }
 0xe9d   :  { %v11274_v13 = vpop.f32.mrf.mxu2  ;;  %v11144_v28 = vadd.f32 %v11138_v4, %v11097_v40 }
 0xe9e   :  { %v11229_v20 = vpop.f32.mrf.mxu1  ;;  %v11283_v12 = vadd.f32 %v11274_v13, %v11236_v1  ;;  %v11633_v18 = vpop.permute.xlu1 %11632 }
 0xe9f   :  { %v11237_v11 = vadd.f32 %v11229_v20, %v11190_v57  ;;  %v11191_v53 = vadd.f32 %v11185_v10, %v11144_v28  ;;  %v14390_v57 = vld [vmem:[%s18776_s24 + $0x10] sm:$0xff] }
 0xea0   :  { %v11187_v36 = vpop.f32.mrf.mxu0 }
 0xea4   :  { %v11140_v51 = vpop.f32.mrf.mxu3 }
 0xea5   :  { %v11276_v41 = vpop.f32.mrf.mxu2 }
 0xea6   :  { %v11232_v34 = vpop.f32.mrf.mxu1  ;;  %v11284_v35 = vadd.f32 %v11276_v41, %v11237_v11  ;;  %v14389_v11 = vld [vmem:[%s18776_s24 + $0x8] sm:$0xff] }
 0xea7   :  { %v11238_v14 = vadd.f32 %v11232_v34, %v11191_v53 }
 0xea8   :  { %v11368_v21 = vpop.f32.mrf.mxu0 }
 0xeac   :  { %v11321_v9 = vpop.f32.mrf.mxu3 }
 0xead   :  { %v11279_v6 = vpop.f32.mrf.mxu2  ;;  %v11330_v54 = vadd.f32 %v11321_v9, %v11283_v12  ;;  %v11537_v9 = vpop.permute.xlu0 %11536 }
 0xeae   :  { %v11234_v56 = vpop.f32.mrf.mxu1  ;;  %v11285_v37 = vadd.f32 %v11279_v6, %v11238_v14 }
 0xeaf   :  { %v11377_v16 = vadd.f32 %v11368_v21, %v11330_v54 }
 0xeb0   :  { %v11370_v49 = vpop.f32.mrf.mxu0 }
 0xeb4   :  { %v11323_v38 = vpop.f32.mrf.mxu3 }
 0xeb5   :  { %v11281_v52 = vpop.f32.mrf.mxu2  ;;  %v11331_v27 = vadd.f32 %v11323_v38, %v11284_v35  ;;  %v18681_v60 = vpop.permute.xlu0 %11648 }
 0xeb6   :  { %v11415_v15 = vpop.f32.mrf.mxu1 }
 0xeb7   :  { %v11424_v26 = vadd.f32 %v11415_v15, %v11377_v16  ;;  %v11378_v5 = vadd.f32 %v11370_v49, %v11331_v27  ;;  %v14388_v27 = vld [vmem:[%s18776_s24] sm:$0xff] }
 0xeb8   :  { %v11373_v0 = vpop.f32.mrf.mxu0 }
 0xebc   :  { %v11326_v24 = vpop.f32.mrf.mxu3 }
 0xebd   :  { %v11462_v23 = vpop.f32.mrf.mxu2  ;;  %v11332_v62 = vadd.f32 %v11326_v24, %v11285_v37  ;;  %v11677_v24 = vld [vmem:[%s18776_s24 + $0x20] sm:$0xf] }
 0xebe   :  { %v11417_v61 = vpop.f32.mrf.mxu1  ;;  %v11471_v44 = vadd.f32 %v11462_v23, %v11424_v26  ;;  %v11695_v50 = vunpack.c.l.b16 %v11677_v24  ;;  %v11628_v23 = vpop.permute.xlu2 %11627 }
 0xebf   :  { %v11425_v2 = vadd.f32 %v11417_v61, %v11378_v5  ;;  %v11379_v33 = vadd.f32 %v11373_v0, %v11332_v62  ;;  %v11624_v0 = vld [vmem:[%s18773_s21 + $0x10] sm:$0xff] }
 0xec0   :  { %v11375_v7 = vpop.f32.mrf.mxu0  ;;  %v11700_v61 = vpack.c.b16 %v11695_v50, %v11695_v50 }
 0xec1   :  { %v14391_v7 = vld [vmem:[%s18776_s24 + $0x18] sm:$0xff] }
 0xec2   :  { %v11712_v1 = vsel %vm18970_vm14, %v11700_v61, 0 }
 0xec3   :  { %11717 = vmatpush.bf16.msrb.mxu0 %v11712_v1 }
 0xec4   :  { %v11328_v39 = vpop.f32.mrf.mxu3 }
 0xec5   :  { %v11464_v42 = vpop.f32.mrf.mxu2 }
 0xec6   :  { %v11420_v19 = vpop.f32.mrf.mxu1  ;;  %v11472_v30 = vadd.f32 %v11464_v42, %v11425_v2 }
 0xec7   :  { %v11426_v4 = vadd.f32 %v11420_v19, %v11379_v33  ;;  %11718 = vmatpush.bf16.msrb.mxu0 %v14391_v7 }
 0xecb   :  { %11719 = vmatpush.bf16.msrb.mxu0 %v14390_v57 }
 0xecc   :  { %v11509_v45 = vpop.f32.mrf.mxu3 }
 0xecd   :  { %v11467_v8 = vpop.f32.mrf.mxu2  ;;  %v11518_v31 = vadd.f32 %v11509_v45, %v11471_v44 }
 0xece   :  { %v11422_v17 = vpop.f32.mrf.mxu1  ;;  %v11473_v20 = vadd.f32 %v11467_v8, %v11426_v4 }
 0xecf   :  { %v18654_v32 = vadd.f32 %v11527_v63, %v11518_v31  ;;  %11720 = vmatpush.bf16.msrb.mxu0 %v14389_v11 }
 0xed1   :  { %v11546_v3 = vmul.f32 %v14500_v48, %v18654_v32 }
 0xed3   :  { %v11550_v22 = vsel %vm18964_vm4, %v11546_v3, 0.0  ;;  %v11562_v55 = vmul.f32 %v11546_v3, %v11546_v3  ;;  %11721 = vmatpush.bf16.msrb.mxu0 %v14388_v27 }
 0xed4   :  { %v11511_v58 = vpop.f32.mrf.mxu3  ;;  %11551 = vadd.xlane.f32.xlu2 %v11550_v22 }
 0xed5   :  { %v11519_v25 = vadd.f32 %v11511_v58, %v11472_v30  ;;  %v11565_v43 = vsel %vm18965_vm5, %v11562_v55, 0.0  ;;  %v11469_v46 = vpop.f32.mrf.mxu2 }
 0xed6   :  { %11566 = vadd.xlane.f32.xlu0 %v11565_v43 }
 0xed7   :  { %v18659_v10 = vadd.f32 %v11532_v29, %v11519_v25 }
 0xed9   :  { %v11547_v13 = vmul.f32 %v14500_v48, %v18659_v10 }
 0xedb   :  { %v11553_v36 = vsel %vm18966_vm15, %v11547_v13, 0.0  ;;  %v11563_v51 = vmul.f32 %v11547_v13, %v11547_v13  ;;  %vm18971_vm15 = vmmov %vm18965_vm5 }
 0xedc   :  { %v11514_v41 = vpop.f32.mrf.mxu3  ;;  %11554 = vadd.xlane.f32.xlu1 %v11553_v36 }
 0xedd   :  { %v11520_v34 = vadd.f32 %v11514_v41, %v11473_v20  ;;  %v11568_v21 = vsel %vm18967_vm6, %v11563_v51, 0.0  ;;  %vm18972_vm6 = vmmov %vm18970_vm14 }
 0xede   :  { %11569 = vadd.xlane.f32.xlu2 %v11568_v21  ;;  %vm18975_vm14 = vmmov %vm18972_vm6 }
 0xedf   :  { %v18664_v6 = vadd.f32 %v11537_v9, %v11520_v34 }
 0xee1   :  { %v11548_v56 = vmul.f32 %v14500_v48, %v18664_v6 }
 0xee3   :  { %v11556_v49 = vsel %vm18968_vm7, %v11548_v56, 0.0  ;;  %v11564_v38 = vmul.f32 %v11548_v56, %v11548_v56  ;;  %vm18973_vm7 = vmmov %vm18972_vm6 }
 0xee4   :  { %v11516_v52 = vpop.f32.mrf.mxu3  ;;  %11557 = vadd.xlane.f32.xlu1 %v11556_v49 }
 0xee5   :  { %v11571_v15 = vsel %vm18969_vm8, %v11564_v38, 0.0  ;;  %vm18974_vm8 = vmmov %vm18972_vm6 }
 0xee6   :  { %11572 = vadd.xlane.f32.xlu0 %v11571_v15 }
 0xef6   :  { %11653 = vperm.xlu2 %14458, %v11644_v59  }
 0xefa   :  { %11637 = vperm.xlu0 %14456, %v11624_v0  }
 0xefd   :  { %11658 = vperm.xlu1 %14457, %v11645_v47  }
 0xf47   :  { %v11552_v12 = vpop.xlane.xlu2 %11551 }
 0xf48   :  { %v11559_v54 = vmul.f32 0.125, %v11552_v12 }
 0xf49   :  { %v11567_v39 = vpop.xlane.xlu0 %11566 }
 0xf4a   :  { %v11577_v42 = vmul.f32 %v11559_v54, %v11559_v54  ;;  %v11574_v19 = vmul.f32 0.125, %v11567_v39  ;;  %v11583_v29 = vsub.f32 %v18654_v32, %v11559_v54 }
 0xf4c   :  { %v11580_v40 = vsub.f32 %v11574_v19, %v11577_v42 }
 0xf4e   :  { %v11586_v16 = vadd.f32 1e-05, %v11580_v40 }
 0xf4f   :  { %v11555_v28 = vpop.xlane.xlu1 %11554 }
 0xf50   :  { %14515 = vrsqrt.f32 %v11586_v16  ;;  %v11560_v35 = vmul.f32 0.125, %v11555_v28  ;;  %vm11595_vm9 = vweird.f32 %v11586_v16 }
 0xf51   :  { %v11570_v26 = vpop.xlane.xlu2 %11569 }
 0xf52   :  { %v11578_v44 = vmul.f32 %v11560_v35, %v11560_v35  ;;  %v11575_v45 = vmul.f32 0.125, %v11570_v26  ;;  %v11584_v41 = vsub.f32 %v18659_v10, %v11560_v35 }
 0xf54   :  { %v11581_v53 = vsub.f32 %v11575_v45, %v11578_v44  ;;  %v11875_v45 = vld [vmem:[%s18778_s26 + $0x8] sm:$0x3] }
 0xf56   :  { %v14516_v8 = vpop.eup %14515  ;;  %v11587_v31 = vadd.f32 1e-05, %v11581_v53  ;;  %v11874_v53 = vld [vmem:[%s18778_s26] sm:$0xff] }
 0xf57   :  { %v11590_v48 = vmul.f32 %v14516_v8, %v11586_v16  ;;  %v11558_v63 = vpop.xlane.xlu1 %11557  ;;  %vm11596_vm11 = vweird.f32 %v14516_v8 }
 0xf58   :  { %14517 = vrsqrt.f32 %v11587_v31  ;;  %v11561_v17 = vmul.f32 0.125, %v11558_v63  ;;  %vm11597_vm1 = vmor %vm11595_vm9, %vm11596_vm11  ;;  %vm11605_vm2 = vweird.f32 %v11587_v31  ;;  %vm11888_vm11 = vcmask 15360  }
 0xf59   :  { %v11591_v14 = vmul.f32 %v14516_v8, %v11590_v48  ;;  %v11573_v5 = vpop.xlane.xlu0 %11572  ;;  %v11654_v32 = vpop.permute.xlu2 %11653 }
 0xf5a   :  { %v11579_v37 = vmul.f32 %v11561_v17, %v11561_v17  ;;  %v11576_v2 = vmul.f32 0.125, %v11573_v5  ;;  %v11585_v47 = vsub.f32 %v18664_v6, %v11561_v17 }
 0xf5b   :  { %v11592_v3 = vmul.f32 0.5, %v11591_v14 }
 0xf5c   :  { %v11582_v62 = vsub.f32 %v11576_v2, %v11579_v37  ;;  %v14008_v37 = vld [vmem:[%s18777_s25 + $0x10] sm:$0xf]  ;;  %v14394_v2 = vld [vmem:[%s18777_s25 + $0x10] sm:$0x10] }
 0xf5d   :  { %v11593_v30 = vsub.f32 1.5, %v11592_v3 }
 0xf5e   :  { %v14518_v22 = vpop.eup %14517  ;;  %v11588_v55 = vadd.f32 1e-05, %v11582_v62  ;;  %v14009_v62 = vor.u32 %v14394_v2, %v14008_v37 }
 0xf5f   :  { %v11594_v58 = vmul.f32 %v14516_v8, %v11593_v30  ;;  %v11600_v25 = vmul.f32 %v14518_v22, %v11587_v31  ;;  %vm11606_vm12 = vweird.f32 %v14518_v22  ;;  %v14392_v31 = vld [vmem:[%s18777_s25] sm:$0x10]  ;;  %v14015_v30 = vld [vmem:[%s18777_s25 + $0x18] sm:$0xf] }
 0xf60   :  { %14519 = vrsqrt.f32 %v11588_v55  ;;  %vm11607_vm10 = vmor %vm11605_vm2, %vm11606_vm12  ;;  %vm11615_vm3 = vweird.f32 %v11588_v55 }
 0xf61   :  { %v11601_v43 = vmul.f32 %v14518_v22, %v11600_v25  ;;  %v11598_v46 = vsel %vm11597_vm1, %v14516_v8, %v11594_v58  ;;  %v14001_v8 = vld [vmem:[%s18777_s25] sm:$0xf] }
 0xf62   :  { %v11619_v4 = vmul.f32 %v11598_v46, %v11583_v29  ;;  %v14002_v48 = vor.u32 %v14392_v31, %v14001_v8  ;;  %v13996_v46 = vld [vmem:[%s18777_s25 + $0x8] sm:$0xf]  ;;  %v14393_v29 = vld [vmem:[%s18777_s25 + $0x8] sm:$0x10] }
 0xf63   :  { %v11602_v33 = vmul.f32 0.5, %v11601_v43 }
 0xf64   :  { %v11640_v34 = vmul.f32 %v11628_v23, %v11619_v4  ;;  %v13997_v4 = vor.u32 %v14393_v29, %v13996_v46 }
 0xf65   :  { %v11603_v13 = vsub.f32 1.5, %v11602_v33 }
 0xf66   :  { %v14520_v20 = vpop.eup %14519  ;;  %v11661_v38 = vadd.f32 %v18681_v60, %v11640_v34 }
 0xf67   :  { %v11604_v36 = vmul.f32 %v14518_v22, %v11603_v13  ;;  %v11610_v51 = vmul.f32 %v14520_v20, %v11588_v55  ;;  %vm11616_vm0 = vweird.f32 %v14520_v20 }
 0xf68   :  { %v11664_v24 = vmax.f32 %v11661_v38, 0.0  ;;  %vm11617_vm4 = vmor %vm11615_vm3, %vm11616_vm0 }
 0xf69   :  { %v11608_v21 = vsel %vm11607_vm10, %v14518_v22, %v11604_v36  ;;  %v11611_v9 = vmul.f32 %v14520_v20, %v11610_v51  ;;  %v14395_v22 = vld [vmem:[%s18777_s25 + $0x18] sm:$0x10]  ;;  %s18976_s25 = sld [smem:[#allocation28_spill]] }
 0xf6a   :  { %v11620_v56 = vmul.f32 %v11608_v21, %v11584_v41  ;;  %v14016_v25 = vor.u32 %v14395_v22, %v14015_v30 }
 0xf6b   :  { %v11612_v49 = vmul.f32 0.5, %v11611_v9 }
 0xf6c   :  { %v11641_v52 = vmul.f32 %v11633_v18, %v11620_v56  ;;  %v11638_v1 = vpop.permute.xlu0 %11637 }
 0xf6d   :  { %v11613_v15 = vsub.f32 1.5, %v11612_v49 }
 0xf6e   :  { %v11662_v59 = vadd.f32 %v11654_v32, %v11641_v52 }
 0xf6f   :  { %v11614_v0 = vmul.f32 %v14520_v20, %v11613_v15  ;;  %v11659_v60 = vpop.permute.xlu1 %11658 }
 0xf70   :  { %v11665_v50 = vmax.f32 %v11662_v59, 0.0 }
 0xf71   :  { %v11618_v10 = vsel %vm11617_vm4, %v14520_v20, %v11614_v0 }
 0xf72   :  { %v11667_v23 = vpack.c.bf16 %v11665_v50, %v11664_v24  ;;  %v11621_v61 = vmul.f32 %v11618_v10, %v11585_v47 }
 0xf74   :  { %13990 = vmatmul.msk.bf16.vlgmr.msrb.gmra.mxu0 %vm18965_vm5, %v11667_v23  ;;  %v11642_v7 = vmul.f32 %v11638_v1, %v11621_v61 }
 0xf76   :  { %v11663_v18 = vadd.f32 %v11659_v60, %v11642_v7 }
 0xf78   :  { %v11666_v12 = vmax.f32 %v11663_v18, 0.0 }
 0xf7a   :  { %v11668_v54 = vpack.c.bf16 %v11666_v12, %v11666_v12 }
 0xf84   :  { %13991 = vmatmul.msk.bf16.gmra.mxu0 %vm18971_vm15, %v11668_v54 }
 0xff1   :  { %v11723_v39 = vpop.f32.mrf.mxu0 }
 0xff2   :  { %v11732_v57 = vpack.c.bf16 %v11723_v39, %v11723_v39 }
 0xff4   :  { %v11748_v19 = vunpack.c.l.b16 %v11732_v57 }
 0xff9   :  { %v11725_v42 = vpop.f32.mrf.mxu0 }
 0xffa   :  { %v11733_v6 = vpack.c.bf16 %v11725_v42, %v11725_v42 }
 0xffc   :  { %v11749_v40 = vunpack.c.l.b16 %v11733_v6 }
 0xffe   :  { %v11751_v11 = vpack.c.b16 %v11749_v40, %v11748_v19 }
0x1000   :  { %11812 = vrot.lane.b32.xlu1 %v11751_v11, %s18913_s29 }
0x1001   :  { %v11728_v16 = vpop.f32.mrf.mxu0 }
0x1002   :  { %v11734_v28 = vpack.c.bf16 %v11728_v16, %v11728_v16 }
0x1004   :  { %v11750_v35 = vunpack.c.l.b16 %v11734_v28 }
0x1006   :  { %v11752_v26 = vpack.c.b16 %v11750_v35, %v11750_v35 }
0x1008   :  { %11847 = vrot.lane.b32.xlu1 %v11751_v11, %s14602_s5  ;;  %11755 = vrot.lane.b32.xlu0 %v11752_v26, %s18928_s11  ;;  %v11788_v27 = vsel %vm18972_vm6, %v11752_v26, 0 }
0x1009   :  { %11814 = vrot.lane.b32.xlu2 %v11752_v26, %s18913_s29  ;;  %v11730_v44 = vpop.f32.mrf.mxu0  ;;  %11796 = vmatpush.bf16.msra.mxu2 %v11788_v27 }
0x100d   :  { %11797 = vmatpush.bf16.msra.mxu2 %v11751_v11 }
0x1010   :  { %11753 = vrot.lane.b32.xlu0 %v11751_v11, %s18928_s11  ;;  %14003 = vmatmul.msk.bf16.vlgmr.msra.gmra.mxu2 %vm10376_vm13, %v14002_v48 }
0x1011   :  { %11849 = vrot.lane.b32.xlu2 %v11752_v26, %s14602_s5 }
0x1018   :  { %11883 = vperm.xlu0 %14456, %v11875_v45  }
0x1019   :  { %11878 = vperm.xlu2 %14458, %v11874_v53  }
0x1063   :  { %v11815_v63 = vpop.permute.xlu2 %11814 }
0x1064   :  { %v11821_v17 = vsel %vm18973_vm7, %v11815_v63, 0 }
0x1065   :  { %11829 = vmatpush.bf16.msrb.mxu3 %v11821_v17 }
0x106b   :  { %v11850_v14 = vpop.permute.xlu2 %11849 }
0x106c   :  { %v11856_v5 = vsel %vm18974_vm8, %v11850_v14, 0 }
0x106d   :  { %11864 = vmatpush.bf16.msra.mxu0 %v11856_v5 }
0x1072   :  { %v11813_v3 = vpop.permute.xlu1 %11812 }
0x1073   :  { %11830 = vmatpush.bf16.msrb.mxu3 %v11813_v3  ;;  %v11879_v9 = vpop.permute.xlu2 %11878 }
0x1076   :  { %14010 = vmatmul.msk.bf16.vlgmr.msrb.gmra.mxu3 %vm10376_vm13, %v14009_v62 }
0x107a   :  { %v11756_v55 = vpop.permute.xlu0 %11755  ;;  %v11848_v58 = vpop.permute.xlu1 %11847 }
0x107b   :  { %v11762_v43 = vsel %vm18975_vm14, %v11756_v55, 0  ;;  %11865 = vmatpush.bf16.msra.mxu0 %v11848_v58 }
0x107c   :  { %11770 = vmatpush.bf16.msrb.mxu1 %v11762_v43 }
0x107e   :  { %14017 = vmatmul.msk.bf16.vlgmr.msra.gmra.mxu0 %vm10376_vm13, %v14016_v25 }
0x1082   :  { %v11754_v33 = vpop.permute.xlu0 %11753 }
0x1083   :  { %11771 = vmatpush.bf16.msrb.mxu1 %v11754_v33 }
0x1086   :  { %13998 = vmatmul.msk.bf16.vlgmr.msrb.gmra.mxu1 %vm10376_vm13, %v13997_v4  ;;  %vm11890_vm13 = vcmask 9216  }
0x108a   :  { %v11884_v47 = vpop.permute.xlu0 %11883 }
0x1093   :  { %v11799_v13 = vpop.f32.mrf.mxu2 }
0x109b   :  { %v11801_v38 = vpop.f32.mrf.mxu2 }
0x10f9   :  { %v11832_v36 = vpop.f32.mrf.mxu3 }
0x10fb   :  { %v11867_v41 = vpop.f32.mrf.mxu0 }
0x1101   :  { %v11834_v32 = vpop.f32.mrf.mxu3 }
0x1103   :  { %v11773_v20 = vpop.f32.mrf.mxu1  ;;  %v11869_v59 = vpop.f32.mrf.mxu0 }
0x1104   :  { %v11800_v51 = vadd.f32 %v11799_v13, %v11773_v20 }
0x1106   :  { %v11837_v34 = vadd.f32 %v11832_v36, %v11800_v51 }
0x1108   :  { %v11872_v21 = vadd.f32 %v11867_v41, %v11837_v34 }
0x110a   :  { %v11886_v56 = vadd.f32 %v11879_v9, %v11872_v21 }
0x110b   :  { %v11775_v49 = vpop.f32.mrf.mxu1 }
0x110c   :  { %11889 = vst.msk [vmem:[%s18976_s25] sm:$0xff] %vm11888_vm11, %v11886_v56  ;;  %v11802_v52 = vadd.f32 %v11801_v38, %v11775_v49 }
0x110e   :  { %v11838_v15 = vadd.f32 %v11834_v32, %v11802_v52 }
0x1110   :  { %v11873_v0 = vadd.f32 %v11869_v59, %v11838_v15 }
0x1112   :  { %v11887_v24 = vadd.f32 %v11884_v47, %v11873_v0 }
0x1114   :  { %11891 = vst.msk [vmem:[%s18976_s25 + $0x8] sm:$0x3] %vm11890_vm13, %v11887_v24 }
0x1115   :  { %11896 = vsyncpa [#allocation3], 1 }

</bundles_post_ra>
